<compile_context>
chip_gen: v7x
topology: tpu7x:2x2x1
jax: 0.10.0
libtpu: 0.0.40
codegen_flags: <defaults>
</compile_context>

<pallas_src>
import functools

import jax
import jax.numpy as jnp
import numpy as np
from jax.experimental import pallas as pl
from jax.experimental.pallas import tpu as pltpu


# ----------------------------- in-kernel helpers -----------------------------
def _sigmoid(x):
    # single EUP op (tanh) instead of exp + divide
    return 0.5 * (jnp.tanh(0.5 * x) + 1.0)


def _silu(x):
    return x * _sigmoid(x)


def _softplus(x):
    return jnp.where(x > 20.0, x, jnp.log(1.0 + jnp.exp(jnp.minimum(x, 20.0))))


# ------------------------------ fused kernel ----------------------------------
def _fused_mamba_kernel(n_layers, d_conv,
                        x_ref, rmsw_ref, win_ref, convw_ref, convb_ref,
                        wx_ref, wdt_ref, bdt_ref, alogT_ref, dskip_ref,
                        wout_ref, rmsf_ref, fcw_ref, fcb_ref,
                        out_ref, h_res, y_s):
    layer = pl.program_id(0)
    B, L, D = x_ref.shape
    ED = win_ref.shape[1] // 2
    R = wdt_ref.shape[0]
    N = alogT_ref.shape[0]
    K = d_conv
    BL = B * L

    # layer 0: bring the input into the resident residual-stream scratch
    @pl.when(layer == 0)
    def _():
        h_res[...] = x_ref[...]

    h = h_res[...]                                           # (B, L, D)

    # ---- RMSNorm (per token) ----
    rw = rmsw_ref[...].reshape(1, 1, D)
    xn = h * jax.lax.rsqrt(jnp.mean(h * h, axis=-1, keepdims=True) + 1e-5) * rw

    # ---- in_proj: (B*L, D) @ (D, 2*ED) ----
    xz = jnp.dot(xn.reshape(BL, D), win_ref[...],
                 preferred_element_type=jnp.float32).reshape(B, L, 2 * ED)
    xs = xz[:, :, :ED]
    z = xz[:, :, ED:]

    # ---- causal depthwise conv1d (left pad K-1) + SiLU ----
    convw = convw_ref[...]                                   # (K, ED) tap-major
    xp = jnp.concatenate([jnp.zeros((B, K - 1, ED), jnp.float32), xs], axis=1)
    acc = jnp.zeros((B, L, ED), jnp.float32)
    for k in range(K):
        acc = acc + xp[:, k:k + L, :] * convw[k].reshape(1, 1, ED)
    xs = _silu(acc + convb_ref[...].reshape(1, 1, ED))       # (B, L, ED)

    # ---- x_proj (one MXU pass) ; dt_proj on the VPU (rank-1 contraction) ----
    xs2 = xs.reshape(BL, ED)
    dbc = jnp.dot(xs2, wx_ref[...],
                  preferred_element_type=jnp.float32)        # (BL, R + 2N)
    wdt = wdt_ref[...]                                       # (R, ED)
    dt = dbc[:, 0:1] * wdt[0:1, :]
    for r in range(1, R):
        dt = dt + dbc[:, r:r + 1] * wdt[r:r + 1, :]
    delta = _softplus(dt + bdt_ref[...]).reshape(B, L, ED)   # (B, L, ED)
    Bm = dbc[:, R:R + N].reshape(B, L, N)
    Cm = dbc[:, R + N:].reshape(B, L, N)

    # ---- selective SSM scan; state laid out (B, N, ED): ED on lanes ----
    A_nd = -jnp.exp(alogT_ref[...])                          # (N, ED)
    hstate = jnp.zeros((B, N, ED), jnp.float32)
    for t in range(L):                                       # static unroll (L small)
        d_t = delta[:, t, :]                                 # (B, ED)
        dA_t = jnp.exp(d_t[:, None, :] * A_nd[None, :, :])   # (B, N, ED) per step
        bx_t = (d_t * xs[:, t, :])[:, None, :] * Bm[:, t, :][:, :, None]
        hstate = dA_t * hstate + bx_t
        # plain store per step (no functional .at[].set copies)
        y_s[:, t, :] = jnp.sum(hstate * Cm[:, t, :][:, :, None], axis=1)

    # skip connection D*x then gate with SiLU(z)
    y = (y_s[...] + dskip_ref[...].reshape(1, 1, ED) * xs) * _silu(z)

    # ---- all but last layer: out_proj + residual, keep h resident in VMEM ----
    @pl.when(layer < n_layers - 1)
    def _():
        proj = jnp.dot(y.reshape(BL, ED), wout_ref[...],
                       preferred_element_type=jnp.float32).reshape(B, L, D)
        h_res[...] = h + proj

    # ---- last layer: fused classifier head (RMSNorm_f -> last token -> fc) ----
    @pl.when(layer == n_layers - 1)
    def _():
        last = y[:, L - 1, :]                                # (B, ED)
        ln = last * jax.lax.rsqrt(
            jnp.mean(last * last, axis=-1, keepdims=True) + 1e-5) * rmsf_ref[...]
        out_ref[...] = (jnp.dot(ln, fcw_ref[...],
                                preferred_element_type=jnp.float32)
                        + fcb_ref[...])                      # (B, num_classes)


# ------------------------------ pallas wrapper --------------------------------
_LAYER_KEYS = ["rms_w", "w_in", "conv_w", "conv_b", "w_x", "w_dt", "b_dt",
               "a_log_t", "d", "w_out"]
_HEAD_KEYS = ["rms_f", "fc_w", "fc_b"]


def mamba_classifier_forward(x, stacked, head, *, d_conv):
    B, L, D = x.shape
    n_layers = stacked["w_in"].shape[0]
    ED = stacked["w_in"].shape[2] // 2
    C = head["fc_w"].shape[1]

    def layer_spec(a):
        nzeros = a.ndim - 1
        return pl.BlockSpec((None,) + a.shape[1:],
                            lambda l: (l,) + (0,) * nzeros)

    def const_spec(a):
        nzeros = a.ndim
        return pl.BlockSpec(a.shape, lambda l: (0,) * nzeros)

    in_specs = ([pl.BlockSpec((B, L, D), lambda l: (0, 0, 0))]
                + [layer_spec(stacked[k]) for k in _LAYER_KEYS]
                + [const_spec(head[k]) for k in _HEAD_KEYS])

    kernel = functools.partial(_fused_mamba_kernel, n_layers, d_conv)

    return pl.pallas_call(
        kernel,
        out_shape=jax.ShapeDtypeStruct((B, C), jnp.float32),
        grid_spec=pltpu.PrefetchScalarGridSpec(
            num_scalar_prefetch=0,
            grid=(n_layers,),
            in_specs=in_specs,
            out_specs=pl.BlockSpec((B, C), lambda l: (0, 0)),
            scratch_shapes=[
                pltpu.VMEM((B, L, D), jnp.float32),    # resident residual stream
                pltpu.VMEM((B, L, ED), jnp.float32),   # scan output y
            ],
        ),
        compiler_params=pltpu.CompilerParams(
            dimension_semantics=("arbitrary",)),       # layers are sequential
    )(x, *[stacked[k] for k in _LAYER_KEYS], *[head[k] for k in _HEAD_KEYS])


# ------------------------- pure-JAX reference (checks) ------------------------
def _ref_forward(x, stacked, head, *, d_conv):
    HI = jax.lax.Precision.HIGHEST
    n_layers = stacked["w_in"].shape[0]
    h = x
    for i in range(n_layers):
        p = {k: v[i] for k, v in stacked.items()}
        B, L, D = h.shape
        ED = p["w_in"].shape[1] // 2
        R = p["w_dt"].shape[0]
        N = p["a_log_t"].shape[0]
        rw = p["rms_w"].reshape(1, 1, D)
        xn = h * jax.lax.rsqrt(jnp.mean(h * h, -1, keepdims=True) + 1e-5) * rw
        xz = jnp.dot(xn.reshape(B * L, D), p["w_in"],
                     precision=HI).reshape(B, L, 2 * ED)
        xs, z = xz[..., :ED], xz[..., ED:]
        xp = jnp.concatenate(
            [jnp.zeros((B, d_conv - 1, ED), jnp.float32), xs], axis=1)
        conv = sum(xp[:, k:k + L, :] * p["conv_w"][k].reshape(1, 1, ED)
                   for k in range(d_conv))
        xs = jax.nn.silu(conv + p["conv_b"].reshape(1, 1, ED))
        dbc = jnp.dot(xs.reshape(B * L, ED), p["w_x"],
                      precision=HI).reshape(B, L, R + 2 * N)
        dlt, Bm, Cm = dbc[..., :R], dbc[..., R:R + N], dbc[..., R + N:]
        delta = jax.nn.softplus(
            jnp.dot(dlt.reshape(B * L, R), p["w_dt"],
                    precision=HI).reshape(B, L, ED)
            + p["b_dt"].reshape(1, 1, ED))
        A = -jnp.exp(p["a_log_t"]).T                         # (ED, N)
        dA = jnp.exp(delta[..., None] * A)                   # (B, L, ED, N)
        BX = (delta * xs)[..., None] * Bm[:, :, None, :]
        hs = jnp.zeros((B, ED, N), jnp.float32)
        ys = []
        for t in range(L):
            hs = dA[:, t] * hs + BX[:, t]
            ys.append(jnp.sum(hs * Cm[:, t][:, None, :], axis=-1))
        y = jnp.stack(ys, axis=1)
        y = (y + p["d"].reshape(1, 1, ED) * xs) * jax.nn.silu(z)
        if i < n_layers - 1:
            h = h + jnp.dot(y.reshape(B * L, ED), p["w_out"],
                            precision=HI).reshape(B, L, D)
        else:
            h = y
    last = h[:, -1, :]
    last = last * jax.lax.rsqrt(
        jnp.mean(last * last, -1, keepdims=True) + 1e-5) * head["rms_f"]
    return jnp.dot(last, head["fc_w"], precision=HI) + head["fc_b"]


# --------------------------------- param init ---------------------------------
def init_params(key, d_model, d_inner, d_state, d_conv, dt_rank, n_layers,
                num_classes):
    ks = jax.random.split(key, 9)
    stacked = dict(
        rms_w=jnp.ones((n_layers, 1, d_model), jnp.float32),
        w_in=0.1 * jax.random.normal(ks[0], (n_layers, d_model, 2 * d_inner),
                                     jnp.float32),
        conv_w=0.1 * jax.random.normal(ks[1], (n_layers, d_conv, d_inner),
                                       jnp.float32),
        conv_b=0.1 * jax.random.normal(ks[2], (n_layers, 1, d_inner),
                                       jnp.float32),
        w_x=0.1 * jax.random.normal(ks[3],
                                    (n_layers, d_inner, dt_rank + 2 * d_state),
                                    jnp.float32),
        w_dt=0.1 * jax.random.normal(ks[4], (n_layers, dt_rank, d_inner),
                                     jnp.float32),
        b_dt=0.1 * jax.random.normal(ks[5], (n_layers, 1, d_inner),
                                     jnp.float32),
        # A_log stored transposed: (n_layers, d_state, d_inner)
        a_log_t=jnp.broadcast_to(
            jnp.log(jnp.arange(1, d_state + 1, dtype=jnp.float32))[None, :, None],
            (n_layers, d_state, d_inner)) + 0.0,
        d=jnp.ones((n_layers, 1, d_inner), jnp.float32),
        w_out=0.1 * jax.random.normal(ks[6], (n_layers, d_inner, d_model),
                                      jnp.float32),
    )
    head = dict(
        rms_f=jnp.ones((1, d_inner), jnp.float32),
        fc_w=0.1 * jax.random.normal(ks[7], (d_inner, num_classes), jnp.float32),
        fc_b=0.1 * jax.random.normal(ks[8], (1, num_classes), jnp.float32),
    )
    return stacked, head


# ------------------------------------ main ------------------------------------
if __name__ == "__main__":
    # Shapes implied by the module: d_model = problemDim = 6, hidden_size = 48,
    # expand = hidden_size // d_model = 8, d_state = 32, d_conv = 16,
    # dt_rank = ceil(d_model / 16) = 1.  Small batch / seq / layers / classes.
    BATCH, SEQ = 2, 16
    D_MODEL, HIDDEN = 6, 48
    D_STATE, D_CONV, DT_RANK = 32, 16, 1
    N_LAYERS, NUM_CLASSES = 2, 4

    key = jax.random.PRNGKey(0)
    kx, kp = jax.random.split(key)
    x = jax.random.normal(kx, (BATCH, SEQ, D_MODEL), jnp.float32)
    stacked, head = init_params(kp, D_MODEL, HIDDEN, D_STATE, D_CONV, DT_RANK,
                                N_LAYERS, NUM_CLASSES)

    fwd = jax.jit(lambda inp: mamba_classifier_forward(inp, stacked, head,
                                                       d_conv=D_CONV))
    logits = jax.block_until_ready(fwd(x))

    assert logits.shape == (BATCH, NUM_CLASSES)
    assert bool(jnp.all(jnp.isfinite(logits)))

    ref = jax.block_until_ready(
        jax.jit(lambda inp: _ref_forward(inp, stacked, head, d_conv=D_CONV))(x))
    np.testing.assert_allclose(np.asarray(logits), np.asarray(ref),
                               rtol=2e-2, atol=2e-2)

    print("KERNEL_OK")
</pallas_src>

<mosaic_0001>
module attributes {stable_mosaic.version = 11 : i64} {
  func.func @_fused_mamba_kernel(%arg0: i32, %arg1: memref<2x16x6xf32, #tpu.memory_space<vmem>>, %arg2: memref<1x1x6xf32, #tpu.memory_space<vmem>>, %arg3: memref<1x6x96xf32, #tpu.memory_space<vmem>>, %arg4: memref<1x16x48xf32, #tpu.memory_space<vmem>>, %arg5: memref<1x1x48xf32, #tpu.memory_space<vmem>>, %arg6: memref<1x48x65xf32, #tpu.memory_space<vmem>>, %arg7: memref<1x1x48xf32, #tpu.memory_space<vmem>>, %arg8: memref<1x1x48xf32, #tpu.memory_space<vmem>>, %arg9: memref<1x32x48xf32, #tpu.memory_space<vmem>>, %arg10: memref<1x1x48xf32, #tpu.memory_space<vmem>>, %arg11: memref<1x48x6xf32, #tpu.memory_space<vmem>>, %arg12: memref<1x48xf32, #tpu.memory_space<vmem>>, %arg13: memref<48x4xf32, #tpu.memory_space<vmem>>, %arg14: memref<1x4xf32, #tpu.memory_space<vmem>>, %arg15: memref<2x4xf32, #tpu.memory_space<vmem>>, %arg16: memref<2x16x6xf32, #tpu.memory_space<vmem>>, %arg17: memref<2x16x48xf32, #tpu.memory_space<vmem>>) attributes {dimension_semantics = [#tpu.dimension_semantics<arbitrary>], iteration_bounds = array<i64: 2>, scalar_prefetch = 0 : i64, scratch_operands = 2 : i64, tpu.core_type = #tpu.core_type<tc>, window_params = [{pipeline_mode = #tpu.pipeline_mode<synchronous>, transform_indices = @transform_0, window_bounds = array<i64: 2, 16, 6>}, {transform_indices = @transform_1, window_bounds = array<i64: 1, 1, 6>}, {transform_indices = @transform_2, window_bounds = array<i64: 1, 6, 96>}, {transform_indices = @transform_3, window_bounds = array<i64: 1, 16, 48>}, {transform_indices = @transform_4, window_bounds = array<i64: 1, 1, 48>}, {transform_indices = @transform_5, window_bounds = array<i64: 1, 48, 65>}, {transform_indices = @transform_6, window_bounds = array<i64: 1, 1, 48>}, {transform_indices = @transform_7, window_bounds = array<i64: 1, 1, 48>}, {transform_indices = @transform_8, window_bounds = array<i64: 1, 32, 48>}, {transform_indices = @transform_9, window_bounds = array<i64: 1, 1, 48>}, {transform_indices = @transform_10, window_bounds = array<i64: 1, 48, 6>}, {pipeline_mode = #tpu.pipeline_mode<synchronous>, transform_indices = @transform_11, window_bounds = array<i64: 1, 48>}, {pipeline_mode = #tpu.pipeline_mode<synchronous>, transform_indices = @transform_12, window_bounds = array<i64: 48, 4>}, {pipeline_mode = #tpu.pipeline_mode<synchronous>, transform_indices = @transform_13, window_bounds = array<i64: 1, 4>}, {pipeline_mode = #tpu.pipeline_mode<synchronous>, transform_indices = @transform_14, window_bounds = array<i64: 2, 4>}]} {
    %c0_i32 = arith.constant 0 : i32
    %0 = arith.cmpi eq, %arg0, %c0_i32 : i32
    %1 = arith.extui %0 : i1 to i32
    %c0_i32_0 = arith.constant 0 : i32
    %2 = arith.cmpi ne, %1, %c0_i32_0 : i32
    scf.if %2 {
      %c0_102 = arith.constant 0 : index
      %c0_103 = arith.constant 0 : index
      %c0_104 = arith.constant 0 : index
      %676 = vector.load %arg1[%c0_102, %c0_103, %c0_104] : memref<2x16x6xf32, #tpu.memory_space<vmem>>, vector<2x16x6xf32>
      %c0_105 = arith.constant 0 : index
      %c0_106 = arith.constant 0 : index
      %c0_107 = arith.constant 0 : index
      %677 = vector.load %arg16[%c0_105, %c0_106, %c0_107] : memref<2x16x6xf32, #tpu.memory_space<vmem>>, vector<2x16x6xf32>
      tpu.vector_store %arg16[%c0_105, %c0_106, %c0_107], %676 {strides = array<i32>} : memref<2x16x6xf32, #tpu.memory_space<vmem>>, vector<2x16x6xf32>,
    } else {
    }
    %c0 = arith.constant 0 : index
    %c0_1 = arith.constant 0 : index
    %c0_2 = arith.constant 0 : index
    %3 = vector.load %arg16[%c0, %c0_1, %c0_2] : memref<2x16x6xf32, #tpu.memory_space<vmem>>, vector<2x16x6xf32>
    %c0_3 = arith.constant 0 : index
    %c0_4 = arith.constant 0 : index
    %c0_5 = arith.constant 0 : index
    %4 = vector.load %arg2[%c0_3, %c0_4, %c0_5] : memref<1x1x6xf32, #tpu.memory_space<vmem>>, vector<1x1x6xf32>
    %5 = vector.shape_cast %4 : vector<1x1x6xf32> to vector<1x6xf32>
    %6 = vector.shape_cast %5 : vector<1x6xf32> to vector<1x1x6xf32>
    %7 = arith.mulf %3, %3 : vector<2x16x6xf32>
    %cst = arith.constant dense<0.000000e+00> : vector<2x16xf32>
    %8 = vector.multi_reduction <add>, %7, %cst [2] : vector<2x16x6xf32> to vector<2x16xf32>
    %9 = vector.shape_cast %8 : vector<2x16xf32> to vector<2x16x1xf32>
    %cst_6 = arith.constant 6.000000e+00 : f32
    %10 = vector.broadcast %cst_6 : f32 to vector<2x16x1xf32>
    %11 = arith.divf %9, %10 : vector<2x16x1xf32>
    %cst_7 = arith.constant 9.99999974E-6 : f32
    %12 = vector.broadcast %cst_7 : f32 to vector<2x16x1xf32>
    %13 = arith.addf %11, %12 : vector<2x16x1xf32>
    %14 = math.rsqrt %13 : vector<2x16x1xf32>
    %15 = vector.broadcast %14 : vector<2x16x1xf32> to vector<2x16x6xf32>
    %16 = arith.mulf %3, %15 : vector<2x16x6xf32>
    %17 = vector.broadcast %6 : vector<1x1x6xf32> to vector<2x16x6xf32>
    %18 = arith.mulf %16, %17 : vector<2x16x6xf32>
    %19 = vector.shape_cast %18 : vector<2x16x6xf32> to vector<32x6xf32>
    %c0_8 = arith.constant 0 : index
    %c0_9 = arith.constant 0 : index
    %c0_10 = arith.constant 0 : index
    %20 = vector.load %arg3[%c0_8, %c0_9, %c0_10] : memref<1x6x96xf32, #tpu.memory_space<vmem>>, vector<1x6x96xf32>
    %21 = vector.shape_cast %20 : vector<1x6x96xf32> to vector<6x96xf32>
    %cst_11 = arith.constant dense<0.000000e+00> : vector<32x96xf32>
    %22 = tpu.matmul %19, %21, %cst_11 {dimension_numbers = #tpu.dot_dimension_numbers<[1], [0], [0], [1], [0, 0, 1, 1], [], []>} : vector<32x6xf32>, vector<6x96xf32>, vector<32x96xf32> -> vector<32x96xf32>
    %23 = vector.shape_cast %22 : vector<32x96xf32> to vector<2x16x96xf32>
    %24 = vector.extract_strided_slice %23 {offsets = [0, 0, 0], sizes = [2, 16, 48], strides = [1, 1, 1]} : vector<2x16x96xf32> to vector<2x16x48xf32>
    %25 = vector.extract_strided_slice %23 {offsets = [0, 0, 48], sizes = [2, 16, 48], strides = [1, 1, 1]} : vector<2x16x96xf32> to vector<2x16x48xf32>
    %c0_12 = arith.constant 0 : index
    %c0_13 = arith.constant 0 : index
    %c0_14 = arith.constant 0 : index
    %26 = vector.load %arg4[%c0_12, %c0_13, %c0_14] : memref<1x16x48xf32, #tpu.memory_space<vmem>>, vector<1x16x48xf32>
    %27 = vector.shape_cast %26 : vector<1x16x48xf32> to vector<16x48xf32>
    %cst_15 = arith.constant 0.000000e+00 : f32
    %28 = vector.broadcast %cst_15 : f32 to vector<2x15x48xf32>
    %29 = tpu.concatenate %28, %24 in 1 : vector<2x15x48xf32>, vector<2x16x48xf32> -> vector<2x31x48xf32>
    %cst_16 = arith.constant 0.000000e+00 : f32
    %30 = vector.broadcast %cst_16 : f32 to vector<2x16x48xf32>
    %31 = vector.extract_strided_slice %29 {offsets = [0, 0, 0], sizes = [2, 16, 48], strides = [1, 1, 1]} : vector<2x31x48xf32> to vector<2x16x48xf32>
    %32 = vector.extract_strided_slice %27 {offsets = [0, 0], sizes = [1, 48], strides = [1, 1]} : vector<16x48xf32> to vector<1x48xf32>
    %33 = vector.shape_cast %32 : vector<1x48xf32> to vector<48xf32>
    %34 = vector.shape_cast %33 : vector<48xf32> to vector<1x1x48xf32>
    %35 = vector.broadcast %34 : vector<1x1x48xf32> to vector<2x16x48xf32>
    %36 = arith.mulf %31, %35 : vector<2x16x48xf32>
    %37 = arith.addf %30, %36 : vector<2x16x48xf32>
    %38 = vector.extract_strided_slice %29 {offsets = [0, 1, 0], sizes = [2, 16, 48], strides = [1, 1, 1]} : vector<2x31x48xf32> to vector<2x16x48xf32>
    %39 = vector.extract_strided_slice %27 {offsets = [1, 0], sizes = [1, 48], strides = [1, 1]} : vector<16x48xf32> to vector<1x48xf32>
    %40 = vector.shape_cast %39 : vector<1x48xf32> to vector<48xf32>
    %41 = vector.shape_cast %40 : vector<48xf32> to vector<1x1x48xf32>
    %42 = vector.broadcast %41 : vector<1x1x48xf32> to vector<2x16x48xf32>
    %43 = arith.mulf %38, %42 : vector<2x16x48xf32>
    %44 = arith.addf %37, %43 : vector<2x16x48xf32>
    %45 = vector.extract_strided_slice %29 {offsets = [0, 2, 0], sizes = [2, 16, 48], strides = [1, 1, 1]} : vector<2x31x48xf32> to vector<2x16x48xf32>
    %46 = vector.extract_strided_slice %27 {offsets = [2, 0], sizes = [1, 48], strides = [1, 1]} : vector<16x48xf32> to vector<1x48xf32>
    %47 = vector.shape_cast %46 : vector<1x48xf32> to vector<48xf32>
    %48 = vector.shape_cast %47 : vector<48xf32> to vector<1x1x48xf32>
    %49 = vector.broadcast %48 : vector<1x1x48xf32> to vector<2x16x48xf32>
    %50 = arith.mulf %45, %49 : vector<2x16x48xf32>
    %51 = arith.addf %44, %50 : vector<2x16x48xf32>
    %52 = vector.extract_strided_slice %29 {offsets = [0, 3, 0], sizes = [2, 16, 48], strides = [1, 1, 1]} : vector<2x31x48xf32> to vector<2x16x48xf32>
    %53 = vector.extract_strided_slice %27 {offsets = [3, 0], sizes = [1, 48], strides = [1, 1]} : vector<16x48xf32> to vector<1x48xf32>
    %54 = vector.shape_cast %53 : vector<1x48xf32> to vector<48xf32>
    %55 = vector.shape_cast %54 : vector<48xf32> to vector<1x1x48xf32>
    %56 = vector.broadcast %55 : vector<1x1x48xf32> to vector<2x16x48xf32>
    %57 = arith.mulf %52, %56 : vector<2x16x48xf32>
    %58 = arith.addf %51, %57 : vector<2x16x48xf32>
    %59 = vector.extract_strided_slice %29 {offsets = [0, 4, 0], sizes = [2, 16, 48], strides = [1, 1, 1]} : vector<2x31x48xf32> to vector<2x16x48xf32>
    %60 = vector.extract_strided_slice %27 {offsets = [4, 0], sizes = [1, 48], strides = [1, 1]} : vector<16x48xf32> to vector<1x48xf32>
    %61 = vector.shape_cast %60 : vector<1x48xf32> to vector<48xf32>
    %62 = vector.shape_cast %61 : vector<48xf32> to vector<1x1x48xf32>
    %63 = vector.broadcast %62 : vector<1x1x48xf32> to vector<2x16x48xf32>
    %64 = arith.mulf %59, %63 : vector<2x16x48xf32>
    %65 = arith.addf %58, %64 : vector<2x16x48xf32>
    %66 = vector.extract_strided_slice %29 {offsets = [0, 5, 0], sizes = [2, 16, 48], strides = [1, 1, 1]} : vector<2x31x48xf32> to vector<2x16x48xf32>
    %67 = vector.extract_strided_slice %27 {offsets = [5, 0], sizes = [1, 48], strides = [1, 1]} : vector<16x48xf32> to vector<1x48xf32>
    %68 = vector.shape_cast %67 : vector<1x48xf32> to vector<48xf32>
    %69 = vector.shape_cast %68 : vector<48xf32> to vector<1x1x48xf32>
    %70 = vector.broadcast %69 : vector<1x1x48xf32> to vector<2x16x48xf32>
    %71 = arith.mulf %66, %70 : vector<2x16x48xf32>
    %72 = arith.addf %65, %71 : vector<2x16x48xf32>
    %73 = vector.extract_strided_slice %29 {offsets = [0, 6, 0], sizes = [2, 16, 48], strides = [1, 1, 1]} : vector<2x31x48xf32> to vector<2x16x48xf32>
    %74 = vector.extract_strided_slice %27 {offsets = [6, 0], sizes = [1, 48], strides = [1, 1]} : vector<16x48xf32> to vector<1x48xf32>
    %75 = vector.shape_cast %74 : vector<1x48xf32> to vector<48xf32>
    %76 = vector.shape_cast %75 : vector<48xf32> to vector<1x1x48xf32>
    %77 = vector.broadcast %76 : vector<1x1x48xf32> to vector<2x16x48xf32>
    %78 = arith.mulf %73, %77 : vector<2x16x48xf32>
    %79 = arith.addf %72, %78 : vector<2x16x48xf32>
    %80 = vector.extract_strided_slice %29 {offsets = [0, 7, 0], sizes = [2, 16, 48], strides = [1, 1, 1]} : vector<2x31x48xf32> to vector<2x16x48xf32>
    %81 = vector.extract_strided_slice %27 {offsets = [7, 0], sizes = [1, 48], strides = [1, 1]} : vector<16x48xf32> to vector<1x48xf32>
    %82 = vector.shape_cast %81 : vector<1x48xf32> to vector<48xf32>
    %83 = vector.shape_cast %82 : vector<48xf32> to vector<1x1x48xf32>
    %84 = vector.broadcast %83 : vector<1x1x48xf32> to vector<2x16x48xf32>
    %85 = arith.mulf %80, %84 : vector<2x16x48xf32>
    %86 = arith.addf %79, %85 : vector<2x16x48xf32>
    %87 = vector.extract_strided_slice %29 {offsets = [0, 8, 0], sizes = [2, 16, 48], strides = [1, 1, 1]} : vector<2x31x48xf32> to vector<2x16x48xf32>
    %88 = vector.extract_strided_slice %27 {offsets = [8, 0], sizes = [1, 48], strides = [1, 1]} : vector<16x48xf32> to vector<1x48xf32>
    %89 = vector.shape_cast %88 : vector<1x48xf32> to vector<48xf32>
    %90 = vector.shape_cast %89 : vector<48xf32> to vector<1x1x48xf32>
    %91 = vector.broadcast %90 : vector<1x1x48xf32> to vector<2x16x48xf32>
    %92 = arith.mulf %87, %91 : vector<2x16x48xf32>
    %93 = arith.addf %86, %92 : vector<2x16x48xf32>
    %94 = vector.extract_strided_slice %29 {offsets = [0, 9, 0], sizes = [2, 16, 48], strides = [1, 1, 1]} : vector<2x31x48xf32> to vector<2x16x48xf32>
    %95 = vector.extract_strided_slice %27 {offsets = [9, 0], sizes = [1, 48], strides = [1, 1]} : vector<16x48xf32> to vector<1x48xf32>
    %96 = vector.shape_cast %95 : vector<1x48xf32> to vector<48xf32>
    %97 = vector.shape_cast %96 : vector<48xf32> to vector<1x1x48xf32>
    %98 = vector.broadcast %97 : vector<1x1x48xf32> to vector<2x16x48xf32>
    %99 = arith.mulf %94, %98 : vector<2x16x48xf32>
    %100 = arith.addf %93, %99 : vector<2x16x48xf32>
    %101 = vector.extract_strided_slice %29 {offsets = [0, 10, 0], sizes = [2, 16, 48], strides = [1, 1, 1]} : vector<2x31x48xf32> to vector<2x16x48xf32>
    %102 = vector.extract_strided_slice %27 {offsets = [10, 0], sizes = [1, 48], strides = [1, 1]} : vector<16x48xf32> to vector<1x48xf32>
    %103 = vector.shape_cast %102 : vector<1x48xf32> to vector<48xf32>
    %104 = vector.shape_cast %103 : vector<48xf32> to vector<1x1x48xf32>
    %105 = vector.broadcast %104 : vector<1x1x48xf32> to vector<2x16x48xf32>
    %106 = arith.mulf %101, %105 : vector<2x16x48xf32>
    %107 = arith.addf %100, %106 : vector<2x16x48xf32>
    %108 = vector.extract_strided_slice %29 {offsets = [0, 11, 0], sizes = [2, 16, 48], strides = [1, 1, 1]} : vector<2x31x48xf32> to vector<2x16x48xf32>
    %109 = vector.extract_strided_slice %27 {offsets = [11, 0], sizes = [1, 48], strides = [1, 1]} : vector<16x48xf32> to vector<1x48xf32>
    %110 = vector.shape_cast %109 : vector<1x48xf32> to vector<48xf32>
    %111 = vector.shape_cast %110 : vector<48xf32> to vector<1x1x48xf32>
    %112 = vector.broadcast %111 : vector<1x1x48xf32> to vector<2x16x48xf32>
    %113 = arith.mulf %108, %112 : vector<2x16x48xf32>
    %114 = arith.addf %107, %113 : vector<2x16x48xf32>
    %115 = vector.extract_strided_slice %29 {offsets = [0, 12, 0], sizes = [2, 16, 48], strides = [1, 1, 1]} : vector<2x31x48xf32> to vector<2x16x48xf32>
    %116 = vector.extract_strided_slice %27 {offsets = [12, 0], sizes = [1, 48], strides = [1, 1]} : vector<16x48xf32> to vector<1x48xf32>
    %117 = vector.shape_cast %116 : vector<1x48xf32> to vector<48xf32>
    %118 = vector.shape_cast %117 : vector<48xf32> to vector<1x1x48xf32>
    %119 = vector.broadcast %118 : vector<1x1x48xf32> to vector<2x16x48xf32>
    %120 = arith.mulf %115, %119 : vector<2x16x48xf32>
    %121 = arith.addf %114, %120 : vector<2x16x48xf32>
    %122 = vector.extract_strided_slice %29 {offsets = [0, 13, 0], sizes = [2, 16, 48], strides = [1, 1, 1]} : vector<2x31x48xf32> to vector<2x16x48xf32>
    %123 = vector.extract_strided_slice %27 {offsets = [13, 0], sizes = [1, 48], strides = [1, 1]} : vector<16x48xf32> to vector<1x48xf32>
    %124 = vector.shape_cast %123 : vector<1x48xf32> to vector<48xf32>
    %125 = vector.shape_cast %124 : vector<48xf32> to vector<1x1x48xf32>
    %126 = vector.broadcast %125 : vector<1x1x48xf32> to vector<2x16x48xf32>
    %127 = arith.mulf %122, %126 : vector<2x16x48xf32>
    %128 = arith.addf %121, %127 : vector<2x16x48xf32>
    %129 = vector.extract_strided_slice %29 {offsets = [0, 14, 0], sizes = [2, 16, 48], strides = [1, 1, 1]} : vector<2x31x48xf32> to vector<2x16x48xf32>
    %130 = vector.extract_strided_slice %27 {offsets = [14, 0], sizes = [1, 48], strides = [1, 1]} : vector<16x48xf32> to vector<1x48xf32>
    %131 = vector.shape_cast %130 : vector<1x48xf32> to vector<48xf32>
    %132 = vector.shape_cast %131 : vector<48xf32> to vector<1x1x48xf32>
    %133 = vector.broadcast %132 : vector<1x1x48xf32> to vector<2x16x48xf32>
    %134 = arith.mulf %129, %133 : vector<2x16x48xf32>
    %135 = arith.addf %128, %134 : vector<2x16x48xf32>
    %136 = vector.extract_strided_slice %29 {offsets = [0, 15, 0], sizes = [2, 16, 48], strides = [1, 1, 1]} : vector<2x31x48xf32> to vector<2x16x48xf32>
    %137 = vector.extract_strided_slice %27 {offsets = [15, 0], sizes = [1, 48], strides = [1, 1]} : vector<16x48xf32> to vector<1x48xf32>
    %138 = vector.shape_cast %137 : vector<1x48xf32> to vector<48xf32>
    %139 = vector.shape_cast %138 : vector<48xf32> to vector<1x1x48xf32>
    %140 = vector.broadcast %139 : vector<1x1x48xf32> to vector<2x16x48xf32>
    %141 = arith.mulf %136, %140 : vector<2x16x48xf32>
    %142 = arith.addf %135, %141 : vector<2x16x48xf32>
    %c0_17 = arith.constant 0 : index
    %c0_18 = arith.constant 0 : index
    %c0_19 = arith.constant 0 : index
    %143 = vector.load %arg5[%c0_17, %c0_18, %c0_19] : memref<1x1x48xf32, #tpu.memory_space<vmem>>, vector<1x1x48xf32>
    %144 = vector.shape_cast %143 : vector<1x1x48xf32> to vector<1x48xf32>
    %145 = vector.shape_cast %144 : vector<1x48xf32> to vector<1x1x48xf32>
    %146 = vector.broadcast %145 : vector<1x1x48xf32> to vector<2x16x48xf32>
    %147 = arith.addf %142, %146 : vector<2x16x48xf32>
    %cst_20 = arith.constant 5.000000e-01 : f32
    %148 = vector.broadcast %cst_20 : f32 to vector<2x16x48xf32>
    %149 = arith.mulf %148, %147 : vector<2x16x48xf32>
    %150 = math.tanh %149 : vector<2x16x48xf32>
    %cst_21 = arith.constant 1.000000e+00 : f32
    %151 = vector.broadcast %cst_21 : f32 to vector<2x16x48xf32>
    %152 = arith.addf %150, %151 : vector<2x16x48xf32>
    %cst_22 = arith.constant 5.000000e-01 : f32
    %153 = vector.broadcast %cst_22 : f32 to vector<2x16x48xf32>
    %154 = arith.mulf %153, %152 : vector<2x16x48xf32>
    %155 = arith.mulf %147, %154 : vector<2x16x48xf32>
    %156 = vector.shape_cast %155 : vector<2x16x48xf32> to vector<32x48xf32>
    %c0_23 = arith.constant 0 : index
    %c0_24 = arith.constant 0 : index
    %c0_25 = arith.constant 0 : index
    %157 = vector.load %arg6[%c0_23, %c0_24, %c0_25] : memref<1x48x65xf32, #tpu.memory_space<vmem>>, vector<1x48x65xf32>
    %158 = vector.shape_cast %157 : vector<1x48x65xf32> to vector<48x65xf32>
    %cst_26 = arith.constant dense<0.000000e+00> : vector<32x65xf32>
    %159 = tpu.matmul %156, %158, %cst_26 {dimension_numbers = #tpu.dot_dimension_numbers<[1], [0], [0], [1], [0, 0, 1, 1], [], []>} : vector<32x48xf32>, vector<48x65xf32>, vector<32x65xf32> -> vector<32x65xf32>
    %c0_27 = arith.constant 0 : index
    %c0_28 = arith.constant 0 : index
    %c0_29 = arith.constant 0 : index
    %160 = vector.load %arg7[%c0_27, %c0_28, %c0_29] : memref<1x1x48xf32, #tpu.memory_space<vmem>>, vector<1x1x48xf32>
    %161 = vector.shape_cast %160 : vector<1x1x48xf32> to vector<1x48xf32>
    %162 = vector.extract_strided_slice %159 {offsets = [0, 0], sizes = [32, 1], strides = [1, 1]} : vector<32x65xf32> to vector<32x1xf32>
    %163 = vector.broadcast %162 : vector<32x1xf32> to vector<32x48xf32>
    %164 = vector.broadcast %161 : vector<1x48xf32> to vector<32x48xf32>
    %165 = arith.mulf %163, %164 : vector<32x48xf32>
    %c0_30 = arith.constant 0 : index
    %c0_31 = arith.constant 0 : index
    %c0_32 = arith.constant 0 : index
    %166 = vector.load %arg8[%c0_30, %c0_31, %c0_32] : memref<1x1x48xf32, #tpu.memory_space<vmem>>, vector<1x1x48xf32>
    %167 = vector.shape_cast %166 : vector<1x1x48xf32> to vector<1x48xf32>
    %168 = vector.broadcast %167 : vector<1x48xf32> to vector<32x48xf32>
    %169 = arith.addf %165, %168 : vector<32x48xf32>
    %cst_33 = arith.constant 2.000000e+01 : f32
    %170 = vector.broadcast %cst_33 : f32 to vector<32x48xf32>
    %171 = arith.cmpf ogt, %169, %170 : vector<32x48xf32>
    %cst_34 = arith.constant 2.000000e+01 : f32
    %172 = vector.broadcast %cst_34 : f32 to vector<32x48xf32>
    %173 = arith.minimumf %169, %172 : vector<32x48xf32>
    %174 = math.exp %173 : vector<32x48xf32>
    %cst_35 = arith.constant 1.000000e+00 : f32
    %175 = vector.broadcast %cst_35 : f32 to vector<32x48xf32>
    %176 = arith.addf %175, %174 : vector<32x48xf32>
    %177 = math.log %176 : vector<32x48xf32>
    %178 = arith.select %171, %169, %177 : vector<32x48xi1>, vector<32x48xf32>
    %179 = vector.shape_cast %178 : vector<32x48xf32> to vector<2x16x48xf32>
    %180 = vector.extract_strided_slice %159 {offsets = [0, 1], sizes = [32, 32], strides = [1, 1]} : vector<32x65xf32> to vector<32x32xf32>
    %181 = vector.shape_cast %180 : vector<32x32xf32> to vector<2x16x32xf32>
    %182 = vector.extract_strided_slice %159 {offsets = [0, 33], sizes = [32, 32], strides = [1, 1]} : vector<32x65xf32> to vector<32x32xf32>
    %183 = vector.shape_cast %182 : vector<32x32xf32> to vector<2x16x32xf32>
    %c0_36 = arith.constant 0 : index
    %c0_37 = arith.constant 0 : index
    %c0_38 = arith.constant 0 : index
    %184 = vector.load %arg9[%c0_36, %c0_37, %c0_38] : memref<1x32x48xf32, #tpu.memory_space<vmem>>, vector<1x32x48xf32>
    %185 = vector.shape_cast %184 : vector<1x32x48xf32> to vector<32x48xf32>
    %186 = math.exp %185 : vector<32x48xf32>
    %cst_39 = arith.constant 0.000000e+00 : f32
    %187 = vector.broadcast %cst_39 : f32 to vector<32x48xf32>
    %188 = arith.subf %187, %186 : vector<32x48xf32>
    %cst_40 = arith.constant 0.000000e+00 : f32
    %189 = vector.broadcast %cst_40 : f32 to vector<2x32x48xf32>
    %190 = vector.extract_strided_slice %179 {offsets = [0, 0, 0], sizes = [2, 1, 48], strides = [1, 1, 1]} : vector<2x16x48xf32> to vector<2x1x48xf32>
    %191 = vector.shape_cast %190 : vector<2x1x48xf32> to vector<2x48xf32>
    %192 = vector.shape_cast %191 : vector<2x48xf32> to vector<2x1x48xf32>
    %193 = vector.shape_cast %188 : vector<32x48xf32> to vector<1x32x48xf32>
    %194 = vector.broadcast %192 : vector<2x1x48xf32> to vector<2x32x48xf32>
    %195 = vector.broadcast %193 : vector<1x32x48xf32> to vector<2x32x48xf32>
    %196 = arith.mulf %194, %195 : vector<2x32x48xf32>
    %197 = math.exp %196 : vector<2x32x48xf32>
    %198 = vector.extract_strided_slice %155 {offsets = [0, 0, 0], sizes = [2, 1, 48], strides = [1, 1, 1]} : vector<2x16x48xf32> to vector<2x1x48xf32>
    %199 = vector.shape_cast %198 : vector<2x1x48xf32> to vector<2x48xf32>
    %200 = arith.mulf %191, %199 : vector<2x48xf32>
    %201 = vector.shape_cast %200 : vector<2x48xf32> to vector<2x1x48xf32>
    %202 = vector.extract_strided_slice %181 {offsets = [0, 0, 0], sizes = [2, 1, 32], strides = [1, 1, 1]} : vector<2x16x32xf32> to vector<2x1x32xf32>
    %203 = vector.shape_cast %202 : vector<2x1x32xf32> to vector<2x32xf32>
    %204 = vector.shape_cast %203 : vector<2x32xf32> to vector<2x32x1xf32>
    %205 = vector.broadcast %201 : vector<2x1x48xf32> to vector<2x32x48xf32>
    %206 = vector.broadcast %204 : vector<2x32x1xf32> to vector<2x32x48xf32>
    %207 = arith.mulf %205, %206 : vector<2x32x48xf32>
    %208 = arith.mulf %197, %189 : vector<2x32x48xf32>
    %209 = arith.addf %208, %207 : vector<2x32x48xf32>
    %210 = vector.extract_strided_slice %183 {offsets = [0, 0, 0], sizes = [2, 1, 32], strides = [1, 1, 1]} : vector<2x16x32xf32> to vector<2x1x32xf32>
    %211 = vector.shape_cast %210 : vector<2x1x32xf32> to vector<2x32xf32>
    %212 = vector.shape_cast %211 : vector<2x32xf32> to vector<2x32x1xf32>
    %213 = vector.broadcast %212 : vector<2x32x1xf32> to vector<2x32x48xf32>
    %214 = arith.mulf %209, %213 : vector<2x32x48xf32>
    %cst_41 = arith.constant dense<0.000000e+00> : vector<2x48xf32>
    %215 = vector.multi_reduction <add>, %214, %cst_41 [1] : vector<2x32x48xf32> to vector<2x48xf32>
    %c0_42 = arith.constant 0 : index
    %c0_43 = arith.constant 0 : index
    %c0_44 = arith.constant 0 : index
    %216 = vector.load %arg17[%c0_42, %c0_43, %c0_44] : memref<2x16x48xf32, #tpu.memory_space<vmem>>, vector<2x1x48xf32>
    %217 = vector.shape_cast %216 : vector<2x1x48xf32> to vector<2x48xf32>
    %218 = vector.shape_cast %215 : vector<2x48xf32> to vector<2x1x48xf32>
    tpu.vector_store %arg17[%c0_42, %c0_43, %c0_44], %218 {strides = array<i32>} : memref<2x16x48xf32, #tpu.memory_space<vmem>>, vector<2x1x48xf32>,
    %219 = vector.extract_strided_slice %179 {offsets = [0, 1, 0], sizes = [2, 1, 48], strides = [1, 1, 1]} : vector<2x16x48xf32> to vector<2x1x48xf32>
    %220 = vector.shape_cast %219 : vector<2x1x48xf32> to vector<2x48xf32>
    %221 = vector.shape_cast %220 : vector<2x48xf32> to vector<2x1x48xf32>
    %222 = vector.shape_cast %188 : vector<32x48xf32> to vector<1x32x48xf32>
    %223 = vector.broadcast %221 : vector<2x1x48xf32> to vector<2x32x48xf32>
    %224 = vector.broadcast %222 : vector<1x32x48xf32> to vector<2x32x48xf32>
    %225 = arith.mulf %223, %224 : vector<2x32x48xf32>
    %226 = math.exp %225 : vector<2x32x48xf32>
    %227 = vector.extract_strided_slice %155 {offsets = [0, 1, 0], sizes = [2, 1, 48], strides = [1, 1, 1]} : vector<2x16x48xf32> to vector<2x1x48xf32>
    %228 = vector.shape_cast %227 : vector<2x1x48xf32> to vector<2x48xf32>
    %229 = arith.mulf %220, %228 : vector<2x48xf32>
    %230 = vector.shape_cast %229 : vector<2x48xf32> to vector<2x1x48xf32>
    %231 = vector.extract_strided_slice %181 {offsets = [0, 1, 0], sizes = [2, 1, 32], strides = [1, 1, 1]} : vector<2x16x32xf32> to vector<2x1x32xf32>
    %232 = vector.shape_cast %231 : vector<2x1x32xf32> to vector<2x32xf32>
    %233 = vector.shape_cast %232 : vector<2x32xf32> to vector<2x32x1xf32>
    %234 = vector.broadcast %230 : vector<2x1x48xf32> to vector<2x32x48xf32>
    %235 = vector.broadcast %233 : vector<2x32x1xf32> to vector<2x32x48xf32>
    %236 = arith.mulf %234, %235 : vector<2x32x48xf32>
    %237 = arith.mulf %226, %209 : vector<2x32x48xf32>
    %238 = arith.addf %237, %236 : vector<2x32x48xf32>
    %239 = vector.extract_strided_slice %183 {offsets = [0, 1, 0], sizes = [2, 1, 32], strides = [1, 1, 1]} : vector<2x16x32xf32> to vector<2x1x32xf32>
    %240 = vector.shape_cast %239 : vector<2x1x32xf32> to vector<2x32xf32>
    %241 = vector.shape_cast %240 : vector<2x32xf32> to vector<2x32x1xf32>
    %242 = vector.broadcast %241 : vector<2x32x1xf32> to vector<2x32x48xf32>
    %243 = arith.mulf %238, %242 : vector<2x32x48xf32>
    %cst_45 = arith.constant dense<0.000000e+00> : vector<2x48xf32>
    %244 = vector.multi_reduction <add>, %243, %cst_45 [1] : vector<2x32x48xf32> to vector<2x48xf32>
    %c0_46 = arith.constant 0 : index
    %c1 = arith.constant 1 : index
    %c0_47 = arith.constant 0 : index
    %245 = vector.load %arg17[%c0_46, %c1, %c0_47] : memref<2x16x48xf32, #tpu.memory_space<vmem>>, vector<2x1x48xf32>
    %246 = vector.shape_cast %245 : vector<2x1x48xf32> to vector<2x48xf32>
    %247 = vector.shape_cast %244 : vector<2x48xf32> to vector<2x1x48xf32>
    tpu.vector_store %arg17[%c0_46, %c1, %c0_47], %247 {strides = array<i32>} : memref<2x16x48xf32, #tpu.memory_space<vmem>>, vector<2x1x48xf32>,
    %248 = vector.extract_strided_slice %179 {offsets = [0, 2, 0], sizes = [2, 1, 48], strides = [1, 1, 1]} : vector<2x16x48xf32> to vector<2x1x48xf32>
    %249 = vector.shape_cast %248 : vector<2x1x48xf32> to vector<2x48xf32>
    %250 = vector.shape_cast %249 : vector<2x48xf32> to vector<2x1x48xf32>
    %251 = vector.shape_cast %188 : vector<32x48xf32> to vector<1x32x48xf32>
    %252 = vector.broadcast %250 : vector<2x1x48xf32> to vector<2x32x48xf32>
    %253 = vector.broadcast %251 : vector<1x32x48xf32> to vector<2x32x48xf32>
    %254 = arith.mulf %252, %253 : vector<2x32x48xf32>
    %255 = math.exp %254 : vector<2x32x48xf32>
    %256 = vector.extract_strided_slice %155 {offsets = [0, 2, 0], sizes = [2, 1, 48], strides = [1, 1, 1]} : vector<2x16x48xf32> to vector<2x1x48xf32>
    %257 = vector.shape_cast %256 : vector<2x1x48xf32> to vector<2x48xf32>
    %258 = arith.mulf %249, %257 : vector<2x48xf32>
    %259 = vector.shape_cast %258 : vector<2x48xf32> to vector<2x1x48xf32>
    %260 = vector.extract_strided_slice %181 {offsets = [0, 2, 0], sizes = [2, 1, 32], strides = [1, 1, 1]} : vector<2x16x32xf32> to vector<2x1x32xf32>
    %261 = vector.shape_cast %260 : vector<2x1x32xf32> to vector<2x32xf32>
    %262 = vector.shape_cast %261 : vector<2x32xf32> to vector<2x32x1xf32>
    %263 = vector.broadcast %259 : vector<2x1x48xf32> to vector<2x32x48xf32>
    %264 = vector.broadcast %262 : vector<2x32x1xf32> to vector<2x32x48xf32>
    %265 = arith.mulf %263, %264 : vector<2x32x48xf32>
    %266 = arith.mulf %255, %238 : vector<2x32x48xf32>
    %267 = arith.addf %266, %265 : vector<2x32x48xf32>
    %268 = vector.extract_strided_slice %183 {offsets = [0, 2, 0], sizes = [2, 1, 32], strides = [1, 1, 1]} : vector<2x16x32xf32> to vector<2x1x32xf32>
    %269 = vector.shape_cast %268 : vector<2x1x32xf32> to vector<2x32xf32>
    %270 = vector.shape_cast %269 : vector<2x32xf32> to vector<2x32x1xf32>
    %271 = vector.broadcast %270 : vector<2x32x1xf32> to vector<2x32x48xf32>
    %272 = arith.mulf %267, %271 : vector<2x32x48xf32>
    %cst_48 = arith.constant dense<0.000000e+00> : vector<2x48xf32>
    %273 = vector.multi_reduction <add>, %272, %cst_48 [1] : vector<2x32x48xf32> to vector<2x48xf32>
    %c0_49 = arith.constant 0 : index
    %c2 = arith.constant 2 : index
    %c0_50 = arith.constant 0 : index
    %274 = vector.load %arg17[%c0_49, %c2, %c0_50] : memref<2x16x48xf32, #tpu.memory_space<vmem>>, vector<2x1x48xf32>
    %275 = vector.shape_cast %274 : vector<2x1x48xf32> to vector<2x48xf32>
    %276 = vector.shape_cast %273 : vector<2x48xf32> to vector<2x1x48xf32>
    tpu.vector_store %arg17[%c0_49, %c2, %c0_50], %276 {strides = array<i32>} : memref<2x16x48xf32, #tpu.memory_space<vmem>>, vector<2x1x48xf32>,
    %277 = vector.extract_strided_slice %179 {offsets = [0, 3, 0], sizes = [2, 1, 48], strides = [1, 1, 1]} : vector<2x16x48xf32> to vector<2x1x48xf32>
    %278 = vector.shape_cast %277 : vector<2x1x48xf32> to vector<2x48xf32>
    %279 = vector.shape_cast %278 : vector<2x48xf32> to vector<2x1x48xf32>
    %280 = vector.shape_cast %188 : vector<32x48xf32> to vector<1x32x48xf32>
    %281 = vector.broadcast %279 : vector<2x1x48xf32> to vector<2x32x48xf32>
    %282 = vector.broadcast %280 : vector<1x32x48xf32> to vector<2x32x48xf32>
    %283 = arith.mulf %281, %282 : vector<2x32x48xf32>
    %284 = math.exp %283 : vector<2x32x48xf32>
    %285 = vector.extract_strided_slice %155 {offsets = [0, 3, 0], sizes = [2, 1, 48], strides = [1, 1, 1]} : vector<2x16x48xf32> to vector<2x1x48xf32>
    %286 = vector.shape_cast %285 : vector<2x1x48xf32> to vector<2x48xf32>
    %287 = arith.mulf %278, %286 : vector<2x48xf32>
    %288 = vector.shape_cast %287 : vector<2x48xf32> to vector<2x1x48xf32>
    %289 = vector.extract_strided_slice %181 {offsets = [0, 3, 0], sizes = [2, 1, 32], strides = [1, 1, 1]} : vector<2x16x32xf32> to vector<2x1x32xf32>
    %290 = vector.shape_cast %289 : vector<2x1x32xf32> to vector<2x32xf32>
    %291 = vector.shape_cast %290 : vector<2x32xf32> to vector<2x32x1xf32>
    %292 = vector.broadcast %288 : vector<2x1x48xf32> to vector<2x32x48xf32>
    %293 = vector.broadcast %291 : vector<2x32x1xf32> to vector<2x32x48xf32>
    %294 = arith.mulf %292, %293 : vector<2x32x48xf32>
    %295 = arith.mulf %284, %267 : vector<2x32x48xf32>
    %296 = arith.addf %295, %294 : vector<2x32x48xf32>
    %297 = vector.extract_strided_slice %183 {offsets = [0, 3, 0], sizes = [2, 1, 32], strides = [1, 1, 1]} : vector<2x16x32xf32> to vector<2x1x32xf32>
    %298 = vector.shape_cast %297 : vector<2x1x32xf32> to vector<2x32xf32>
    %299 = vector.shape_cast %298 : vector<2x32xf32> to vector<2x32x1xf32>
    %300 = vector.broadcast %299 : vector<2x32x1xf32> to vector<2x32x48xf32>
    %301 = arith.mulf %296, %300 : vector<2x32x48xf32>
    %cst_51 = arith.constant dense<0.000000e+00> : vector<2x48xf32>
    %302 = vector.multi_reduction <add>, %301, %cst_51 [1] : vector<2x32x48xf32> to vector<2x48xf32>
    %c0_52 = arith.constant 0 : index
    %c3 = arith.constant 3 : index
    %c0_53 = arith.constant 0 : index
    %303 = vector.load %arg17[%c0_52, %c3, %c0_53] : memref<2x16x48xf32, #tpu.memory_space<vmem>>, vector<2x1x48xf32>
    %304 = vector.shape_cast %303 : vector<2x1x48xf32> to vector<2x48xf32>
    %305 = vector.shape_cast %302 : vector<2x48xf32> to vector<2x1x48xf32>
    tpu.vector_store %arg17[%c0_52, %c3, %c0_53], %305 {strides = array<i32>} : memref<2x16x48xf32, #tpu.memory_space<vmem>>, vector<2x1x48xf32>,
    %306 = vector.extract_strided_slice %179 {offsets = [0, 4, 0], sizes = [2, 1, 48], strides = [1, 1, 1]} : vector<2x16x48xf32> to vector<2x1x48xf32>
    %307 = vector.shape_cast %306 : vector<2x1x48xf32> to vector<2x48xf32>
    %308 = vector.shape_cast %307 : vector<2x48xf32> to vector<2x1x48xf32>
    %309 = vector.shape_cast %188 : vector<32x48xf32> to vector<1x32x48xf32>
    %310 = vector.broadcast %308 : vector<2x1x48xf32> to vector<2x32x48xf32>
    %311 = vector.broadcast %309 : vector<1x32x48xf32> to vector<2x32x48xf32>
    %312 = arith.mulf %310, %311 : vector<2x32x48xf32>
    %313 = math.exp %312 : vector<2x32x48xf32>
    %314 = vector.extract_strided_slice %155 {offsets = [0, 4, 0], sizes = [2, 1, 48], strides = [1, 1, 1]} : vector<2x16x48xf32> to vector<2x1x48xf32>
    %315 = vector.shape_cast %314 : vector<2x1x48xf32> to vector<2x48xf32>
    %316 = arith.mulf %307, %315 : vector<2x48xf32>
    %317 = vector.shape_cast %316 : vector<2x48xf32> to vector<2x1x48xf32>
    %318 = vector.extract_strided_slice %181 {offsets = [0, 4, 0], sizes = [2, 1, 32], strides = [1, 1, 1]} : vector<2x16x32xf32> to vector<2x1x32xf32>
    %319 = vector.shape_cast %318 : vector<2x1x32xf32> to vector<2x32xf32>
    %320 = vector.shape_cast %319 : vector<2x32xf32> to vector<2x32x1xf32>
    %321 = vector.broadcast %317 : vector<2x1x48xf32> to vector<2x32x48xf32>
    %322 = vector.broadcast %320 : vector<2x32x1xf32> to vector<2x32x48xf32>
    %323 = arith.mulf %321, %322 : vector<2x32x48xf32>
    %324 = arith.mulf %313, %296 : vector<2x32x48xf32>
    %325 = arith.addf %324, %323 : vector<2x32x48xf32>
    %326 = vector.extract_strided_slice %183 {offsets = [0, 4, 0], sizes = [2, 1, 32], strides = [1, 1, 1]} : vector<2x16x32xf32> to vector<2x1x32xf32>
    %327 = vector.shape_cast %326 : vector<2x1x32xf32> to vector<2x32xf32>
    %328 = vector.shape_cast %327 : vector<2x32xf32> to vector<2x32x1xf32>
    %329 = vector.broadcast %328 : vector<2x32x1xf32> to vector<2x32x48xf32>
    %330 = arith.mulf %325, %329 : vector<2x32x48xf32>
    %cst_54 = arith.constant dense<0.000000e+00> : vector<2x48xf32>
    %331 = vector.multi_reduction <add>, %330, %cst_54 [1] : vector<2x32x48xf32> to vector<2x48xf32>
    %c0_55 = arith.constant 0 : index
    %c4 = arith.constant 4 : index
    %c0_56 = arith.constant 0 : index
    %332 = vector.load %arg17[%c0_55, %c4, %c0_56] : memref<2x16x48xf32, #tpu.memory_space<vmem>>, vector<2x1x48xf32>
    %333 = vector.shape_cast %332 : vector<2x1x48xf32> to vector<2x48xf32>
    %334 = vector.shape_cast %331 : vector<2x48xf32> to vector<2x1x48xf32>
    tpu.vector_store %arg17[%c0_55, %c4, %c0_56], %334 {strides = array<i32>} : memref<2x16x48xf32, #tpu.memory_space<vmem>>, vector<2x1x48xf32>,
    %335 = vector.extract_strided_slice %179 {offsets = [0, 5, 0], sizes = [2, 1, 48], strides = [1, 1, 1]} : vector<2x16x48xf32> to vector<2x1x48xf32>
    %336 = vector.shape_cast %335 : vector<2x1x48xf32> to vector<2x48xf32>
    %337 = vector.shape_cast %336 : vector<2x48xf32> to vector<2x1x48xf32>
    %338 = vector.shape_cast %188 : vector<32x48xf32> to vector<1x32x48xf32>
    %339 = vector.broadcast %337 : vector<2x1x48xf32> to vector<2x32x48xf32>
    %340 = vector.broadcast %338 : vector<1x32x48xf32> to vector<2x32x48xf32>
    %341 = arith.mulf %339, %340 : vector<2x32x48xf32>
    %342 = math.exp %341 : vector<2x32x48xf32>
    %343 = vector.extract_strided_slice %155 {offsets = [0, 5, 0], sizes = [2, 1, 48], strides = [1, 1, 1]} : vector<2x16x48xf32> to vector<2x1x48xf32>
    %344 = vector.shape_cast %343 : vector<2x1x48xf32> to vector<2x48xf32>
    %345 = arith.mulf %336, %344 : vector<2x48xf32>
    %346 = vector.shape_cast %345 : vector<2x48xf32> to vector<2x1x48xf32>
    %347 = vector.extract_strided_slice %181 {offsets = [0, 5, 0], sizes = [2, 1, 32], strides = [1, 1, 1]} : vector<2x16x32xf32> to vector<2x1x32xf32>
    %348 = vector.shape_cast %347 : vector<2x1x32xf32> to vector<2x32xf32>
    %349 = vector.shape_cast %348 : vector<2x32xf32> to vector<2x32x1xf32>
    %350 = vector.broadcast %346 : vector<2x1x48xf32> to vector<2x32x48xf32>
    %351 = vector.broadcast %349 : vector<2x32x1xf32> to vector<2x32x48xf32>
    %352 = arith.mulf %350, %351 : vector<2x32x48xf32>
    %353 = arith.mulf %342, %325 : vector<2x32x48xf32>
    %354 = arith.addf %353, %352 : vector<2x32x48xf32>
    %355 = vector.extract_strided_slice %183 {offsets = [0, 5, 0], sizes = [2, 1, 32], strides = [1, 1, 1]} : vector<2x16x32xf32> to vector<2x1x32xf32>
    %356 = vector.shape_cast %355 : vector<2x1x32xf32> to vector<2x32xf32>
    %357 = vector.shape_cast %356 : vector<2x32xf32> to vector<2x32x1xf32>
    %358 = vector.broadcast %357 : vector<2x32x1xf32> to vector<2x32x48xf32>
    %359 = arith.mulf %354, %358 : vector<2x32x48xf32>
    %cst_57 = arith.constant dense<0.000000e+00> : vector<2x48xf32>
    %360 = vector.multi_reduction <add>, %359, %cst_57 [1] : vector<2x32x48xf32> to vector<2x48xf32>
    %c0_58 = arith.constant 0 : index
    %c5 = arith.constant 5 : index
    %c0_59 = arith.constant 0 : index
    %361 = vector.load %arg17[%c0_58, %c5, %c0_59] : memref<2x16x48xf32, #tpu.memory_space<vmem>>, vector<2x1x48xf32>
    %362 = vector.shape_cast %361 : vector<2x1x48xf32> to vector<2x48xf32>
    %363 = vector.shape_cast %360 : vector<2x48xf32> to vector<2x1x48xf32>
    tpu.vector_store %arg17[%c0_58, %c5, %c0_59], %363 {strides = array<i32>} : memref<2x16x48xf32, #tpu.memory_space<vmem>>, vector<2x1x48xf32>,
    %364 = vector.extract_strided_slice %179 {offsets = [0, 6, 0], sizes = [2, 1, 48], strides = [1, 1, 1]} : vector<2x16x48xf32> to vector<2x1x48xf32>
    %365 = vector.shape_cast %364 : vector<2x1x48xf32> to vector<2x48xf32>
    %366 = vector.shape_cast %365 : vector<2x48xf32> to vector<2x1x48xf32>
    %367 = vector.shape_cast %188 : vector<32x48xf32> to vector<1x32x48xf32>
    %368 = vector.broadcast %366 : vector<2x1x48xf32> to vector<2x32x48xf32>
    %369 = vector.broadcast %367 : vector<1x32x48xf32> to vector<2x32x48xf32>
    %370 = arith.mulf %368, %369 : vector<2x32x48xf32>
    %371 = math.exp %370 : vector<2x32x48xf32>
    %372 = vector.extract_strided_slice %155 {offsets = [0, 6, 0], sizes = [2, 1, 48], strides = [1, 1, 1]} : vector<2x16x48xf32> to vector<2x1x48xf32>
    %373 = vector.shape_cast %372 : vector<2x1x48xf32> to vector<2x48xf32>
    %374 = arith.mulf %365, %373 : vector<2x48xf32>
    %375 = vector.shape_cast %374 : vector<2x48xf32> to vector<2x1x48xf32>
    %376 = vector.extract_strided_slice %181 {offsets = [0, 6, 0], sizes = [2, 1, 32], strides = [1, 1, 1]} : vector<2x16x32xf32> to vector<2x1x32xf32>
    %377 = vector.shape_cast %376 : vector<2x1x32xf32> to vector<2x32xf32>
    %378 = vector.shape_cast %377 : vector<2x32xf32> to vector<2x32x1xf32>
    %379 = vector.broadcast %375 : vector<2x1x48xf32> to vector<2x32x48xf32>
    %380 = vector.broadcast %378 : vector<2x32x1xf32> to vector<2x32x48xf32>
    %381 = arith.mulf %379, %380 : vector<2x32x48xf32>
    %382 = arith.mulf %371, %354 : vector<2x32x48xf32>
    %383 = arith.addf %382, %381 : vector<2x32x48xf32>
    %384 = vector.extract_strided_slice %183 {offsets = [0, 6, 0], sizes = [2, 1, 32], strides = [1, 1, 1]} : vector<2x16x32xf32> to vector<2x1x32xf32>
    %385 = vector.shape_cast %384 : vector<2x1x32xf32> to vector<2x32xf32>
    %386 = vector.shape_cast %385 : vector<2x32xf32> to vector<2x32x1xf32>
    %387 = vector.broadcast %386 : vector<2x32x1xf32> to vector<2x32x48xf32>
    %388 = arith.mulf %383, %387 : vector<2x32x48xf32>
    %cst_60 = arith.constant dense<0.000000e+00> : vector<2x48xf32>
    %389 = vector.multi_reduction <add>, %388, %cst_60 [1] : vector<2x32x48xf32> to vector<2x48xf32>
    %c0_61 = arith.constant 0 : index
    %c6 = arith.constant 6 : index
    %c0_62 = arith.constant 0 : index
    %390 = vector.load %arg17[%c0_61, %c6, %c0_62] : memref<2x16x48xf32, #tpu.memory_space<vmem>>, vector<2x1x48xf32>
    %391 = vector.shape_cast %390 : vector<2x1x48xf32> to vector<2x48xf32>
    %392 = vector.shape_cast %389 : vector<2x48xf32> to vector<2x1x48xf32>
    tpu.vector_store %arg17[%c0_61, %c6, %c0_62], %392 {strides = array<i32>} : memref<2x16x48xf32, #tpu.memory_space<vmem>>, vector<2x1x48xf32>,
    %393 = vector.extract_strided_slice %179 {offsets = [0, 7, 0], sizes = [2, 1, 48], strides = [1, 1, 1]} : vector<2x16x48xf32> to vector<2x1x48xf32>
    %394 = vector.shape_cast %393 : vector<2x1x48xf32> to vector<2x48xf32>
    %395 = vector.shape_cast %394 : vector<2x48xf32> to vector<2x1x48xf32>
    %396 = vector.shape_cast %188 : vector<32x48xf32> to vector<1x32x48xf32>
    %397 = vector.broadcast %395 : vector<2x1x48xf32> to vector<2x32x48xf32>
    %398 = vector.broadcast %396 : vector<1x32x48xf32> to vector<2x32x48xf32>
    %399 = arith.mulf %397, %398 : vector<2x32x48xf32>
    %400 = math.exp %399 : vector<2x32x48xf32>
    %401 = vector.extract_strided_slice %155 {offsets = [0, 7, 0], sizes = [2, 1, 48], strides = [1, 1, 1]} : vector<2x16x48xf32> to vector<2x1x48xf32>
    %402 = vector.shape_cast %401 : vector<2x1x48xf32> to vector<2x48xf32>
    %403 = arith.mulf %394, %402 : vector<2x48xf32>
    %404 = vector.shape_cast %403 : vector<2x48xf32> to vector<2x1x48xf32>
    %405 = vector.extract_strided_slice %181 {offsets = [0, 7, 0], sizes = [2, 1, 32], strides = [1, 1, 1]} : vector<2x16x32xf32> to vector<2x1x32xf32>
    %406 = vector.shape_cast %405 : vector<2x1x32xf32> to vector<2x32xf32>
    %407 = vector.shape_cast %406 : vector<2x32xf32> to vector<2x32x1xf32>
    %408 = vector.broadcast %404 : vector<2x1x48xf32> to vector<2x32x48xf32>
    %409 = vector.broadcast %407 : vector<2x32x1xf32> to vector<2x32x48xf32>
    %410 = arith.mulf %408, %409 : vector<2x32x48xf32>
    %411 = arith.mulf %400, %383 : vector<2x32x48xf32>
    %412 = arith.addf %411, %410 : vector<2x32x48xf32>
    %413 = vector.extract_strided_slice %183 {offsets = [0, 7, 0], sizes = [2, 1, 32], strides = [1, 1, 1]} : vector<2x16x32xf32> to vector<2x1x32xf32>
    %414 = vector.shape_cast %413 : vector<2x1x32xf32> to vector<2x32xf32>
    %415 = vector.shape_cast %414 : vector<2x32xf32> to vector<2x32x1xf32>
    %416 = vector.broadcast %415 : vector<2x32x1xf32> to vector<2x32x48xf32>
    %417 = arith.mulf %412, %416 : vector<2x32x48xf32>
    %cst_63 = arith.constant dense<0.000000e+00> : vector<2x48xf32>
    %418 = vector.multi_reduction <add>, %417, %cst_63 [1] : vector<2x32x48xf32> to vector<2x48xf32>
    %c0_64 = arith.constant 0 : index
    %c7 = arith.constant 7 : index
    %c0_65 = arith.constant 0 : index
    %419 = vector.load %arg17[%c0_64, %c7, %c0_65] : memref<2x16x48xf32, #tpu.memory_space<vmem>>, vector<2x1x48xf32>
    %420 = vector.shape_cast %419 : vector<2x1x48xf32> to vector<2x48xf32>
    %421 = vector.shape_cast %418 : vector<2x48xf32> to vector<2x1x48xf32>
    tpu.vector_store %arg17[%c0_64, %c7, %c0_65], %421 {strides = array<i32>} : memref<2x16x48xf32, #tpu.memory_space<vmem>>, vector<2x1x48xf32>,
    %422 = vector.extract_strided_slice %179 {offsets = [0, 8, 0], sizes = [2, 1, 48], strides = [1, 1, 1]} : vector<2x16x48xf32> to vector<2x1x48xf32>
    %423 = vector.shape_cast %422 : vector<2x1x48xf32> to vector<2x48xf32>
    %424 = vector.shape_cast %423 : vector<2x48xf32> to vector<2x1x48xf32>
    %425 = vector.shape_cast %188 : vector<32x48xf32> to vector<1x32x48xf32>
    %426 = vector.broadcast %424 : vector<2x1x48xf32> to vector<2x32x48xf32>
    %427 = vector.broadcast %425 : vector<1x32x48xf32> to vector<2x32x48xf32>
    %428 = arith.mulf %426, %427 : vector<2x32x48xf32>
    %429 = math.exp %428 : vector<2x32x48xf32>
    %430 = vector.extract_strided_slice %155 {offsets = [0, 8, 0], sizes = [2, 1, 48], strides = [1, 1, 1]} : vector<2x16x48xf32> to vector<2x1x48xf32>
    %431 = vector.shape_cast %430 : vector<2x1x48xf32> to vector<2x48xf32>
    %432 = arith.mulf %423, %431 : vector<2x48xf32>
    %433 = vector.shape_cast %432 : vector<2x48xf32> to vector<2x1x48xf32>
    %434 = vector.extract_strided_slice %181 {offsets = [0, 8, 0], sizes = [2, 1, 32], strides = [1, 1, 1]} : vector<2x16x32xf32> to vector<2x1x32xf32>
    %435 = vector.shape_cast %434 : vector<2x1x32xf32> to vector<2x32xf32>
    %436 = vector.shape_cast %435 : vector<2x32xf32> to vector<2x32x1xf32>
    %437 = vector.broadcast %433 : vector<2x1x48xf32> to vector<2x32x48xf32>
    %438 = vector.broadcast %436 : vector<2x32x1xf32> to vector<2x32x48xf32>
    %439 = arith.mulf %437, %438 : vector<2x32x48xf32>
    %440 = arith.mulf %429, %412 : vector<2x32x48xf32>
    %441 = arith.addf %440, %439 : vector<2x32x48xf32>
    %442 = vector.extract_strided_slice %183 {offsets = [0, 8, 0], sizes = [2, 1, 32], strides = [1, 1, 1]} : vector<2x16x32xf32> to vector<2x1x32xf32>
    %443 = vector.shape_cast %442 : vector<2x1x32xf32> to vector<2x32xf32>
    %444 = vector.shape_cast %443 : vector<2x32xf32> to vector<2x32x1xf32>
    %445 = vector.broadcast %444 : vector<2x32x1xf32> to vector<2x32x48xf32>
    %446 = arith.mulf %441, %445 : vector<2x32x48xf32>
    %cst_66 = arith.constant dense<0.000000e+00> : vector<2x48xf32>
    %447 = vector.multi_reduction <add>, %446, %cst_66 [1] : vector<2x32x48xf32> to vector<2x48xf32>
    %c0_67 = arith.constant 0 : index
    %c8 = arith.constant 8 : index
    %c0_68 = arith.constant 0 : index
    %448 = vector.load %arg17[%c0_67, %c8, %c0_68] : memref<2x16x48xf32, #tpu.memory_space<vmem>>, vector<2x1x48xf32>
    %449 = vector.shape_cast %448 : vector<2x1x48xf32> to vector<2x48xf32>
    %450 = vector.shape_cast %447 : vector<2x48xf32> to vector<2x1x48xf32>
    tpu.vector_store %arg17[%c0_67, %c8, %c0_68], %450 {strides = array<i32>} : memref<2x16x48xf32, #tpu.memory_space<vmem>>, vector<2x1x48xf32>,
    %451 = vector.extract_strided_slice %179 {offsets = [0, 9, 0], sizes = [2, 1, 48], strides = [1, 1, 1]} : vector<2x16x48xf32> to vector<2x1x48xf32>
    %452 = vector.shape_cast %451 : vector<2x1x48xf32> to vector<2x48xf32>
    %453 = vector.shape_cast %452 : vector<2x48xf32> to vector<2x1x48xf32>
    %454 = vector.shape_cast %188 : vector<32x48xf32> to vector<1x32x48xf32>
    %455 = vector.broadcast %453 : vector<2x1x48xf32> to vector<2x32x48xf32>
    %456 = vector.broadcast %454 : vector<1x32x48xf32> to vector<2x32x48xf32>
    %457 = arith.mulf %455, %456 : vector<2x32x48xf32>
    %458 = math.exp %457 : vector<2x32x48xf32>
    %459 = vector.extract_strided_slice %155 {offsets = [0, 9, 0], sizes = [2, 1, 48], strides = [1, 1, 1]} : vector<2x16x48xf32> to vector<2x1x48xf32>
    %460 = vector.shape_cast %459 : vector<2x1x48xf32> to vector<2x48xf32>
    %461 = arith.mulf %452, %460 : vector<2x48xf32>
    %462 = vector.shape_cast %461 : vector<2x48xf32> to vector<2x1x48xf32>
    %463 = vector.extract_strided_slice %181 {offsets = [0, 9, 0], sizes = [2, 1, 32], strides = [1, 1, 1]} : vector<2x16x32xf32> to vector<2x1x32xf32>
    %464 = vector.shape_cast %463 : vector<2x1x32xf32> to vector<2x32xf32>
    %465 = vector.shape_cast %464 : vector<2x32xf32> to vector<2x32x1xf32>
    %466 = vector.broadcast %462 : vector<2x1x48xf32> to vector<2x32x48xf32>
    %467 = vector.broadcast %465 : vector<2x32x1xf32> to vector<2x32x48xf32>
    %468 = arith.mulf %466, %467 : vector<2x32x48xf32>
    %469 = arith.mulf %458, %441 : vector<2x32x48xf32>
    %470 = arith.addf %469, %468 : vector<2x32x48xf32>
    %471 = vector.extract_strided_slice %183 {offsets = [0, 9, 0], sizes = [2, 1, 32], strides = [1, 1, 1]} : vector<2x16x32xf32> to vector<2x1x32xf32>
    %472 = vector.shape_cast %471 : vector<2x1x32xf32> to vector<2x32xf32>
    %473 = vector.shape_cast %472 : vector<2x32xf32> to vector<2x32x1xf32>
    %474 = vector.broadcast %473 : vector<2x32x1xf32> to vector<2x32x48xf32>
    %475 = arith.mulf %470, %474 : vector<2x32x48xf32>
    %cst_69 = arith.constant dense<0.000000e+00> : vector<2x48xf32>
    %476 = vector.multi_reduction <add>, %475, %cst_69 [1] : vector<2x32x48xf32> to vector<2x48xf32>
    %c0_70 = arith.constant 0 : index
    %c9 = arith.constant 9 : index
    %c0_71 = arith.constant 0 : index
    %477 = vector.load %arg17[%c0_70, %c9, %c0_71] : memref<2x16x48xf32, #tpu.memory_space<vmem>>, vector<2x1x48xf32>
    %478 = vector.shape_cast %477 : vector<2x1x48xf32> to vector<2x48xf32>
    %479 = vector.shape_cast %476 : vector<2x48xf32> to vector<2x1x48xf32>
    tpu.vector_store %arg17[%c0_70, %c9, %c0_71], %479 {strides = array<i32>} : memref<2x16x48xf32, #tpu.memory_space<vmem>>, vector<2x1x48xf32>,
    %480 = vector.extract_strided_slice %179 {offsets = [0, 10, 0], sizes = [2, 1, 48], strides = [1, 1, 1]} : vector<2x16x48xf32> to vector<2x1x48xf32>
    %481 = vector.shape_cast %480 : vector<2x1x48xf32> to vector<2x48xf32>
    %482 = vector.shape_cast %481 : vector<2x48xf32> to vector<2x1x48xf32>
    %483 = vector.shape_cast %188 : vector<32x48xf32> to vector<1x32x48xf32>
    %484 = vector.broadcast %482 : vector<2x1x48xf32> to vector<2x32x48xf32>
    %485 = vector.broadcast %483 : vector<1x32x48xf32> to vector<2x32x48xf32>
    %486 = arith.mulf %484, %485 : vector<2x32x48xf32>
    %487 = math.exp %486 : vector<2x32x48xf32>
    %488 = vector.extract_strided_slice %155 {offsets = [0, 10, 0], sizes = [2, 1, 48], strides = [1, 1, 1]} : vector<2x16x48xf32> to vector<2x1x48xf32>
    %489 = vector.shape_cast %488 : vector<2x1x48xf32> to vector<2x48xf32>
    %490 = arith.mulf %481, %489 : vector<2x48xf32>
    %491 = vector.shape_cast %490 : vector<2x48xf32> to vector<2x1x48xf32>
    %492 = vector.extract_strided_slice %181 {offsets = [0, 10, 0], sizes = [2, 1, 32], strides = [1, 1, 1]} : vector<2x16x32xf32> to vector<2x1x32xf32>
    %493 = vector.shape_cast %492 : vector<2x1x32xf32> to vector<2x32xf32>
    %494 = vector.shape_cast %493 : vector<2x32xf32> to vector<2x32x1xf32>
    %495 = vector.broadcast %491 : vector<2x1x48xf32> to vector<2x32x48xf32>
    %496 = vector.broadcast %494 : vector<2x32x1xf32> to vector<2x32x48xf32>
    %497 = arith.mulf %495, %496 : vector<2x32x48xf32>
    %498 = arith.mulf %487, %470 : vector<2x32x48xf32>
    %499 = arith.addf %498, %497 : vector<2x32x48xf32>
    %500 = vector.extract_strided_slice %183 {offsets = [0, 10, 0], sizes = [2, 1, 32], strides = [1, 1, 1]} : vector<2x16x32xf32> to vector<2x1x32xf32>
    %501 = vector.shape_cast %500 : vector<2x1x32xf32> to vector<2x32xf32>
    %502 = vector.shape_cast %501 : vector<2x32xf32> to vector<2x32x1xf32>
    %503 = vector.broadcast %502 : vector<2x32x1xf32> to vector<2x32x48xf32>
    %504 = arith.mulf %499, %503 : vector<2x32x48xf32>
    %cst_72 = arith.constant dense<0.000000e+00> : vector<2x48xf32>
    %505 = vector.multi_reduction <add>, %504, %cst_72 [1] : vector<2x32x48xf32> to vector<2x48xf32>
    %c0_73 = arith.constant 0 : index
    %c10 = arith.constant 10 : index
    %c0_74 = arith.constant 0 : index
    %506 = vector.load %arg17[%c0_73, %c10, %c0_74] : memref<2x16x48xf32, #tpu.memory_space<vmem>>, vector<2x1x48xf32>
    %507 = vector.shape_cast %506 : vector<2x1x48xf32> to vector<2x48xf32>
    %508 = vector.shape_cast %505 : vector<2x48xf32> to vector<2x1x48xf32>
    tpu.vector_store %arg17[%c0_73, %c10, %c0_74], %508 {strides = array<i32>} : memref<2x16x48xf32, #tpu.memory_space<vmem>>, vector<2x1x48xf32>,
    %509 = vector.extract_strided_slice %179 {offsets = [0, 11, 0], sizes = [2, 1, 48], strides = [1, 1, 1]} : vector<2x16x48xf32> to vector<2x1x48xf32>
    %510 = vector.shape_cast %509 : vector<2x1x48xf32> to vector<2x48xf32>
    %511 = vector.shape_cast %510 : vector<2x48xf32> to vector<2x1x48xf32>
    %512 = vector.shape_cast %188 : vector<32x48xf32> to vector<1x32x48xf32>
    %513 = vector.broadcast %511 : vector<2x1x48xf32> to vector<2x32x48xf32>
    %514 = vector.broadcast %512 : vector<1x32x48xf32> to vector<2x32x48xf32>
    %515 = arith.mulf %513, %514 : vector<2x32x48xf32>
    %516 = math.exp %515 : vector<2x32x48xf32>
    %517 = vector.extract_strided_slice %155 {offsets = [0, 11, 0], sizes = [2, 1, 48], strides = [1, 1, 1]} : vector<2x16x48xf32> to vector<2x1x48xf32>
    %518 = vector.shape_cast %517 : vector<2x1x48xf32> to vector<2x48xf32>
    %519 = arith.mulf %510, %518 : vector<2x48xf32>
    %520 = vector.shape_cast %519 : vector<2x48xf32> to vector<2x1x48xf32>
    %521 = vector.extract_strided_slice %181 {offsets = [0, 11, 0], sizes = [2, 1, 32], strides = [1, 1, 1]} : vector<2x16x32xf32> to vector<2x1x32xf32>
    %522 = vector.shape_cast %521 : vector<2x1x32xf32> to vector<2x32xf32>
    %523 = vector.shape_cast %522 : vector<2x32xf32> to vector<2x32x1xf32>
    %524 = vector.broadcast %520 : vector<2x1x48xf32> to vector<2x32x48xf32>
    %525 = vector.broadcast %523 : vector<2x32x1xf32> to vector<2x32x48xf32>
    %526 = arith.mulf %524, %525 : vector<2x32x48xf32>
    %527 = arith.mulf %516, %499 : vector<2x32x48xf32>
    %528 = arith.addf %527, %526 : vector<2x32x48xf32>
    %529 = vector.extract_strided_slice %183 {offsets = [0, 11, 0], sizes = [2, 1, 32], strides = [1, 1, 1]} : vector<2x16x32xf32> to vector<2x1x32xf32>
    %530 = vector.shape_cast %529 : vector<2x1x32xf32> to vector<2x32xf32>
    %531 = vector.shape_cast %530 : vector<2x32xf32> to vector<2x32x1xf32>
    %532 = vector.broadcast %531 : vector<2x32x1xf32> to vector<2x32x48xf32>
    %533 = arith.mulf %528, %532 : vector<2x32x48xf32>
    %cst_75 = arith.constant dense<0.000000e+00> : vector<2x48xf32>
    %534 = vector.multi_reduction <add>, %533, %cst_75 [1] : vector<2x32x48xf32> to vector<2x48xf32>
    %c0_76 = arith.constant 0 : index
    %c11 = arith.constant 11 : index
    %c0_77 = arith.constant 0 : index
    %535 = vector.load %arg17[%c0_76, %c11, %c0_77] : memref<2x16x48xf32, #tpu.memory_space<vmem>>, vector<2x1x48xf32>
    %536 = vector.shape_cast %535 : vector<2x1x48xf32> to vector<2x48xf32>
    %537 = vector.shape_cast %534 : vector<2x48xf32> to vector<2x1x48xf32>
    tpu.vector_store %arg17[%c0_76, %c11, %c0_77], %537 {strides = array<i32>} : memref<2x16x48xf32, #tpu.memory_space<vmem>>, vector<2x1x48xf32>,
    %538 = vector.extract_strided_slice %179 {offsets = [0, 12, 0], sizes = [2, 1, 48], strides = [1, 1, 1]} : vector<2x16x48xf32> to vector<2x1x48xf32>
    %539 = vector.shape_cast %538 : vector<2x1x48xf32> to vector<2x48xf32>
    %540 = vector.shape_cast %539 : vector<2x48xf32> to vector<2x1x48xf32>
    %541 = vector.shape_cast %188 : vector<32x48xf32> to vector<1x32x48xf32>
    %542 = vector.broadcast %540 : vector<2x1x48xf32> to vector<2x32x48xf32>
    %543 = vector.broadcast %541 : vector<1x32x48xf32> to vector<2x32x48xf32>
    %544 = arith.mulf %542, %543 : vector<2x32x48xf32>
    %545 = math.exp %544 : vector<2x32x48xf32>
    %546 = vector.extract_strided_slice %155 {offsets = [0, 12, 0], sizes = [2, 1, 48], strides = [1, 1, 1]} : vector<2x16x48xf32> to vector<2x1x48xf32>
    %547 = vector.shape_cast %546 : vector<2x1x48xf32> to vector<2x48xf32>
    %548 = arith.mulf %539, %547 : vector<2x48xf32>
    %549 = vector.shape_cast %548 : vector<2x48xf32> to vector<2x1x48xf32>
    %550 = vector.extract_strided_slice %181 {offsets = [0, 12, 0], sizes = [2, 1, 32], strides = [1, 1, 1]} : vector<2x16x32xf32> to vector<2x1x32xf32>
    %551 = vector.shape_cast %550 : vector<2x1x32xf32> to vector<2x32xf32>
    %552 = vector.shape_cast %551 : vector<2x32xf32> to vector<2x32x1xf32>
    %553 = vector.broadcast %549 : vector<2x1x48xf32> to vector<2x32x48xf32>
    %554 = vector.broadcast %552 : vector<2x32x1xf32> to vector<2x32x48xf32>
    %555 = arith.mulf %553, %554 : vector<2x32x48xf32>
    %556 = arith.mulf %545, %528 : vector<2x32x48xf32>
    %557 = arith.addf %556, %555 : vector<2x32x48xf32>
    %558 = vector.extract_strided_slice %183 {offsets = [0, 12, 0], sizes = [2, 1, 32], strides = [1, 1, 1]} : vector<2x16x32xf32> to vector<2x1x32xf32>
    %559 = vector.shape_cast %558 : vector<2x1x32xf32> to vector<2x32xf32>
    %560 = vector.shape_cast %559 : vector<2x32xf32> to vector<2x32x1xf32>
    %561 = vector.broadcast %560 : vector<2x32x1xf32> to vector<2x32x48xf32>
    %562 = arith.mulf %557, %561 : vector<2x32x48xf32>
    %cst_78 = arith.constant dense<0.000000e+00> : vector<2x48xf32>
    %563 = vector.multi_reduction <add>, %562, %cst_78 [1] : vector<2x32x48xf32> to vector<2x48xf32>
    %c0_79 = arith.constant 0 : index
    %c12 = arith.constant 12 : index
    %c0_80 = arith.constant 0 : index
    %564 = vector.load %arg17[%c0_79, %c12, %c0_80] : memref<2x16x48xf32, #tpu.memory_space<vmem>>, vector<2x1x48xf32>
    %565 = vector.shape_cast %564 : vector<2x1x48xf32> to vector<2x48xf32>
    %566 = vector.shape_cast %563 : vector<2x48xf32> to vector<2x1x48xf32>
    tpu.vector_store %arg17[%c0_79, %c12, %c0_80], %566 {strides = array<i32>} : memref<2x16x48xf32, #tpu.memory_space<vmem>>, vector<2x1x48xf32>,
    %567 = vector.extract_strided_slice %179 {offsets = [0, 13, 0], sizes = [2, 1, 48], strides = [1, 1, 1]} : vector<2x16x48xf32> to vector<2x1x48xf32>
    %568 = vector.shape_cast %567 : vector<2x1x48xf32> to vector<2x48xf32>
    %569 = vector.shape_cast %568 : vector<2x48xf32> to vector<2x1x48xf32>
    %570 = vector.shape_cast %188 : vector<32x48xf32> to vector<1x32x48xf32>
    %571 = vector.broadcast %569 : vector<2x1x48xf32> to vector<2x32x48xf32>
    %572 = vector.broadcast %570 : vector<1x32x48xf32> to vector<2x32x48xf32>
    %573 = arith.mulf %571, %572 : vector<2x32x48xf32>
    %574 = math.exp %573 : vector<2x32x48xf32>
    %575 = vector.extract_strided_slice %155 {offsets = [0, 13, 0], sizes = [2, 1, 48], strides = [1, 1, 1]} : vector<2x16x48xf32> to vector<2x1x48xf32>
    %576 = vector.shape_cast %575 : vector<2x1x48xf32> to vector<2x48xf32>
    %577 = arith.mulf %568, %576 : vector<2x48xf32>
    %578 = vector.shape_cast %577 : vector<2x48xf32> to vector<2x1x48xf32>
    %579 = vector.extract_strided_slice %181 {offsets = [0, 13, 0], sizes = [2, 1, 32], strides = [1, 1, 1]} : vector<2x16x32xf32> to vector<2x1x32xf32>
    %580 = vector.shape_cast %579 : vector<2x1x32xf32> to vector<2x32xf32>
    %581 = vector.shape_cast %580 : vector<2x32xf32> to vector<2x32x1xf32>
    %582 = vector.broadcast %578 : vector<2x1x48xf32> to vector<2x32x48xf32>
    %583 = vector.broadcast %581 : vector<2x32x1xf32> to vector<2x32x48xf32>
    %584 = arith.mulf %582, %583 : vector<2x32x48xf32>
    %585 = arith.mulf %574, %557 : vector<2x32x48xf32>
    %586 = arith.addf %585, %584 : vector<2x32x48xf32>
    %587 = vector.extract_strided_slice %183 {offsets = [0, 13, 0], sizes = [2, 1, 32], strides = [1, 1, 1]} : vector<2x16x32xf32> to vector<2x1x32xf32>
    %588 = vector.shape_cast %587 : vector<2x1x32xf32> to vector<2x32xf32>
    %589 = vector.shape_cast %588 : vector<2x32xf32> to vector<2x32x1xf32>
    %590 = vector.broadcast %589 : vector<2x32x1xf32> to vector<2x32x48xf32>
    %591 = arith.mulf %586, %590 : vector<2x32x48xf32>
    %cst_81 = arith.constant dense<0.000000e+00> : vector<2x48xf32>
    %592 = vector.multi_reduction <add>, %591, %cst_81 [1] : vector<2x32x48xf32> to vector<2x48xf32>
    %c0_82 = arith.constant 0 : index
    %c13 = arith.constant 13 : index
    %c0_83 = arith.constant 0 : index
    %593 = vector.load %arg17[%c0_82, %c13, %c0_83] : memref<2x16x48xf32, #tpu.memory_space<vmem>>, vector<2x1x48xf32>
    %594 = vector.shape_cast %593 : vector<2x1x48xf32> to vector<2x48xf32>
    %595 = vector.shape_cast %592 : vector<2x48xf32> to vector<2x1x48xf32>
    tpu.vector_store %arg17[%c0_82, %c13, %c0_83], %595 {strides = array<i32>} : memref<2x16x48xf32, #tpu.memory_space<vmem>>, vector<2x1x48xf32>,
    %596 = vector.extract_strided_slice %179 {offsets = [0, 14, 0], sizes = [2, 1, 48], strides = [1, 1, 1]} : vector<2x16x48xf32> to vector<2x1x48xf32>
    %597 = vector.shape_cast %596 : vector<2x1x48xf32> to vector<2x48xf32>
    %598 = vector.shape_cast %597 : vector<2x48xf32> to vector<2x1x48xf32>
    %599 = vector.shape_cast %188 : vector<32x48xf32> to vector<1x32x48xf32>
    %600 = vector.broadcast %598 : vector<2x1x48xf32> to vector<2x32x48xf32>
    %601 = vector.broadcast %599 : vector<1x32x48xf32> to vector<2x32x48xf32>
    %602 = arith.mulf %600, %601 : vector<2x32x48xf32>
    %603 = math.exp %602 : vector<2x32x48xf32>
    %604 = vector.extract_strided_slice %155 {offsets = [0, 14, 0], sizes = [2, 1, 48], strides = [1, 1, 1]} : vector<2x16x48xf32> to vector<2x1x48xf32>
    %605 = vector.shape_cast %604 : vector<2x1x48xf32> to vector<2x48xf32>
    %606 = arith.mulf %597, %605 : vector<2x48xf32>
    %607 = vector.shape_cast %606 : vector<2x48xf32> to vector<2x1x48xf32>
    %608 = vector.extract_strided_slice %181 {offsets = [0, 14, 0], sizes = [2, 1, 32], strides = [1, 1, 1]} : vector<2x16x32xf32> to vector<2x1x32xf32>
    %609 = vector.shape_cast %608 : vector<2x1x32xf32> to vector<2x32xf32>
    %610 = vector.shape_cast %609 : vector<2x32xf32> to vector<2x32x1xf32>
    %611 = vector.broadcast %607 : vector<2x1x48xf32> to vector<2x32x48xf32>
    %612 = vector.broadcast %610 : vector<2x32x1xf32> to vector<2x32x48xf32>
    %613 = arith.mulf %611, %612 : vector<2x32x48xf32>
    %614 = arith.mulf %603, %586 : vector<2x32x48xf32>
    %615 = arith.addf %614, %613 : vector<2x32x48xf32>
    %616 = vector.extract_strided_slice %183 {offsets = [0, 14, 0], sizes = [2, 1, 32], strides = [1, 1, 1]} : vector<2x16x32xf32> to vector<2x1x32xf32>
    %617 = vector.shape_cast %616 : vector<2x1x32xf32> to vector<2x32xf32>
    %618 = vector.shape_cast %617 : vector<2x32xf32> to vector<2x32x1xf32>
    %619 = vector.broadcast %618 : vector<2x32x1xf32> to vector<2x32x48xf32>
    %620 = arith.mulf %615, %619 : vector<2x32x48xf32>
    %cst_84 = arith.constant dense<0.000000e+00> : vector<2x48xf32>
    %621 = vector.multi_reduction <add>, %620, %cst_84 [1] : vector<2x32x48xf32> to vector<2x48xf32>
    %c0_85 = arith.constant 0 : index
    %c14 = arith.constant 14 : index
    %c0_86 = arith.constant 0 : index
    %622 = vector.load %arg17[%c0_85, %c14, %c0_86] : memref<2x16x48xf32, #tpu.memory_space<vmem>>, vector<2x1x48xf32>
    %623 = vector.shape_cast %622 : vector<2x1x48xf32> to vector<2x48xf32>
    %624 = vector.shape_cast %621 : vector<2x48xf32> to vector<2x1x48xf32>
    tpu.vector_store %arg17[%c0_85, %c14, %c0_86], %624 {strides = array<i32>} : memref<2x16x48xf32, #tpu.memory_space<vmem>>, vector<2x1x48xf32>,
    %625 = vector.extract_strided_slice %179 {offsets = [0, 15, 0], sizes = [2, 1, 48], strides = [1, 1, 1]} : vector<2x16x48xf32> to vector<2x1x48xf32>
    %626 = vector.shape_cast %625 : vector<2x1x48xf32> to vector<2x48xf32>
    %627 = vector.shape_cast %626 : vector<2x48xf32> to vector<2x1x48xf32>
    %628 = vector.shape_cast %188 : vector<32x48xf32> to vector<1x32x48xf32>
    %629 = vector.broadcast %627 : vector<2x1x48xf32> to vector<2x32x48xf32>
    %630 = vector.broadcast %628 : vector<1x32x48xf32> to vector<2x32x48xf32>
    %631 = arith.mulf %629, %630 : vector<2x32x48xf32>
    %632 = math.exp %631 : vector<2x32x48xf32>
    %633 = vector.extract_strided_slice %155 {offsets = [0, 15, 0], sizes = [2, 1, 48], strides = [1, 1, 1]} : vector<2x16x48xf32> to vector<2x1x48xf32>
    %634 = vector.shape_cast %633 : vector<2x1x48xf32> to vector<2x48xf32>
    %635 = arith.mulf %626, %634 : vector<2x48xf32>
    %636 = vector.shape_cast %635 : vector<2x48xf32> to vector<2x1x48xf32>
    %637 = vector.extract_strided_slice %181 {offsets = [0, 15, 0], sizes = [2, 1, 32], strides = [1, 1, 1]} : vector<2x16x32xf32> to vector<2x1x32xf32>
    %638 = vector.shape_cast %637 : vector<2x1x32xf32> to vector<2x32xf32>
    %639 = vector.shape_cast %638 : vector<2x32xf32> to vector<2x32x1xf32>
    %640 = vector.broadcast %636 : vector<2x1x48xf32> to vector<2x32x48xf32>
    %641 = vector.broadcast %639 : vector<2x32x1xf32> to vector<2x32x48xf32>
    %642 = arith.mulf %640, %641 : vector<2x32x48xf32>
    %643 = arith.mulf %632, %615 : vector<2x32x48xf32>
    %644 = arith.addf %643, %642 : vector<2x32x48xf32>
    %645 = vector.extract_strided_slice %183 {offsets = [0, 15, 0], sizes = [2, 1, 32], strides = [1, 1, 1]} : vector<2x16x32xf32> to vector<2x1x32xf32>
    %646 = vector.shape_cast %645 : vector<2x1x32xf32> to vector<2x32xf32>
    %647 = vector.shape_cast %646 : vector<2x32xf32> to vector<2x32x1xf32>
    %648 = vector.broadcast %647 : vector<2x32x1xf32> to vector<2x32x48xf32>
    %649 = arith.mulf %644, %648 : vector<2x32x48xf32>
    %cst_87 = arith.constant dense<0.000000e+00> : vector<2x48xf32>
    %650 = vector.multi_reduction <add>, %649, %cst_87 [1] : vector<2x32x48xf32> to vector<2x48xf32>
    %c0_88 = arith.constant 0 : index
    %c15 = arith.constant 15 : index
    %c0_89 = arith.constant 0 : index
    %651 = vector.load %arg17[%c0_88, %c15, %c0_89] : memref<2x16x48xf32, #tpu.memory_space<vmem>>, vector<2x1x48xf32>
    %652 = vector.shape_cast %651 : vector<2x1x48xf32> to vector<2x48xf32>
    %653 = vector.shape_cast %650 : vector<2x48xf32> to vector<2x1x48xf32>
    tpu.vector_store %arg17[%c0_88, %c15, %c0_89], %653 {strides = array<i32>} : memref<2x16x48xf32, #tpu.memory_space<vmem>>, vector<2x1x48xf32>,
    %c0_90 = arith.constant 0 : index
    %c0_91 = arith.constant 0 : index
    %c0_92 = arith.constant 0 : index
    %654 = vector.load %arg17[%c0_90, %c0_91, %c0_92] : memref<2x16x48xf32, #tpu.memory_space<vmem>>, vector<2x16x48xf32>
    %c0_93 = arith.constant 0 : index
    %c0_94 = arith.constant 0 : index
    %c0_95 = arith.constant 0 : index
    %655 = vector.load %arg10[%c0_93, %c0_94, %c0_95] : memref<1x1x48xf32, #tpu.memory_space<vmem>>, vector<1x1x48xf32>
    %656 = vector.shape_cast %655 : vector<1x1x48xf32> to vector<1x48xf32>
    %657 = vector.shape_cast %656 : vector<1x48xf32> to vector<1x1x48xf32>
    %658 = vector.broadcast %657 : vector<1x1x48xf32> to vector<2x16x48xf32>
    %659 = arith.mulf %658, %155 : vector<2x16x48xf32>
    %660 = arith.addf %654, %659 : vector<2x16x48xf32>
    %cst_96 = arith.constant 5.000000e-01 : f32
    %661 = vector.broadcast %cst_96 : f32 to vector<2x16x48xf32>
    %662 = arith.mulf %661, %25 : vector<2x16x48xf32>
    %663 = math.tanh %662 : vector<2x16x48xf32>
    %cst_97 = arith.constant 1.000000e+00 : f32
    %664 = vector.broadcast %cst_97 : f32 to vector<2x16x48xf32>
    %665 = arith.addf %663, %664 : vector<2x16x48xf32>
    %cst_98 = arith.constant 5.000000e-01 : f32
    %666 = vector.broadcast %cst_98 : f32 to vector<2x16x48xf32>
    %667 = arith.mulf %666, %665 : vector<2x16x48xf32>
    %668 = arith.mulf %25, %667 : vector<2x16x48xf32>
    %669 = arith.mulf %660, %668 : vector<2x16x48xf32>
    %c1_i32 = arith.constant 1 : i32
    %670 = arith.cmpi slt, %arg0, %c1_i32 : i32
    %671 = arith.extui %670 : i1 to i32
    %c0_i32_99 = arith.constant 0 : i32
    %672 = arith.cmpi ne, %671, %c0_i32_99 : i32
    scf.if %672 {
      %676 = vector.shape_cast %669 : vector<2x16x48xf32> to vector<32x48xf32>
      %c0_102 = arith.constant 0 : index
      %c0_103 = arith.constant 0 : index
      %c0_104 = arith.constant 0 : index
      %677 = vector.load %arg11[%c0_102, %c0_103, %c0_104] : memref<1x48x6xf32, #tpu.memory_space<vmem>>, vector<1x48x6xf32>
      %678 = vector.shape_cast %677 : vector<1x48x6xf32> to vector<48x6xf32>
      %cst_105 = arith.constant dense<0.000000e+00> : vector<32x6xf32>
      %679 = tpu.matmul %676, %678, %cst_105 {dimension_numbers = #tpu.dot_dimension_numbers<[1], [0], [0], [1], [0, 0, 1, 1], [], []>} : vector<32x48xf32>, vector<48x6xf32>, vector<32x6xf32> -> vector<32x6xf32>
      %680 = vector.shape_cast %679 : vector<32x6xf32> to vector<2x16x6xf32>
      %681 = arith.addf %3, %680 : vector<2x16x6xf32>
      %c0_106 = arith.constant 0 : index
      %c0_107 = arith.constant 0 : index
      %c0_108 = arith.constant 0 : index
      %682 = vector.load %arg16[%c0_106, %c0_107, %c0_108] : memref<2x16x6xf32, #tpu.memory_space<vmem>>, vector<2x16x6xf32>
      tpu.vector_store %arg16[%c0_106, %c0_107, %c0_108], %681 {strides = array<i32>} : memref<2x16x6xf32, #tpu.memory_space<vmem>>, vector<2x16x6xf32>,
    } else {
    }
    %c1_i32_100 = arith.constant 1 : i32
    %673 = arith.cmpi eq, %arg0, %c1_i32_100 : i32
    %674 = arith.extui %673 : i1 to i32
    %c0_i32_101 = arith.constant 0 : i32
    %675 = arith.cmpi ne, %674, %c0_i32_101 : i32
    scf.if %675 {
      %676 = vector.extract_strided_slice %669 {offsets = [0, 15, 0], sizes = [2, 1, 48], strides = [1, 1, 1]} : vector<2x16x48xf32> to vector<2x1x48xf32>
      %677 = vector.shape_cast %676 : vector<2x1x48xf32> to vector<2x48xf32>
      %678 = arith.mulf %677, %677 : vector<2x48xf32>
      %cst_102 = arith.constant dense<0.000000e+00> : vector<2xf32>
      %679 = vector.multi_reduction <add>, %678, %cst_102 [1] : vector<2x48xf32> to vector<2xf32>
      %680 = vector.shape_cast %679 : vector<2xf32> to vector<2x1xf32>
      %cst_103 = arith.constant 4.800000e+01 : f32
      %681 = vector.broadcast %cst_103 : f32 to vector<2x1xf32>
      %682 = arith.divf %680, %681 : vector<2x1xf32>
      %cst_104 = arith.constant 9.99999974E-6 : f32
      %683 = vector.broadcast %cst_104 : f32 to vector<2x1xf32>
      %684 = arith.addf %682, %683 : vector<2x1xf32>
      %685 = math.rsqrt %684 : vector<2x1xf32>
      %686 = vector.broadcast %685 : vector<2x1xf32> to vector<2x48xf32>
      %687 = arith.mulf %677, %686 : vector<2x48xf32>
      %c0_105 = arith.constant 0 : index
      %c0_106 = arith.constant 0 : index
      %688 = vector.load %arg12[%c0_105, %c0_106] : memref<1x48xf32, #tpu.memory_space<vmem>>, vector<1x48xf32>
      %689 = vector.broadcast %688 : vector<1x48xf32> to vector<2x48xf32>
      %690 = arith.mulf %687, %689 : vector<2x48xf32>
      %c0_107 = arith.constant 0 : index
      %c0_108 = arith.constant 0 : index
      %691 = vector.load %arg13[%c0_107, %c0_108] : memref<48x4xf32, #tpu.memory_space<vmem>>, vector<48x4xf32>
      %cst_109 = arith.constant dense<0.000000e+00> : vector<2x4xf32>
      %692 = tpu.matmul %690, %691, %cst_109 {dimension_numbers = #tpu.dot_dimension_numbers<[1], [0], [0], [1], [0, 0, 1, 1], [], []>} : vector<2x48xf32>, vector<48x4xf32>, vector<2x4xf32> -> vector<2x4xf32>
      %c0_110 = arith.constant 0 : index
      %c0_111 = arith.constant 0 : index
      %693 = vector.load %arg14[%c0_110, %c0_111] : memref<1x4xf32, #tpu.memory_space<vmem>>, vector<1x4xf32>
      %694 = vector.broadcast %693 : vector<1x4xf32> to vector<2x4xf32>
      %695 = arith.addf %692, %694 : vector<2x4xf32>
      %c0_112 = arith.constant 0 : index
      %c0_113 = arith.constant 0 : index
      %696 = vector.load %arg15[%c0_112, %c0_113] : memref<2x4xf32, #tpu.memory_space<vmem>>, vector<2x4xf32>
      tpu.vector_store %arg15[%c0_112, %c0_113], %695 {strides = array<i32>} : memref<2x4xf32, #tpu.memory_space<vmem>>, vector<2x4xf32>,
    } else {
    }
    return
  }
  func.func @transform_0(%arg0: i32) -> (i32, i32, i32) {
    %c0_i32 = arith.constant 0 : i32
    %c0_i32_0 = arith.constant 0 : i32
    %c0_i32_1 = arith.constant 0 : i32
    %c0_i32_2 = arith.constant 0 : i32
    return %c0_i32, %c0_i32_0, %c0_i32_1 : i32, i32, i32
  }
  func.func @transform_1(%arg0: i32) -> (i32, i32, i32) {
    %c0_i32 = arith.constant 0 : i32
    %c0_i32_0 = arith.constant 0 : i32
    %c0_i32_1 = arith.constant 0 : i32
    return %arg0, %c0_i32, %c0_i32_0 : i32, i32, i32
  }
  func.func @transform_2(%arg0: i32) -> (i32, i32, i32) {
    %c0_i32 = arith.constant 0 : i32
    %c0_i32_0 = arith.constant 0 : i32
    %c0_i32_1 = arith.constant 0 : i32
    return %arg0, %c0_i32, %c0_i32_0 : i32, i32, i32
  }
  func.func @transform_3(%arg0: i32) -> (i32, i32, i32) {
    %c0_i32 = arith.constant 0 : i32
    %c0_i32_0 = arith.constant 0 : i32
    %c0_i32_1 = arith.constant 0 : i32
    return %arg0, %c0_i32, %c0_i32_0 : i32, i32, i32
  }
  func.func @transform_4(%arg0: i32) -> (i32, i32, i32) {
    %c0_i32 = arith.constant 0 : i32
    %c0_i32_0 = arith.constant 0 : i32
    %c0_i32_1 = arith.constant 0 : i32
    return %arg0, %c0_i32, %c0_i32_0 : i32, i32, i32
  }
  func.func @transform_5(%arg0: i32) -> (i32, i32, i32) {
    %c0_i32 = arith.constant 0 : i32
    %c0_i32_0 = arith.constant 0 : i32
    %c0_i32_1 = arith.constant 0 : i32
    return %arg0, %c0_i32, %c0_i32_0 : i32, i32, i32
  }
  func.func @transform_6(%arg0: i32) -> (i32, i32, i32) {
    %c0_i32 = arith.constant 0 : i32
    %c0_i32_0 = arith.constant 0 : i32
    %c0_i32_1 = arith.constant 0 : i32
    return %arg0, %c0_i32, %c0_i32_0 : i32, i32, i32
  }
  func.func @transform_7(%arg0: i32) -> (i32, i32, i32) {
    %c0_i32 = arith.constant 0 : i32
    %c0_i32_0 = arith.constant 0 : i32
    %c0_i32_1 = arith.constant 0 : i32
    return %arg0, %c0_i32, %c0_i32_0 : i32, i32, i32
  }
  func.func @transform_8(%arg0: i32) -> (i32, i32, i32) {
    %c0_i32 = arith.constant 0 : i32
    %c0_i32_0 = arith.constant 0 : i32
    %c0_i32_1 = arith.constant 0 : i32
    return %arg0, %c0_i32, %c0_i32_0 : i32, i32, i32
  }
  func.func @transform_9(%arg0: i32) -> (i32, i32, i32) {
    %c0_i32 = arith.constant 0 : i32
    %c0_i32_0 = arith.constant 0 : i32
    %c0_i32_1 = arith.constant 0 : i32
    return %arg0, %c0_i32, %c0_i32_0 : i32, i32, i32
  }
  func.func @transform_10(%arg0: i32) -> (i32, i32, i32) {
    %c0_i32 = arith.constant 0 : i32
    %c0_i32_0 = arith.constant 0 : i32
    %c0_i32_1 = arith.constant 0 : i32
    return %arg0, %c0_i32, %c0_i32_0 : i32, i32, i32
  }
  func.func @transform_11(%arg0: i32) -> (i32, i32) {
    %c0_i32 = arith.constant 0 : i32
    %c0_i32_0 = arith.constant 0 : i32
    %c0_i32_1 = arith.constant 0 : i32
    return %c0_i32, %c0_i32_0 : i32, i32
  }
  func.func @transform_12(%arg0: i32) -> (i32, i32) {
    %c0_i32 = arith.constant 0 : i32
    %c0_i32_0 = arith.constant 0 : i32
    %c0_i32_1 = arith.constant 0 : i32
    return %c0_i32, %c0_i32_0 : i32, i32
  }
  func.func @transform_13(%arg0: i32) -> (i32, i32) {
    %c0_i32 = arith.constant 0 : i32
    %c0_i32_0 = arith.constant 0 : i32
    %c0_i32_1 = arith.constant 0 : i32
    return %c0_i32, %c0_i32_0 : i32, i32
  }
  func.func @transform_14(%arg0: i32) -> (i32, i32) {
    %c0_i32 = arith.constant 0 : i32
    %c0_i32_0 = arith.constant 0 : i32
    %c0_i32_1 = arith.constant 0 : i32
    return %c0_i32, %c0_i32_0 : i32, i32
  }
}

</mosaic_0001>

<bundles_post_ra>
// kernel: _lambda_.1
= control target key start
LH: loop header
LB: loop body
LE: loop exit
PB: predicated region body
PF: predicated region fallthrough
CT: control target
= control target key end

     0   :  { %s9068_s0 = inlined_call_operand.vmem [shape: f32[2,16,6], index: 0, kind: input, shape index: {}]   ;;  %s9069_s1 = inlined_call_operand.vmem [shape: f32[2,1,6], index: 1, kind: input, shape index: {}]   ;;  %s9070_s2 = inlined_call_operand.vmem [shape: f32[2,6,96], index: 2, kind: input, shape index: {}]   ;;  %s9071_s3 = inlined_call_operand.hbm [shape: f32[2,16,48], index: 3, kind: input, shape index: {}]   ;;  %s9072_s4 = inlined_call_operand.hbm [shape: f32[2,1,48], index: 4, kind: input, shape index: {}]   ;;  %s9073_s5 = inlined_call_operand.hbm [shape: f32[2,48,65], index: 5, kind: input, shape index: {}]   ;;  %s9074_s6 = inlined_call_operand.vmem [shape: f32[2,1,48], index: 6, kind: input, shape index: {}]   ;;  %s9075_s7 = inlined_call_operand.vmem [shape: f32[2,1,48], index: 7, kind: input, shape index: {}]   ;;  %s9076_s8 = inlined_call_operand.vmem [shape: f32[2,32,48], index: 8, kind: input, shape index: {}]   ;;  %s9077_s9 = inlined_call_operand.vmem [shape: f32[2,1,48], index: 9, kind: input, shape index: {}]   ;;  %s9078_s10 = inlined_call_operand.hbm [shape: f32[2,48,6], index: 10, kind: input, shape index: {}]   ;;  %s9079_s11 = inlined_call_operand.vmem [shape: f32[1,48], index: 11, kind: input, shape index: {}]   ;;  %s9080_s12 = inlined_call_operand.hbm [shape: f32[48,4], index: 12, kind: input, shape index: {}]   ;;  %s9081_s13 = inlined_call_operand.vmem [shape: f32[1,4], index: 13, kind: input, shape index: {}]   ;;  %s9082_s14 = inlined_call_operand.hbm [shape: f32[2,4], index: 14, kind: output, shape index: {}]  }
   0x1   :  { %9192 = sst [smem:[#allocation120_spill]] %s9071_s3 }
   0x2   :  { %9193 = sst [smem:[#allocation121_spill]] %s9072_s4 }
   0x3   :  { %9194 = sst [smem:[#allocation122_spill]] %s9073_s5 }
   0x4   :  { %9195 = sst [smem:[#allocation123_spill]] %s9079_s11 }
   0x5   :  { %9196 = sst [smem:[#allocation124_spill]] %s9080_s12 }
   0x6   :  { %9197 = sst [smem:[#allocation125_spill]] %s9081_s13 }
   0x7   :  { %9198 = sst [smem:[#allocation126_spill]] %s9082_s14 }
   0x8   :  { %19 = vsyncpa [#allocation5], 0 }
   0x9   :  { %21 = vsyncpa [#allocation5 + $0x1], 0 }
   0xa   :  { %22 = vsyncpa [#allocation8], 0 }
   0xb   :  { %24 = vsyncpa [#allocation8 + $0x1], 0 }
   0xc   :  { %25 = vsyncpa [#allocation11], 0 }
   0xd   :  { %27 = vsyncpa [#allocation11 + $0x1], 0 }
   0xe   :  { %28 = vsyncpa [#allocation6], 0  ;;  %s5731_s29 = smov 0   ;;  %s5733_s30 = smov 0  }
   0xf   :  { %s5735_s15 = smov 0   ;;  %s5737_s16 = smov 0  }
  0x10 LB: > { %9199 = sst [smem:[#allocation19_spill]] %s5637_s15  ;;  %s5750_s17 = sadd.s32 4294967295, %s5641_s16   ;;  %s5641_s16 = sphi %s5737_s16, %s9654_s16   ;;  %s5637_s15 = sphi %s5735_s15, %s9659_s15   ;;  %s5633_s30 = sphi %s5733_s30, %s9658_s30   ;;  %s5629_s29 = sphi %s5731_s29, %s9657_s29  }
  0x11   : > { %p127_p0 = scmp.ne.s32.totalorder %s5633_s30, %s5629_s29  ;;  %p9084_p1 = scmp.eq.s32.totalorder %s5750_s17, 0 }
  0x12   : > { %p4839_p2 = scmp.ge.s32.totalorder %s5641_s16, 1  ;;  %p404_p3 = scmp.lt.s32.totalorder %s5641_s16, 3 }
  0x13   : > { %p5759_p5 = por %p9084_p1, %p127_p0  ;;  %s5643_s20 = smov [#allocation12]  }
  0x14   : > { %p5763_p6 = pnand %p4839_p2, %p404_p3  ;;  %s422_s21 = sshll.u32 %s5643_s20, 4  ;;  %s423_s21 = int_to_ptr.vmem [resolvable:$true] %s422_s21 }
  0x15   : > { %s9200_s18 = scalar_select %p5759_p5, 1, 0 }
  0x16   : > { %s9201_s19 = scalar_select %p5763_p6, 1, 0 }
  0x17   : > { %p5041_p7 = pneg %p5763_p6  ;;  %s5776_s23 = sadd.s32 1, %s5641_s16  }
  0x18   : > { %9203 = sst [smem:[#allocation20_spill]] %s5776_s23  ;;  %s114_s24 = sadd.s32 1, %s5637_s15 }
  0x19   : > { %p5771_p8 = pnand %p5041_p7, %p9084_p1  ;;  %s111_s25 = ssub.s32 %s5641_s16, %s5776_s23 }
  0x1a   : > { %s9204_s12 = sld [smem:[#allocation124_spill]] }
  0x1b   : > { %p5419_p10 = pneg %p5771_p8 }
  0x20   : > { %s5417_s28 = scalar_lea.hbm %s9204_s12, 768 }
  0x21   : > { %p5418_p9 = scmp.ne.s32.totalorder %s9204_s12, %s5417_s28  ;;  %p5424_p13 = scmp.lt.u32.totalorder %s5417_s28, %s9204_s12 }
  0x23   : > { %p5420_p11 = pnand %p5419_p10, %p5418_p9 }
  0x25   : > { %p5421_p12 = pneg %p5420_p11 }
  0x27   : > { %p5426_p0 = pnand %p5424_p13, %p5421_p12 }
  0x29   : > { %5429 = shalt.err (!%p5426_p0)
}
  0x2a   : > { %s5430_s11 = scalar_lea.vmem %s423_s21, 768  ;;  %p5438_p4 = scmp.lt.s32.totalorder %s423_s21, %s423_s21 }
  0x2b   : > { %p5431_p2 = scmp.ne.s32.totalorder %s423_s21, %s5430_s11  ;;  %p5439_p1 = scmp.lt.s32.totalorder %s5430_s11, %s5430_s11 }
  0x2d   : > { %p5433_p3 = pnand %p5431_p2, %p5419_p10  ;;  %p5440_p5 = por %p5439_p1, %p5438_p4 }
  0x2f   : > { %p5434_p7 = pneg %p5433_p3 }
  0x31   : > { %p5441_p6 = pnand %p5440_p5, %p5434_p7 }
  0x33   : > { %5444 = shalt.err (!%p5441_p6)
}
  0x34   : > { %s9087_s26 = smov 128   ;;  %s9089_s13 = smov 8  }
  0x35   : > { %5044 = dma.hbm_to_vmem [thread:$0]  (!%p5771_p8), %s9204_s12, 768, %s423_s21, [#allocation11], %s9087_s26, %s9087_s26, %s9089_s13  }
  0x36   : > { %p112_p1 = scmp.eq.s32.totalorder %s111_s25, 0  ;;  %p121_p4 = scmp.ne.s32.totalorder %s5637_s15, %s5633_s30 }
  0x37   : > { %p122_p5 = scmp.eq.s32.totalorder %s5641_s16, 0  ;;  %p5059_p6 = scmp.lt.s32.totalorder %s5641_s16, 2 }
  0x38   : > { %s5805_s27 = scalar_select %p112_p1, %s5637_s15, %s114_s24  }
  0x39   : > { %p123_p9 = por %p122_p5, %p121_p4  ;;  %s5808_s28 = sand.u32 1, %s5637_s15  }
  0x3a   : > { %9205 = sst [smem:[#allocation21_spill]] %s5805_s27  ;;  %s9091_s22 = sand.u32 1, %s5641_s16  }
  0x3b   : > { %p5811_p10 = pnand %p5059_p6, %p123_p9  ;;  %s4845_s20 = sshll.u32 %s5641_s16, 4 }
  0x3c   : > { %s476_s21 = scalar_lea.vmem [#allocation7], %s5808_s28  ;;  %s9207_s4 = sld [smem:[#allocation121_spill]] }
  0x3d   : > { %s483_s14 = sshll.u32 %s476_s21, 4  ;;  %s5827_s13 = scalar_lea.sflag [#allocation8], %s9091_s22  ;;  %s5822_s14 = int_to_ptr.vmem [resolvable:$true] %s483_s14 }
  0x3e   : > { %p5833_p11 = pneg %p5811_p10 }
  0x42   : > { %s5820_s26 = scalar_lea.hbm %s9207_s4, %s4845_s20  ;;  %s5450_s11 = scalar_lea.hbm %s9207_s4, 32 }
  0x43   : > { %s5445_s12 = scalar_lea.hbm %s5820_s26, 16  ;;  %p5451_p0 = scmp.lt.u32.totalorder %s5820_s26, %s9207_s4 }
  0x44   : > { %p5446_p8 = scmp.ne.s32.totalorder %s5820_s26, %s5445_s12  ;;  %p5452_p2 = scmp.lt.u32.totalorder %s5450_s11, %s5445_s12 }
  0x45   : > { %p5454_p7 = scmp.lt.u32.totalorder %s5445_s12, %s5820_s26 }
  0x46   : > { %p5448_p12 = pnand %p5833_p11, %p5446_p8  ;;  %p5453_p3 = por %p5452_p2, %p5451_p0 }
  0x48   : > { %p5449_p13 = pneg %p5448_p12  ;;  %p5455_p1 = por %p5454_p7, %p5453_p3 }
  0x4a   : > { %p5456_p4 = pnand %p5455_p1, %p5449_p13 }
  0x4c   : > { %5459 = shalt.err (!%p5456_p4)
}
  0x4d   : > { %s5460_s22 = scalar_lea.vmem %s5822_s14, 16  ;;  %s5646_s20 = smov [#allocation7]  }
  0x4e   : > { %p5461_p5 = scmp.ne.s32.totalorder %s5822_s14, %s5460_s22  ;;  %s5465_s25 = sshll.u32 %s5646_s20, 4  ;;  %s5466_s25 = int_to_ptr.vmem [resolvable:$false] %s5465_s25 }
  0x4f   : > { %s5467_s27 = scalar_lea.vmem %s5466_s25, 32  ;;  %p5468_p8 = scmp.lt.s32.totalorder %s5822_s14, %s5466_s25 }
  0x50   : > { %p5463_p6 = pnand %p5461_p5, %p5833_p11  ;;  %p5469_p12 = scmp.lt.s32.totalorder %s5467_s27, %s5460_s22 }
  0x52   : > { %p5464_p9 = pneg %p5463_p6  ;;  %p5470_p0 = por %p5469_p12, %p5468_p8 }
  0x54   : > { %p5471_p2 = pnand %p5470_p0, %p5464_p9 }
  0x56   : > { %5474 = shalt.err (!%p5471_p2)
}
  0x57   : > { %5051 = dma.hbm_to_vmem [thread:$0]  (!%p5811_p10), %s5820_s26, 16, %s5822_s14, %s5827_s13  }
  0x58   : > { %s4842_s12 = sshll.u32 %s5808_s28, 4  ;;  %s4882_s24 = sshll.u32 %s5641_s16, 8 }
  0x59   : > { %s9209_s3 = sld [smem:[#allocation120_spill]]  ;;  %s456_s25 = scalar_lea.vmem [#allocation4], %s4842_s12 }
  0x5a   : > { %s463_s27 = sshll.u32 %s456_s25, 4  ;;  %s5021_s4 = smul.u32 768, %s5641_s16  ;;  %s5864_s27 = int_to_ptr.vmem [resolvable:$true] %s463_s27 }
  0x5b   : > { %s453_s15 = scalar_lea.sflag [#allocation5], %s5808_s28 }
  0x5f   : > { %s5862_s22 = scalar_lea.hbm %s9209_s3, %s4882_s24  ;;  %s5480_s24 = scalar_lea.hbm %s9209_s3, 512 }
  0x60   : > { %s5475_s23 = scalar_lea.hbm %s5862_s22, 256  ;;  %p5481_p1 = scmp.lt.u32.totalorder %s5862_s22, %s9209_s3 }
  0x61   : > { %p5476_p13 = scmp.ne.s32.totalorder %s5862_s22, %s5475_s23  ;;  %p5482_p4 = scmp.lt.u32.totalorder %s5480_s24, %s5475_s23 }
  0x62   : > { %p5484_p6 = scmp.lt.u32.totalorder %s5475_s23, %s5862_s22 }
  0x63   : > { %p5478_p3 = pnand %p5476_p13, %p5833_p11  ;;  %p5483_p5 = por %p5482_p4, %p5481_p1 }
  0x65   : > { %p5479_p7 = pneg %p5478_p3  ;;  %p5485_p9 = por %p5484_p6, %p5483_p5 }
  0x67   : > { %p5486_p8 = pnand %p5485_p9, %p5479_p7 }
  0x69   : > { %5489 = shalt.err (!%p5486_p8)
}
  0x6a   : > { %s5490_s12 = scalar_lea.vmem %s5864_s27, 256  ;;  %s5647_s25 = smov [#allocation4]  }
  0x6b   : > { %p5491_p12 = scmp.ne.s32.totalorder %s5864_s27, %s5490_s12  ;;  %s5495_s26 = sshll.u32 %s5647_s25, 4  ;;  %s5496_s26 = int_to_ptr.vmem [resolvable:$false] %s5495_s26 }
  0x6c   : > { %s5497_s14 = scalar_lea.vmem %s5496_s26, 512  ;;  %p5498_p13 = scmp.lt.s32.totalorder %s5864_s27, %s5496_s26 }
  0x6d   : > { %p5493_p0 = pnand %p5491_p12, %p5833_p11  ;;  %p5499_p3 = scmp.lt.s32.totalorder %s5497_s14, %s5490_s12 }
  0x6f   : > { %p5494_p2 = pneg %p5493_p0  ;;  %p5500_p1 = por %p5499_p3, %p5498_p13 }
  0x71   : > { %p5501_p4 = pnand %p5500_p1, %p5494_p2 }
  0x73   : > { %5504 = shalt.err (!%p5501_p4)
}
  0x74   : > { %s9210_s23 = smov 8   ;;  %s9211_s24 = smov 128  }
  0x75   : > { %5048 = dma.hbm_to_vmem [thread:$0]  (!%p5811_p10), %s5862_s22, 256, %s5864_s27, %s453_s15, %s9211_s24, %s9211_s24, %s9210_s23  }
  0x76   : > { %s9212_s5 = sld [smem:[#allocation122_spill]]  ;;  %s9213_s25 = smul.u32 48, %s5808_s28 }
  0x78   : > { %s494_s26 = scalar_lea.vmem [#allocation9], %s9213_s25 }
  0x79   : > { %s501_s14 = sshll.u32 %s494_s26, 4  ;;  %s5903_s14 = int_to_ptr.vmem [resolvable:$true] %s501_s14 }
  0x7c   : > { %s5899_s12 = scalar_lea.hbm %s9212_s5, %s5021_s4  ;;  %s5510_s27 = scalar_lea.hbm %s9212_s5, 1536 }
  0x7d   : > { %s5505_s3 = scalar_lea.hbm %s5899_s12, 768  ;;  %p5511_p9 = scmp.lt.u32.totalorder %s5899_s12, %s9212_s5 }
  0x7e   : > { %p5506_p7 = scmp.ne.s32.totalorder %s5899_s12, %s5505_s3  ;;  %p5512_p8 = scmp.lt.u32.totalorder %s5510_s27, %s5505_s3 }
  0x7f   : > { %p5514_p0 = scmp.lt.u32.totalorder %s5505_s3, %s5899_s12 }
  0x80   : > { %p5508_p5 = pnand %p5506_p7, %p5833_p11  ;;  %p5513_p12 = por %p5512_p8, %p5511_p9 }
  0x82   : > { %p5509_p6 = pneg %p5508_p5  ;;  %p5515_p2 = por %p5514_p0, %p5513_p12 }
  0x84   : > { %p5516_p13 = pnand %p5515_p2, %p5509_p6 }
  0x86   : > { %5519 = shalt.err (!%p5516_p13)
}
  0x87   : > { %s5520_s25 = scalar_lea.vmem %s5903_s14, 768  ;;  %s5648_s26 = smov [#allocation9]  }
  0x88   : > { %p5521_p3 = scmp.ne.s32.totalorder %s5903_s14, %s5520_s25  ;;  %s5525_s15 = sshll.u32 %s5648_s26, 4  ;;  %s5526_s15 = int_to_ptr.vmem [resolvable:$false] %s5525_s15 }
  0x89   : > { %s5527_s22 = scalar_lea.vmem %s5526_s15, 1536  ;;  %p5528_p7 = scmp.lt.s32.totalorder %s5903_s14, %s5526_s15 }
  0x8a   : > { %p5523_p1 = pnand %p5521_p3, %p5833_p11  ;;  %p5529_p5 = scmp.lt.s32.totalorder %s5527_s22, %s5520_s25 }
  0x8c   : > { %p5524_p4 = pneg %p5523_p1  ;;  %p5530_p9 = por %p5529_p5, %p5528_p7 }
  0x8e   : > { %p5531_p8 = pnand %p5530_p9, %p5524_p4 }
  0x90   : > { %5534 = shalt.err (!%p5531_p8)
}
  0x91   : > { %5054 = dma.hbm_to_vmem [thread:$0]  (!%p5811_p10), %s5899_s12, 768, %s5903_s14, %s5827_s13, %s9211_s24, %s9211_s24, %s9210_s23  }
  0x92   : > { %s5935_s11 = scalar_lea.hbm %s9078_s10, %s5021_s4  ;;  %s9214_s20 = smul.u32 48, %s5808_s28 }
  0x93   : > { %s9215_s15 = sand.u32 1, %s5641_s16   ;;  %s5535_s5 = scalar_lea.hbm %s5935_s11, 768 }
  0x94   : > { %s541_s25 = scalar_lea.vmem [#allocation10], %s9214_s20  ;;  %s5943_s22 = scalar_lea.sflag [#allocation11], %s9215_s15 }
  0x95   : > { %s548_s26 = sshll.u32 %s541_s25, 4  ;;  %p5536_p6 = scmp.ne.s32.totalorder %s5935_s11, %s5535_s5  ;;  %s5939_s26 = int_to_ptr.vmem [resolvable:$true] %s548_s26 }
  0x96   : > { %s5540_s28 = scalar_lea.hbm %s9078_s10, 1536  ;;  %p5541_p2 = scmp.lt.u32.totalorder %s5935_s11, %s9078_s10 }
  0x97   : > { %p5538_p12 = pnand %p5536_p6, %p5833_p11  ;;  %p5542_p13 = scmp.lt.u32.totalorder %s5540_s28, %s5535_s5 }
  0x98   : > { %p5544_p1 = scmp.lt.u32.totalorder %s5535_s5, %s5935_s11 }
  0x99   : > { %p5539_p0 = pneg %p5538_p12  ;;  %p5543_p3 = por %p5542_p13, %p5541_p2 }
  0x9b   : > { %p5545_p4 = por %p5544_p1, %p5543_p3 }
  0x9d   : > { %p5546_p7 = pnand %p5545_p4, %p5539_p0 }
  0x9f   : > { %5549 = shalt.err (!%p5546_p7)
}
  0xa0   : > { %s5550_s16 = scalar_lea.vmem %s5939_s26, 768  ;;  %s5649_s3 = smov [#allocation10]  }
  0xa1   : > { %p5551_p5 = scmp.ne.s32.totalorder %s5939_s26, %s5550_s16  ;;  %s5555_s27 = sshll.u32 %s5649_s3, 4  ;;  %s5556_s27 = int_to_ptr.vmem [resolvable:$false] %s5555_s27 }
  0xa2   : > { %s5557_s20 = scalar_lea.vmem %s5556_s27, 1536  ;;  %p5558_p6 = scmp.lt.s32.totalorder %s5939_s26, %s5556_s27 }
  0xa3   : > { %p5553_p9 = pnand %p5551_p5, %p5833_p11  ;;  %p5559_p12 = scmp.lt.s32.totalorder %s5557_s20, %s5550_s16 }
  0xa5   : > { %p5554_p8 = pneg %p5553_p9  ;;  %p5560_p2 = por %p5559_p12, %p5558_p6 }
  0xa7   : > { %p5561_p13 = pnand %p5560_p2, %p5554_p8 }
  0xa9   : > { %5564 = shalt.err (!%p5561_p13)
}
  0xaa   : > { %5057 = dma.hbm_to_vmem [thread:$0]  (!%p5811_p10), %s5935_s11, 768, %s5939_s26, %s5943_s22, %s9211_s24, %s9211_s24, %s9210_s23  }
  0xab   : > { %p9216_p11 = scmp.ne.s32.totalorder %s9201_s19, 0 }
  0xad   : > { %560 = sbr.rel (%p9216_p11) target bundleno = 2191 (0x88f), region = 76 }
  0xb4   : > { %s5973_s5 = sand.u32 1, %s5633_s30   ;;  %p9217_p0 = scmp.ne.s32.totalorder %s9200_s18, 0 }
  0xb5   : > { %s4849_s21 = sshll.u32 %s5973_s5, 4  ;;  %s563_s25 = scalar_lea.sflag [#allocation5], %s5973_s5 }
  0xb6   : > { %s5977_s15 = scalar_lea.vmem [#allocation4], %s4849_s21 }
  0xb7   : > { %5608 = dma.done.wait (%p9217_p0), %s563_s25, 256  }
  0xb8   : > { %5610 = vsyncadd (%p9217_p0), %s563_s25, 4294967040  ;;  %s571_s19 = sand.u32 1, %s5750_s17  }
  0xb9   : > { %s572_s29 = scalar_lea.sflag [#allocation8], %s571_s19 }
  0xba   : > { %5612 = dma.done.wait (%p9217_p0), %s572_s29, 784  }
  0xbb   : > { %5614 = vsyncadd (%p9217_p0), %s572_s29, 4294966512  ;;  %s5024_s24 = smul.u32 48, %s5973_s5  ;;  %s589_s26 = scalar_lea.sflag [#allocation11], %s571_s19 }
  0xbd   : > { %s5990_s11 = scalar_lea.vmem [#allocation9], %s5024_s24  ;;  %s5992_s22 = scalar_lea.vmem [#allocation10], %s5024_s24 }
  0xbe   : > { %5616 = dma.done.wait (%p9217_p0), %s589_s26, 768  }
  0xbf   : > { %5618 = vsyncadd (%p9217_p0), %s589_s26, 4294966528  ;;  %p9218_p10 = scmp.eq.s32.totalorder %s5750_s17, 0 }
  0xc1   : > { %5620 = dma.done.wait (%p9218_p10), [#allocation11], 768   ;;  %p9219_p3 = pmov %p9218_p10 }
  0xc2   : > { %p671_p1 = scmp.lt.s32.totalorder %s5750_s17, 1  ;;  %p9220_p4 = scmp.ne.s32.totalorder %s5750_s17, 0 }
  0xc3   : > { %5622 = vsyncadd (%p9219_p3), [#allocation11], 4294966528  ;;  %v696_v0 = vld [vmem:[%s9068_s0] sm:$0xff] (!%p9220_p4)  ;;  %vm700_vm0 = vcmask (!%p9220_p4), 48128   ;;  %v697_v1 = vld [vmem:[%s9068_s0 + $0x8] sm:$0xff] (!%p9220_p4) }
  0xc4   : > { %s6004_s13 = scalar_select %p671_p1, %s5750_s17, 1 }
  0xc5   : > { %695 = sbr.rel (%p9220_p4) target bundleno = 204 (0xcc), region = 100  ;;  %v698_v2 = vld [vmem:[%s9068_s0 + $0x10] sm:$0xff] (!%p9220_p4)  ;;  %701 = vst.msk [vmem:[#allocation2] sm:$0xff] (!%p9220_p4), %vm700_vm0, %v696_v0  ;;  %702 = vst.msk [vmem:[#allocation2 + $0x8] sm:$0xff] (!%p9220_p4), %vm700_vm0, %v697_v1  ;;  %v699_v3 = vld [vmem:[%s9068_s0 + $0x18] sm:$0xff] (!%p9220_p4) }
  0xc6   : > { %s4851_s12 = sshll.u32 %s6004_s13, 3  ;;  %s6018_s21 = scalar_lea.vmem %s9074_s6, %s6004_s13  ;;  %703 = vst.msk [vmem:[#allocation2 + $0x10] sm:$0xff] (!%p9220_p4), %vm700_vm0, %v698_v2  ;;  %704 = vst.msk [vmem:[#allocation2 + $0x18] sm:$0xff] (!%p9220_p4), %vm700_vm0, %v699_v3 }
  0xc7   : > { %s677_s3 = scalar_lea.vmem %s9070_s2, %s4851_s12  ;;  %s6024_s29 = scalar_lea.vmem %s9075_s7, %s6004_s13 }
  0xc8   : > { %s4883_s24 = sshll.u32 %s6004_s13, 5  ;;  %s6036_s12 = scalar_lea.vmem %s9077_s9, %s6004_s13 }
  0xc9   : > { %s6030_s28 = scalar_lea.vmem %s9076_s8, %s4883_s24 }
  0xcc PF: > { %v6052_v4 = vld [vmem:[#allocation2] sm:$0xff]  ;;  %vm714_vm1 = vcmask 48128   ;;  %v6054_v5 = vld [vmem:[#allocation2 + $0x8] sm:$0xff]  ;;  %v754_v10 = vld [vmem:[%s677_s3] sm:$0x3f]  ;;  %vm767_vm2 = vcmask 1045504   ;;  %s9225_s26 = scalar_lea.vmem %s9069_s1, %s6004_s13  ;;  %v877_v51 = vlaneseq }
  0xcd   : > { %9221 = vst [vmem:[#allocation22_spill] sm:$0xff] %v6052_v4  ;;  %9222 = vst [vmem:[#allocation23_spill] sm:$0xff] %v6054_v5  ;;  %v710_v6 = vmul.f32 %v6052_v4, %v6052_v4  ;;  %v711_v7 = vmul.f32 %v6054_v5, %v6054_v5  ;;  %4916 = vmatprep.subr.msk.mxu0 %vm767_vm2, %v754_v10  ;;  %v6064_v11 = vld [vmem:[#allocation2 + $0x10] sm:$0xff]  ;;  %v6066_v12 = vld [vmem:[#allocation2 + $0x18] sm:$0xff]  ;;  %v5650_v1 = vmov 0   ;;  %vm862_vm3 = vcmask 1046528  }
  0xce   : > { %4917 = vmatpush3.msk.msra.mxu0 %vm767_vm2, %v754_v10  ;;  %9223 = vst [vmem:[#allocation24_spill] sm:$0xff] %v6064_v11  ;;  %9224 = vst [vmem:[#allocation25_spill] sm:$0xff] %v6066_v12  ;;  %v712_v13 = vmul.f32 %v6064_v11, %v6064_v11  ;;  %v713_v14 = vmul.f32 %v6066_v12, %v6066_v12  ;;  %v4855_v24 = vld [vmem:[%s9225_s26] ss:$0 sm:$0xff]  ;;  %v1390_v42 = vld [vmem:[%s5990_s11] sm:$0xff]  ;;  %v878_v52 = vshrl.u32 %v877_v51, 7  ;;  %5104 = vset.pattern.permute.xlu1 %v5650_v1 }
  0xcf   : > { %v715_v8 = vsel %vm714_vm1, %v710_v6, 0.0  ;;  %v718_v9 = vsel %vm714_vm1, %v711_v7, 0.0  ;;  %v1391_v43 = vld [vmem:[%s5990_s11 + $0x8] sm:$0xff]  ;;  %v1392_v44 = vld [vmem:[%s5990_s11 + $0x10] sm:$0xff]  ;;  %v1393_v46 = vld [vmem:[%s5990_s11 + $0x18] sm:$0xff]  ;;  %5105 = vset.pattern.permute.xlu0 %v5650_v1  ;;  %vm963_vm4 = vcmask 1044480  }
  0xd0   : > { %716 = vadd.xlane.f32.xlu0 %v715_v8  ;;  %v721_v15 = vsel %vm714_vm1, %v712_v13, 0.0  ;;  %v724_v16 = vsel %vm714_vm1, %v713_v14, 0.0  ;;  %v4975_v45 = vpack.c.bf16 %v1391_v43, %v1390_v42  ;;  %v4979_v47 = vpack.c.bf16 %v1393_v46, %v1392_v44  ;;  %v1394_v48 = vld [vmem:[%s5990_s11 + $0x20] sm:$0xff]  ;;  %v1395_v49 = vld [vmem:[%s5990_s11 + $0x28] sm:$0xff]  ;;  %p4869_p7 = scmp.ge.s32.totalorder %s5750_s17, 1 }
  0xd1   : > { %722 = vadd.xlane.f32.xlu1 %v721_v15  ;;  %v4983_v50 = vpack.c.bf16 %v1395_v49, %v1394_v48  ;;  %v856_v53 = vld [vmem:[%s5977_s15] sm:$0xff]  ;;  %v6094_v54 = vsub.s32 1, %v878_v52  ;;  %v6096_v55 = vsub.s32 2, %v878_v52  ;;  %v6098_v56 = vsub.s32 3, %v878_v52  ;;  %v857_v8 = vld [vmem:[%s5977_s15 + $0x8] sm:$0xff]  ;;  %s9241_s15 = scalar_lea.vmem [#allocation7], %s5973_s5 }
  0xd2   : > { %4976 = vmatprep.subr.bf16.mxu0 %v4975_v45  ;;  %5008 = vmatprep.subr.bf16.mxu1 %v4975_v45  ;;  %v6100_v57 = vsub.s32 4, %v878_v52  ;;  %v6102_v58 = vsub.s32 5, %v878_v52  ;;  %v6110_v61 = vsub.s32 6, %v878_v52  ;;  %v6118_v0 = vsub.s32 7, %v878_v52  ;;  %s5651_s5 = smov 80  }
  0xd3   : > { %5011 = vmatpush3.bf16.msra.mxu1 %v4975_v45  ;;  %9226 = vst [vmem:[#allocation26_spill] sm:$0xff] %v6094_v54  ;;  %9227 = vst [vmem:[#allocation27_spill] sm:$0xff] %v6096_v55  ;;  %v6105_v59 = vrot.slane %v856_v53, %v6094_v54  ;;  %v6108_v60 = vrot.slane %v856_v53, %v6096_v55  ;;  %v6113_v62 = vrot.slane %v856_v53, %v6098_v56  ;;  %vm995_vm5 = vcmask 1043456  }
  0xd4   : > { %719 = vadd.xlane.f32.xlu0 %v718_v9  ;;  %5009 = vmatprep.subr.bf16.mxu1 %v4979_v47  ;;  %9228 = vst [vmem:[#allocation28_spill] sm:$0xff] %v6098_v56  ;;  %9229 = vst [vmem:[#allocation29_spill] sm:$0xff] %v6100_v57  ;;  %v6116_v63 = vrot.slane %v856_v53, %v6100_v57  ;;  %v6120_v2 = vsub.s32 0, %v878_v52  ;;  %v6123_v3 = vrot.slane %v856_v53, %v6102_v58  ;;  %vm1027_vm6 = vcmask 1042432  }
  0xd5   : > { %725 = vadd.xlane.f32.xlu1 %v724_v16  ;;  %9230 = vst [vmem:[#allocation30_spill] sm:$0xff] %v6102_v58  ;;  %9231 = vst [vmem:[#allocation31_spill] sm:$0xff] %v6110_v61  ;;  %v6126_v6 = vrot.slane %v856_v53, %v6110_v61  ;;  %v6129_v7 = vrot.slane %v856_v53, %v6118_v0  ;;  %v6133_v9 = vmul.f32 0.0, %v6105_v59  ;;  %v6136_v10 = vmul.f32 0.0, %v6108_v60 }
  0xd6   : > { %9232 = vst [vmem:[#allocation32_spill] sm:$0xff] %v6118_v0  ;;  %9233 = vst [vmem:[#allocation33_spill] sm:$0xff] %v6120_v2  ;;  %v6139_v13 = vmul.f32 0.0, %v6113_v62  ;;  %v6142_v14 = vmul.f32 0.0, %v6116_v63  ;;  %v6145_v15 = vrot.slane %v856_v53, %v6120_v2  ;;  %v6148_v16 = vmul.f32 0.0, %v6123_v3 }
  0xd7   : > { %5012 = vmatpush3.bf16.msra.mxu1 %v4979_v47  ;;  %v6206_v42 = vrot.slane %v857_v8, %v6110_v61  ;;  %vm1059_vm7 = vcmask 1041408   ;;  %vm1091_vm8 = vcmask 1040384   ;;  %vm1396_vm9 = vcmask 392192  }
  0xd8   : > { %5010 = vmatprep.subr.bf16.mxu1 %v4983_v50  ;;  %vm1756_vm12 = vcmask 385024  }
  0xdb   : > { %5013 = vmatpush3.bf16.msra.mxu1 %v4983_v50 }
 0x15d   : > { %v717_v17 = vpop.xlane.xlu0 %716 }
 0x15e   : > { %v728_v18 = vmul.f32 0.16666667, %v717_v17  ;;  %v723_v30 = vpop.xlane.xlu1 %722  ;;  %v6151_v17 = vmul.f32 0.0, %v6126_v6 }
 0x15f   : > { %v730_v31 = vmul.f32 0.16666667, %v723_v30 }
 0x160   : > { %v732_v19 = vadd.f32 1e-05, %v728_v18  ;;  %v6154_v18 = vrot.slane %v857_v8, %v6094_v54 }
 0x161   : > { %v720_v20 = vpop.xlane.xlu0 %719  ;;  %v734_v32 = vadd.f32 1e-05, %v730_v31 }
 0x162   : > { %5106 = vrsqrt.f32 %v732_v19  ;;  %v729_v21 = vmul.f32 0.16666667, %v720_v20  ;;  %v726_v33 = vpop.xlane.xlu1 %725  ;;  %v6157_v19 = vmul.f32 0.0, %v6129_v7 }
 0x163   : > { %v731_v34 = vmul.f32 0.16666667, %v726_v33  ;;  %v6181_v33 = vrot.slane %v857_v8, %v6096_v55 }
 0x164   : > { %v733_v22 = vadd.f32 1e-05, %v729_v21  ;;  %v6162_v21 = vmul.f32 0.0, %v6145_v15 }
 0x165   : > { %v735_v35 = vadd.f32 1e-05, %v731_v34  ;;  %v6184_v34 = vrot.slane %v857_v8, %v6098_v56 }
 0x166   : > { %5108 = vrsqrt.f32 %v733_v22  ;;  %v9096_v22 = vrot.slane %v6133_v9, 1 }
 0x167   : > { %5110 = vrsqrt.f32 %v734_v32  ;;  %v6178_v32 = vrot.slane %v857_v8, %v6120_v2 }
 0x168   : > { %5112 = vrsqrt.f32 %v735_v35 }
 0x16c   : > { %v5107_v23 = vpop.eup %5106 }
 0x16d   : > { %v740_v25 = vmul.f32 %v5107_v23, %v6052_v4  ;;  %v9095_v23 = vrot.slane %v6136_v10, 2 }
 0x16f   : > { %v750_v26 = vmul.f32 %v4855_v24, %v740_v25 }
 0x170   : > { %v5109_v27 = vpop.eup %5108 }
 0x171   : > { %4918 = vmatprep.mubr.msk.f32.mxu0 %vm714_vm1, %v750_v26  ;;  %v741_v28 = vmul.f32 %v5109_v27, %v6054_v5  ;;  %v5111_v36 = vpop.eup %5110  ;;  %v6227_v26 = vrot.slane %v857_v8, %v6118_v0 }
 0x172   : > { %v742_v37 = vmul.f32 %v5111_v36, %v6064_v11  ;;  %v5113_v39 = vpop.eup %5112 }
 0x173   : > { %v751_v29 = vmul.f32 %v4855_v24, %v741_v28  ;;  %v743_v40 = vmul.f32 %v5113_v39, %v6066_v12 }
 0x174   : > { %v752_v38 = vmul.f32 %v4855_v24, %v742_v37  ;;  %v6194_v37 = vrot.slane %v857_v8, %v6100_v57 }
 0x175   : > { %4919 = vmatmul.mubr.msk.f32.vlgmr.msra.gmra.mrb[0].mxu0 %vm714_vm1, %v751_v29  ;;  %v753_v41 = vmul.f32 %v4855_v24, %v743_v40 }
 0x176   : > { %4921 = vmatprep.mubr.msk.f32.mxu0 %vm714_vm1, %v752_v38  ;;  %4978 = vmatpush3.bf16.msra.mxu0 %v4975_v45  ;;  %v6197_v38 = vrot.slane %v857_v8, %v6102_v58 }
 0x177   : > { %4980 = vmatprep.subr.bf16.mxu0 %v4979_v47 }
 0x179   : > { %4922 = vmatmul.mubr.msk.f32.gmra.mrb[2].mxu0 %vm714_vm1, %v753_v41 }
 0x17a   : > { %4982 = vmatpush3.bf16.msra.mxu0 %v4979_v47 }
 0x17b   : > { %4984 = vmatprep.subr.bf16.mxu0 %v4983_v50 }
 0x17e   : > { %4986 = vmatpush3.bf16.msra.mxu0 %v4983_v50 }
 0x248   : > { %v6159_v20 = vpop.f32.mrb[0].mxu0 }
 0x249   : > { %9234 = vst [vmem:[#allocation34_spill] sm:$0xff] %v6159_v20  ;;  %v6167_v24 = vrot.slane %v6159_v20, 1  ;;  %v6169_v25 = vpop.f32.mrb[1].mxu0  ;;  %v9252_v20 = vrot.slane %v6157_v19, 7 }
 0x24a   : > { %9235 = vst [vmem:[#allocation35_spill] sm:$0xff] %v6169_v25  ;;  %v863_v28 = vrot.slane %v6169_v25, 1 }
 0x24c   : > { %v6188_v35 = vsel %vm862_vm3, %v863_v28, %v6167_v24  ;;  %v6191_v36 = vsel %vm862_vm3, 0.0, %v863_v28 }
 0x24d   : > { %v882_v39 = vmul.f32 %v6145_v15, %v6191_v36  ;;  %v892_v40 = vmul.f32 %v6105_v59, %v6191_v36  ;;  %v893_v41 = vmul.f32 %v6105_v59, %v6188_v35  ;;  %v923_v43 = vmul.f32 %v6108_v60, %v6191_v36 }
 0x24e   : > { %v924_v44 = vmul.f32 %v6108_v60, %v6188_v35  ;;  %v954_v45 = vmul.f32 %v6113_v62, %v6191_v36  ;;  %v955_v46 = vmul.f32 %v6113_v62, %v6188_v35  ;;  %v986_v49 = vmul.f32 %v6116_v63, %v6191_v36 }
 0x24f   : > { %v902_v47 = vrot.slane %v892_v40, 1  ;;  %v904_v48 = vrot.slane %v893_v41, 1  ;;  %v987_v50 = vmul.f32 %v6116_v63, %v6188_v35  ;;  %v933_v51 = vrot.slane %v923_v43, 2 }
 0x250   : > { %v935_v52 = vrot.slane %v924_v44, 2  ;;  %v965_v53 = vrot.slane %v954_v45, 3  ;;  %v967_v1 = vrot.slane %v955_v46, 3  ;;  %v997_v30 = vrot.slane %v986_v49, 4 }
 0x251   : > { %v903_v28 = vsel %vm862_vm3, %v9096_v22, %v902_v47  ;;  %v905_v31 = vsel %vm862_vm3, %v902_v47, %v904_v48  ;;  %v999_v29 = vrot.slane %v987_v50, 4  ;;  %v1127_v43 = vmul.f32 %v6154_v18, %v6167_v24 }
 0x252   : > { %v914_v40 = vadd.f32 %v903_v28, %v6162_v21  ;;  %v915_v41 = vadd.f32 %v905_v31, %v882_v39  ;;  %v936_v27 = vsel %vm767_vm2, %v933_v51, %v935_v52  ;;  %v934_v44 = vsel %vm767_vm2, %v9095_v23, %v933_v51 }
 0x253   : > { %v968_v45 = vsel %vm963_vm4, %v965_v53, %v967_v1  ;;  %v1000_v46 = vsel %vm995_vm5, %v997_v30, %v999_v29  ;;  %v1018_v31 = vmul.f32 %v6123_v3, %v6191_v36  ;;  %v1019_v8 = vmul.f32 %v6123_v3, %v6188_v35 }
 0x254   : > { %v945_v47 = vadd.f32 %v934_v44, %v914_v40  ;;  %v946_v48 = vadd.f32 %v936_v27, %v915_v41  ;;  %v9236_v39 = vrot.slane %v6139_v13, 3  ;;  %v9237_v50 = vrot.slane %v6142_v14, 4 }
 0x255   : > { %v1050_v52 = vmul.f32 %v6126_v6, %v6191_v36  ;;  %v1051_v27 = vmul.f32 %v6126_v6, %v6188_v35  ;;  %v1029_v28 = vrot.slane %v1018_v31, 5  ;;  %v1082_v40 = vmul.f32 %v6129_v7, %v6191_v36 }
 0x256   : > { %v966_v49 = vsel %vm963_vm4, %v9236_v39, %v965_v53  ;;  %v998_v51 = vsel %vm995_vm5, %v9237_v50, %v997_v30  ;;  %v978_v1 = vadd.f32 %v968_v45, %v946_v48  ;;  %v1031_v41 = vrot.slane %v1019_v8, 5 }
 0x257   : > { %v977_v29 = vadd.f32 %v966_v49, %v945_v47  ;;  %v1061_v44 = vrot.slane %v1050_v52, 6  ;;  %v1063_v23 = vrot.slane %v1051_v27, 6  ;;  %v1083_v53 = vmul.f32 %v6129_v7, %v6188_v35 }
 0x258   : > { %v1010_v30 = vadd.f32 %v1000_v46, %v978_v1  ;;  %v1161_v50 = vmul.f32 %v6181_v33, %v6167_v24  ;;  %v1195_v22 = vmul.f32 %v6184_v34, %v6167_v24  ;;  %v9238_v45 = vrot.slane %v6148_v16, 5 }
 0x259   : > { %v1009_v39 = vadd.f32 %v998_v51, %v977_v29  ;;  %v1032_v48 = vsel %vm1027_vm6, %v1029_v28, %v1031_v41  ;;  %v1064_v31 = vsel %vm1059_vm7, %v1061_v44, %v1063_v23  ;;  %v1229_v8 = vmul.f32 %v6194_v37, %v6167_v24 }
 0x25a   : > { %v1030_v47 = vsel %vm1027_vm6, %v9238_v45, %v1029_v28  ;;  %v1140_v49 = vrot.slane %v1127_v43, 1  ;;  %v1042_v46 = vadd.f32 %v1032_v48, %v1010_v30  ;;  %v1093_v52 = vrot.slane %v1082_v40, 7 }
 0x25b   : > { %v1041_v51 = vadd.f32 %v1030_v47, %v1009_v39  ;;  %v9239_v27 = vrot.slane %v6151_v17, 6  ;;  %v1095_v1 = vrot.slane %v1083_v53, 7  ;;  %v1113_v11 = vmul.f32 %v6178_v32, %v6191_v36 }
 0x25c   : > { %v1114_v28 = vmul.f32 %v6178_v32, %v6188_v35  ;;  %v1074_v23 = vadd.f32 %v1064_v31, %v1042_v46  ;;  %v9240_v45 = vrot.slane %v6157_v19, 7  ;;  %v1125_v40 = vmul.f32 %v6154_v18, %v6191_v36 }
 0x25d   : > { %v1062_v29 = vsel %vm1059_vm7, %v9239_v27, %v1061_v44  ;;  %v1096_v39 = vsel %vm1091_vm8, %v1093_v52, %v1095_v1  ;;  %v1126_v44 = vmul.f32 %v6154_v18, %v6188_v35  ;;  %v1159_v53 = vmul.f32 %v6181_v33, %v6191_v36 }
 0x25e   : > { %v1073_v41 = vadd.f32 %v1062_v29, %v1041_v51  ;;  %v1094_v43 = vsel %vm1091_vm8, %v9240_v45, %v1093_v52  ;;  %v1160_v30 = vmul.f32 %v6181_v33, %v6188_v35  ;;  %v1106_v48 = vadd.f32 %v1096_v39, %v1074_v23 }
 0x25f   : > { %v1137_v31 = vrot.slane %v1125_v40, 1  ;;  %v1174_v51 = vrot.slane %v1161_v50, 2  ;;  %v1138_v46 = vrot.slane %v1126_v44, 1  ;;  %v1171_v27 = vrot.slane %v1159_v53, 2 }
 0x260   : > { %v1105_v47 = vadd.f32 %v1094_v43, %v1073_v41  ;;  %v1172_v29 = vrot.slane %v1160_v30, 2  ;;  %v1193_v45 = vmul.f32 %v6184_v34, %v6191_v36  ;;  %v1118_v1 = vadd.f32 %v1114_v28, %v1106_v48 }
 0x261   : > { %v1194_v4 = vmul.f32 %v6184_v34, %v6188_v35  ;;  %v1208_v12 = vrot.slane %v1195_v22, 3  ;;  %v1139_v5 = vsel %vm862_vm3, %v1137_v31, %v1138_v46  ;;  %v1141_v25 = vsel %vm862_vm3, %v1138_v46, %v1140_v49 }
 0x262   : > { %v1117_v52 = vadd.f32 %v1113_v11, %v1105_v47  ;;  %v1173_v41 = vsel %vm767_vm2, %v1171_v27, %v1172_v29  ;;  %v1175_v50 = vsel %vm767_vm2, %v1172_v29, %v1174_v51  ;;  %v1152_v43 = vadd.f32 %v1141_v25, %v1118_v1 }
 0x263   : > { %v1205_v40 = vrot.slane %v1193_v45, 3  ;;  %v1206_v39 = vrot.slane %v1194_v4, 3  ;;  %v1227_v11 = vmul.f32 %v6194_v37, %v6191_v36  ;;  %v1228_v28 = vmul.f32 %v6194_v37, %v6188_v35 }
 0x264   : > { %v1151_v23 = vadd.f32 %v1139_v5, %v1117_v52  ;;  %v1242_v44 = vrot.slane %v1229_v8, 4  ;;  %v1261_v22 = vmul.f32 %v6197_v38, %v6191_v36  ;;  %v1186_v49 = vadd.f32 %v1175_v50, %v1152_v43 }
 0x265   : > { %v1207_v30 = vsel %vm963_vm4, %v1205_v40, %v1206_v39  ;;  %v1209_v47 = vsel %vm963_vm4, %v1206_v39, %v1208_v12  ;;  %v1239_v5 = vrot.slane %v1227_v11, 4  ;;  %v1240_v25 = vrot.slane %v1228_v28, 4 }
 0x266   : > { %v1185_v53 = vadd.f32 %v1173_v41, %v1151_v23  ;;  %v1262_v4 = vmul.f32 %v6197_v38, %v6188_v35  ;;  %v1263_v48 = vmul.f32 %v6197_v38, %v6167_v24  ;;  %v1220_v51 = vadd.f32 %v1209_v47, %v1186_v49 }
 0x267   : > { %v1273_v8 = vrot.slane %v1261_v22, 5  ;;  %v1295_v46 = vmul.f32 %v6206_v42, %v6191_v36  ;;  %v1241_v27 = vsel %vm995_vm5, %v1239_v5, %v1240_v25  ;;  %v1243_v29 = vsel %vm995_vm5, %v1240_v25, %v1242_v44 }
 0x268   : > { %v1219_v31 = vadd.f32 %v1207_v30, %v1185_v53  ;;  %v1274_v45 = vrot.slane %v1262_v4, 5  ;;  %v1276_v12 = vrot.slane %v1263_v48, 5  ;;  %v1254_v1 = vadd.f32 %v1243_v29, %v1220_v51 }
 0x269   : > { %v1296_v41 = vmul.f32 %v6206_v42, %v6188_v35  ;;  %v1297_v50 = vmul.f32 %v6206_v42, %v6167_v24  ;;  %v1307_v40 = vrot.slane %v1295_v46, 6  ;;  %v1329_v39 = vmul.f32 %v6227_v26, %v6191_v36 }
 0x26a   : > { %v1253_v52 = vadd.f32 %v1241_v27, %v1219_v31  ;;  %v1275_v23 = vsel %vm1027_vm6, %v1273_v8, %v1274_v45  ;;  %v1277_v43 = vsel %vm1027_vm6, %v1274_v45, %v1276_v12  ;;  %v1330_v53 = vmul.f32 %v6227_v26, %v6188_v35  ;;  %v6326_v8 = vld [vmem:[%s9241_s15] ss:$0 sm:$0xff]  ;;  %v6328_v27 = vpop.f32.mrb[2].mxu0 }
 0x26b   : > { %v1288_v28 = vadd.f32 %v1277_v43, %v1254_v1  ;;  %v1308_v44 = vrot.slane %v1296_v41, 6  ;;  %v1310_v22 = vrot.slane %v1297_v50, 6  ;;  %v1331_v49 = vmul.f32 %v6227_v26, %v6167_v24  ;;  %9242 = vst [vmem:[#allocation36_spill] sm:$0xff] %v6328_v27  ;;  %v6339_v12 = vpop.f32.mrb[3].mxu0 }
 0x26c   : > { %v1287_v11 = vadd.f32 %v1275_v23, %v1253_v52  ;;  %v1341_v30 = vrot.slane %v1329_v39, 7  ;;  %v1342_v48 = vrot.slane %v1330_v53, 7  ;;  %v6337_v45 = vrot.slane %v6328_v27, 1  ;;  %9243 = vst [vmem:[#allocation37_spill] sm:$0xff] %v6339_v12 }
 0x26d   : > { %v1309_v47 = vsel %vm1059_vm7, %v1307_v40, %v1308_v44  ;;  %v1311_v5 = vsel %vm1059_vm7, %v1308_v44, %v1310_v22  ;;  %v1344_v36 = vrot.slane %v1331_v49, 7  ;;  %v866_v52 = vrot.slane %v6339_v12, 1 }
 0x26e   : > { %v1321_v25 = vadd.f32 %v1309_v47, %v1287_v11  ;;  %v1322_v4 = vadd.f32 %v1311_v5, %v1288_v28  ;;  %v1343_v31 = vsel %vm1091_vm8, %v1341_v30, %v1342_v48  ;;  %v9244_v47 = vrot.slane %v6133_v9, 1 }
 0x26f   : > { %v1345_v51 = vsel %vm1091_vm8, %v1342_v48, %v1344_v36  ;;  %v6346_v50 = vsel %vm862_vm3, %v866_v52, %v6337_v45  ;;  %v6349_v23 = vsel %vm862_vm3, 0.0, %v866_v52  ;;  %v6395_v36 = vmul.f32 %v6154_v18, %v6337_v45 }
 0x270   : > { %v1355_v35 = vadd.f32 %v1343_v31, %v1321_v25  ;;  %v1356_v46 = vadd.f32 %v1345_v51, %v1322_v4  ;;  %v6353_v43 = vmul.f32 %v6105_v59, %v6349_v23  ;;  %v6357_v40 = vmul.f32 %v6108_v60, %v6349_v23 }
 0x271   : > { %v6361_v39 = vmul.f32 %v6113_v62, %v6349_v23  ;;  %v6365_v11 = vmul.f32 %v6116_v63, %v6349_v23  ;;  %v6369_v28 = vmul.f32 %v6123_v3, %v6349_v23  ;;  %v6373_v44 = vmul.f32 %v6126_v6, %v6349_v23 }
 0x272   : > { %v6331_v24 = vadd.f32 %v6326_v8, %v1355_v35  ;;  %v6334_v29 = vadd.f32 %v6326_v8, %v1356_v46  ;;  %v9106_v22 = vrot.slane %v6353_v43, 1  ;;  %v9105_v53 = vrot.slane %v6357_v40, 2 }
 0x273   : > { %v9104_v49 = vrot.slane %v6361_v39, 3  ;;  %v9103_v30 = vrot.slane %v6365_v11, 4  ;;  %v9245_v25 = vrot.slane %v6136_v10, 2  ;;  %v6391_v48 = vmul.f32 %v6129_v7, %v6349_v23 }
 0x274   : > { %v1370_v1 = vmul.f32 0.5, %v6331_v24  ;;  %v1371_v41 = vmul.f32 0.5, %v6334_v29  ;;  %v907_v5 = vsel %vm862_vm3, %v9244_v47, %v9106_v22  ;;  %v9246_v9 = vrot.slane %v6139_v13, 3 }
 0x275   : > { %v938_v4 = vsel %vm767_vm2, %v9245_v25, %v9105_v53  ;;  %v916_v31 = vadd.f32 %v907_v5, %v6162_v21  ;;  %v9110_v10 = vrot.slane %v6369_v28, 5  ;;  %v9247_v46 = vrot.slane %v6142_v14, 4 }
 0x276   : > { %5114 = vtanh.f32 %v1370_v1  ;;  %v970_v51 = vsel %vm963_vm4, %v9246_v9, %v9104_v49  ;;  %v1128_v21 = vmul.f32 %v6154_v18, %v6349_v23  ;;  %v6414_v1 = vmul.f32 %v6154_v18, %v6346_v50 }
 0x277   : > { %5116 = vtanh.f32 %v1371_v41  ;;  %v1002_v52 = vsel %vm995_vm5, %v9247_v46, %v9103_v30  ;;  %v1162_v13 = vmul.f32 %v6181_v33, %v6349_v23  ;;  %v947_v41 = vadd.f32 %v938_v4, %v916_v31 }
 0x278   : > { %v6420_v47 = vmul.f32 %v6181_v33, %v6346_v50  ;;  %v1196_v14 = vmul.f32 %v6184_v34, %v6349_v23  ;;  %v6426_v5 = vmul.f32 %v6184_v34, %v6346_v50  ;;  %v1142_v25 = vrot.slane %v1128_v21, 1 }
 0x279   : > { %v9109_v9 = vrot.slane %v6414_v1, 1  ;;  %v1176_v18 = vrot.slane %v1162_v13, 2  ;;  %v1230_v46 = vmul.f32 %v6194_v37, %v6349_v23  ;;  %v979_v30 = vadd.f32 %v970_v51, %v947_v41 }
 0x27a   : > { %v9113_v31 = vrot.slane %v6420_v47, 2  ;;  %v1210_v49 = vrot.slane %v1196_v14, 3  ;;  %v9248_v22 = vrot.slane %v6148_v16, 5  ;;  %v9117_v13 = vrot.slane %v6426_v5, 3 }
 0x27b   : > { %v1144_v21 = vsel %vm862_vm3, %v1142_v25, %v9109_v9  ;;  %v6444_v51 = vmul.f32 %v6194_v37, %v6346_v50  ;;  %v1011_v14 = vadd.f32 %v1002_v52, %v979_v30  ;;  %v6451_v16 = vmul.f32 %v6181_v33, %v6337_v45 }
 0x27c   : > { %v1034_v35 = vsel %vm1027_vm6, %v9248_v22, %v9110_v10  ;;  %v1178_v12 = vsel %vm767_vm2, %v1176_v18, %v9113_v31  ;;  %v9249_v25 = vrot.slane %v6373_v44, 6  ;;  %v9250_v9 = vrot.slane %v6151_v17, 6 }
 0x27d   : > { %v1244_v30 = vrot.slane %v1230_v46, 4  ;;  %v1043_v27 = vadd.f32 %v1034_v35, %v1011_v14  ;;  %v1115_v18 = vmul.f32 %v6178_v32, %v6349_v23  ;;  %v9116_v33 = vrot.slane %v6444_v51, 4 }
 0x27e   : > { %v1066_v10 = vsel %vm1059_vm7, %v9250_v9, %v9249_v25  ;;  %v1264_v9 = vmul.f32 %v6197_v38, %v6349_v23  ;;  %v1298_v19 = vmul.f32 %v6206_v42, %v6349_v23  ;;  %v6489_v25 = vmul.f32 %v6206_v42, %v6346_v50 }
 0x27f   : > { %v1075_v46 = vadd.f32 %v1066_v10, %v1043_v27  ;;  %v1332_v10 = vmul.f32 %v6227_v26, %v6349_v23 }
 0x280   : > { %v5115_v53 = vpop.eup %5114  ;;  %v1278_v14 = vrot.slane %v1264_v9, 5 }
 0x281   : > { %v5117_v41 = vpop.eup %5116  ;;  %v1378_v4 = vadd.f32 1.0, %v5115_v53  ;;  %v1212_v53 = vsel %vm963_vm4, %v1210_v49, %v9117_v13  ;;  %v6473_v49 = vmul.f32 %v6197_v38, %v6346_v50  ;;  %v1346_v9 = vrot.slane %v1332_v10, 7 }
 0x282   : > { %v1379_v22 = vadd.f32 1.0, %v5117_v41  ;;  %v9251_v41 = vrot.slane %v6391_v48, 7 }
 0x283   : > { %v1382_v52 = vmul.f32 0.5, %v1378_v4  ;;  %v1246_v4 = vsel %vm995_vm5, %v1244_v30, %v9116_v33  ;;  %v6497_v30 = vmul.f32 %v6227_v26, %v6346_v50 }
 0x284   : > { %v1383_v31 = vmul.f32 0.5, %v1379_v22  ;;  %v1098_v17 = vsel %vm1091_vm8, %v9252_v20, %v9251_v41  ;;  %v1279_v22 = vrot.slane %v6473_v49, 5  ;;  %v895_v41 = vmul.f32 %v6105_v59, %v6346_v50 }
 0x285   : > { %v6476_v35 = vmul.f32 %v1382_v52, %v6331_v24  ;;  %v1107_v27 = vadd.f32 %v1098_v17, %v1075_v46  ;;  %v1312_v24 = vrot.slane %v1298_v19, 6  ;;  %v883_v52 = vmul.f32 %v6145_v15, %v6349_v23 }
 0x286   : > { %v6484_v20 = vmul.f32 %v1383_v31, %v6334_v29  ;;  %v1280_v29 = vsel %vm1027_vm6, %v1278_v14, %v1279_v22  ;;  %v1313_v31 = vrot.slane %v6489_v25, 6  ;;  %v1347_v46 = vrot.slane %v6497_v30, 7 }
 0x287   : > { %9253 = vst [vmem:[#allocation38_spill] sm:$0xff] %v6476_v35  ;;  %4936 = vmatprep.mubr.msk.f32.mxu0 %vm1396_vm9, %v6476_v35  ;;  %v1119_v17 = vadd.f32 %v1115_v18, %v1107_v27  ;;  %v926_v19 = vmul.f32 %v6108_v60, %v6346_v50  ;;  %v908_v13 = vrot.slane %v895_v41, 1  ;;  %v957_v14 = vmul.f32 %v6113_v62, %v6346_v50 }
 0x288   : > { %9254 = vst [vmem:[#allocation39_spill] sm:$0xff] %v6484_v20  ;;  %4937 = vmatmul.mubr.msk.f32.vlgmr.msra.gmra.mrb[4].mxu0 %vm1396_vm9, %v6484_v20  ;;  %v1314_v33 = vsel %vm1059_vm7, %v1312_v24, %v1313_v31  ;;  %v989_v25 = vmul.f32 %v6116_v63, %v6346_v50  ;;  %v1348_v23 = vsel %vm1091_vm8, %v1346_v9, %v1347_v46  ;;  %v9255_v27 = vrot.slane %v6353_v43, 1 }
 0x289   : > { %v1153_v15 = vadd.f32 %v1144_v21, %v1119_v17  ;;  %v939_v59 = vrot.slane %v926_v19, 2  ;;  %v1021_v18 = vmul.f32 %v6123_v3, %v6346_v50  ;;  %v971_v10 = vrot.slane %v957_v14, 3 }
 0x28a   : > { %v909_v60 = vsel %vm862_vm3, %v9255_v27, %v908_v13  ;;  %v1003_v24 = vrot.slane %v989_v25, 4  ;;  %v1053_v30 = vmul.f32 %v6126_v6, %v6346_v50  ;;  %v9256_v63 = vrot.slane %v6357_v40, 2 }
 0x28b   : > { %v1187_v62 = vadd.f32 %v1178_v12, %v1153_v15  ;;  %v917_v41 = vadd.f32 %v909_v60, %v883_v52  ;;  %v1035_v17 = vrot.slane %v1021_v18, 5  ;;  %v9257_v9 = vrot.slane %v6361_v39, 3 }
 0x28c   : > { %v940_v21 = vsel %vm767_vm2, %v9256_v63, %v939_v59  ;;  %v9258_v43 = vrot.slane %v6365_v11, 4  ;;  %v1067_v19 = vrot.slane %v1053_v30, 6  ;;  %v1085_v14 = vmul.f32 %v6129_v7, %v6346_v50 }
 0x28d   : > { %v972_v3 = vsel %vm963_vm4, %v9257_v9, %v971_v10  ;;  %v1221_v6 = vadd.f32 %v1212_v53, %v1187_v62  ;;  %v948_v12 = vadd.f32 %v940_v21, %v917_v41  ;;  %v9259_v52 = vrot.slane %v6369_v28, 5 }
 0x28e   : > { %v1004_v13 = vsel %vm995_vm5, %v9258_v43, %v1003_v24  ;;  %v9260_v25 = vrot.slane %v6373_v44, 6  ;;  %v1099_v15 = vrot.slane %v1085_v14, 7  ;;  %v1145_v59 = vrot.slane %v6395_v36, 1 }
 0x28f   : > { %v1036_v40 = vsel %vm1027_vm6, %v9259_v52, %v1035_v17  ;;  %v1179_v11 = vrot.slane %v6451_v16, 2  ;;  %v1255_v18 = vadd.f32 %v1246_v4, %v1221_v6  ;;  %v980_v27 = vadd.f32 %v972_v3, %v948_v12 }
 0x290   : > { %v1068_v39 = vsel %vm1059_vm7, %v9260_v25, %v1067_v19  ;;  %v1198_v7 = vmul.f32 %v6184_v34, %v6337_v45  ;;  %v1232_v53 = vmul.f32 %v6194_v37, %v6337_v45  ;;  %v9261_v28 = vrot.slane %v6391_v48, 7 }
 0x291   : > { %v9262_v44 = vrot.slane %v6414_v1, 1  ;;  %v9263_v36 = vrot.slane %v6420_v47, 2  ;;  %v1266_v4 = vmul.f32 %v6197_v38, %v6337_v45  ;;  %v1289_v24 = vadd.f32 %v1280_v29, %v1255_v18 }
 0x292   : > { %v1100_v60 = vsel %vm1091_vm8, %v9261_v28, %v1099_v15  ;;  %v1012_v34 = vadd.f32 %v1004_v13, %v980_v27  ;;  %v1213_v30 = vrot.slane %v1198_v7, 3  ;;  %v1247_v62 = vrot.slane %v1232_v53, 4 }
 0x293   : > { %v1146_v10 = vsel %vm862_vm3, %v9262_v44, %v1145_v59  ;;  %v1180_v16 = vsel %vm767_vm2, %v9263_v36, %v1179_v11  ;;  %v1281_v37 = vrot.slane %v1266_v4, 5  ;;  %v1300_v48 = vmul.f32 %v6206_v42, %v6337_v45 }
 0x294   : > { %v1334_v1 = vmul.f32 %v6227_v26, %v6337_v45  ;;  %v1323_v41 = vadd.f32 %v1314_v33, %v1289_v24  ;;  %v1044_v63 = vadd.f32 %v1036_v40, %v1012_v34  ;;  %v9264_v47 = vrot.slane %v6426_v5, 3 }
 0x295   : > { %v9265_v17 = vrot.slane %v6444_v51, 4  ;;  %v1282_v29 = vsel %vm1027_vm6, %v1279_v22, %v1281_v37  ;;  %v1315_v9 = vrot.slane %v1300_v48, 6  ;;  %v1116_v26 = vmul.f32 %v6178_v32, %v6346_v50 }
 0x296   : > { %v1214_v21 = vsel %vm963_vm4, %v9264_v47, %v1213_v30  ;;  %v1349_v3 = vrot.slane %v1334_v1, 7  ;;  %v1357_v42 = vadd.f32 %v1348_v23, %v1323_v41  ;;  %v1076_v43 = vadd.f32 %v1068_v39, %v1044_v63 }
 0x297   : > { %v1248_v38 = vsel %vm995_vm5, %v9265_v17, %v1247_v62  ;;  %v1316_v45 = vsel %vm1059_vm7, %v1313_v31, %v1315_v9 }
 0x298   : > { %v1350_v5 = vsel %vm1091_vm8, %v1347_v46, %v1349_v3  ;;  %v1368_v33 = vadd.f32 %v6326_v8, %v1357_v42  ;;  %v1108_v51 = vadd.f32 %v1100_v60, %v1076_v43 }
 0x29a   : > { %v1372_v13 = vmul.f32 0.5, %v1368_v33  ;;  %v1120_v19 = vadd.f32 %v1116_v26, %v1108_v51 }
 0x29c   : > { %5118 = vtanh.f32 %v1372_v13  ;;  %v1154_v49 = vadd.f32 %v1146_v10, %v1120_v19 }
 0x29e   : > { %v1188_v14 = vadd.f32 %v1180_v16, %v1154_v49 }
 0x2a0   : > { %v1222_v22 = vadd.f32 %v1214_v21, %v1188_v14 }
 0x2a2   : > { %v1256_v6 = vadd.f32 %v1248_v38, %v1222_v22 }
 0x2a4   : > { %v1290_v12 = vadd.f32 %v1282_v29, %v1256_v6 }
 0x2a6   : > { %v5119_v23 = vpop.eup %5118  ;;  %v1324_v52 = vadd.f32 %v1316_v45, %v1290_v12 }
 0x2a7   : > { %v1380_v40 = vadd.f32 1.0, %v5119_v23 }
 0x2a8   : > { %v1358_v25 = vadd.f32 %v1350_v5, %v1324_v52 }
 0x2a9   : > { %v1384_v32 = vmul.f32 0.5, %v1380_v40  ;;  %v4866_v40 = vld [vmem:[%s6018_s21] ss:$0 sm:$0xff] }
 0x2aa   : > { %v1369_v50 = vadd.f32 %v6326_v8, %v1358_v25 }
 0x2ab   : > { %v6578_v31 = vmul.f32 %v1384_v32, %v1368_v33 }
 0x2ac   : > { %v1373_v46 = vmul.f32 0.5, %v1369_v50 }
 0x2ad   : > { %9266 = vst [vmem:[#allocation40_spill] sm:$0xff] %v6578_v31  ;;  %4939 = vmatprep.mubr.msk.f32.mxu1 %vm1396_vm9, %v6578_v31 }
 0x2ae   : > { %5120 = vtanh.f32 %v1373_v46  ;;  %v4867_v46 = vld [vmem:[%s6024_s29] ss:$0 sm:$0xff] }
 0x2b8   : > { %v5121_v39 = vpop.eup %5120 }
 0x2b9   : > { %v1381_v15 = vadd.f32 1.0, %v5121_v39 }
 0x2bb   : > { %v1385_v59 = vmul.f32 0.5, %v1381_v15 }
 0x2bd   : > { %v6582_v11 = vmul.f32 %v1385_v59, %v1369_v50 }
 0x2bf   : > { %9267 = vst [vmem:[#allocation41_spill] sm:$0xff] %v6582_v11  ;;  %4940 = vmatmul.mubr.msk.f32.vlgmr.msra.gmra.mrb[0].mxu1 %vm1396_vm9, %v6582_v11 }
 0x35b   : > { %v4938_v18 = vpop.f32.mrb[4].mxu0 }
 0x35c   : > { %1502 = vperm.xlu1 %5104, %v4938_v18   ;;  %v6586_v27 = vpop.f32.mrb[5].mxu0  ;;  %v3000_v8 = vrot.slane %v4938_v18, %v6120_v2  ;;  %v3172_v7 = vrot.slane %v4938_v18, %v6094_v54  ;;  %v3344_v53 = vrot.slane %v4938_v18, %v6096_v55  ;;  %v3516_v28 = vrot.slane %v4938_v18, %v6098_v56 }
 0x35d   : > { %1497 = vperm.xlu0 %5105, %v6586_v27   ;;  %v3688_v60 = vrot.slane %v4938_v18, %v6100_v57  ;;  %v6597_v10 = vrot.slane %v4938_v18, %v6102_v58  ;;  %v6604_v16 = vrot.slane %v4938_v18, %v6110_v61  ;;  %v6609_v4 = vrot.slane %v4938_v18, %v6118_v0 }
 0x35e   : > { %v1621_v24 = vrot.slane %v6586_v27, %v6120_v2  ;;  %v1794_v34 = vrot.slane %v6586_v27, %v6094_v54  ;;  %v1966_v30 = vrot.slane %v6586_v27, %v6096_v55  ;;  %v6645_v17 = vrot.slane %v6586_v27, %v6098_v56 }
 0x35f   : > { %9268 = vst [vmem:[#allocation42_spill] sm:$0xff] %v6597_v10  ;;  %9270 = vst [vmem:[#allocation44_spill] sm:$0xff] %v6604_v16  ;;  %v6669_v5 = vrot.slane %v6586_v27, %v6100_v57  ;;  %v6693_v12 = vrot.slane %v6586_v27, %v6102_v58 }
 0x360   : > { %3003 = vbcast.lane.b32.xlu1 %v3000_v8, 257  ;;  %9271 = vst [vmem:[#allocation45_spill] sm:$0xff] %v6609_v4 }
 0x361   : > { %3007 = vbcast.lane.b32.xlu0 %v3000_v8, 265 }
 0x364   : > { %3011 = vbcast.lane.b32.xlu1 %v3000_v8, 273 }
 0x365   : > { %3015 = vbcast.lane.b32.xlu0 %v3000_v8, 281 }
 0x368   : > { %3071 = vbcast.lane.b32.xlu1 %v3000_v8, 289 }
 0x369   : > { %3075 = vbcast.lane.b32.xlu0 %v3000_v8, 297 }
 0x36c   : > { %3079 = vbcast.lane.b32.xlu1 %v3000_v8, 305 }
 0x36d   : > { %3083 = vbcast.lane.b32.xlu0 %v3000_v8, 313 }
 0x370   : > { %3175 = vbcast.lane.b32.xlu1 %v3172_v7, 257 }
 0x371   : > { %3179 = vbcast.lane.b32.xlu0 %v3172_v7, 265 }
 0x374   : > { %3183 = vbcast.lane.b32.xlu1 %v3172_v7, 273 }
 0x375   : > { %3187 = vbcast.lane.b32.xlu0 %v3172_v7, 281 }
 0x378   : > { %3243 = vbcast.lane.b32.xlu1 %v3172_v7, 289 }
 0x379   : > { %3247 = vbcast.lane.b32.xlu0 %v3172_v7, 297 }
 0x37c   : > { %3251 = vbcast.lane.b32.xlu1 %v3172_v7, 305 }
 0x37d   : > { %3255 = vbcast.lane.b32.xlu0 %v3172_v7, 313 }
 0x380   : > { %3347 = vbcast.lane.b32.xlu1 %v3344_v53, 257 }
 0x381   : > { %3351 = vbcast.lane.b32.xlu0 %v3344_v53, 265 }
 0x384   : > { %3355 = vbcast.lane.b32.xlu1 %v3344_v53, 273 }
 0x385   : > { %3359 = vbcast.lane.b32.xlu0 %v3344_v53, 281 }
 0x388   : > { %3415 = vbcast.lane.b32.xlu1 %v3344_v53, 289 }
 0x389   : > { %3419 = vbcast.lane.b32.xlu0 %v3344_v53, 297 }
 0x38c   : > { %3423 = vbcast.lane.b32.xlu1 %v3344_v53, 305 }
 0x38d   : > { %3427 = vbcast.lane.b32.xlu0 %v3344_v53, 313  ;;  %v6724_v53 = vrot.slane %v6586_v27, %v6110_v61 }
 0x390   : > { %3519 = vbcast.lane.b32.xlu1 %v3516_v28, 257 }
 0x391   : > { %3523 = vbcast.lane.b32.xlu0 %v3516_v28, 265 }
 0x392   : > { %v6594_v44 = vpop.f32.mrb[0].mxu1 }
 0x393   : > { %v6599_v36 = vpop.f32.mrb[1].mxu1 }
 0x394   : > { %3527 = vbcast.lane.b32.xlu1 %v3516_v28, 273  ;;  %9269 = vst [vmem:[#allocation43_spill] sm:$0xff] %v6599_v36 }
 0x395   : > { %3531 = vbcast.lane.b32.xlu0 %v3516_v28, 281 }
 0x398   : > { %3587 = vbcast.lane.b32.xlu1 %v3516_v28, 289 }
 0x399   : > { %3591 = vbcast.lane.b32.xlu0 %v3516_v28, 297 }
 0x39c   : > { %3595 = vbcast.lane.b32.xlu1 %v3516_v28, 305 }
 0x39d   : > { %3599 = vbcast.lane.b32.xlu0 %v3516_v28, 313 }
 0x3a0   : > { %3691 = vbcast.lane.b32.xlu1 %v3688_v60, 257 }
 0x3a1   : > { %3695 = vbcast.lane.b32.xlu0 %v3688_v60, 265 }
 0x3a4   : > { %3699 = vbcast.lane.b32.xlu1 %v3688_v60, 273 }
 0x3a5   : > { %3703 = vbcast.lane.b32.xlu0 %v3688_v60, 281 }
 0x3a8   : > { %3759 = vbcast.lane.b32.xlu1 %v3688_v60, 289 }
 0x3a9   : > { %3763 = vbcast.lane.b32.xlu0 %v3688_v60, 297 }
 0x3ac   : > { %3767 = vbcast.lane.b32.xlu1 %v3688_v60, 305 }
 0x3ad   : > { %3771 = vbcast.lane.b32.xlu0 %v3688_v60, 313 }
 0x3b0   : > { %3863 = vbcast.lane.b32.xlu1 %v6597_v10, 257 }
 0x3b1   : > { %3867 = vbcast.lane.b32.xlu0 %v6597_v10, 265 }
 0x3b4   : > { %3871 = vbcast.lane.b32.xlu1 %v6597_v10, 273 }
 0x3b5   : > { %4039 = vbcast.lane.b32.xlu0 %v6604_v16, 265 }
 0x3b8   : > { %3875 = vbcast.lane.b32.xlu1 %v6597_v10, 281 }
 0x3b9   : > { %4211 = vbcast.lane.b32.xlu0 %v6609_v4, 265 }
 0x3bc   : > { %4035 = vbcast.lane.b32.xlu1 %v6604_v16, 257 }
 0x3bd   : > { %3935 = vbcast.lane.b32.xlu0 %v6597_v10, 297 }
 0x3c0   : > { %4043 = vbcast.lane.b32.xlu1 %v6604_v16, 273 }
 0x3c1   : > { %4107 = vbcast.lane.b32.xlu0 %v6604_v16, 297 }
 0x3c4   : > { %4047 = vbcast.lane.b32.xlu1 %v6604_v16, 281 }
 0x3c5   : > { %1696 = vbcast.lane.b32.xlu0 %v1621_v24, 297 }
 0x3c8   : > { %4207 = vbcast.lane.b32.xlu1 %v6609_v4, 257 }
 0x3c9   : > { %1704 = vbcast.lane.b32.xlu0 %v1621_v24, 313 }
 0x3cc   : > { %4215 = vbcast.lane.b32.xlu1 %v6609_v4, 273 }
 0x3cd   : > { %1801 = vbcast.lane.b32.xlu0 %v1794_v34, 265 }
 0x3d0   : > { %3931 = vbcast.lane.b32.xlu1 %v6597_v10, 289 }
 0x3d1   : > { %1809 = vbcast.lane.b32.xlu0 %v1794_v34, 281 }
 0x3d4   : > { %4103 = vbcast.lane.b32.xlu1 %v6604_v16, 289 }
 0x3d5   : > { %1869 = vbcast.lane.b32.xlu0 %v1794_v34, 297 }
 0x3d8   : > { %4219 = vbcast.lane.b32.xlu1 %v6609_v4, 281 }
 0x3d9   : > { %1877 = vbcast.lane.b32.xlu0 %v1794_v34, 313 }
 0x3db   : > { %v6629_v62 = vpop.permute.xlu1 %1502 }
 0x3dc   : > { %v1498_v37 = vpop.permute.xlu0 %1497  ;;  %1624 = vbcast.lane.b32.xlu1 %v1621_v24, 257 }
 0x3dd   : > { %1973 = vbcast.lane.b32.xlu0 %v1966_v30, 265  ;;  %v1521_v50 = vmul.f32 %v4866_v40, %v1498_v37 }
 0x3df   : > { %v6631_v48 = vpop.permute.xlu1 %3003  ;;  %v6713_v59 = vadd.f32 %v4867_v46, %v1521_v50 }
 0x3e0   : > { %v6633_v1 = vpop.permute.xlu0 %3007  ;;  %1628 = vbcast.lane.b32.xlu1 %v1621_v24, 265 }
 0x3e1   : > { %1981 = vbcast.lane.b32.xlu0 %v1966_v30, 281  ;;  %v1540_v7 = vmin.f32 %v6713_v59, 20.0  ;;  %vm1536_vm10 = vcmp.gt.f32.partialorder %v6713_v59, 20.0 }
 0x3e3   : > { %v6635_v41 = vpop.permute.xlu1 %3011 }
 0x3e4   : > { %v6637_v63 = vpop.permute.xlu0 %3015  ;;  %1632 = vbcast.lane.b32.xlu1 %v1621_v24, 273 }
 0x3e5   : > { %2041 = vbcast.lane.b32.xlu0 %v1966_v30, 297 }
 0x3e7   : > { %v6639_v47 = vpop.permute.xlu1 %3071 }
 0x3e8   : > { %9272 = vst [vmem:[#allocation46_spill] sm:$0xff] %v6639_v47  ;;  %v6641_v21 = vpop.permute.xlu0 %3075  ;;  %1636 = vbcast.lane.b32.xlu1 %v1621_v24, 281 }
 0x3e9   : > { %9273 = vst [vmem:[#allocation47_spill] sm:$0xff] %v6641_v21  ;;  %2049 = vbcast.lane.b32.xlu0 %v1966_v30, 313 }
 0x3eb   : > { %v6647_v38 = vpop.permute.xlu1 %3079 }
 0x3ec   : > { %9274 = vst [vmem:[#allocation48_spill] sm:$0xff] %v6647_v38  ;;  %v6649_v29 = vpop.permute.xlu0 %3083  ;;  %1692 = vbcast.lane.b32.xlu1 %v1621_v24, 289 }
 0x3ed   : > { %9275 = vst [vmem:[#allocation49_spill] sm:$0xff] %v6649_v29  ;;  %2145 = vbcast.lane.b32.xlu0 %v6645_v17, 265 }
 0x3ef   : > { %v6652_v9 = vpop.permute.xlu1 %3175 }
 0x3f0   : > { %v6654_v3 = vpop.permute.xlu0 %3179  ;;  %1700 = vbcast.lane.b32.xlu1 %v1621_v24, 305  ;;  %v1544_v24 = vmul.f32 1.442695, %v1540_v7 }
 0x3f1   : > { %2153 = vbcast.lane.b32.xlu0 %v6645_v17, 281 }
 0x3f2   : > { %5122 = vpow2.f32 %v1544_v24 }
 0x3f3   : > { %v6657_v42 = vpop.permute.xlu1 %3183 }
 0x3f4   : > { %v6659_v43 = vpop.permute.xlu0 %3187  ;;  %1797 = vbcast.lane.b32.xlu1 %v1794_v34, 257 }
 0x3f5   : > { %2213 = vbcast.lane.b32.xlu0 %v6645_v17, 297 }
 0x3f7   : > { %v6662_v26 = vpop.permute.xlu1 %3243 }
 0x3f8   : > { %9276 = vst [vmem:[#allocation50_spill] sm:$0xff] %v6662_v26  ;;  %v6664_v45 = vpop.permute.xlu0 %3247  ;;  %1805 = vbcast.lane.b32.xlu1 %v1794_v34, 273 }
 0x3f9   : > { %9277 = vst [vmem:[#allocation51_spill] sm:$0xff] %v6664_v45  ;;  %2221 = vbcast.lane.b32.xlu0 %v6645_v17, 313 }
 0x3fb   : > { %v6671_v33 = vpop.permute.xlu1 %3251 }
 0x3fc   : > { %9278 = vst [vmem:[#allocation52_spill] sm:$0xff] %v6671_v33  ;;  %v6673_v51 = vpop.permute.xlu0 %3255  ;;  %1865 = vbcast.lane.b32.xlu1 %v1794_v34, 289  ;;  %v5123_v10 = vpop.eup %5122  ;;  %v1570_v33 = vld [vmem:[%s6030_s28 + $0x10] sm:$0xff] }
 0x3fd   : > { %9279 = vst [vmem:[#allocation53_spill] sm:$0xff] %v6673_v51  ;;  %2317 = vbcast.lane.b32.xlu0 %v6669_v5, 265  ;;  %v1552_v11 = vadd.f32 1.0, %v5123_v10 }
 0x3ff   : > { %v6676_v13 = vpop.permute.xlu1 %3347  ;;  %5124 = vlog2.f32 %v1552_v11 }
 0x400   : > { %9280 = vst [vmem:[#allocation54_spill] sm:$0xff] %v6676_v13  ;;  %v6678_v19 = vpop.permute.xlu0 %3351  ;;  %1873 = vbcast.lane.b32.xlu1 %v1794_v34, 305 }
 0x401   : > { %9281 = vst [vmem:[#allocation55_spill] sm:$0xff] %v6678_v19  ;;  %2325 = vbcast.lane.b32.xlu0 %v6669_v5, 281 }
 0x403   : > { %v6681_v49 = vpop.permute.xlu1 %3355 }
 0x404   : > { %9282 = vst [vmem:[#allocation56_spill] sm:$0xff] %v6681_v49  ;;  %v6683_v14 = vpop.permute.xlu0 %3359  ;;  %1969 = vbcast.lane.b32.xlu1 %v1966_v30, 257 }
 0x405   : > { %9283 = vst [vmem:[#allocation57_spill] sm:$0xff] %v6683_v14  ;;  %2385 = vbcast.lane.b32.xlu0 %v6669_v5, 297 }
 0x407   : > { %v6686_v22 = vpop.permute.xlu1 %3415 }
 0x408   : > { %9284 = vst [vmem:[#allocation58_spill] sm:$0xff] %v6686_v22  ;;  %v6688_v6 = vpop.permute.xlu0 %3419  ;;  %1977 = vbcast.lane.b32.xlu1 %v1966_v30, 273 }
 0x409   : > { %9285 = vst [vmem:[#allocation59_spill] sm:$0xff] %v6688_v6  ;;  %2393 = vbcast.lane.b32.xlu0 %v6669_v5, 313 }
 0x40b   : > { %v6695_v23 = vpop.permute.xlu1 %3423 }
 0x40c   : > { %9286 = vst [vmem:[#allocation60_spill] sm:$0xff] %v6695_v23  ;;  %v6697_v52 = vpop.permute.xlu0 %3427  ;;  %2037 = vbcast.lane.b32.xlu1 %v1966_v30, 289  ;;  %v5125_v23 = vpop.eup %5124 }
 0x40d   : > { %9287 = vst [vmem:[#allocation61_spill] sm:$0xff] %v6697_v52  ;;  %2489 = vbcast.lane.b32.xlu0 %v6693_v12, 265 }
 0x40f   : > { %v6701_v25 = vpop.permute.xlu1 %3519 }
 0x410   : > { %9288 = vst [vmem:[#allocation62_spill] sm:$0xff] %v6701_v25  ;;  %v6703_v32 = vpop.permute.xlu0 %3523  ;;  %2045 = vbcast.lane.b32.xlu1 %v1966_v30, 305 }
 0x411   : > { %9289 = vst [vmem:[#allocation63_spill] sm:$0xff] %v6703_v32  ;;  %2497 = vbcast.lane.b32.xlu0 %v6693_v12, 281 }
 0x413   : > { %v6707_v39 = vpop.permute.xlu1 %3527 }
 0x414   : > { %9290 = vst [vmem:[#allocation64_spill] sm:$0xff] %v6707_v39  ;;  %v6709_v15 = vpop.permute.xlu0 %3531  ;;  %2141 = vbcast.lane.b32.xlu1 %v6645_v17, 257 }
 0x415   : > { %9291 = vst [vmem:[#allocation65_spill] sm:$0xff] %v6709_v15  ;;  %2557 = vbcast.lane.b32.xlu0 %v6693_v12, 297  ;;  %v6919_v15 = vrot.slane %v6594_v44, %v6118_v0 }
 0x417   : > { %v6715_v18 = vpop.permute.xlu1 %3587  ;;  %9323 = vst [vmem:[#allocation97_spill] sm:$0xff] %v6919_v15 }
 0x418   : > { %9292 = vst [vmem:[#allocation66_spill] sm:$0xff] %v6715_v18  ;;  %v6717_v8 = vpop.permute.xlu0 %3591  ;;  %2149 = vbcast.lane.b32.xlu1 %v6645_v17, 273 }
 0x419   : > { %9293 = vst [vmem:[#allocation67_spill] sm:$0xff] %v6717_v8  ;;  %2565 = vbcast.lane.b32.xlu0 %v6693_v12, 313 }
 0x41b   : > { %v6726_v28 = vpop.permute.xlu1 %3595 }
 0x41c   : > { %9294 = vst [vmem:[#allocation68_spill] sm:$0xff] %v6726_v28  ;;  %v6728_v60 = vpop.permute.xlu0 %3599  ;;  %2209 = vbcast.lane.b32.xlu1 %v6645_v17, 289  ;;  %v1569_v28 = vld [vmem:[%s6030_s28 + $0x8] sm:$0xff] }
 0x41d   : > { %9295 = vst [vmem:[#allocation69_spill] sm:$0xff] %v6728_v60  ;;  %2661 = vbcast.lane.b32.xlu0 %v6724_v53, 265 }
 0x41f   : > { %v6732_v34 = vpop.permute.xlu1 %3691 }
 0x420   : > { %9296 = vst [vmem:[#allocation70_spill] sm:$0xff] %v6732_v34  ;;  %v6734_v30 = vpop.permute.xlu0 %3695  ;;  %2217 = vbcast.lane.b32.xlu1 %v6645_v17, 305  ;;  %v6752_v17 = vrot.slane %v6586_v27, %v6118_v0  ;;  %v1522_v27 = vmul.f32 %v4866_v40, %v6629_v62  ;;  %v1571_v62 = vld [vmem:[%s6030_s28 + $0x18] sm:$0xff]  ;;  %v6786_v40 = vrot.slane %v6594_v44, %v6120_v2 }
 0x421   : > { %9297 = vst [vmem:[#allocation71_spill] sm:$0xff] %v6734_v30  ;;  %2669 = vbcast.lane.b32.xlu0 %v6724_v53, 281 }
 0x422   : > { %v6773_v10 = vadd.f32 %v4867_v46, %v1522_v27 }
 0x423   : > { %v6738_v37 = vpop.permute.xlu1 %3699 }
 0x424   : > { %9298 = vst [vmem:[#allocation72_spill] sm:$0xff] %v6738_v37  ;;  %v6740_v50 = vpop.permute.xlu0 %3703  ;;  %2313 = vbcast.lane.b32.xlu1 %v6669_v5, 257  ;;  %v1541_v11 = vmin.f32 %v6773_v10, 20.0  ;;  %vm1537_vm11 = vcmp.gt.f32.partialorder %v6773_v10, 20.0 }
 0x425   : > { %9299 = vst [vmem:[#allocation73_spill] sm:$0xff] %v6740_v50  ;;  %2729 = vbcast.lane.b32.xlu0 %v6724_v53, 297  ;;  %v6896_v50 = vrot.slane %v6594_v44, %v6098_v56 }
 0x426   : > { %v1546_v52 = vmul.f32 1.442695, %v1541_v11 }
 0x427   : > { %v6744_v16 = vpop.permute.xlu1 %3759 }
 0x428   : > { %9300 = vst [vmem:[#allocation74_spill] sm:$0xff] %v6744_v16  ;;  %v6746_v7 = vpop.permute.xlu0 %3763  ;;  %2321 = vbcast.lane.b32.xlu1 %v6669_v5, 273 }
 0x429   : > { %9301 = vst [vmem:[#allocation75_spill] sm:$0xff] %v6746_v7  ;;  %2737 = vbcast.lane.b32.xlu0 %v6724_v53, 313  ;;  %v1578_v7 = vmul.f32 1.442695, %v1571_v62 }
 0x42b   : > { %v6754_v24 = vpop.permute.xlu1 %3767 }
 0x42c   : > { %9302 = vst [vmem:[#allocation76_spill] sm:$0xff] %v6754_v24  ;;  %v6756_v31 = vpop.permute.xlu0 %3771  ;;  %2381 = vbcast.lane.b32.xlu1 %v6669_v5, 289 }
 0x42d   : > { %9303 = vst [vmem:[#allocation77_spill] sm:$0xff] %v6756_v31  ;;  %2833 = vbcast.lane.b32.xlu0 %v6752_v17, 265  ;;  %v1574_v31 = vmul.f32 1.442695, %v1569_v28  ;;  %v1568_v28 = vld [vmem:[%s6030_s28] sm:$0xff] }
 0x42e   : > { %v1572_v8 = vmul.f32 1.442695, %v1568_v28 }
 0x42f   : > { %v6760_v4 = vpop.permute.xlu1 %3863  ;;  %5126 = vpow2.f32 %v1574_v31  ;;  %v1557_v31 = vmul.f32 0.6931472, %v5125_v23 }
 0x430   : > { %9304 = vst [vmem:[#allocation78_spill] sm:$0xff] %v6760_v4  ;;  %v6762_v16 = vpop.permute.xlu0 %3867  ;;  %2389 = vbcast.lane.b32.xlu1 %v6669_v5, 305  ;;  %5128 = vpow2.f32 %v1578_v7  ;;  %v6824_v7 = vrot.slane %v6594_v44, %v6094_v54 }
 0x431   : > { %9305 = vst [vmem:[#allocation79_spill] sm:$0xff] %v6762_v16  ;;  %2841 = vbcast.lane.b32.xlu0 %v6752_v17, 281  ;;  %5130 = vpow2.f32 %v1546_v52  ;;  %v6806_v28 = vsel %vm1536_vm10, %v6713_v59, %v1557_v31 }
 0x432   : > { %5132 = vpow2.f32 %v1572_v8  ;;  %v6835_v26 = vrot.slane %v6806_v28, %v6094_v54  ;;  %v6874_v4 = vmul.f32 %v6806_v28, %v6476_v35 }
 0x433   : > { %v6767_v24 = vpop.permute.xlu1 %3871 }
 0x434   : > { %9306 = vst [vmem:[#allocation80_spill] sm:$0xff] %v6767_v24  ;;  %v6770_v18 = vpop.permute.xlu0 %4039  ;;  %2485 = vbcast.lane.b32.xlu1 %v6693_v12, 257  ;;  %v6940_v15 = vrot.slane %v6874_v4, %v6094_v54 }
 0x435   : > { %9307 = vst [vmem:[#allocation81_spill] sm:$0xff] %v6770_v18  ;;  %2901 = vbcast.lane.b32.xlu0 %v6752_v17, 297 }
 0x437   : > { %v6776_v5 = vpop.permute.xlu1 %3875 }
 0x438   : > { %9308 = vst [vmem:[#allocation82_spill] sm:$0xff] %v6776_v5  ;;  %v6778_v60 = vpop.permute.xlu0 %4211  ;;  %2493 = vbcast.lane.b32.xlu1 %v6693_v12, 273 }
 0x439   : > { %9309 = vst [vmem:[#allocation83_spill] sm:$0xff] %v6778_v60  ;;  %2909 = vbcast.lane.b32.xlu0 %v6752_v17, 313  ;;  %v5127_v62 = vpop.eup %5126 }
 0x43a   : > { %v6814_v23 = vsub.f32 0.0, %v5127_v62  ;;  %v5129_v59 = vpop.eup %5128 }
 0x43b   : > { %v6788_v46 = vpop.permute.xlu1 %4035  ;;  %v5131_v8 = vpop.eup %5130  ;;  %v6837_v6 = vsub.f32 0.0, %v5129_v59 }
 0x43c   : > { %9310 = vst [vmem:[#allocation84_spill] sm:$0xff] %v6788_v46  ;;  %v6791_v27 = vpop.permute.xlu0 %3935  ;;  %2553 = vbcast.lane.b32.xlu1 %v6693_v12, 289  ;;  %9316 = vst [vmem:[#allocation90_spill] sm:$0xff] %v6814_v23  ;;  %v5133_v62 = vpop.eup %5132  ;;  %v1553_v51 = vadd.f32 1.0, %v5131_v8  ;;  %v1768_v46 = vmul.f32 %v6835_v26, %v6814_v23 }
 0x43d   : > { %9311 = vst [vmem:[#allocation85_spill] sm:$0xff] %v6791_v27  ;;  %3027 = vbcast.lane.b32.xlu0 %v6786_v40, 265  ;;  %v1576_v27 = vmul.f32 1.442695, %v1570_v33  ;;  %v1587_v33 = vrot.slane %v6806_v28, %v6120_v2 }
 0x43f   : > { %v6796_v22 = vpop.permute.xlu1 %4043  ;;  %5134 = vpow2.f32 %v1576_v27  ;;  %v1593_v31 = vmul.f32 %v1587_v33, %v6814_v23  ;;  %v1595_v8 = vmul.f32 %v1587_v33, %v6837_v6 }
 0x440   : > { %9312 = vst [vmem:[#allocation86_spill] sm:$0xff] %v6796_v22  ;;  %v6798_v38 = vpop.permute.xlu0 %4107  ;;  %2561 = vbcast.lane.b32.xlu1 %v6693_v12, 305  ;;  %5136 = vlog2.f32 %v1553_v51 }
 0x441   : > { %9313 = vst [vmem:[#allocation87_spill] sm:$0xff] %v6798_v38  ;;  %3035 = vbcast.lane.b32.xlu0 %v6786_v40, 281  ;;  %v1606_v51 = vmul.f32 1.442695, %v1595_v8 }
 0x443   : > { %v6803_v11 = vpop.permute.xlu1 %4047 }
 0x444   : > { %9314 = vst [vmem:[#allocation88_spill] sm:$0xff] %v6803_v11  ;;  %v6808_v22 = vpop.permute.xlu0 %1696  ;;  %2657 = vbcast.lane.b32.xlu1 %v6724_v53, 257 }
 0x445   : > { %3091 = vbcast.lane.b32.xlu0 %v6786_v40, 297 }
 0x447   : > { %v6812_v12 = vpop.permute.xlu1 %4207 }
 0x448   : > { %9315 = vst [vmem:[#allocation89_spill] sm:$0xff] %v6812_v12  ;;  %v6818_v52 = vpop.permute.xlu0 %1704  ;;  %2665 = vbcast.lane.b32.xlu1 %v6724_v53, 273  ;;  %v6841_v12 = vsub.f32 0.0, %v5133_v62 }
 0x449   : > { %3099 = vbcast.lane.b32.xlu0 %v6786_v40, 313  ;;  %v5135_v47 = vpop.eup %5134 }
 0x44a   : > { %v6850_v59 = vsub.f32 0.0, %v5135_v47  ;;  %v5137_v11 = vpop.eup %5136 }
 0x44b   : > { %v6826_v27 = vpop.permute.xlu1 %4215  ;;  %v1559_v16 = vmul.f32 0.6931472, %v5137_v11 }
 0x44c   : > { %9317 = vst [vmem:[#allocation91_spill] sm:$0xff] %v6826_v27  ;;  %v6829_v38 = vpop.permute.xlu0 %1801  ;;  %2725 = vbcast.lane.b32.xlu1 %v6724_v53, 289  ;;  %v1602_v27 = vmul.f32 1.442695, %v1593_v31  ;;  %v1592_v31 = vmul.f32 %v1587_v33, %v6841_v12  ;;  %v1594_v47 = vmul.f32 %v1587_v33, %v6850_v59 }
 0x44d   : > { %3199 = vbcast.lane.b32.xlu0 %v6824_v7, 265  ;;  %v1840_v25 = vmul.f32 %v6940_v15, %v6829_v38 }
 0x44e   : > { %5138 = vpow2.f32 %v1602_v27  ;;  %v1604_v8 = vmul.f32 1.442695, %v1594_v47 }
 0x44f   : > { %v6839_v29 = vpop.permute.xlu1 %3931 }
 0x450   : > { %9318 = vst [vmem:[#allocation92_spill] sm:$0xff] %v6839_v29  ;;  %v6843_v45 = vpop.permute.xlu0 %1809  ;;  %2733 = vbcast.lane.b32.xlu1 %v6724_v53, 305  ;;  %v1777_v53 = vmul.f32 1.442695, %v1768_v46  ;;  %v6861_v29 = vrot.slane %v6806_v28, %v6096_v55  ;;  %v1770_v46 = vmul.f32 %v6835_v26, %v6837_v6 }
 0x451   : > { %3207 = vbcast.lane.b32.xlu0 %v6824_v7, 281 }
 0x452   : > { %5140 = vpow2.f32 %v1777_v53  ;;  %v1940_v33 = vmul.f32 %v6861_v29, %v6814_v23  ;;  %v1781_v35 = vmul.f32 1.442695, %v1770_v46  ;;  %v1942_v5 = vmul.f32 %v6861_v29, %v6837_v6 }
 0x453   : > { %v6852_v21 = vpop.permute.xlu1 %4103  ;;  %5142 = vpow2.f32 %v1606_v51  ;;  %v1661_v51 = vrot.slane %v6874_v4, %v6120_v2 }
 0x454   : > { %9319 = vst [vmem:[#allocation93_spill] sm:$0xff] %v6852_v21  ;;  %v6855_v62 = vpop.permute.xlu0 %1869  ;;  %2829 = vbcast.lane.b32.xlu1 %v6752_v17, 257  ;;  %v1600_v21 = vmul.f32 1.442695, %v1592_v31  ;;  %v6880_v31 = vrot.slane %v6594_v44, %v6096_v55  ;;  %v1949_v47 = vmul.f32 1.442695, %v1940_v33  ;;  %v6903_v33 = vrot.slane %v6594_v44, %v6100_v57 }
 0x455   : > { %3263 = vbcast.lane.b32.xlu0 %v6824_v7, 297  ;;  %v1953_v11 = vmul.f32 1.442695, %v1942_v5 }
 0x456   : > { %5144 = vpow2.f32 %v1600_v21  ;;  %v6892_v21 = vrot.slane %v6806_v28, %v6098_v56 }
 0x457   : > { %v6864_v24 = vpop.permute.xlu1 %4219  ;;  %5146 = vpow2.f32 %v1604_v8  ;;  %v6907_v8 = vrot.slane %v6594_v44, %v6102_v58 }
 0x458   : > { %9320 = vst [vmem:[#allocation94_spill] sm:$0xff] %v6864_v24  ;;  %v6866_v27 = vpop.permute.xlu0 %1877  ;;  %2837 = vbcast.lane.b32.xlu1 %v6752_v17, 273  ;;  %v5139_v60 = vpop.eup %5138  ;;  %5148 = vpow2.f32 %v1781_v35  ;;  %v6923_v35 = vrot.slane %v6599_v36, %v6120_v2 }
 0x459   : > { %3271 = vbcast.lane.b32.xlu0 %v6824_v7, 313  ;;  %v1675_v37 = vmul.f32 0.0, %v5139_v60  ;;  %9321 = vst [vmem:[#allocation95_spill] sm:$0xff] %v6907_v8  ;;  %v6912_v60 = vrot.slane %v6594_v44, %v6110_v61  ;;  %5150 = vpow2.f32 %v1949_v47  ;;  %v6928_v47 = vsel %vm1537_vm11, %v6773_v10, %v1559_v16 }
 0x45a   : > { %9324 = vst [vmem:[#allocation98_spill] sm:$0xff] %v6923_v35  ;;  %9325 = vst [vmem:[#allocation99_spill] sm:$0xff] %v6928_v47  ;;  %v6936_v8 = vrot.slane %v6599_v36, %v6096_v55  ;;  %5152 = vpow2.f32 %v1953_v11  ;;  %v1767_v16 = vmul.f32 %v6835_v26, %v6841_v12  ;;  %v6950_v10 = vrot.slane %v6806_v28, %v6100_v57 }
 0x45b   : > { %v1625_v24 = vpop.permute.xlu1 %1624  ;;  %9322 = vst [vmem:[#allocation96_spill] sm:$0xff] %v6912_v60  ;;  %v2114_v60 = vmul.f32 %v6892_v21, %v6837_v6  ;;  %v6962_v11 = vmul.f32 %v6928_v47, %v6484_v20 }
 0x45c   : > { %v6882_v53 = vpop.permute.xlu0 %1973  ;;  %2897 = vbcast.lane.b32.xlu1 %v6752_v17, 289  ;;  %v5141_v34 = vpop.eup %5140  ;;  %9327 = vst [vmem:[#allocation101_spill] sm:$0xff] %v6936_v8  ;;  %v6954_v8 = vrot.slane %v6599_v36, %v6098_v56  ;;  %v2284_v38 = vmul.f32 %v6950_v10, %v6814_v23 }
 0x45d   : > { %3371 = vbcast.lane.b32.xlu0 %v6880_v31, 265  ;;  %v2125_v14 = vmul.f32 1.442695, %v2114_v60  ;;  %v6982_v60 = vrot.slane %v6806_v28, %v6102_v58 }
 0x45e   : > { %9329 = vst [vmem:[#allocation103_spill] sm:$0xff] %v6954_v8 }
 0x45f   : > { %v1629_v18 = vpop.permute.xlu1 %1628 }
 0x460   : > { %v1667_v46 = vmul.f32 %v1661_v51, %v1629_v18  ;;  %v6898_v30 = vpop.permute.xlu0 %1981  ;;  %2905 = vbcast.lane.b32.xlu1 %v6752_v17, 305  ;;  %v2112_v17 = vmul.f32 %v6892_v21, %v6814_v23 }
 0x461   : > { %3379 = vbcast.lane.b32.xlu0 %v6880_v31, 281 }
 0x462   : > { %v1683_v18 = vadd.f32 %v1675_v37, %v1667_v46  ;;  %v5143_v37 = vpop.eup %5142  ;;  %v6932_v46 = vrot.slane %v6599_v36, %v6094_v54 }
 0x463   : > { %v1633_v5 = vpop.permute.xlu1 %1632  ;;  %v5145_v39 = vpop.eup %5144  ;;  %v1677_v49 = vmul.f32 0.0, %v5143_v37 }
 0x464   : > { %9326 = vst [vmem:[#allocation100_spill] sm:$0xff] %v6932_v46  ;;  %v6942_v35 = vpop.permute.xlu0 %2041  ;;  %1512 = vperm.xlu1 %5104, %v6594_v44   ;;  %v1848_v32 = vmul.f32 %v5141_v34, %v1683_v18  ;;  %v6958_v46 = vrot.slane %v6599_v36, %v6100_v57  ;;  %v1666_v44 = vmul.f32 %v1661_v51, %v1625_v24  ;;  %v2121_v34 = vmul.f32 1.442695, %v2112_v17  ;;  %v5147_v8 = vpop.eup %5146 }
 0x465   : > { %9328 = vst [vmem:[#allocation102_spill] sm:$0xff] %v6942_v35  ;;  %3435 = vbcast.lane.b32.xlu0 %v6880_v31, 297  ;;  %v6966_v35 = vrot.slane %v6928_v47, %v6094_v54  ;;  %v1674_v24 = vmul.f32 0.0, %v5145_v39  ;;  %v1769_v17 = vmul.f32 %v6835_v26, %v6850_v59  ;;  %v5149_v39 = vpop.eup %5148  ;;  %v6988_v26 = vrot.slane %v6874_v4, %v6096_v55 }
 0x466   : > { %9330 = vst [vmem:[#allocation104_spill] sm:$0xff] %v6958_v46  ;;  %v6975_v20 = vadd.f32 %v1848_v32, %v1840_v25  ;;  %v1775_v46 = vmul.f32 1.442695, %v1767_v16  ;;  %5154 = vpow2.f32 %v2121_v34  ;;  %v1676_v32 = vmul.f32 0.0, %v5147_v8 }
 0x467   : > { %9331 = vst [vmem:[#allocation105_spill] sm:$0xff] %v6966_v35  ;;  %v1637_v0 = vpop.permute.xlu1 %1636  ;;  %5156 = vpow2.f32 %v2125_v14  ;;  %v2286_v16 = vmul.f32 %v6950_v10, %v6837_v6  ;;  %v1842_v35 = vmul.f32 %v6940_v15, %v6843_v45  ;;  %v1779_v14 = vmul.f32 1.442695, %v1769_v17 }
 0x468   : > { %v1669_v19 = vmul.f32 %v1661_v51, %v1637_v0  ;;  %v6970_v13 = vpop.permute.xlu0 %2049  ;;  %1507 = vperm.xlu1 %5104, %v6599_v36   ;;  %v1668_v0 = vmul.f32 %v1661_v51, %v1633_v5  ;;  %v5151_v36 = vpop.eup %5150  ;;  %5158 = vpow2.f32 %v1775_v46  ;;  %v2293_v8 = vmul.f32 1.442695, %v2284_v38 }
 0x469   : > { %9332 = vst [vmem:[#allocation106_spill] sm:$0xff] %v6970_v13  ;;  %3443 = vbcast.lane.b32.xlu0 %v6880_v31, 313  ;;  %v6984_v13 = vadd.f32 %v1674_v24, %v1666_v44  ;;  %v2020_v44 = vmul.f32 %v5151_v36, %v6975_v20  ;;  %v7012_v36 = vrot.slane %v6928_v47, %v6098_v56  ;;  %v2297_v17 = vmul.f32 1.442695, %v2286_v16 }
 0x46a   : > { %v1685_v37 = vadd.f32 %v1677_v49, %v1669_v19  ;;  %v1723_v19 = vmul.f32 %v6808_v22, %v1683_v18  ;;  %v7002_v45 = vadd.f32 %v1676_v32, %v1668_v0  ;;  %v2456_v22 = vmul.f32 %v6982_v60, %v6814_v23  ;;  %v5153_v18 = vpop.eup %5152 }
 0x46b   : > { %v1693_v25 = vpop.permute.xlu1 %1692  ;;  %5160 = vpow2.f32 %v1779_v14  ;;  %v7039_v14 = vrot.slane %v6874_v4, %v6098_v56 }
 0x46c   : > { %v1850_v49 = vmul.f32 %v5149_v39, %v1685_v37  ;;  %v1722_v51 = vmul.f32 %v1693_v25, %v6984_v13  ;;  %v2146_v5 = vpop.permute.xlu0 %2145  ;;  %3023 = vbcast.lane.b32.xlu1 %v6786_v40, 257  ;;  %v7008_v39 = vrot.slane %v6928_v47, %v6096_v55  ;;  %v1725_v38 = vmul.f32 %v6818_v52, %v1685_v37 }
 0x46d   : > { %3543 = vbcast.lane.b32.xlu0 %v6896_v50, 265  ;;  %v1731_v25 = vsel %vm1396_vm9, %v1723_v19, 0.0  ;;  %v2014_v52 = vmul.f32 %v6988_v26, %v6898_v30  ;;  %5162 = vpow2.f32 %v2293_v8  ;;  %v2465_v16 = vmul.f32 1.442695, %v2456_v22 }
 0x46e   : > { %v6999_v34 = vadd.f32 %v1850_v49, %v1842_v35  ;;  %v1730_v24 = vsel %vm1396_vm9, %v1722_v51, 0.0  ;;  %9333 = vst [vmem:[#allocation107_spill] sm:$0xff] %v7008_v39  ;;  %v2012_v35 = vmul.f32 %v6988_v26, %v6882_v53  ;;  %v2458_v53 = vmul.f32 %v6982_v60, %v6837_v6 }
 0x46f   : > { %v1701_v46 = vpop.permute.xlu1 %1700  ;;  %v1732_v39 = vadd.f32 %v1731_v25, %v1730_v24  ;;  %v7031_v19 = vrot.slane %v6928_v47, %v6100_v57  ;;  %v1735_v8 = vsel %vm1396_vm9, %v1725_v38, 0.0  ;;  %v7051_v25 = vrot.slane %v6928_v47, %v6120_v2 }
 0x470   : > { %v2022_v0 = vmul.f32 %v5153_v18, %v6999_v34  ;;  %v1724_v32 = vmul.f32 %v1701_v46, %v7002_v45  ;;  %v2154_v49 = vpop.permute.xlu0 %2153  ;;  %3031 = vbcast.lane.b32.xlu1 %v6786_v40, 273  ;;  %v7021_v51 = vadd.f32 %v2020_v44, %v2012_v35  ;;  %v7035_v44 = vrot.slane %v6928_v47, %v6102_v58  ;;  %v5155_v35 = vpop.eup %5154 }
 0x471   : > { %3551 = vbcast.lane.b32.xlu0 %v6896_v50, 281  ;;  %9334 = vst [vmem:[#allocation108_spill] sm:$0xff] %v7031_v19  ;;  %v1939_v46 = vmul.f32 %v6861_v29, %v6841_v12  ;;  %5164 = vpow2.f32 %v2297_v17  ;;  %v7058_v38 = vrot.slane %v6962_v11, %v6120_v2  ;;  %v7063_v47 = vrot.slane %v6962_v11, %v6094_v54 }
 0x472   : > { %v1733_v37 = vsel %vm1396_vm9, %v1724_v32, 0.0  ;;  %9335 = vst [vmem:[#allocation109_spill] sm:$0xff] %v7035_v44  ;;  %v7041_v30 = vadd.f32 %v2022_v0, %v2014_v52  ;;  %v5157_v32 = vpop.eup %5156  ;;  %v2192_v0 = vmul.f32 %v5155_v35, %v7021_v51  ;;  %5166 = vpow2.f32 %v2465_v16 }
 0x473   : > { %v1734_v24 = vadd.f32 %v1733_v37, %v1732_v39  ;;  %v1798_v18 = vpop.permute.xlu1 %1797  ;;  %v2184_v39 = vmul.f32 %v7039_v14, %v2146_v5  ;;  %v2469_v44 = vmul.f32 1.442695, %v2458_v53  ;;  %v5159_v19 = vpop.eup %5158  ;;  %v7067_v5 = vrot.slane %v6962_v11, %v6096_v55 }
 0x474   : > { %v7044_v22 = vpop.permute.xlu0 %2213  ;;  %3087 = vbcast.lane.b32.xlu1 %v6786_v40, 289  ;;  %v1839_v52 = vmul.f32 %v6940_v15, %v1798_v18  ;;  %v1941_v17 = vmul.f32 %v6861_v29, %v6850_v59  ;;  %v7077_v53 = vrot.slane %v6962_v11, %v6100_v57  ;;  %v2194_v18 = vmul.f32 %v5157_v32, %v7041_v30 }
 0x475   : > { %9336 = vst [vmem:[#allocation110_spill] sm:$0xff] %v7044_v22  ;;  %v1736_v37 = vadd.f32 %v1735_v8, %v1734_v24  ;;  %3607 = vbcast.lane.b32.xlu0 %v6896_v50, 297  ;;  %v7073_v8 = vrot.slane %v6962_v11, %v6098_v56  ;;  %v1847_v54 = vmul.f32 %v5159_v19, %v6984_v13  ;;  %v1947_v29 = vmul.f32 1.442695, %v1939_v46 }
 0x476   : > { %9337 = vst [vmem:[#allocation111_spill] sm:$0xff] %v7077_v53  ;;  %v7084_v2 = vadd.f32 %v2192_v0, %v2184_v39  ;;  %v7089_v56 = vrot.slane %v6806_v28, %v6110_v61  ;;  %v2186_v22 = vmul.f32 %v7039_v14, %v2154_v49  ;;  %5168 = vpow2.f32 %v2469_v44 }
 0x477   : > { %v1737_v24 = vrot.slane %v1736_v37, 4  ;;  %v1806_v35 = vpop.permute.xlu1 %1805  ;;  %v7093_v53 = vadd.f32 %v1847_v54, %v1839_v52  ;;  %v7097_v13 = vrot.slane %v6962_v11, %v6102_v58  ;;  %v7101_v46 = vrot.slane %v6874_v4, %v6100_v57 }
 0x478   : > { %v7079_v16 = vpop.permute.xlu0 %2221  ;;  %3095 = vbcast.lane.b32.xlu1 %v6786_v40, 305  ;;  %v5161_v40 = vpop.eup %5160  ;;  %v1951_v39 = vmul.f32 1.442695, %v1941_v17  ;;  %v7103_v0 = vadd.f32 %v2194_v18, %v2186_v22  ;;  %v1896_v54 = vmul.f32 %v6855_v62, %v6975_v20  ;;  %5170 = vpow2.f32 %v1947_v29 }
 0x479   : > { %9338 = vst [vmem:[#allocation112_spill] sm:$0xff] %v7079_v16  ;;  %v1738_v55 = vadd.f32 %v1737_v24, %v1736_v37  ;;  %3615 = vbcast.lane.b32.xlu0 %v6896_v50, 313  ;;  %v1841_v16 = vmul.f32 %v6940_v15, %v1806_v35  ;;  %9339 = vst [vmem:[#allocation113_spill] sm:$0xff] %v7097_v13  ;;  %v5163_v37 = vpop.eup %5162  ;;  %v1849_v44 = vmul.f32 %v5161_v40, %v7002_v45 }
 0x47a   : > { %v2364_v35 = vmul.f32 %v5163_v37, %v7084_v2  ;;  %v7115_v22 = vrot.slane %v6962_v11, %v6110_v61  ;;  %v2628_v17 = vmul.f32 %v7089_v56, %v6814_v23  ;;  %5172 = vpow2.f32 %v1951_v39 }
 0x47b   : > { %v1739_v19 = vrot.slane %v1738_v55, 2  ;;  %v1866_v32 = vpop.permute.xlu1 %1865  ;;  %v7118_v62 = vadd.f32 %v1849_v44, %v1841_v16  ;;  %v5165_v45 = vpop.eup %5164  ;;  %v1898_v16 = vmul.f32 %v6866_v27, %v6999_v34 }
 0x47c   : > { %v1895_v15 = vmul.f32 %v1866_v32, %v7093_v53  ;;  %v2318_v49 = vpop.permute.xlu0 %2317  ;;  %3195 = vbcast.lane.b32.xlu1 %v6824_v7, 257  ;;  %9340 = vst [vmem:[#allocation114_spill] sm:$0xff] %v7115_v22  ;;  %v5167_v29 = vpop.eup %5166  ;;  %v1904_v32 = vsel %vm1396_vm9, %v1896_v54, 0.0  ;;  %v7141_v54 = vmul.f32 %v7058_v38, %v6633_v1  ;;  %v2637_v34 = vmul.f32 1.442695, %v2628_v17 }
 0x47d   : > { %v1740_v52 = vadd.f32 %v1739_v19, %v1738_v55  ;;  %v2356_v24 = vmul.f32 %v7101_v46, %v2318_v49  ;;  %3715 = vbcast.lane.b32.xlu0 %v6903_v33, 265  ;;  %v7124_v55 = vmul.f32 %v7058_v38, %v6631_v48  ;;  %v2366_v49 = vmul.f32 %v5165_v45, %v7103_v0  ;;  %v9370_v13 = vld [vmem:[#allocation111_spill] sm:$0xff] }
 0x47e   : > { %v1903_v20 = vsel %vm1396_vm9, %v1895_v15, 0.0  ;;  %v7159_v17 = vmul.f32 %v7063_v47, %v6652_v9  ;;  %5174 = vpow2.f32 %v2637_v34 }
 0x47f   : > { %9341 = vst [vmem:[#allocation115_spill] sm:$0xff] %v7124_v55  ;;  %v1741_v18 = vrot.slane %v1740_v52, 1  ;;  %v1874_v40 = vpop.permute.xlu1 %1873  ;;  %v7126_v19 = vadd.f32 %v2364_v35, %v2356_v24  ;;  %v1905_v44 = vadd.f32 %v1904_v32, %v1903_v20  ;;  %v2630_v24 = vmul.f32 %v7089_v56, %v6837_v6 }
 0x480   : > { %v1897_v37 = vmul.f32 %v1874_v40, %v7118_v62  ;;  %v2326_v15 = vpop.permute.xlu0 %2325  ;;  %3203 = vbcast.lane.b32.xlu1 %v6824_v7, 273  ;;  %v7152_v35 = vmul.f32 %v7058_v38, %v6637_v63  ;;  %9343 = vst [vmem:[#allocation117_spill] sm:$0xff] %v7159_v17  ;;  %v7163_v40 = vmul.f32 %v7063_v47, %v6654_v3  ;;  %v1908_v63 = vsel %vm1396_vm9, %v1898_v16, 0.0 }
 0x481   : > { %v1742_v48 = vadd.f32 %v1741_v18, %v1740_v52  ;;  %v2358_v57 = vmul.f32 %v7101_v46, %v2326_v15  ;;  %3723 = vbcast.lane.b32.xlu0 %v6903_v33, 281  ;;  %v7137_v39 = vmul.f32 %v5167_v29, %v7126_v19  ;;  %v7148_v52 = vmul.f32 %v7058_v38, %v6635_v41  ;;  %v5169_v18 = vpop.eup %5168  ;;  %v9346_v29 = vld [vmem:[#allocation54_spill] sm:$0xff] }
 0x482   : > { %v1906_v27 = vsel %vm1396_vm9, %v1897_v37, 0.0  ;;  %v7167_v41 = vmul.f32 %v7063_v47, %v6657_v42  ;;  %v2111_v42 = vmul.f32 %v6892_v21, %v6841_v12  ;;  %v7185_v32 = vmul.f32 %v7067_v5, %v9346_v29  ;;  %v5171_v15 = vpop.eup %5170 }
 0x483   : > { %9342 = vst [vmem:[#allocation116_spill] sm:$0xff] %v7148_v52  ;;  %1757 = vst.msk [vmem:[#allocation3] sm:$0x1] %vm1756_vm12, %v1742_v48  ;;  %v1907_v20 = vadd.f32 %v1906_v27, %v1905_v44  ;;  %v1970_v45 = vpop.permute.xlu1 %1969  ;;  %v7155_v1 = vadd.f32 %v2366_v49, %v2358_v57  ;;  %v7175_v57 = vmul.f32 %v7063_v47, %v6659_v43  ;;  %v2641_v37 = vmul.f32 1.442695, %v2630_v24  ;;  %v9348_v43 = vld [vmem:[#allocation55_spill] sm:$0xff] }
 0x484   : > { %9344 = vst [vmem:[#allocation118_spill] sm:$0xff] %v7167_v41  ;;  %v7170_v38 = vpop.permute.xlu0 %2385  ;;  %3259 = vbcast.lane.b32.xlu1 %v6824_v7, 289  ;;  %9347 = vst [vmem:[#allocation54_spill] sm:$0xff] %v7185_v32  ;;  %v2011_v16 = vmul.f32 %v6988_v26, %v1970_v45  ;;  %v7190_v47 = vmul.f32 %v7067_v5, %v9348_v43  ;;  %v9349_v49 = vld [vmem:[#allocation56_spill] sm:$0xff]  ;;  %v9351_v44 = vld [vmem:[#allocation57_spill] sm:$0xff]  ;;  %v2019_v24 = vmul.f32 %v5171_v15, %v7093_v53  ;;  %v5173_v43 = vpop.eup %5172 }
 0x485   : > { %9345 = vst [vmem:[#allocation119_spill] sm:$0xff] %v7175_v57  ;;  %v1909_v9 = vadd.f32 %v1908_v63, %v1907_v20  ;;  %3779 = vbcast.lane.b32.xlu0 %v6903_v33, 297  ;;  %v7179_v3 = vmul.f32 %v5169_v18, %v7155_v1  ;;  %v7194_v48 = vmul.f32 %v7067_v5, %v9349_v49  ;;  %v9353_v63 = vld [vmem:[#allocation32_spill] sm:$0xff]  ;;  %v9355_v49 = vld [vmem:[#allocation62_spill] sm:$0xff]  ;;  %5176 = vpow2.f32 %v2641_v37 }
 0x486   : > { %v7198_v27 = vmul.f32 %v7067_v5, %v9351_v44  ;;  %v7202_v45 = vrot.slane %v6962_v11, %v9353_v63  ;;  %v7210_v29 = vrot.slane %v6874_v4, %v6102_v58  ;;  %v2113_v5 = vmul.f32 %v6892_v21, %v6850_v59  ;;  %v9357_v11 = vld [vmem:[#allocation63_spill] sm:$0xff]  ;;  %v9359_v58 = vld [vmem:[#allocation64_spill] sm:$0xff] }
 0x487   : > { %9350 = vst [vmem:[#allocation55_spill] sm:$0xff] %v7194_v48  ;;  %v1910_v20 = vrot.slane %v1909_v9, 4  ;;  %v1978_v18 = vpop.permute.xlu1 %1977  ;;  %v7216_v44 = vmul.f32 %v7073_v8, %v9355_v49  ;;  %v7220_v48 = vmul.f32 %v7073_v8, %v9357_v11  ;;  %v7224_v15 = vadd.f32 %v2019_v24, %v2011_v16 }
 0x488   : > { %9352 = vst [vmem:[#allocation56_spill] sm:$0xff] %v7198_v27  ;;  %9354 = vst [vmem:[#allocation57_spill] sm:$0xff] %v7202_v45  ;;  %v7204_v34 = vpop.permute.xlu0 %2393  ;;  %3267 = vbcast.lane.b32.xlu1 %v6824_v7, 305  ;;  %v2119_v7 = vmul.f32 1.442695, %v2111_v42  ;;  %v2013_v53 = vmul.f32 %v6988_v26, %v1978_v18  ;;  %v7228_v21 = vrot.slane %v6806_v28, %v9353_v63  ;;  %v9363_v42 = vld [vmem:[#allocation102_spill] sm:$0xff] }
 0x489   : > { %9356 = vst [vmem:[#allocation62_spill] sm:$0xff] %v7216_v44  ;;  %9358 = vst [vmem:[#allocation63_spill] sm:$0xff] %v7220_v48  ;;  %v1911_v41 = vadd.f32 %v1910_v20, %v1909_v9  ;;  %3787 = vbcast.lane.b32.xlu0 %v6903_v33, 313  ;;  %v7232_v49 = vmul.f32 %v7073_v8, %v9359_v58  ;;  %v9361_v44 = vld [vmem:[#allocation65_spill] sm:$0xff]  ;;  %v7240_v26 = vrot.slane %v6874_v4, %v6110_v61  ;;  %v9375_v48 = vld [vmem:[#allocation96_spill] sm:$0xff] }
 0x48a   : > { %v7236_v11 = vmul.f32 %v7073_v8, %v9361_v44  ;;  %v2068_v16 = vmul.f32 %v9363_v42, %v7021_v51  ;;  %v2021_v58 = vmul.f32 %v5173_v43, %v7118_v62  ;;  %v2123_v18 = vmul.f32 1.442695, %v2113_v5  ;;  %v9364_v44 = vld [vmem:[#allocation95_spill] sm:$0xff] }
 0x48b   : > { %9360 = vst [vmem:[#allocation64_spill] sm:$0xff] %v7232_v49  ;;  %v1912_v9 = vrot.slane %v1911_v41, 2  ;;  %v2038_v20 = vpop.permute.xlu1 %2037  ;;  %5178 = vpow2.f32 %v2119_v7  ;;  %v2283_v49 = vmul.f32 %v6950_v10, %v6841_v12  ;;  %v2800_v62 = vmul.f32 %v7228_v21, %v6814_v23 }
 0x48c   : > { %9362 = vst [vmem:[#allocation65_spill] sm:$0xff] %v7236_v11  ;;  %v2067_v28 = vmul.f32 %v2038_v20, %v7224_v15  ;;  %v2490_v37 = vpop.permute.xlu0 %2489  ;;  %3367 = vbcast.lane.b32.xlu1 %v6880_v31, 257  ;;  %v7252_v51 = vadd.f32 %v2021_v58, %v2013_v53  ;;  %v2285_v20 = vmul.f32 %v6950_v10, %v6850_v59  ;;  %v2076_v53 = vsel %vm1396_vm9, %v2068_v16, 0.0 }
 0x48d   : > { %v1913_v24 = vadd.f32 %v1912_v9, %v1911_v41  ;;  %v2528_v8 = vmul.f32 %v7210_v29, %v2490_v37  ;;  %3887 = vbcast.lane.b32.xlu0 %v9364_v44, 265  ;;  %v2972_v7 = vmul.f32 %v7051_v25, %v6814_v23  ;;  %v9365_v9 = vld [vmem:[#allocation105_spill] sm:$0xff]  ;;  %v9366_v37 = vld [vmem:[#allocation106_spill] sm:$0xff]  ;;  %5180 = vpow2.f32 %v2123_v18 }
 0x48e   : > { %v2075_v32 = vsel %vm1396_vm9, %v2067_v28, 0.0  ;;  %v3146_v42 = vmul.f32 %v9365_v9, %v6814_v23  ;;  %v5175_v28 = vpop.eup %5174  ;;  %v2070_v10 = vmul.f32 %v9366_v37, %v7041_v30  ;;  %v2291_v45 = vmul.f32 1.442695, %v2283_v49 }
 0x48f   : > { %v1914_v5 = vrot.slane %v1913_v24, 1  ;;  %v2046_v41 = vpop.permute.xlu1 %2045  ;;  %v7259_v43 = vadd.f32 %v7137_v39, %v2528_v8  ;;  %v2077_v8 = vadd.f32 %v2076_v53, %v2075_v32  ;;  %v2809_v22 = vmul.f32 1.442695, %v2800_v62 }
 0x490   : > { %v2069_v58 = vmul.f32 %v2046_v41, %v7252_v51  ;;  %v2498_v52 = vpop.permute.xlu0 %2497  ;;  %3375 = vbcast.lane.b32.xlu1 %v6880_v31, 273  ;;  %v2802_v30 = vmul.f32 %v7228_v21, %v6837_v6  ;;  %v2080_v49 = vsel %vm1396_vm9, %v2070_v10, 0.0  ;;  %v7292_v53 = vrot.slane %v6874_v4, %v9353_v63 }
 0x491   : > { %v1915_v39 = vadd.f32 %v1914_v5, %v1913_v24  ;;  %v2530_v17 = vmul.f32 %v7210_v29, %v2498_v52  ;;  %3891 = vbcast.lane.b32.xlu0 %v9364_v44, 273  ;;  %v7273_v55 = vmul.f32 %v5175_v28, %v7259_v43  ;;  %v9368_v52 = vld [vmem:[#allocation107_spill] sm:$0xff]  ;;  %v3490_v5 = vmul.f32 %v7012_v36, %v6814_v23  ;;  %v5177_v28 = vpop.eup %5176 }
 0x492   : > { %v2078_v16 = vsel %vm1396_vm9, %v2069_v58, 0.0  ;;  %v3318_v24 = vmul.f32 %v9368_v52, %v6814_v23  ;;  %v2295_v37 = vmul.f32 1.442695, %v2285_v20  ;;  %v2455_v10 = vmul.f32 %v6982_v60, %v6841_v12 }
 0x493   : > { %1929 = vst.msk [vmem:[#allocation3 + $0x1] sm:$0x1] %vm1756_vm12, %v1915_v39  ;;  %v2079_v41 = vadd.f32 %v2078_v16, %v2077_v8  ;;  %v2142_v18 = vpop.permute.xlu1 %2141  ;;  %v7280_v32 = vadd.f32 %v7179_v3, %v2530_v17  ;;  %v7294_v17 = vmul.f32 1.442695, %v2972_v7  ;;  %v7300_v39 = vmul.f32 1.442695, %v3146_v42 }
 0x494   : > { %v7287_v62 = vpop.permute.xlu0 %2557  ;;  %3431 = vbcast.lane.b32.xlu1 %v6880_v31, 289  ;;  %v2183_v8 = vmul.f32 %v7039_v14, %v2142_v18  ;;  %5182 = vpow2.f32 %v2809_v22  ;;  %v2813_v16 = vmul.f32 1.442695, %v2802_v30  ;;  %v2974_v4 = vmul.f32 %v7051_v25, %v6837_v6  ;;  %v9372_v18 = vld [vmem:[#allocation71_spill] sm:$0xff] }
 0x495   : > { %9367 = vst [vmem:[#allocation102_spill] sm:$0xff] %v7280_v32  ;;  %v2081_v3 = vadd.f32 %v2080_v49, %v2079_v41  ;;  %3895 = vbcast.lane.b32.xlu0 %v9364_v44, 281  ;;  %v7298_v58 = vmul.f32 %v5177_v28, %v7280_v32  ;;  %v5179_v20 = vpop.eup %5178  ;;  %v7307_v49 = vmul.f32 1.442695, %v3318_v24  ;;  %v7309_v11 = vmul.f32 1.442695, %v3490_v5 }
 0x496   : > { %v3148_v42 = vmul.f32 %v9365_v9, %v6837_v6  ;;  %v9369_v28 = vld [vmem:[#allocation70_spill] sm:$0xff]  ;;  %v7319_v22 = vmul.f32 %v9370_v13, %v9372_v18  ;;  %v2191_v24 = vmul.f32 %v5179_v20, %v7224_v15  ;;  %v2457_v5 = vmul.f32 %v6982_v60, %v6850_v59 }
 0x497   : > { %v2082_v7 = vrot.slane %v2081_v3, 4  ;;  %v2150_v41 = vpop.permute.xlu1 %2149  ;;  %v7315_v27 = vmul.f32 %v9370_v13, %v9369_v28  ;;  %5184 = vpow2.f32 %v2291_v45  ;;  %v3320_v28 = vmul.f32 %v9368_v52, %v6837_v6  ;;  %v5181_v57 = vpop.eup %5180  ;;  %v9376_v45 = vld [vmem:[#allocation110_spill] sm:$0xff] }
 0x498   : > { %9373 = vst [vmem:[#allocation105_spill] sm:$0xff] %v7319_v22  ;;  %v7321_v30 = vpop.permute.xlu0 %2565  ;;  %3439 = vbcast.lane.b32.xlu1 %v6880_v31, 305  ;;  %v2185_v18 = vmul.f32 %v7039_v14, %v2150_v41  ;;  %v2199_v22 = vadd.f32 %v2191_v24, %v2183_v8  ;;  %5186 = vpow2.f32 %v2813_v16  ;;  %v7333_v20 = vmul.f32 1.442695, %v3148_v42  ;;  %v9377_v41 = vld [vmem:[#allocation72_spill] sm:$0xff] }
 0x499   : > { %9371 = vst [vmem:[#allocation95_spill] sm:$0xff] %v7315_v27  ;;  %9374 = vst [vmem:[#allocation106_spill] sm:$0xff] %v7321_v30  ;;  %v2083_v32 = vadd.f32 %v2082_v7, %v2081_v3  ;;  %4059 = vbcast.lane.b32.xlu0 %v9375_v48, 265  ;;  %v2463_v27 = vmul.f32 1.442695, %v2455_v10  ;;  %5188 = vpow2.f32 %v2295_v37  ;;  %v2627_v60 = vmul.f32 %v7089_v56, %v6841_v12 }
 0x49a   : > { %v7331_v30 = vmul.f32 1.442695, %v2974_v4  ;;  %v2240_v3 = vmul.f32 %v9376_v45, %v7084_v2  ;;  %v2193_v14 = vmul.f32 %v5181_v57, %v7252_v51  ;;  %v2467_v8 = vmul.f32 1.442695, %v2457_v5  ;;  %v9379_v57 = vld [vmem:[#allocation73_spill] sm:$0xff] }
 0x49b   : > { %v2084_v31 = vrot.slane %v2083_v32, 2  ;;  %v2210_v15 = vpop.permute.xlu1 %2209  ;;  %v7343_v37 = vmul.f32 1.442695, %v3320_v28  ;;  %5190 = vpow2.f32 %v2463_v27  ;;  %v7347_v42 = vmul.f32 %v9370_v13, %v9377_v41 }
 0x49c   : > { %v2239_v7 = vmul.f32 %v2210_v15, %v2199_v22  ;;  %v2662_v10 = vpop.permute.xlu0 %2661  ;;  %3539 = vbcast.lane.b32.xlu1 %v6896_v50, 257  ;;  %v2201_v24 = vadd.f32 %v2193_v14, %v2185_v18  ;;  %v2629_v15 = vmul.f32 %v7089_v56, %v6850_v59  ;;  %v7354_v51 = vmul.f32 %v9370_v13, %v9379_v57 }
 0x49d   : > { %v2085_v16 = vadd.f32 %v2084_v31, %v2083_v32  ;;  %v2700_v4 = vmul.f32 %v7240_v26, %v2662_v10  ;;  %4063 = vbcast.lane.b32.xlu0 %v9375_v48, 273  ;;  %9378 = vst [vmem:[#allocation107_spill] sm:$0xff] %v7347_v42  ;;  %v7359_v27 = vmul.f32 1.442695, %v2627_v60  ;;  %v2248_v45 = vsel %vm1396_vm9, %v2240_v3, 0.0 }
 0x49e   : > { %v2247_v2 = vsel %vm1396_vm9, %v2239_v7, 0.0  ;;  %v5183_v31 = vpop.eup %5182  ;;  %v9380_v7 = vld [vmem:[#allocation112_spill] sm:$0xff]  ;;  %5192 = vpow2.f32 %v2467_v8  ;;  %v7372_v3 = vmul.f32 1.442695, %v2629_v15  ;;  %v2971_v57 = vmul.f32 %v7051_v25, %v6841_v12 }
 0x49f   : > { %v2086_v32 = vrot.slane %v2085_v16, 1  ;;  %v2218_v5 = vpop.permute.xlu1 %2217  ;;  %v7357_v28 = vadd.f32 %v7273_v55, %v2700_v4  ;;  %v2242_v18 = vmul.f32 %v9380_v7, %v7103_v0  ;;  %v2249_v13 = vadd.f32 %v2248_v45, %v2247_v2 }
 0x4a0   : > { %v2241_v10 = vmul.f32 %v2218_v5, %v2201_v24  ;;  %v2670_v14 = vpop.permute.xlu0 %2669  ;;  %3547 = vbcast.lane.b32.xlu1 %v6896_v50, 273  ;;  %5194 = vpow2.f32 %v7294_v17  ;;  %v2799_v0 = vmul.f32 %v7228_v21, %v6841_v12 }
 0x4a1   : > { %v2087_v56 = vadd.f32 %v2086_v32, %v2085_v16  ;;  %v2702_v41 = vmul.f32 %v7240_v26, %v2670_v14  ;;  %4067 = vbcast.lane.b32.xlu0 %v9375_v48, 281  ;;  %v7368_v55 = vmul.f32 %v5183_v31, %v7357_v28  ;;  %v5185_v4 = vpop.eup %5184  ;;  %v3145_v32 = vmul.f32 %v9365_v9, %v6841_v12 }
 0x4a2   : > { %v2250_v60 = vsel %vm1396_vm9, %v2241_v10, 0.0  ;;  %v5187_v17 = vpop.eup %5186  ;;  %v2252_v15 = vsel %vm1396_vm9, %v2242_v18, 0.0  ;;  %v2363_v45 = vmul.f32 %v5185_v4, %v2199_v22  ;;  %5196 = vpow2.f32 %v7300_v39  ;;  %v9381_v10 = vld [vmem:[#allocation97_spill] sm:$0xff] }
 0x4a3   : > { %2101 = vst.msk [vmem:[#allocation3 + $0x2] sm:$0x1] %vm1756_vm12, %v2087_v56  ;;  %v2251_v8 = vadd.f32 %v2250_v60, %v2249_v13  ;;  %v2314_v16 = vpop.permute.xlu1 %2313  ;;  %v7378_v2 = vadd.f32 %v7298_v58, %v2702_v41  ;;  %v5189_v58 = vpop.eup %5188  ;;  %v3317_v56 = vmul.f32 %v9368_v52, %v6841_v12  ;;  %v3489_v18 = vmul.f32 %v7012_v36, %v6841_v12 }
 0x4a4   : > { %v2355_v5 = vmul.f32 %v7101_v46, %v2314_v16  ;;  %v7386_v31 = vpop.permute.xlu0 %2729  ;;  %3603 = vbcast.lane.b32.xlu1 %v6896_v50, 289  ;;  %5198 = vpow2.f32 %v7307_v49  ;;  %v7399_v41 = vmul.f32 1.442695, %v2799_v0  ;;  %v2801_v39 = vmul.f32 %v7228_v21, %v6850_v59 }
 0x4a5   : > { %v2253_v7 = vadd.f32 %v2252_v15, %v2251_v8  ;;  %4231 = vbcast.lane.b32.xlu0 %v9381_v10, 265  ;;  %v7392_v14 = vmul.f32 %v5187_v17, %v7378_v2  ;;  %v5191_v22 = vpop.eup %5190  ;;  %v7403_v8 = vmul.f32 1.442695, %v2971_v57  ;;  %v7405_v16 = vmul.f32 1.442695, %v3145_v32 }
 0x4a6   : > { %v2371_v13 = vadd.f32 %v2363_v45, %v2355_v5  ;;  %v2973_v17 = vmul.f32 %v7051_v25, %v6850_v59  ;;  %v2365_v49 = vmul.f32 %v5189_v58, %v2201_v24  ;;  %5200 = vpow2.f32 %v7309_v11 }
 0x4a7   : > { %v2254_v60 = vrot.slane %v2253_v7, 4  ;;  %v2322_v4 = vpop.permute.xlu1 %2321  ;;  %v7417_v57 = vmul.f32 1.442695, %v3317_v56  ;;  %v7419_v32 = vmul.f32 1.442695, %v3489_v18  ;;  %v3147_v25 = vmul.f32 %v9365_v9, %v6850_v59  ;;  %v9382_v18 = vld [vmem:[#allocation108_spill] sm:$0xff] }
 0x4a8   : > { %v2357_v15 = vmul.f32 %v7101_v46, %v2322_v4  ;;  %v7410_v5 = vpop.permute.xlu0 %2737  ;;  %3611 = vbcast.lane.b32.xlu1 %v6896_v50, 305  ;;  %v7414_v21 = vmul.f32 %v5191_v22, %v2371_v13  ;;  %v5193_v46 = vpop.eup %5192  ;;  %v2412_v45 = vmul.f32 %v7170_v38, %v7126_v19  ;;  %v7425_v24 = vmul.f32 1.442695, %v2801_v39  ;;  %v9383_v38 = vld [vmem:[#allocation109_spill] sm:$0xff] }
 0x4a9   : > { %v2255_v0 = vadd.f32 %v2254_v60, %v2253_v7  ;;  %4235 = vbcast.lane.b32.xlu0 %v9381_v10, 273  ;;  %v3319_v11 = vmul.f32 %v9368_v52, %v6850_v59  ;;  %5202 = vpow2.f32 %v7331_v30  ;;  %v7430_v56 = vmul.f32 1.442695, %v2973_v17 }
 0x4aa   : > { %v2373_v50 = vadd.f32 %v2365_v49, %v2357_v15  ;;  %v3662_v22 = vmul.f32 %v9382_v18, %v6814_v23  ;;  %v5195_v9 = vpop.eup %5194  ;;  %5204 = vpow2.f32 %v7333_v20  ;;  %v3834_v52 = vmul.f32 %v9383_v38, %v6814_v23 }
 0x4ab   : > { %v2256_v58 = vrot.slane %v2255_v0, 2  ;;  %v2382_v7 = vpop.permute.xlu1 %2381  ;;  %5206 = vpow2.f32 %v7359_v27  ;;  %v7443_v17 = vmul.f32 1.442695, %v3147_v25  ;;  %v2420_v15 = vsel %vm1396_vm9, %v2412_v45, 0.0 }
 0x4ac   : > { %v2411_v60 = vmul.f32 %v2382_v7, %v2371_v13  ;;  %v2834_v4 = vpop.permute.xlu0 %2833  ;;  %3711 = vbcast.lane.b32.xlu1 %v6903_v33, 257  ;;  %v7436_v19 = vmul.f32 %v5193_v46, %v2373_v50  ;;  %v5197_v13 = vpop.eup %5196  ;;  %v7447_v20 = vmul.f32 1.442695, %v3319_v11  ;;  %v9384_v46 = vld [vmem:[#allocation99_spill] sm:$0xff]  ;;  %v3492_v27 = vmul.f32 %v7012_v36, %v6837_v6 }
 0x4ad   : > { %v2257_v39 = vadd.f32 %v2256_v58, %v2255_v0  ;;  %v2872_v30 = vmul.f32 %v7292_v53, %v2834_v4  ;;  %3951 = vbcast.lane.b32.xlu0 %v9364_v44, 297  ;;  %v7451_v7 = vrot.slane %v9384_v46, %v6110_v61  ;;  %v2414_v45 = vmul.f32 %v7204_v34, %v7155_v1 }
 0x4ae   : > { %v2419_v49 = vsel %vm1396_vm9, %v2411_v60, 0.0  ;;  %v5199_v25 = vpop.eup %5198  ;;  %5208 = vpow2.f32 %v7343_v37  ;;  %v3664_v37 = vmul.f32 %v9382_v18, %v6837_v6 }
 0x4af   : > { %v2258_v0 = vrot.slane %v2257_v39, 1  ;;  %v2421_v58 = vadd.f32 %v2420_v15, %v2419_v49  ;;  %v2390_v4 = vpop.permute.xlu1 %2389  ;;  %v7454_v42 = vadd.f32 %v7368_v55, %v2872_v30  ;;  %v7464_v15 = vrot.slane %v9384_v46, %v9353_v63 }
 0x4b0   : > { %v2413_v60 = vmul.f32 %v2390_v4, %v2373_v50  ;;  %v2842_v11 = vpop.permute.xlu0 %2841  ;;  %3719 = vbcast.lane.b32.xlu1 %v6903_v33, 273  ;;  %5210 = vpow2.f32 %v7372_v3  ;;  %v7470_v1 = vpop.eup %5200  ;;  %v3671_v50 = vmul.f32 1.442695, %v3662_v22  ;;  %v3843_v4 = vmul.f32 1.442695, %v3834_v52 }
 0x4b1   : > { %v2259_v49 = vadd.f32 %v2258_v0, %v2257_v39  ;;  %v2874_v55 = vmul.f32 %v7292_v53, %v2842_v11  ;;  %4123 = vbcast.lane.b32.xlu0 %v9375_v48, 297  ;;  %v3054_v30 = vmul.f32 %v5195_v9, %v7454_v42  ;;  %v3503_v3 = vmul.f32 1.442695, %v3492_v27 }
 0x4b2   : > { %v2422_v34 = vsel %vm1396_vm9, %v2413_v60, 0.0  ;;  %v2424_v11 = vsel %vm1396_vm9, %v2414_v45, 0.0  ;;  %v4006_v52 = vmul.f32 %v7451_v7, %v6814_v23  ;;  %v4178_v27 = vmul.f32 %v7464_v15, %v6814_v23 }
 0x4b3   : > { %2273 = vst.msk [vmem:[#allocation3 + $0x3] sm:$0x1] %vm1756_vm12, %v2259_v49  ;;  %v2423_v39 = vadd.f32 %v2422_v34, %v2421_v58  ;;  %v2486_v46 = vpop.permute.xlu1 %2485  ;;  %v7477_v0 = vadd.f32 %v3054_v30, %v7141_v54  ;;  %v7480_v9 = vadd.f32 %v7392_v14, %v2874_v55  ;;  %v7491_v58 = vmul.f32 %v9382_v18, %v6841_v12  ;;  %v5203_v54 = vpop.eup %5202 }
 0x4b4   : > { %v2527_v60 = vmul.f32 %v7210_v29, %v2486_v46  ;;  %v7484_v22 = vpop.permute.xlu0 %2901  ;;  %3775 = vbcast.lane.b32.xlu1 %v6903_v33, 289  ;;  %v7499_v45 = vmul.f32 %v9383_v38, %v6841_v12  ;;  %v5205_v55 = vpop.eup %5204  ;;  %5212 = vpow2.f32 %v3671_v50  ;;  %v3675_v23 = vmul.f32 1.442695, %v3664_v37 }
 0x4b5   : > { %9385 = vst [vmem:[#allocation70_spill] sm:$0xff] %v7477_v0  ;;  %9386 = vst [vmem:[#allocation111_spill] sm:$0xff] %v7480_v9  ;;  %v2425_v49 = vadd.f32 %v2424_v11, %v2423_v39  ;;  %v3226_v14 = vmul.f32 %v5197_v13, %v7477_v0  ;;  %4239 = vbcast.lane.b32.xlu0 %v9381_v10, 281  ;;  %v3056_v30 = vmul.f32 %v5203_v54, %v7480_v9  ;;  %v5207_v46 = vpop.eup %5206 }
 0x4b6   : > { %v2543_v34 = vadd.f32 %v7414_v21, %v2527_v60  ;;  %v3836_v39 = vmul.f32 %v9383_v38, %v6837_v6  ;;  %5214 = vpow2.f32 %v3503_v3  ;;  %v4015_v50 = vmul.f32 1.442695, %v4006_v52 }
 0x4b7   : > { %v2426_v13 = vrot.slane %v2425_v49, 4  ;;  %v7506_v11 = vadd.f32 %v3226_v14, %v7163_v40  ;;  %v2494_v63 = vpop.permute.xlu1 %2493  ;;  %v7512_v54 = vadd.f32 %v3056_v30, %v7152_v35  ;;  %v9388_v40 = vld [vmem:[#allocation98_spill] sm:$0xff]  ;;  %v4187_v14 = vmul.f32 1.442695, %v4178_v27  ;;  %v9389_v30 = vld [vmem:[#allocation119_spill] sm:$0xff] }
 0x4b8   : > { %v2529_v61 = vmul.f32 %v7210_v29, %v2494_v63  ;;  %v7509_v0 = vpop.permute.xlu0 %2909  ;;  %3783 = vbcast.lane.b32.xlu1 %v6903_v33, 305  ;;  %v7515_v21 = vmul.f32 %v5207_v46, %v2543_v34  ;;  %v4008_v37 = vmul.f32 %v7451_v7, %v6837_v6  ;;  %v5209_v63 = vpop.eup %5208  ;;  %v2584_v29 = vmul.f32 %v7287_v62, %v7259_v43 }
 0x4b9   : > { %9387 = vst [vmem:[#allocation71_spill] sm:$0xff] %v7509_v0  ;;  %v2427_v60 = vadd.f32 %v2426_v13, %v2425_v49  ;;  %v3398_v9 = vmul.f32 %v5199_v25, %v7506_v11  ;;  %1648 = vbcast.lane.b32.xlu0 %v9388_v40, 265  ;;  %v3228_v35 = vmul.f32 %v5205_v55, %v7512_v54  ;;  %5216 = vpow2.f32 %v3843_v4 }
 0x4ba   : > { %v2545_v33 = vadd.f32 %v7436_v19, %v2529_v61  ;;  %v5211_v3 = vpop.eup %5210  ;;  %5218 = vpow2.f32 %v3675_v23  ;;  %v3847_v27 = vmul.f32 1.442695, %v3836_v39  ;;  %v4019_v23 = vmul.f32 1.442695, %v4008_v37  ;;  %v9391_v39 = vld [vmem:[#allocation63_spill] sm:$0xff]  ;;  %v9393_v37 = vld [vmem:[#allocation106_spill] sm:$0xff] }
 0x4bb   : > { %v2428_v52 = vrot.slane %v2427_v60, 2  ;;  %v7526_v49 = vadd.f32 %v3398_v9, %v7190_v47  ;;  %v2554_v25 = vpop.permute.xlu1 %2553  ;;  %v7529_v46 = vadd.f32 %v3228_v35, %v9389_v30  ;;  %5220 = vpow2.f32 %v7399_v41  ;;  %v9392_v35 = vld [vmem:[#allocation102_spill] sm:$0xff] }
 0x4bc   : > { %v2583_v13 = vmul.f32 %v2554_v25, %v2543_v34  ;;  %v7531_v0 = vpop.permute.xlu0 %3027  ;;  %3883 = vbcast.lane.b32.xlu1 %v9364_v44, 257  ;;  %v7534_v43 = vmul.f32 %v5211_v3, %v2545_v33  ;;  %v4180_v62 = vmul.f32 %v7464_v15, %v6837_v6  ;;  %v2592_v19 = vsel %vm1396_vm9, %v2584_v29, 0.0 }
 0x4bd   : > { %9390 = vst [vmem:[#allocation96_spill] sm:$0xff] %v7531_v0  ;;  %v2429_v61 = vadd.f32 %v2428_v52, %v2427_v60  ;;  %v3570_v47 = vmul.f32 %v7470_v1, %v7526_v49  ;;  %1656 = vbcast.lane.b32.xlu0 %v9388_v40, 281  ;;  %v3400_v4 = vmul.f32 %v5209_v63, %v7529_v46  ;;  %5222 = vpow2.f32 %v4015_v50  ;;  %v9395_v50 = vld [vmem:[#allocation56_spill] sm:$0xff] }
 0x4be   : > { %v2591_v9 = vsel %vm1396_vm9, %v2583_v13, 0.0  ;;  %5224 = vpow2.f32 %v3847_v27  ;;  %v5213_v1 = vpop.eup %5212  ;;  %v2586_v3 = vmul.f32 %v9393_v37, %v9392_v35  ;;  %v4005_v63 = vmul.f32 %v7451_v7, %v6841_v12  ;;  %v9398_v35 = vld [vmem:[#allocation113_spill] sm:$0xff] }
 0x4bf   : > { %v2430_v55 = vrot.slane %v2429_v61, 1  ;;  %v2593_v34 = vadd.f32 %v2592_v19, %v2591_v9  ;;  %v2562_v41 = vpop.permute.xlu1 %2561  ;;  %v7546_v60 = vadd.f32 %v3570_v47, %v9391_v39  ;;  %v7556_v29 = vadd.f32 %v3400_v4, %v9395_v50  ;;  %v9400_v50 = vld [vmem:[#allocation65_spill] sm:$0xff] }
 0x4c0   : > { %v2585_v52 = vmul.f32 %v2562_v41, %v2545_v33  ;;  %v7550_v25 = vpop.permute.xlu0 %3035  ;;  %4055 = vbcast.lane.b32.xlu1 %v9375_v48, 257  ;;  %v5215_v30 = vpop.eup %5214  ;;  %5226 = vpow2.f32 %v7425_v24  ;;  %v4177_v33 = vmul.f32 %v7464_v15, %v6841_v12  ;;  %v7565_v19 = vmul.f32 1.442695, %v7491_v58 }
 0x4c1   : > { %9394 = vst [vmem:[#allocation110_spill] sm:$0xff] %v7550_v25  ;;  %v2431_v13 = vadd.f32 %v2430_v55, %v2429_v61  ;;  %1712 = vbcast.lane.b32.xlu0 %v9388_v40, 297  ;;  %v3742_v27 = vmul.f32 %v5213_v1, %v7546_v60  ;;  %5228 = vpow2.f32 %v4187_v14  ;;  %v3572_v4 = vmul.f32 %v5215_v30, %v7556_v29  ;;  %v9396_v55 = vld [vmem:[#allocation105_spill] sm:$0xff]  ;;  %v9397_v1 = vld [vmem:[#allocation79_spill] sm:$0xff] }
 0x4c2   : > { %v2594_v47 = vsel %vm1396_vm9, %v2585_v52, 0.0  ;;  %5230 = vpow2.f32 %v4019_v23  ;;  %v4191_v24 = vmul.f32 1.442695, %v4180_v62  ;;  %v3906_v37 = vmul.f32 %v9398_v35, %v9397_v1 }
 0x4c3   : > { %2445 = vst.msk [vmem:[#allocation3 + $0x4] sm:$0x1] %vm1756_vm12, %v2431_v13  ;;  %v2595_v61 = vadd.f32 %v2594_v47, %v2593_v34  ;;  %v2658_v9 = vpop.permute.xlu1 %2657  ;;  %v7570_v41 = vadd.f32 %v3742_v27, %v9396_v55  ;;  %v5217_v39 = vpop.eup %5216  ;;  %v2596_v14 = vsel %vm1396_vm9, %v2586_v3, 0.0  ;;  %v7580_v34 = vadd.f32 %v3572_v4, %v9400_v50  ;;  %v9403_v50 = vld [vmem:[#allocation114_spill] sm:$0xff] }
 0x4c4   : > { %v2699_v58 = vmul.f32 %v7240_v26, %v2658_v9  ;;  %v7576_v52 = vpop.permute.xlu0 %3091  ;;  %4227 = vbcast.lane.b32.xlu1 %v9381_v10, 257  ;;  %v5219_v30 = vpop.eup %5218  ;;  %v7585_v62 = vmul.f32 1.442695, %v7499_v45  ;;  %v7587_v27 = vmul.f32 1.442695, %v4005_v63  ;;  %5232 = vpow2.f32 %v7403_v8 }
 0x4c5   : > { %9399 = vst [vmem:[#allocation72_spill] sm:$0xff] %v7576_v52  ;;  %v2597_v13 = vadd.f32 %v2596_v14, %v2595_v61  ;;  %1720 = vbcast.lane.b32.xlu0 %v9388_v40, 313  ;;  %v3914_v23 = vmul.f32 %v5217_v39, %v7570_v41  ;;  %v5221_v3 = vpop.eup %5220  ;;  %v7591_v9 = vmul.f32 1.442695, %v4177_v33  ;;  %v3744_v4 = vmul.f32 %v5219_v30, %v7580_v34  ;;  %v9404_v30 = vld [vmem:[#allocation100_spill] sm:$0xff] }
 0x4c6   : > { %v2715_v47 = vadd.f32 %v7515_v21, %v2699_v58  ;;  %v3491_v39 = vmul.f32 %v7012_v36, %v6850_v59  ;;  %5234 = vpow2.f32 %v4191_v24  ;;  %v3663_v21 = vmul.f32 %v9382_v18, %v6850_v59  ;;  %v9402_v58 = vld [vmem:[#allocation81_spill] sm:$0xff] }
 0x4c7   : > { %v2598_v55 = vrot.slane %v2597_v13, 4  ;;  %v2666_v61 = vpop.permute.xlu1 %2665  ;;  %v7594_v1 = vadd.f32 %v3914_v23, %v3906_v37  ;;  %v5223_v45 = vpop.eup %5222  ;;  %v7607_v33 = vadd.f32 %v3744_v4, %v7354_v51  ;;  %v4078_v36 = vmul.f32 %v9403_v50, %v9402_v58 }
 0x4c8   : > { %v2701_v63 = vmul.f32 %v7240_v26, %v2666_v61  ;;  %v7599_v14 = vpop.permute.xlu0 %3099  ;;  %3947 = vbcast.lane.b32.xlu1 %v9364_v44, 289  ;;  %v7602_v8 = vmul.f32 %v5221_v3, %v2715_v47  ;;  %v5225_v37 = vpop.eup %5224  ;;  %v3835_v23 = vmul.f32 %v9383_v38, %v6850_v59  ;;  %v9405_v3 = vld [vmem:[#allocation82_spill] sm:$0xff]  ;;  %v2756_v18 = vmul.f32 %v7386_v31, %v7357_v28 }
 0x4c9   : > { %9401 = vst [vmem:[#allocation73_spill] sm:$0xff] %v7599_v14  ;;  %v2599_v24 = vadd.f32 %v2598_v55, %v2597_v13  ;;  %1821 = vbcast.lane.b32.xlu0 %v9404_v30, 265  ;;  %v4086_v26 = vmul.f32 %v5223_v45, %v7594_v1  ;;  %v3908_v61 = vmul.f32 %v9398_v35, %v9405_v3  ;;  %5236 = vpow2.f32 %v7405_v16  ;;  %v9409_v16 = vld [vmem:[#allocation57_spill] sm:$0xff] }
 0x4ca   : > { %v2717_v51 = vadd.f32 %v7534_v43, %v2701_v63  ;;  %v3916_v4 = vmul.f32 %v5225_v37, %v7607_v33  ;;  %v5227_v14 = vpop.eup %5226  ;;  %v4007_v38 = vmul.f32 %v7451_v7, %v6850_v59  ;;  %5238 = vpow2.f32 %v7417_v57  ;;  %v9408_v63 = vld [vmem:[#allocation83_spill] sm:$0xff] }
 0x4cb   : > { %v2600_v58 = vrot.slane %v2599_v24, 2  ;;  %v2726_v13 = vpop.permute.xlu1 %2725  ;;  %v7622_v55 = vadd.f32 %v4086_v26, %v4078_v36  ;;  %v5229_v45 = vpop.eup %5228  ;;  %v4250_v37 = vmul.f32 %v9409_v16, %v9408_v63  ;;  %5240 = vpow2.f32 %v7419_v32 }
 0x4cc   : > { %v2755_v52 = vmul.f32 %v2726_v13, %v2715_v47  ;;  %v7626_v3 = vpop.permute.xlu0 %3199  ;;  %4119 = vbcast.lane.b32.xlu1 %v9375_v48, 289  ;;  %v7630_v28 = vmul.f32 %v5227_v14, %v2717_v51  ;;  %v7632_v31 = vadd.f32 %v3916_v4, %v3908_v61  ;;  %v5231_v43 = vpop.eup %5230  ;;  %v9410_v47 = vld [vmem:[#allocation88_spill] sm:$0xff]  ;;  %v2764_v57 = vsel %vm1396_vm9, %v2756_v18, 0.0 }
 0x4cd   : > { %9406 = vst [vmem:[#allocation112_spill] sm:$0xff] %v7626_v3  ;;  %v2601_v36 = vadd.f32 %v2600_v58, %v2599_v24  ;;  %1829 = vbcast.lane.b32.xlu0 %v9404_v30, 281  ;;  %v4258_v7 = vmul.f32 %v5229_v45, %v7622_v55  ;;  %v4080_v26 = vmul.f32 %v9403_v50, %v9410_v47  ;;  %5242 = vpow2.f32 %v7430_v56 }
 0x4ce   : > { %9407 = vst [vmem:[#allocation97_spill] sm:$0xff] %v7632_v31  ;;  %v2763_v14 = vsel %vm1396_vm9, %v2755_v52, 0.0  ;;  %v4088_v61 = vmul.f32 %v5231_v43, %v7632_v31  ;;  %v5233_v58 = vpop.eup %5232  ;;  %v2758_v32 = vmul.f32 %v7410_v5, %v7378_v2  ;;  %5244 = vpow2.f32 %v7443_v17  ;;  %v9414_v2 = vld [vmem:[#allocation94_spill] sm:$0xff] }
 0x4cf   : > { %v2602_v4 = vrot.slane %v2601_v36, 1  ;;  %v2765_v13 = vadd.f32 %v2764_v57, %v2763_v14  ;;  %v2734_v25 = vpop.permute.xlu1 %2733  ;;  %v7645_v24 = vadd.f32 %v4258_v7, %v4250_v37  ;;  %5246 = vpow2.f32 %v7447_v20  ;;  %v9417_v57 = vld [vmem:[#allocation78_spill] sm:$0xff] }
 0x4d0   : > { %v2757_v45 = vmul.f32 %v2734_v25, %v2717_v51  ;;  %v7649_v63 = vpop.permute.xlu0 %3207  ;;  %1644 = vbcast.lane.b32.xlu1 %v9388_v40, 257  ;;  %v7653_v52 = vadd.f32 %v4088_v61, %v4080_v26  ;;  %v5235_v18 = vpop.eup %5234  ;;  %v3501_v56 = vmul.f32 1.442695, %v3491_v39  ;;  %v4179_v37 = vmul.f32 %v7464_v15, %v6850_v59  ;;  %v9418_v61 = vld [vmem:[#allocation80_spill] sm:$0xff] }
 0x4d1   : > { %9411 = vst [vmem:[#allocation108_spill] sm:$0xff] %v7645_v24  ;;  %9412 = vst [vmem:[#allocation109_spill] sm:$0xff] %v7649_v63  ;;  %v2603_v43 = vadd.f32 %v2602_v4, %v2601_v36  ;;  %1885 = vbcast.lane.b32.xlu0 %v9404_v30, 297  ;;  %v4252_v5 = vmul.f32 %v9409_v16, %v9414_v2  ;;  %5248 = vpow2.f32 %v7565_v19  ;;  %v3673_v20 = vmul.f32 1.442695, %v3663_v21 }
 0x4d2   : > { %9413 = vst [vmem:[#allocation99_spill] sm:$0xff] %v7653_v52  ;;  %v2766_v25 = vsel %vm1396_vm9, %v2757_v45, 0.0  ;;  %v4260_v17 = vmul.f32 %v5235_v18, %v7653_v52  ;;  %5250 = vpow2.f32 %v7585_v62  ;;  %v3845_v39 = vmul.f32 1.442695, %v3835_v23  ;;  %v9419_v18 = vld [vmem:[#allocation70_spill] sm:$0xff] }
 0x4d3   : > { %2617 = vst.msk [vmem:[#allocation3 + $0x5] sm:$0x1] %vm1756_vm12, %v2603_v43  ;;  %v2767_v51 = vadd.f32 %v2766_v25, %v2765_v13  ;;  %v2830_v36 = vpop.permute.xlu1 %2829  ;;  %v2768_v7 = vsel %vm1396_vm9, %v2758_v32, 0.0  ;;  %5252 = vpow2.f32 %v7587_v27  ;;  %v5237_v26 = vpop.eup %5236  ;;  %v7676_v14 = vmul.f32 %v9398_v35, %v9417_v57  ;;  %v9420_v43 = vld [vmem:[#allocation47_spill] sm:$0xff]  ;;  %v9427_v57 = vld [vmem:[#allocation89_spill] sm:$0xff]  ;;  %v9436_v52 = vld [vmem:[#allocation50_spill] sm:$0xff] }
 0x4d4   : > { %v2871_v15 = vmul.f32 %v7292_v53, %v2830_v36  ;;  %v7668_v47 = vpop.permute.xlu0 %3263  ;;  %1652 = vbcast.lane.b32.xlu1 %v9388_v40, 273  ;;  %v7672_v19 = vadd.f32 %v4260_v17, %v4252_v5  ;;  %5254 = vpow2.f32 %v7591_v9  ;;  %v4017_v21 = vmul.f32 1.442695, %v4007_v38  ;;  %v5239_v23 = vpop.eup %5238  ;;  %v9421_v38 = vld [vmem:[#allocation84_spill] sm:$0xff]  ;;  %v9424_v17 = vld [vmem:[#allocation111_spill] sm:$0xff] }
 0x4d5   : > { %9415 = vst [vmem:[#allocation98_spill] sm:$0xff] %v7668_v47  ;;  %v2769_v62 = vadd.f32 %v2768_v7, %v2767_v51  ;;  %1893 = vbcast.lane.b32.xlu0 %v9404_v30, 313  ;;  %v7682_v4 = vmul.f32 %v9398_v35, %v9418_v61  ;;  %5256 = vpow2.f32 %v3501_v56  ;;  %v4189_v13 = vmul.f32 1.442695, %v4179_v37  ;;  %v7685_v32 = vpop.eup %5240  ;;  %v9425_v51 = vld [vmem:[#allocation71_spill] sm:$0xff]  ;;  %v9426_v7 = vld [vmem:[#allocation101_spill] sm:$0xff] }
 0x4d6   : > { %9416 = vst [vmem:[#allocation119_spill] sm:$0xff] %v7672_v19  ;;  %v2887_v27 = vadd.f32 %v7602_v8, %v2871_v15  ;;  %v2928_v45 = vmul.f32 %v7484_v22, %v7454_v42  ;;  %v3102_v2 = vmul.f32 %v9420_v43, %v9419_v18  ;;  %5258 = vpow2.f32 %v3673_v20  ;;  %v9423_v42 = vld [vmem:[#allocation51_spill] sm:$0xff] }
 0x4d7   : > { %v2770_v5 = vrot.slane %v2769_v62, 4  ;;  %v2838_v9 = vpop.permute.xlu1 %2837  ;;  %v7693_v25 = vmul.f32 %v9403_v50, %v9421_v38  ;;  %5260 = vpow2.f32 %v3845_v39  ;;  %v5243_v37 = vpop.eup %5242  ;;  %v3274_v22 = vmul.f32 %v9423_v42, %v7506_v11  ;;  %v9428_v61 = vld [vmem:[#allocation115_spill] sm:$0xff]  ;;  %v9430_v42 = vld [vmem:[#allocation46_spill] sm:$0xff] }
 0x4d8   : > { %v2873_v35 = vmul.f32 %v7292_v53, %v2838_v9  ;;  %v7696_v8 = vpop.permute.xlu0 %3271  ;;  %1708 = vbcast.lane.b32.xlu1 %v9388_v40, 289  ;;  %v3053_v56 = vmul.f32 %v5233_v58, %v2887_v27  ;;  %v2930_v36 = vmul.f32 %v9425_v51, %v9424_v17  ;;  %5262 = vpow2.f32 %v4017_v21  ;;  %v5245_v15 = vpop.eup %5244 }
 0x4d9   : > { %9422 = vst [vmem:[#allocation63_spill] sm:$0xff] %v7696_v8  ;;  %v2771_v20 = vadd.f32 %v2770_v5, %v2769_v62  ;;  %1993 = vbcast.lane.b32.xlu0 %v9426_v7, 265  ;;  %v7706_v53 = vmul.f32 %v9409_v16, %v9427_v57  ;;  %5264 = vpow2.f32 %v4189_v13  ;;  %v5247_v39 = vpop.eup %5246  ;;  %v2936_v11 = vsel %vm1396_vm9, %v2928_v45, 0.0  ;;  %v9429_v62 = vld [vmem:[#allocation49_spill] sm:$0xff] }
 0x4da   : > { %v3061_v18 = vadd.f32 %v3053_v56, %v9428_v61  ;;  %v2889_v58 = vadd.f32 %v7630_v28, %v2873_v35  ;;  %v3110_v43 = vsel %vm1396_vm9, %v3102_v2, 0.0  ;;  %v3104_v5 = vmul.f32 %v9429_v62, %v7512_v54  ;;  %v9432_v2 = vld [vmem:[#allocation59_spill] sm:$0xff] }
 0x4db   : > { %v2772_v9 = vrot.slane %v2771_v20, 2  ;;  %v2898_v21 = vpop.permute.xlu1 %2897  ;;  %v7714_v38 = vpop.eup %5248  ;;  %v3282_v45 = vsel %vm1396_vm9, %v3274_v22, 0.0  ;;  %v3446_v54 = vmul.f32 %v9432_v2, %v7526_v49  ;;  %v2940_v35 = vsel %vm1396_vm9, %v2930_v36, 0.0  ;;  %v9435_v22 = vld [vmem:[#allocation53_spill] sm:$0xff] }
 0x4dc   : > { %v3101_v17 = vmul.f32 %v9430_v42, %v3061_v18  ;;  %v3225_v51 = vmul.f32 %v5237_v26, %v3061_v18  ;;  %v2927_v57 = vmul.f32 %v2898_v21, %v2887_v27  ;;  %v7717_v56 = vpop.permute.xlu0 %3371  ;;  %1716 = vbcast.lane.b32.xlu1 %v9388_v40, 305  ;;  %v3055_v28 = vmul.f32 %v5243_v37, %v2889_v58  ;;  %v7720_v13 = vpop.eup %5250  ;;  %v9433_v27 = vld [vmem:[#allocation117_spill] sm:$0xff]  ;;  %v9434_v37 = vld [vmem:[#allocation116_spill] sm:$0xff] }
 0x4dd   : > { %9431 = vst [vmem:[#allocation102_spill] sm:$0xff] %v7717_v56  ;;  %v2773_v61 = vadd.f32 %v2772_v9, %v2771_v20  ;;  %2001 = vbcast.lane.b32.xlu0 %v9426_v7, 281  ;;  %v7727_v62 = vpop.eup %5252  ;;  %v3276_v49 = vmul.f32 %v9435_v22, %v7529_v46  ;;  %v3114_v46 = vsel %vm1396_vm9, %v3104_v5, 0.0 }
 0x4de   : > { %v3109_v26 = vsel %vm1396_vm9, %v3101_v17, 0.0  ;;  %v3233_v18 = vadd.f32 %v3225_v51, %v9433_v27  ;;  %v2935_v40 = vsel %vm1396_vm9, %v2927_v57, 0.0  ;;  %v3063_v21 = vadd.f32 %v3055_v28, %v9434_v37  ;;  %v7733_v42 = vpop.eup %5254  ;;  %v9437_v17 = vld [vmem:[#allocation48_spill] sm:$0xff] }
 0x4df   : > { %v2774_v2 = vrot.slane %v2773_v61, 1  ;;  %v3111_v36 = vadd.f32 %v3110_v43, %v3109_v26  ;;  %v2937_v20 = vadd.f32 %v2936_v11, %v2935_v40  ;;  %v2906_v9 = vpop.permute.xlu1 %2905  ;;  %v5257_v19 = vpop.eup %5256  ;;  %v3454_v28 = vsel %vm1396_vm9, %v3446_v54, 0.0  ;;  %v9440_v40 = vld [vmem:[#allocation118_spill] sm:$0xff] }
 0x4e0   : > { %v3273_v31 = vmul.f32 %v9436_v52, %v3233_v18  ;;  %v3397_v8 = vmul.f32 %v5239_v23, %v3233_v18  ;;  %v3103_v47 = vmul.f32 %v9437_v17, %v3063_v21  ;;  %v3227_v51 = vmul.f32 %v5245_v15, %v3063_v21  ;;  %v7739_v27 = vpop.permute.xlu0 %3379  ;;  %1817 = vbcast.lane.b32.xlu1 %v9404_v30, 257  ;;  %v7742_v57 = vpop.eup %5258  ;;  %v9439_v23 = vld [vmem:[#allocation54_spill] sm:$0xff] }
 0x4e1   : > { %9438 = vst [vmem:[#allocation106_spill] sm:$0xff] %v7739_v27  ;;  %v2775_v43 = vadd.f32 %v2774_v2, %v2773_v61  ;;  %v2929_v11 = vmul.f32 %v2906_v9, %v2889_v58  ;;  %2057 = vbcast.lane.b32.xlu0 %v9426_v7, 297  ;;  %v7747_v26 = vpop.eup %5260  ;;  %v3286_v54 = vsel %vm1396_vm9, %v3276_v49, 0.0  ;;  %v9442_v9 = vld [vmem:[#allocation52_spill] sm:$0xff] }
 0x4e2   : > { %v3281_v52 = vsel %vm1396_vm9, %v3273_v31, 0.0  ;;  %v3405_v15 = vadd.f32 %v3397_v8, %v9439_v23  ;;  %v3112_v18 = vsel %vm1396_vm9, %v3103_v47, 0.0  ;;  %v3235_v37 = vadd.f32 %v3227_v51, %v9440_v40  ;;  %v7753_v21 = vpop.eup %5262  ;;  %v9441_v31 = vld [vmem:[#allocation58_spill] sm:$0xff]  ;;  %v9447_v40 = vld [vmem:[#allocation55_spill] sm:$0xff] }
 0x4e3   : > { %2789 = vst.msk [vmem:[#allocation3 + $0x6] sm:$0x1] %vm1756_vm12, %v2775_v43  ;;  %v3283_v5 = vadd.f32 %v3282_v45, %v3281_v52  ;;  %v3113_v58 = vadd.f32 %v3112_v18, %v3111_v36  ;;  %v2938_v61 = vsel %vm1396_vm9, %v2929_v11, 0.0  ;;  %v7758_v22 = vpop.permute.xlu1 %1512  ;;  %v7760_v2 = vpop.eup %5264  ;;  %v9444_v36 = vld [vmem:[#allocation67_spill] sm:$0xff]  ;;  %v9445_v11 = vld [vmem:[#allocation61_spill] sm:$0xff] }
 0x4e4   : > { %v3445_v8 = vmul.f32 %v9441_v31, %v3405_v15  ;;  %v3569_v47 = vmul.f32 %v7685_v32, %v3405_v15  ;;  %v3275_v17 = vmul.f32 %v9442_v9, %v3235_v37  ;;  %v3399_v51 = vmul.f32 %v5247_v39, %v3235_v37  ;;  %v7765_v23 = vpop.permute.xlu0 %3435  ;;  %1825 = vbcast.lane.b32.xlu1 %v9404_v30, 273  ;;  %v9446_v15 = vld [vmem:[#allocation62_spill] sm:$0xff] }
 0x4e5   : > { %9443 = vst [vmem:[#allocation56_spill] sm:$0xff] %v7765_v23  ;;  %v3115_v49 = vadd.f32 %v3114_v46, %v3113_v58  ;;  %v2939_v45 = vadd.f32 %v2938_v61, %v2937_v20  ;;  %2065 = vbcast.lane.b32.xlu0 %v9426_v7, 313  ;;  %v3618_v43 = vmul.f32 %v9444_v36, %v7546_v60 }
 0x4e6   : > { %v3448_v52 = vmul.f32 %v9445_v11, %v7556_v29  ;;  %v3453_v18 = vsel %vm1396_vm9, %v3445_v8, 0.0  ;;  %v3284_v32 = vsel %vm1396_vm9, %v3275_v17, 0.0  ;;  %v3577_v39 = vadd.f32 %v3569_v47, %v9446_v15  ;;  %v9449_v29 = vld [vmem:[#allocation60_spill] sm:$0xff]  ;;  %v9450_v17 = vld [vmem:[#allocation75_spill] sm:$0xff]  ;;  %v9451_v47 = vld [vmem:[#allocation69_spill] sm:$0xff] }
 0x4e7   : > { %v3407_v37 = vadd.f32 %v3399_v51, %v9447_v40  ;;  %v3455_v31 = vadd.f32 %v3454_v28, %v3453_v18  ;;  %v3116_v9 = vrot.slane %v3115_v49, 4  ;;  %v3285_v46 = vadd.f32 %v3284_v32, %v3283_v5  ;;  %v7777_v58 = vpop.permute.xlu1 %1507  ;;  %v9453_v18 = vld [vmem:[#allocation95_spill] sm:$0xff] }
 0x4e8   : > { %v2941_v20 = vadd.f32 %v2940_v35, %v2939_v45  ;;  %v7779_v61 = vpop.permute.xlu0 %3443  ;;  %1881 = vbcast.lane.b32.xlu1 %v9404_v30, 289  ;;  %v3741_v60 = vmul.f32 %v7714_v38, %v3577_v39  ;;  %v3790_v36 = vmul.f32 %v9450_v17, %v7570_v41  ;;  %v3620_v51 = vmul.f32 %v9451_v47, %v7580_v34  ;;  %v9452_v35 = vld [vmem:[#allocation103_spill] sm:$0xff]  ;;  %v9454_v38 = vld [vmem:[#allocation85_spill] sm:$0xff]  ;;  %v9456_v47 = vld [vmem:[#allocation64_spill] sm:$0xff] }
 0x4e9   : > { %9448 = vst [vmem:[#allocation105_spill] sm:$0xff] %v7779_v61  ;;  %v3447_v8 = vmul.f32 %v9449_v29, %v3407_v37  ;;  %v3117_v28 = vadd.f32 %v3116_v9, %v3115_v49  ;;  %v3287_v11 = vadd.f32 %v3286_v54, %v3285_v46  ;;  %2165 = vbcast.lane.b32.xlu0 %v9452_v35, 265  ;;  %v3626_v45 = vsel %vm1396_vm9, %v3618_v43, 0.0 }
 0x4ea   : > { %v2942_v5 = vrot.slane %v2941_v20, 4  ;;  %v3749_v32 = vadd.f32 %v3741_v60, %v9453_v18  ;;  %v3571_v15 = vmul.f32 %v5257_v19, %v3407_v37  ;;  %v3962_v40 = vmul.f32 %v9454_v38, %v7594_v1  ;;  %v9455_v1 = vld [vmem:[#allocation87_spill] sm:$0xff] }
 0x4eb   : > { %v7794_v29 = vsel %vm1396_vm9, %v3448_v52, 0.0  ;;  %v3118_v41 = vrot.slane %v3117_v28, 2  ;;  %v3288_v17 = vrot.slane %v3287_v11, 4  ;;  %v7796_v34 = vpop.permute.xlu1 %3023  ;;  %v3456_v54 = vsel %vm1396_vm9, %v3447_v8, 0.0 }
 0x4ec   : > { %v2943_v61 = vadd.f32 %v2942_v5, %v2941_v20  ;;  %v7799_v49 = vpop.permute.xlu0 %3543  ;;  %1889 = vbcast.lane.b32.xlu1 %v9404_v30, 305  ;;  %v3913_v43 = vmul.f32 %v7720_v13, %v3749_v32  ;;  %v3798_v19 = vsel %vm1396_vm9, %v3790_v36, 0.0  ;;  %v4134_v37 = vmul.f32 %v9455_v1, %v7622_v55  ;;  %v9457_v13 = vld [vmem:[#allocation77_spill] sm:$0xff] }
 0x4ed   : > { %v3630_v52 = vsel %vm1396_vm9, %v3620_v51, 0.0  ;;  %v3119_v9 = vadd.f32 %v3118_v41, %v3117_v28  ;;  %v3289_v46 = vadd.f32 %v3288_v17, %v3287_v11  ;;  %2173 = vbcast.lane.b32.xlu0 %v9452_v35, 281  ;;  %v3457_v60 = vadd.f32 %v3456_v54, %v3455_v31  ;;  %v9458_v51 = vld [vmem:[#allocation66_spill] sm:$0xff]  ;;  %v9459_v31 = vld [vmem:[#allocation68_spill] sm:$0xff] }
 0x4ee   : > { %v2944_v20 = vrot.slane %v2943_v61, 2  ;;  %v3921_v8 = vadd.f32 %v3913_v43, %v7676_v14  ;;  %v3579_v5 = vadd.f32 %v3571_v15, %v9456_v47  ;;  %v3970_v30 = vsel %vm1396_vm9, %v3962_v40, 0.0  ;;  %v9460_v47 = vld [vmem:[#allocation107_spill] sm:$0xff] }
 0x4ef   : > { %v3792_v36 = vmul.f32 %v9457_v13, %v7607_v33  ;;  %v3120_v18 = vrot.slane %v3119_v9, 1  ;;  %v3290_v38 = vrot.slane %v3289_v46, 2  ;;  %v7813_v1 = vpop.permute.xlu1 %3031  ;;  %v3617_v28 = vmul.f32 %v9458_v51, %v3577_v39  ;;  %v9465_v51 = vld [vmem:[#allocation76_spill] sm:$0xff] }
 0x4f0   : > { %v2945_v55 = vadd.f32 %v2944_v20, %v2943_v61  ;;  %v7816_v11 = vpop.permute.xlu0 %3551  ;;  %1989 = vbcast.lane.b32.xlu1 %v9426_v7, 257  ;;  %v4085_v14 = vmul.f32 %v7727_v62, %v3921_v8  ;;  %v3619_v15 = vmul.f32 %v9459_v31, %v3579_v5  ;;  %v3743_v40 = vmul.f32 %v7742_v57, %v3579_v5 }
 0x4f1   : > { %v4142_v41 = vsel %vm1396_vm9, %v4134_v37, 0.0  ;;  %v3121_v33 = vadd.f32 %v3120_v18, %v3119_v9  ;;  %v3291_v17 = vadd.f32 %v3290_v38, %v3289_v46  ;;  %2229 = vbcast.lane.b32.xlu0 %v9452_v35, 297  ;;  %v3625_v61 = vsel %vm1396_vm9, %v3617_v28, 0.0  ;;  %v9462_v37 = vld [vmem:[#allocation74_spill] sm:$0xff]  ;;  %v9463_v46 = vld [vmem:[#allocation92_spill] sm:$0xff] }
 0x4f2   : > { %v2946_v54 = vrot.slane %v2945_v55, 1  ;;  %v4093_v39 = vadd.f32 %v4085_v14, %v7693_v25  ;;  %v3627_v43 = vadd.f32 %v3626_v45, %v3625_v61  ;;  %v3628_v20 = vsel %vm1396_vm9, %v3619_v15, 0.0 }
 0x4f3   : > { %v3751_v62 = vadd.f32 %v3743_v40, %v9460_v47  ;;  %3135 = vst.msk [vmem:[#allocation3 + $0x8] sm:$0x1] %vm1756_vm12, %v3121_v33  ;;  %v3292_v13 = vrot.slane %v3291_v17, 1  ;;  %v7829_v5 = vpop.permute.xlu1 %3087  ;;  %v3789_v9 = vmul.f32 %v9462_v37, %v3749_v32  ;;  %v3961_v18 = vmul.f32 %v9463_v46, %v3921_v8  ;;  %v9476_v46 = vld [vmem:[#allocation91_spill] sm:$0xff] }
 0x4f4   : > { %v2947_v57 = vadd.f32 %v2946_v54, %v2945_v55  ;;  %9461 = vst [vmem:[#allocation79_spill] sm:$0xff] %v7829_v5  ;;  %v7833_v38 = vpop.permute.xlu0 %3607  ;;  %1997 = vbcast.lane.b32.xlu1 %v9426_v7, 273  ;;  %v4257_v25 = vmul.f32 %v7733_v42, %v4093_v39  ;;  %v3629_v45 = vadd.f32 %v3628_v20, %v3627_v43  ;;  %v9466_v55 = vld [vmem:[#allocation93_spill] sm:$0xff]  ;;  %v9471_v20 = vld [vmem:[#allocation86_spill] sm:$0xff] }
 0x4f5   : > { %9464 = vst [vmem:[#allocation113_spill] sm:$0xff] %v7833_v38  ;;  %v3791_v28 = vmul.f32 %v9465_v51, %v3751_v62  ;;  %v3915_v14 = vmul.f32 %v7747_v26, %v3751_v62  ;;  %v3293_v31 = vadd.f32 %v3292_v13, %v3291_v17  ;;  %2237 = vbcast.lane.b32.xlu0 %v9452_v35, 313  ;;  %v3797_v32 = vsel %vm1396_vm9, %v3789_v9, 0.0 }
 0x4f6   : > { %2961 = vst.msk [vmem:[#allocation3 + $0x7] sm:$0x1] %vm1756_vm12, %v2947_v57  ;;  %v3969_v8 = vsel %vm1396_vm9, %v3961_v18, 0.0  ;;  %v4133_v15 = vmul.f32 %v9466_v55, %v4093_v39  ;;  %v7845_v40 = vadd.f32 %v4257_v25, %v7706_v53  ;;  %v3799_v42 = vadd.f32 %v3798_v19, %v3797_v32 }
 0x4f7   : > { %v3800_v33 = vsel %vm1396_vm9, %v3791_v28, 0.0  ;;  %v7849_v54 = vadd.f32 %v3915_v14, %v7682_v4  ;;  %3307 = vst.msk [vmem:[#allocation3 + $0x9] sm:$0x1] %vm1756_vm12, %v3293_v31  ;;  %v7852_v26 = vpop.permute.xlu1 %3095  ;;  %v7854_v17 = vadd.f32 %v3970_v30, %v3969_v8  ;;  %v3459_v43 = vadd.f32 %v7794_v29, %v3457_v60  ;;  %v9474_v30 = vld [vmem:[#allocation104_spill] sm:$0xff] }
 0x4f8   : > { %9467 = vst [vmem:[#allocation65_spill] sm:$0xff] %v7845_v40  ;;  %9469 = vst [vmem:[#allocation114_spill] sm:$0xff] %v7852_v26  ;;  %v4141_v61 = vsel %vm1396_vm9, %v4133_v15, 0.0  ;;  %v3631_v39 = vadd.f32 %v3630_v52, %v3629_v45  ;;  %v4079_v53 = vmul.f32 %v9403_v50, %v9471_v20  ;;  %v7860_v19 = vpop.permute.xlu0 %3615  ;;  %2053 = vbcast.lane.b32.xlu1 %v9426_v7, 289  ;;  %v3802_v29 = vsel %vm1396_vm9, %v3792_v36, 0.0 }
 0x4f9   : > { %9468 = vst [vmem:[#allocation81_spill] sm:$0xff] %v7849_v54  ;;  %9470 = vst [vmem:[#allocation100_spill] sm:$0xff] %v7854_v17  ;;  %v3801_v4 = vadd.f32 %v3800_v33, %v3799_v42  ;;  %v4087_v47 = vmul.f32 %v7753_v21, %v7849_v54  ;;  %v7865_v62 = vadd.f32 %v4142_v41, %v4141_v61  ;;  %2337 = vbcast.lane.b32.xlu0 %v9474_v30, 265  ;;  %v9495_v17 = vld [vmem:[#allocation45_spill] sm:$0xff]  ;;  %v9496_v54 = vld [vmem:[#allocation36_spill] sm:$0xff] }
 0x4fa   : > { %9472 = vst [vmem:[#allocation82_spill] sm:$0xff] %v7860_v19  ;;  %v3460_v13 = vrot.slane %v3459_v43, 4  ;;  %v3632_v57 = vrot.slane %v3631_v39, 4  ;;  %v4251_v18 = vmul.f32 %v9409_v16, %v9476_v46 }
 0x4fb   : > { %9473 = vst [vmem:[#allocation83_spill] sm:$0xff] %v7865_v62  ;;  %v7869_v52 = vadd.f32 %v4087_v47, %v4079_v53  ;;  %v3803_v60 = vadd.f32 %v3802_v29, %v3801_v4  ;;  %v7871_v50 = vpop.permute.xlu1 %3195  ;;  %v9480_v4 = vld [vmem:[#allocation30_spill] sm:$0xff]  ;;  %v9481_v47 = vld [vmem:[#allocation43_spill] sm:$0xff] }
 0x4fc   : > { %v3461_v37 = vadd.f32 %v3460_v13, %v3459_v43  ;;  %v3633_v9 = vadd.f32 %v3632_v57, %v3631_v39  ;;  %v7875_v25 = vpop.permute.xlu0 %3715  ;;  %2061 = vbcast.lane.b32.xlu1 %v9426_v7, 305  ;;  %v5410_v39 = vld [vmem:[%s6018_s21] ss:$0 sm:$0xff]  ;;  %v2502_v13 = vrot.slane %v9481_v47, %v9480_v4 }
 0x4fd   : > { %9475 = vst [vmem:[#allocation57_spill] sm:$0xff] %v7869_v52  ;;  %v4259_v21 = vmul.f32 %v7760_v2, %v7869_v52  ;;  %v3804_v41 = vrot.slane %v3803_v60, 4  ;;  %2345 = vbcast.lane.b32.xlu0 %v9474_v30, 281  ;;  %v1523_v20 = vmul.f32 %v5410_v39, %v7777_v58 }
 0x4fe   : > { %v3462_v36 = vrot.slane %v3461_v37, 2  ;;  %v3634_v45 = vrot.slane %v3633_v9, 2 }
 0x4ff   : > { %v7881_v51 = vadd.f32 %v4259_v21, %v4251_v18  ;;  %v3805_v28 = vadd.f32 %v3804_v41, %v3803_v60  ;;  %v7883_v14 = vpop.permute.xlu1 %3203  ;;  %v5411_v60 = vld [vmem:[%s6024_s29] ss:$0 sm:$0xff]  ;;  %v1524_v41 = vmul.f32 %v5410_v39, %v7758_v22 }
 0x500   : > { %v3463_v31 = vadd.f32 %v3462_v36, %v3461_v37  ;;  %v3635_v16 = vadd.f32 %v3634_v45, %v3633_v9  ;;  %v7885_v32 = vpop.permute.xlu0 %3723  ;;  %2161 = vbcast.lane.b32.xlu1 %v9452_v35, 257  ;;  %v7908_v58 = vadd.f32 %v5411_v60, %v1523_v20 }
 0x501   : > { %9477 = vst [vmem:[#allocation88_spill] sm:$0xff] %v7881_v51  ;;  %v3806_v7 = vrot.slane %v3805_v28, 2  ;;  %2401 = vbcast.lane.b32.xlu0 %v9474_v30, 297 }
 0x502   : > { %v3464_v2 = vrot.slane %v3463_v31, 1  ;;  %v3636_v8 = vrot.slane %v3635_v16, 1  ;;  %v1542_v46 = vmin.f32 %v7908_v58, 20.0  ;;  %vm1538_vm13 = vcmp.gt.f32.partialorder %v7908_v58, 20.0 }
 0x503   : > { %v3807_v55 = vadd.f32 %v3806_v7, %v3805_v28  ;;  %v7889_v15 = vpop.permute.xlu1 %3259 }
 0x504   : > { %9478 = vst [vmem:[#allocation94_spill] sm:$0xff] %v7889_v15  ;;  %v3465_v42 = vadd.f32 %v3464_v2, %v3463_v31  ;;  %v3637_v33 = vadd.f32 %v3636_v8, %v3635_v16  ;;  %v7891_v61 = vpop.permute.xlu0 %3779  ;;  %2169 = vbcast.lane.b32.xlu1 %v9452_v35, 273  ;;  %v1548_v36 = vmul.f32 1.442695, %v1542_v46  ;;  %v9485_v31 = vld [vmem:[#allocation31_spill] sm:$0xff] }
 0x505   : > { %9479 = vst [vmem:[#allocation78_spill] sm:$0xff] %v7891_v61  ;;  %v3808_v43 = vrot.slane %v3807_v55, 1  ;;  %2409 = vbcast.lane.b32.xlu0 %v9474_v30, 313  ;;  %v7931_v16 = vrot.slane %v9481_v47, %v9485_v31 }
 0x506   : > { %3479 = vst.msk [vmem:[#allocation3 + $0xa] sm:$0x1] %vm1756_vm12, %v3465_v42  ;;  %3651 = vst.msk [vmem:[#allocation3 + $0xb] sm:$0x1] %vm1756_vm12, %v3637_v33  ;;  %5266 = vpow2.f32 %v1548_v36 }
 0x507   : > { %v3809_v53 = vadd.f32 %v3808_v43, %v3807_v55  ;;  %v7901_v57 = vpop.permute.xlu1 %3267 }
 0x508   : > { %9482 = vst [vmem:[#allocation80_spill] sm:$0xff] %v7901_v57  ;;  %v7903_v29 = vpop.permute.xlu0 %3787  ;;  %2225 = vbcast.lane.b32.xlu1 %v9452_v35, 289  ;;  %v9498_v57 = vld [vmem:[#allocation37_spill] sm:$0xff] }
 0x509   : > { %9483 = vst [vmem:[#allocation70_spill] sm:$0xff] %v7903_v29  ;;  %3823 = vst.msk [vmem:[#allocation3 + $0xc] sm:$0x1] %vm1756_vm12, %v3809_v53  ;;  %2509 = vbcast.lane.b32.xlu0 %v2502_v13, 265 }
 0x50b   : > { %v7910_v37 = vpop.permute.xlu1 %3367 }
 0x50c   : > { %v7912_v9 = vpop.permute.xlu0 %3887  ;;  %2233 = vbcast.lane.b32.xlu1 %v9452_v35, 305  ;;  %v7927_v35 = vadd.f32 %v5411_v60, %v1524_v41 }
 0x50d   : > { %2517 = vbcast.lane.b32.xlu0 %v2502_v13, 281 }
 0x50e   : > { %v1543_v22 = vmin.f32 %v7927_v35, 20.0  ;;  %vm1539_vm14 = vcmp.gt.f32.partialorder %v7927_v35, 20.0 }
 0x50f   : > { %v7916_v18 = vpop.permute.xlu1 %3375 }
 0x510   : > { %v7918_v21 = vpop.permute.xlu0 %3891  ;;  %2333 = vbcast.lane.b32.xlu1 %v9474_v30, 257  ;;  %v1550_v42 = vmul.f32 1.442695, %v1543_v22  ;;  %v5267_v33 = vpop.eup %5266 }
 0x511   : > { %2573 = vbcast.lane.b32.xlu0 %v2502_v13, 297  ;;  %v1554_v20 = vadd.f32 1.0, %v5267_v33  ;;  %v9492_v33 = vld [vmem:[#allocation34_spill] sm:$0xff] }
 0x512   : > { %5268 = vpow2.f32 %v1550_v42  ;;  %v4361_v62 = vmul.f32 0.5, %v9492_v33 }
 0x513   : > { %v7922_v45 = vpop.permute.xlu1 %3431  ;;  %5270 = vlog2.f32 %v1554_v20  ;;  %v9494_v20 = vld [vmem:[#allocation35_spill] sm:$0xff] }
 0x514   : > { %9484 = vst [vmem:[#allocation47_spill] sm:$0xff] %v7922_v45  ;;  %v7924_v28 = vpop.permute.xlu0 %3895  ;;  %2341 = vbcast.lane.b32.xlu1 %v9474_v30, 273  ;;  %v4360_v52 = vmul.f32 0.5, %v9494_v20  ;;  %5272 = vtanh.f32 %v4361_v62  ;;  %v4362_v45 = vmul.f32 0.5, %v9498_v57 }
 0x515   : > { %2581 = vbcast.lane.b32.xlu0 %v2502_v13, 313 }
 0x516   : > { %5274 = vtanh.f32 %v4360_v52 }
 0x517   : > { %v7933_v7 = vpop.permute.xlu1 %3439 }
 0x518   : > { %9486 = vst [vmem:[#allocation84_spill] sm:$0xff] %v7933_v7  ;;  %v7935_v2 = vpop.permute.xlu0 %4059  ;;  %2397 = vbcast.lane.b32.xlu1 %v9474_v30, 289 }
 0x519   : > { %2681 = vbcast.lane.b32.xlu0 %v7931_v16, 265 }
 0x51b   : > { %v7940_v8 = vpop.permute.xlu1 %3539 }
 0x51c   : > { %v7942_v55 = vpop.permute.xlu0 %4063  ;;  %2405 = vbcast.lane.b32.xlu1 %v9474_v30, 305  ;;  %v9488_v30 = vld [vmem:[#allocation32_spill] sm:$0xff]  ;;  %v5269_v22 = vpop.eup %5268 }
 0x51d   : > { %2689 = vbcast.lane.b32.xlu0 %v7931_v16, 281  ;;  %v7958_v46 = vrot.slane %v9481_v47, %v9488_v30  ;;  %v1555_v47 = vadd.f32 1.0, %v5269_v22 }
 0x51f   : > { %v7946_v43 = vpop.permute.xlu1 %3547  ;;  %5276 = vlog2.f32 %v1555_v47 }
 0x520   : > { %v7948_v39 = vpop.permute.xlu0 %4067  ;;  %2505 = vbcast.lane.b32.xlu1 %v2502_v13, 257 }
 0x521   : > { %2745 = vbcast.lane.b32.xlu0 %v7931_v16, 297 }
 0x523   : > { %v7951_v53 = vpop.permute.xlu1 %3603 }
 0x524   : > { %9487 = vst [vmem:[#allocation51_spill] sm:$0xff] %v7951_v53  ;;  %v7953_v60 = vpop.permute.xlu0 %4231  ;;  %2513 = vbcast.lane.b32.xlu1 %v2502_v13, 273  ;;  %v5271_v53 = vpop.eup %5270 }
 0x525   : > { %2753 = vbcast.lane.b32.xlu0 %v7931_v16, 313 }
 0x527   : > { %v7960_v41 = vpop.permute.xlu1 %3611 }
 0x528   : > { %9489 = vst [vmem:[#allocation111_spill] sm:$0xff] %v7960_v41  ;;  %v7962_v36 = vpop.permute.xlu0 %4235  ;;  %2569 = vbcast.lane.b32.xlu1 %v2502_v13, 289  ;;  %v4363_v41 = vmul.f32 0.5, %v9496_v54 }
 0x529   : > { %9490 = vst [vmem:[#allocation71_spill] sm:$0xff] %v7962_v36  ;;  %2853 = vbcast.lane.b32.xlu0 %v7958_v46, 265 }
 0x52a   : > { %5278 = vtanh.f32 %v4363_v41 }
 0x52b   : > { %v7965_v42 = vpop.permute.xlu1 %3711  ;;  %5280 = vtanh.f32 %v4362_v45  ;;  %v5273_v45 = vpop.eup %5272 }
 0x52c   : > { %9491 = vst [vmem:[#allocation101_spill] sm:$0xff] %v7965_v42  ;;  %v7968_v51 = vpop.permute.xlu0 %3951  ;;  %2577 = vbcast.lane.b32.xlu1 %v2502_v13, 305  ;;  %v1561_v13 = vmul.f32 0.6931472, %v5271_v53  ;;  %v9503_v53 = vld [vmem:[#allocation33_spill] sm:$0xff]  ;;  %v5275_v47 = vpop.eup %5274  ;;  %v4369_v23 = vadd.f32 1.0, %v5273_v45 }
 0x52d   : > { %9493 = vst [vmem:[#allocation89_spill] sm:$0xff] %v7968_v51  ;;  %4279 = vbcast.lane.b32.xlu0 %v9495_v17, 297  ;;  %v5277_v29 = vpop.eup %5276  ;;  %v4368_v24 = vadd.f32 1.0, %v5275_v47  ;;  %v4868_v45 = vld [vmem:[%s6036_s12] ss:$0 sm:$0xff] }
 0x52e   : > { %v7988_v62 = vsel %vm1538_vm13, %v7908_v58, %v1561_v13  ;;  %v1563_v19 = vmul.f32 0.6931472, %v5277_v29  ;;  %v4373_v47 = vmul.f32 0.5, %v4369_v23  ;;  %v9511_v23 = vld [vmem:[#allocation38_spill] sm:$0xff] }
 0x52f   : > { %v7973_v7 = vpop.permute.xlu1 %3719  ;;  %v1591_v41 = vrot.slane %v7988_v62, %v9503_v53 }
 0x530   : > { %9497 = vst [vmem:[#allocation115_spill] sm:$0xff] %v7973_v7  ;;  %v7976_v40 = vpop.permute.xlu0 %4123  ;;  %2677 = vbcast.lane.b32.xlu1 %v7931_v16, 257 }
 0x531   : > { %9499 = vst [vmem:[#allocation49_spill] sm:$0xff] %v7976_v40  ;;  %2861 = vbcast.lane.b32.xlu0 %v7958_v46, 281  ;;  %v1596_v61 = vmul.f32 %v1591_v41, %v6841_v12  ;;  %v1599_v29 = vmul.f32 %v1591_v41, %v6837_v6  ;;  %v1598_v7 = vmul.f32 %v1591_v41, %v6850_v59 }
 0x533   : > { %v7980_v26 = vpop.permute.xlu1 %3775  ;;  %v1608_v63 = vmul.f32 1.442695, %v1596_v61  ;;  %v1612_v61 = vmul.f32 1.442695, %v1598_v7  ;;  %v9513_v7 = vld [vmem:[#allocation28_spill] sm:$0xff] }
 0x534   : > { %9500 = vst [vmem:[#allocation46_spill] sm:$0xff] %v7980_v26  ;;  %v7982_v22 = vpop.permute.xlu0 %4239  ;;  %2685 = vbcast.lane.b32.xlu1 %v7931_v16, 273  ;;  %v5279_v58 = vpop.eup %5278 }
 0x535   : > { %9501 = vst [vmem:[#allocation59_spill] sm:$0xff] %v7982_v22  ;;  %4295 = vbcast.lane.b32.xlu0 %v9381_v10, 297  ;;  %v5281_v13 = vpop.eup %5280  ;;  %v4371_v27 = vadd.f32 1.0, %v5279_v58  ;;  %v4372_v58 = vmul.f32 0.5, %v4368_v24  ;;  %v4352_v24 = vmul.f32 %v4868_v45, %v9511_v23  ;;  %v9515_v45 = vld [vmem:[#allocation27_spill] sm:$0xff] }
 0x537   : > { %v7990_v52 = vpop.permute.xlu1 %3783 }
 0x538   : > { %9502 = vst [vmem:[#allocation117_spill] sm:$0xff] %v7990_v52  ;;  %v7992_v15 = vpop.permute.xlu0 %1648  ;;  %2741 = vbcast.lane.b32.xlu1 %v7931_v16, 289  ;;  %v9505_v52 = vld [vmem:[#allocation90_spill] sm:$0xff] }
 0x539   : > { %3955 = vbcast.lane.b32.xlu0 %v9364_v44, 305  ;;  %v1597_v5 = vmul.f32 %v1591_v41, %v9505_v52  ;;  %v4341_v41 = vld [vmem:[#allocation3] sm:$0xff] }
 0x53b   : > { %v7998_v26 = vpop.permute.xlu1 %3883 }
 0x53c   : > { %9504 = vst [vmem:[#allocation116_spill] sm:$0xff] %v7998_v26  ;;  %v8000_v40 = vpop.permute.xlu0 %1656  ;;  %2749 = vbcast.lane.b32.xlu1 %v7931_v16, 305  ;;  %v4370_v16 = vadd.f32 1.0, %v5281_v13  ;;  %v1610_v26 = vmul.f32 1.442695, %v1597_v5  ;;  %v4375_v13 = vmul.f32 0.5, %v4371_v27  ;;  %v8034_v27 = vmul.f32 %v9492_v33, %v4373_v47 }
 0x53d   : > { %4127 = vbcast.lane.b32.xlu0 %v9375_v48, 305  ;;  %v9509_v5 = vld [vmem:[#allocation41_spill] sm:$0xff]  ;;  %v8052_v33 = vadd.f32 %v4352_v24, %v4341_v41 }
 0x53e   : > { %v4374_v56 = vmul.f32 0.5, %v4370_v16  ;;  %5282 = vpow2.f32 %v1610_v26  ;;  %v8040_v26 = vmul.f32 %v9496_v54, %v4375_v13  ;;  %v9517_v54 = vld [vmem:[#allocation26_spill] sm:$0xff] }
 0x53f   : > { %v8005_v51 = vpop.permute.xlu1 %4055  ;;  %5284 = vpow2.f32 %v1608_v63  ;;  %9514 = vst [vmem:[#allocation58_spill] sm:$0xff] %v8052_v33 }
 0x540   : > { %9506 = vst [vmem:[#allocation53_spill] sm:$0xff] %v8005_v51  ;;  %v8008_v38 = vpop.permute.xlu0 %1712  ;;  %2849 = vbcast.lane.b32.xlu1 %v7958_v46, 257  ;;  %v8015_v51 = vsel %vm1539_vm14, %v7927_v35, %v1563_v19  ;;  %v1614_v35 = vmul.f32 1.442695, %v1599_v29  ;;  %v8043_v16 = vmul.f32 %v4374_v56, %v9498_v57 }
 0x541   : > { %4299 = vbcast.lane.b32.xlu0 %v9381_v10, 305  ;;  %9507 = vst [vmem:[#allocation50_spill] sm:$0xff] %v8015_v51  ;;  %v2996_v19 = vmul.f32 %v8015_v51, %v9509_v5  ;;  %v8067_v57 = vrot.slane %v8015_v51, %v9513_v7  ;;  %v8097_v33 = vrot.slane %v8015_v51, %v9517_v54 }
 0x542   : > { %5286 = vpow2.f32 %v1614_v35  ;;  %v9523_v35 = vld [vmem:[#allocation40_spill] sm:$0xff] }
 0x543   : > { %v8017_v22 = vpop.permute.xlu1 %4227  ;;  %v8047_v63 = vrot.slane %v2996_v19, %v9503_v53  ;;  %v8050_v29 = vrot.slane %v2996_v19, %v9513_v7  ;;  %v8059_v47 = vrot.slane %v2996_v19, %v9517_v54  ;;  %5288 = vpow2.f32 %v1612_v61  ;;  %9520 = vst [vmem:[#allocation62_spill] sm:$0xff] %v8067_v57  ;;  %9528 = vst [vmem:[#allocation95_spill] sm:$0xff] %v8097_v33 }
 0x544   : > { %9508 = vst [vmem:[#allocation48_spill] sm:$0xff] %v8017_v22  ;;  %v8020_v42 = vpop.permute.xlu0 %1720  ;;  %2857 = vbcast.lane.b32.xlu1 %v7958_v46, 273  ;;  %v8075_v41 = vmul.f32 %v7988_v62, %v9523_v35  ;;  %v8085_v61 = vrot.slane %v8015_v51, %v9480_v4  ;;  %v8088_v5 = vrot.slane %v2996_v19, %v9515_v45 }
 0x545   : > { %3959 = vbcast.lane.b32.xlu0 %v9364_v44, 313  ;;  %v8037_v44 = vmul.f32 %v4372_v58, %v9494_v20  ;;  %9512 = vst [vmem:[#allocation118_spill] sm:$0xff] %v8047_v63  ;;  %v8056_v20 = vrot.slane %v8015_v51, %v9515_v45  ;;  %9518 = vst [vmem:[#allocation67_spill] sm:$0xff] %v8059_v47  ;;  %v9521_v58 = vld [vmem:[#allocation29_spill] sm:$0xff]  ;;  %v8093_v35 = vrot.slane %v8015_v51, %v9503_v53 }
 0x546   : > { %v8071_v13 = vrot.slane %v8015_v51, %v9521_v58  ;;  %v8078_v23 = vrot.slane %v2996_v19, %v9521_v58  ;;  %9525 = vst [vmem:[#allocation75_spill] sm:$0xff] %v8085_v61  ;;  %9526 = vst [vmem:[#allocation69_spill] sm:$0xff] %v8088_v5  ;;  %v8108_v61 = vrot.slane %v2996_v19, %v9480_v4 }
 0x547   : > { %v8027_v22 = vpop.permute.xlu1 %3947  ;;  %9516 = vst [vmem:[#allocation52_spill] sm:$0xff] %v8056_v20  ;;  %9527 = vst [vmem:[#allocation103_spill] sm:$0xff] %v8093_v35  ;;  %v8115_v57 = vmul.f32 %v8047_v63, %v7813_v1  ;;  %v8119_v51 = vmul.f32 %v8050_v29, %v7816_v11  ;;  %v8132_v1 = vmul.f32 %v8059_v47, %v7883_v14 }
 0x548   : > { %9510 = vst [vmem:[#allocation54_spill] sm:$0xff] %v8027_v22  ;;  %v8029_v3 = vpop.permute.xlu0 %1821  ;;  %4275 = vbcast.lane.b32.xlu1 %v9495_v17, 289  ;;  %9522 = vst [vmem:[#allocation55_spill] sm:$0xff] %v8071_v13  ;;  %v8105_v22 = vmul.f32 %v8050_v29, %v7799_v49  ;;  %v8111_v13 = vrot.slane %v2996_v19, %v9485_v31  ;;  %v8128_v20 = vmul.f32 %v8078_v23, %v7875_v25 }
 0x549   : > { %4131 = vbcast.lane.b32.xlu0 %v9375_v48, 313  ;;  %v1766_v48 = vrot.slane %v7988_v62, %v9517_v54  ;;  %9524 = vst [vmem:[#allocation60_spill] sm:$0xff] %v8078_v23  ;;  %9531 = vst [vmem:[#allocation64_spill] sm:$0xff] %v8115_v57  ;;  %v8136_v11 = vmul.f32 %v8078_v23, %v7885_v32  ;;  %v8145_v25 = vmul.f32 %v8088_v5, %v7910_v37 }
 0x54a   : > { %9530 = vst [vmem:[#allocation87_spill] sm:$0xff] %v8105_v22  ;;  %9532 = vst [vmem:[#allocation77_spill] sm:$0xff] %v8119_v51  ;;  %v5283_v22 = vpop.eup %5282  ;;  %v8149_v14 = vmul.f32 %v8108_v61, %v7912_v9  ;;  %v1938_v32 = vrot.slane %v7988_v62, %v9515_v45  ;;  %v8165_v9 = vmul.f32 %v8108_v61, %v7918_v21 }
 0x54b   : > { %v8061_v56 = vpop.permute.xlu1 %4119  ;;  %9534 = vst [vmem:[#allocation68_spill] sm:$0xff] %v8128_v20  ;;  %9535 = vst [vmem:[#allocation107_spill] sm:$0xff] %v8132_v1  ;;  %v5285_v51 = vpop.eup %5284  ;;  %v8157_v1 = vmul.f32 %v8088_v5, %v7916_v18  ;;  %v8181_v21 = vrot.slane %v8075_v41, %v9513_v7  ;;  %v2110_v33 = vrot.slane %v7988_v62, %v9513_v7 }
 0x54c   : > { %9519 = vst [vmem:[#allocation61_spill] sm:$0xff] %v8061_v56  ;;  %v8080_v24 = vpop.permute.xlu0 %1829  ;;  %4291 = vbcast.lane.b32.xlu1 %v9381_v10, 289  ;;  %v8101_v56 = vmul.f32 %v8047_v63, %v7796_v34  ;;  %v8123_v34 = vmul.f32 %v8059_v47, %v7871_v50  ;;  %9536 = vst [vmem:[#allocation74_spill] sm:$0xff] %v8136_v11  ;;  %v1665_v50 = vrot.slane %v8075_v41, %v9503_v53  ;;  %v5287_v18 = vpop.eup %5286 }
 0x54d   : > { %2917 = vbcast.lane.b32.xlu0 %v7958_v46, 297  ;;  %9538 = vst [vmem:[#allocation92_spill] sm:$0xff] %v8145_v25  ;;  %9539 = vst [vmem:[#allocation76_spill] sm:$0xff] %v8149_v14  ;;  %v1771_v53 = vmul.f32 %v1766_v48, %v6841_v12  ;;  %v8160_v11 = vrot.slane %v2996_v19, %v9488_v30  ;;  %v8169_v14 = vrot.slane %v8075_v41, %v9517_v54  ;;  %v9542_v19 = vld [vmem:[#allocation44_spill] sm:$0xff]  ;;  %v5289_v54 = vpop.eup %5288 }
 0x54e   : > { %9529 = vst [vmem:[#allocation85_spill] sm:$0xff] %v8101_v56  ;;  %9533 = vst [vmem:[#allocation66_spill] sm:$0xff] %v8123_v34  ;;  %v1772_v56 = vmul.f32 %v1766_v48, %v9505_v52  ;;  %v9537_v34 = vld [vmem:[#allocation42_spill] sm:$0xff]  ;;  %v1671_v37 = vmul.f32 %v1665_v50, %v7992_v15  ;;  %v1774_v47 = vmul.f32 %v1766_v48, %v6837_v6  ;;  %v1678_v15 = vmul.f32 0.0, %v5285_v51 }
 0x54f   : > { %v1645_v49 = vpop.permute.xlu1 %1644  ;;  %9540 = vst [vmem:[#allocation93_spill] sm:$0xff] %v8157_v1  ;;  %9541 = vst [vmem:[#allocation86_spill] sm:$0xff] %v8165_v9  ;;  %v1679_v1 = vmul.f32 0.0, %v5283_v22  ;;  %v1783_v9 = vmul.f32 1.442695, %v1771_v53  ;;  %v1773_v22 = vmul.f32 %v1766_v48, %v6850_v59  ;;  %v1673_v51 = vmul.f32 %v1665_v50, %v8000_v40 }
 0x550   : > { %v8140_v57 = vpop.permute.xlu0 %1885  ;;  %3939 = vbcast.lane.b32.xlu1 %v9537_v34, 305  ;;  %v1670_v25 = vmul.f32 %v1665_v50, %v1645_v49  ;;  %v1785_v20 = vmul.f32 1.442695, %v1772_v56  ;;  %v8177_v49 = vrot.slane %v8075_v41, %v9515_v45  ;;  %v1944_v56 = vmul.f32 %v1938_v32, %v9505_v52 }
 0x551   : > { %2925 = vbcast.lane.b32.xlu0 %v7958_v46, 313  ;;  %v8189_v63 = vadd.f32 %v1679_v1, %v1671_v37  ;;  %v8195_v36 = vmul.f32 %v8108_v61, %v7924_v28  ;;  %v1946_v53 = vmul.f32 %v1938_v32, %v6837_v6  ;;  %v1681_v7 = vmul.f32 0.0, %v5287_v18 }
 0x552   : > { %v8191_v0 = vadd.f32 %v1678_v15, %v1670_v25  ;;  %5290 = vpow2.f32 %v1785_v20  ;;  %v1957_v28 = vmul.f32 1.442695, %v1944_v56  ;;  %v1787_v20 = vmul.f32 1.442695, %v1773_v22 }
 0x553   : > { %v1653_v23 = vpop.permute.xlu1 %1652  ;;  %9543 = vst [vmem:[#allocation104_spill] sm:$0xff] %v8195_v36  ;;  %v1727_v48 = vmul.f32 %v8008_v38, %v8189_v63  ;;  %5292 = vpow2.f32 %v1783_v9  ;;  %v1961_v18 = vmul.f32 1.442695, %v1946_v53  ;;  %v1943_v15 = vmul.f32 %v1938_v32, %v6841_v12 }
 0x554   : > { %v8172_v5 = vpop.permute.xlu0 %1893  ;;  %4111 = vbcast.lane.b32.xlu1 %v9542_v19, 305  ;;  %v1672_v45 = vmul.f32 %v1665_v50, %v1653_v23  ;;  %v1680_v23 = vmul.f32 0.0, %v5289_v54  ;;  %v8207_v50 = vadd.f32 %v1681_v7, %v1673_v51  ;;  %v1945_v51 = vmul.f32 %v1938_v32, %v6850_v59 }
 0x555   : > { %4303 = vbcast.lane.b32.xlu0 %v9381_v10, 313  ;;  %v1789_v10 = vmul.f32 1.442695, %v1774_v47  ;;  %v2116_v47 = vmul.f32 %v2110_v33, %v9505_v52  ;;  %v1744_v9 = vsel %vm1396_vm9, %v1727_v48, 0.0 }
 0x556   : > { %v8210_v25 = vadd.f32 %v1680_v23, %v1672_v45  ;;  %v1729_v54 = vmul.f32 %v8020_v42, %v8207_v50  ;;  %v8228_v45 = vmul.f32 %v8111_v13, %v7935_v2  ;;  %v8234_v42 = vrot.slane %v8075_v41, %v9521_v58 }
 0x557   : > { %v1709_v35 = vpop.permute.xlu1 %1708  ;;  %5294 = vpow2.f32 %v1789_v10  ;;  %v2129_v48 = vmul.f32 1.442695, %v2116_v47  ;;  %v1955_v23 = vmul.f32 1.442695, %v1943_v15  ;;  %v1959_v47 = vmul.f32 1.442695, %v1945_v51 }
 0x558   : > { %v1726_v40 = vmul.f32 %v1709_v35, %v8191_v0  ;;  %v8201_v1 = vpop.permute.xlu0 %1993  ;;  %4283 = vbcast.lane.b32.xlu1 %v9495_v17, 305  ;;  %v2118_v35 = vmul.f32 %v2110_v33, %v6837_v6  ;;  %9544 = vst [vmem:[#allocation91_spill] sm:$0xff] %v8228_v45  ;;  %5296 = vpow2.f32 %v1787_v20 }
 0x559   : > { %4386 = vrot.lane.b32.xlu0 %v8034_v27, %s5651_s5  ;;  %v8216_v27 = vrot.slane %v7988_v62, %v9521_v58  ;;  %v1748_v58 = vsel %vm1396_vm9, %v1729_v54, 0.0  ;;  %5298 = vpow2.f32 %v1957_v28 }
 0x55a   : > { %v1743_v38 = vsel %vm1396_vm9, %v1726_v40, 0.0  ;;  %v2133_v7 = vmul.f32 1.442695, %v2118_v35  ;;  %5300 = vpow2.f32 %v1961_v18 }
 0x55b   : > { %v1717_v37 = vpop.permute.xlu1 %1716  ;;  %v1745_v10 = vadd.f32 %v1744_v9, %v1743_v38  ;;  %v2288_v2 = vmul.f32 %v8216_v27, %v9505_v52  ;;  %v2117_v38 = vmul.f32 %v2110_v33, %v6850_v59  ;;  %v2290_v35 = vmul.f32 %v8216_v27, %v6837_v6 }
 0x55c   : > { %v1728_v56 = vmul.f32 %v1717_v37, %v8210_v25  ;;  %v8222_v22 = vpop.permute.xlu0 %2001  ;;  %3943 = vbcast.lane.b32.xlu1 %v9537_v34, 313  ;;  %v2115_v34 = vmul.f32 %v2110_v33, %v6841_v12  ;;  %v5291_v37 = vpop.eup %5290  ;;  %v8253_v33 = vrot.slane %v8075_v41, %v9480_v4  ;;  %v8261_v9 = vmul.f32 %v8111_v13, %v7942_v55 }
 0x55d   : > { %4390 = vrot.lane.b32.xlu0 %v8040_v26, %s5651_s5  ;;  %v8243_v26 = vmul.f32 %v8050_v29, %v7940_v8  ;;  %v8257_v8 = vrot.slane %v7988_v62, %v9480_v4  ;;  %v5293_v28 = vpop.eup %5292  ;;  %v1852_v4 = vmul.f32 %v5291_v37, %v8189_v63  ;;  %5302 = vpow2.f32 %v2129_v48 }
 0x55e   : > { %v1746_v53 = vsel %vm1396_vm9, %v1728_v56, 0.0  ;;  %9546 = vst [vmem:[#allocation43_spill] sm:$0xff] %v8261_v9  ;;  %v8266_v56 = vmul.f32 1.442695, %v2115_v34  ;;  %v1851_v55 = vmul.f32 %v5293_v28, %v8191_v0  ;;  %v2287_v34 = vmul.f32 %v8216_v27, %v6841_v12 }
 0x55f   : > { %v1747_v32 = vadd.f32 %v1746_v53, %v1745_v10  ;;  %v1818_v40 = vpop.permute.xlu1 %1817  ;;  %9545 = vst [vmem:[#allocation30_spill] sm:$0xff] %v8243_v26  ;;  %v2301_v53 = vmul.f32 1.442695, %v2288_v2  ;;  %v2460_v18 = vmul.f32 %v8257_v8, %v9505_v52  ;;  %v2462_v63 = vmul.f32 %v8257_v8, %v6837_v6 }
 0x560   : > { %v8246_v20 = vpop.permute.xlu0 %2057  ;;  %4115 = vbcast.lane.b32.xlu1 %v9542_v19, 313  ;;  %v1844_v19 = vmul.f32 %v8169_v14, %v8029_v3  ;;  %v1843_v54 = vmul.f32 %v8169_v14, %v1818_v40  ;;  %v8275_v3 = vmul.f32 1.442695, %v2290_v35  ;;  %v1846_v2 = vmul.f32 %v8169_v14, %v8080_v24 }
 0x561   : > { %v1749_v15 = vadd.f32 %v1748_v58, %v1747_v32  ;;  %v8268_v32 = vmul.f32 1.442695, %v2117_v38  ;;  %v5295_v40 = vpop.eup %5294  ;;  %v8290_v28 = vmul.f32 %v8050_v29, %v7946_v43  ;;  %v8294_v48 = vmul.f32 %v8111_v13, %v7948_v39 }
 0x562   : > { %v1860_v38 = vadd.f32 %v1852_v4, %v1844_v19  ;;  %v8286_v35 = vadd.f32 %v1851_v55, %v1843_v54  ;;  %v5297_v37 = vpop.eup %5296  ;;  %5304 = vpow2.f32 %v2133_v7  ;;  %v1854_v24 = vmul.f32 %v5295_v40, %v8207_v50 }
 0x563   : > { %v1750_v51 = vrot.slane %v1749_v15, 4  ;;  %v1826_v10 = vpop.permute.xlu1 %1825  ;;  %9547 = vst [vmem:[#allocation31_spill] sm:$0xff] %v8290_v28  ;;  %9548 = vst [vmem:[#allocation32_spill] sm:$0xff] %v8294_v48  ;;  %v1853_v54 = vmul.f32 %v5297_v37, %v8210_v25  ;;  %5306 = vpow2.f32 %v1955_v23  ;;  %v2473_v29 = vmul.f32 1.442695, %v2460_v18  ;;  %v5299_v50 = vpop.eup %5298 }
 0x564   : > { %v8271_v58 = vpop.permute.xlu0 %2065  ;;  %2913 = vbcast.lane.b32.xlu1 %v7958_v46, 289  ;;  %v1845_v0 = vmul.f32 %v8169_v14, %v1826_v10  ;;  %v1900_v26 = vmul.f32 %v8140_v57, %v1860_v38  ;;  %v8301_v10 = vmul.f32 1.442695, %v2287_v34  ;;  %v1862_v39 = vadd.f32 %v1854_v24, %v1846_v2 }
 0x565   : > { %v1751_v9 = vadd.f32 %v1750_v51, %v1749_v15  ;;  %v8306_v57 = vmul.f32 1.442695, %v2462_v63  ;;  %v2016_v55 = vmul.f32 %v8177_v49, %v8201_v1  ;;  %5308 = vpow2.f32 %v1959_v47  ;;  %v5301_v1 = vpop.eup %5300 }
 0x566   : > { %v8304_v7 = vadd.f32 %v1853_v54, %v1845_v0  ;;  %v8312_v25 = vrot.slane %v8075_v41, %v9485_v31  ;;  %v1917_v23 = vsel %vm1396_vm9, %v1900_v26, 0.0  ;;  %v2289_v63 = vmul.f32 %v8216_v27, %v6850_v59 }
 0x567   : > { %v1752_v15 = vrot.slane %v1751_v9, 2  ;;  %v1882_v51 = vpop.permute.xlu1 %1881  ;;  %v2024_v0 = vmul.f32 %v5299_v50, %v1860_v38  ;;  %v8322_v37 = vrot.slane %v7988_v62, %v9485_v31  ;;  %v2018_v26 = vmul.f32 %v8177_v49, %v8222_v22 }
 0x568   : > { %v1899_v14 = vmul.f32 %v1882_v51, %v8286_v35  ;;  %v2166_v19 = vpop.permute.xlu0 %2165  ;;  %2921 = vbcast.lane.b32.xlu1 %v7958_v46, 305  ;;  %5310 = vpow2.f32 %v2301_v53  ;;  %v8332_v24 = vrot.slane %v7988_v62, %v9488_v30  ;;  %v8340_v22 = vmul.f32 %v8160_v11, %v7953_v60 }
 0x569   : > { %v1753_v43 = vadd.f32 %v1752_v15, %v1751_v9  ;;  %v1902_v9 = vmul.f32 %v8172_v5, %v1862_v39  ;;  %v5303_v15 = vpop.eup %5302  ;;  %v2032_v27 = vadd.f32 %v2024_v0, %v2016_v55  ;;  %v2026_v54 = vmul.f32 %v5301_v1, %v1862_v39  ;;  %v9550_v0 = vld [vmem:[#allocation103_spill] sm:$0xff] }
 0x56a   : > { %v1916_v4 = vsel %vm1396_vm9, %v1899_v14, 0.0  ;;  %v8336_v14 = vrot.slane %v8075_v41, %v9488_v30  ;;  %9549 = vst [vmem:[#allocation34_spill] sm:$0xff] %v8340_v22  ;;  %5312 = vpow2.f32 %v8275_v3  ;;  %v2632_v60 = vmul.f32 %v8322_v37, %v9505_v52 }
 0x56b   : > { %v1754_v40 = vrot.slane %v1753_v43, 1  ;;  %v1890_v46 = vpop.permute.xlu1 %1889  ;;  %v1918_v47 = vadd.f32 %v1917_v23, %v1916_v4  ;;  %v1921_v53 = vsel %vm1396_vm9, %v1902_v9, 0.0  ;;  %v2188_v4 = vmul.f32 %v8181_v21, %v2166_v19 }
 0x56c   : > { %v1901_v34 = vmul.f32 %v1890_v46, %v8304_v7  ;;  %v2174_v18 = vpop.permute.xlu0 %2173  ;;  %4287 = vbcast.lane.b32.xlu1 %v9495_v17, 313  ;;  %v2459_v17 = vmul.f32 %v8257_v8, %v6841_v12  ;;  %v5305_v62 = vpop.eup %5304  ;;  %5314 = vpow2.f32 %v8266_v56  ;;  %v2034_v41 = vadd.f32 %v2026_v54, %v2018_v26 }
 0x56d   : > { %v1755_v2 = vadd.f32 %v1754_v40, %v1753_v43  ;;  %5316 = vpow2.f32 %v2473_v29  ;;  %v2303_v39 = vmul.f32 1.442695, %v2289_v63  ;;  %v5307_v40 = vpop.eup %5306  ;;  %v2196_v23 = vmul.f32 %v5303_v15, %v2032_v27 }
 0x56e   : > { %v1919_v5 = vsel %vm1396_vm9, %v1901_v34, 0.0  ;;  %5318 = vpow2.f32 %v8268_v32  ;;  %v2634_v3 = vmul.f32 %v8322_v37, %v6837_v6  ;;  %v2190_v19 = vmul.f32 %v8181_v21, %v2174_v18 }
 0x56f   : > { %1758 = vst.msk [vmem:[#allocation3 + $0x10] sm:$0x1] %vm1756_vm12, %v1755_v2  ;;  %v1920_v51 = vadd.f32 %v1919_v5, %v1918_v47  ;;  %v1990_v38 = vpop.permute.xlu1 %1989  ;;  %v2023_v9 = vmul.f32 %v5307_v40, %v8286_v35  ;;  %v8362_v29 = vmul.f32 1.442695, %v2459_v17  ;;  %v2804_v34 = vmul.f32 %v8332_v24, %v9505_v52  ;;  %v5309_v63 = vpop.eup %5308 }
 0x570   : > { %v8343_v43 = vpop.permute.xlu0 %2229  ;;  %4384 = vrot.lane.b32.xlu1 %v8037_v44, %s5651_s5  ;;  %v2015_v55 = vmul.f32 %v8177_v49, %v1990_v38  ;;  %v8366_v32 = vadd.f32 %v2196_v23, %v2188_v4  ;;  %v2645_v2 = vmul.f32 1.442695, %v2632_v60  ;;  %v2976_v18 = vmul.f32 %v9550_v0, %v9505_v52  ;;  %v9553_v38 = vld [vmem:[#allocation96_spill] sm:$0xff] }
 0x571   : > { %v1922_v50 = vadd.f32 %v1921_v53, %v1920_v51  ;;  %v2198_v26 = vmul.f32 %v5305_v62, %v2034_v41  ;;  %5320 = vpow2.f32 %v8306_v57  ;;  %v2649_v51 = vmul.f32 1.442695, %v2634_v3  ;;  %v9554_v53 = vld [vmem:[#allocation118_spill] sm:$0xff] }
 0x572   : > { %v8371_v5 = vadd.f32 %v2023_v9, %v2015_v55  ;;  %v8380_v54 = vmul.f32 %v9554_v53, %v9553_v38  ;;  %v5311_v4 = vpop.eup %5310  ;;  %v2025_v57 = vmul.f32 %v5309_v63, %v8304_v7  ;;  %v2817_v23 = vmul.f32 1.442695, %v2804_v34  ;;  %v9556_v7 = vld [vmem:[#allocation95_spill] sm:$0xff] }
 0x573   : > { %v1923_v46 = vrot.slane %v1922_v50, 4  ;;  %v1998_v44 = vpop.permute.xlu1 %1997  ;;  %5322 = vpow2.f32 %v8301_v10  ;;  %v3150_v63 = vmul.f32 %v9556_v7, %v9505_v52 }
 0x574   : > { %v8357_v56 = vpop.permute.xlu0 %2237  ;;  %4388 = vrot.lane.b32.xlu1 %v8043_v16, %s5651_s5  ;;  %v2017_v47 = vmul.f32 %v8177_v49, %v1998_v44  ;;  %v9551_v16 = vld [vmem:[#allocation71_spill] sm:$0xff]  ;;  %9555 = vst [vmem:[#allocation45_spill] sm:$0xff] %v8380_v54  ;;  %v8383_v49 = vadd.f32 %v2198_v26, %v2190_v19  ;;  %v5313_v44 = vpop.eup %5312  ;;  %5324 = vpow2.f32 %v2303_v39  ;;  %v2461_v39 = vmul.f32 %v8257_v8, %v6850_v59 }
 0x575   : > { %v1924_v1 = vadd.f32 %v1923_v46, %v1922_v50  ;;  %v8376_v35 = vmul.f32 %v8160_v11, %v9551_v16  ;;  %v2072_v50 = vmul.f32 %v8246_v20, %v2032_v27  ;;  %v2368_v46 = vmul.f32 %v5311_v4, %v8366_v32 }
 0x576   : > { %v8390_v9 = vadd.f32 %v2025_v57, %v2017_v47  ;;  %v2989_v20 = vmul.f32 1.442695, %v2976_v18  ;;  %v5315_v27 = vpop.eup %5314  ;;  %v2074_v47 = vmul.f32 %v8271_v58, %v2034_v41  ;;  %v2370_v18 = vmul.f32 %v5313_v44, %v8383_v49  ;;  %v9561_v58 = vld [vmem:[#allocation62_spill] sm:$0xff] }
 0x577   : > { %9552 = vst [vmem:[#allocation35_spill] sm:$0xff] %v8376_v35  ;;  %v1925_v17 = vrot.slane %v1924_v1, 2  ;;  %v2054_v15 = vpop.permute.xlu1 %2053  ;;  %v5317_v34 = vpop.eup %5316  ;;  %v9558_v35 = vld [vmem:[#allocation112_spill] sm:$0xff]  ;;  %v3494_v41 = vmul.f32 %v9561_v58, %v9505_v52  ;;  %5326 = vpow2.f32 %v2645_v2 }
 0x578   : > { %v2071_v62 = vmul.f32 %v2054_v15, %v8371_v5  ;;  %v2338_v60 = vpop.permute.xlu0 %2337  ;;  %v2089_v15 = vsel %vm1396_vm9, %v2072_v50, 0.0  ;;  %v5319_v4 = vpop.eup %5318  ;;  %v9559_v50 = vld [vmem:[#allocation67_spill] sm:$0xff]  ;;  %v2093_v48 = vsel %vm1396_vm9, %v2074_v47, 0.0  ;;  %5328 = vpow2.f32 %v2649_v51 }
 0x579   : > { %v1926_v55 = vadd.f32 %v1925_v17, %v1924_v1  ;;  %v2360_v40 = vmul.f32 %v8234_v42, %v2338_v60  ;;  %v9557_v1 = vld [vmem:[#allocation52_spill] sm:$0xff]  ;;  %v8410_v28 = vmul.f32 %v9559_v50, %v9558_v35  ;;  %5330 = vpow2.f32 %v8362_v29 }
 0x57a   : > { %v2088_v3 = vsel %vm1396_vm9, %v2071_v62, 0.0  ;;  %v3322_v17 = vmul.f32 %v9557_v1, %v9505_v52  ;;  %v9566_v35 = vld [vmem:[#allocation60_spill] sm:$0xff]  ;;  %v3324_v2 = vmul.f32 %v9557_v1, %v6837_v6  ;;  %v2195_v51 = vmul.f32 %v5315_v27, %v8371_v5 }
 0x57b   : > { %v1927_v19 = vrot.slane %v1926_v55, 1  ;;  %v2062_v26 = vpop.permute.xlu1 %2061  ;;  %v8393_v16 = vadd.f32 %v2368_v46, %v2360_v40  ;;  %v2090_v60 = vadd.f32 %v2089_v15, %v2088_v3  ;;  %9560 = vst [vmem:[#allocation36_spill] sm:$0xff] %v8410_v28  ;;  %v5321_v15 = vpop.eup %5320  ;;  %5332 = vpow2.f32 %v2817_v23 }
 0x57c   : > { %v2073_v38 = vmul.f32 %v2062_v26, %v8390_v9  ;;  %v2346_v10 = vpop.permute.xlu0 %2345  ;;  %v9563_v26 = vld [vmem:[#allocation69_spill] sm:$0xff]  ;;  %5334 = vpow2.f32 %v2989_v20 }
 0x57d   : > { %v1928_v62 = vadd.f32 %v1927_v19, %v1926_v55  ;;  %v2362_v57 = vmul.f32 %v8234_v42, %v2346_v10  ;;  %v8405_v40 = vmul.f32 %v5317_v34, %v8393_v16  ;;  %v9562_v19 = vld [vmem:[#allocation102_spill] sm:$0xff] }
 0x57e   : > { %v2091_v46 = vsel %vm1396_vm9, %v2073_v38, 0.0  ;;  %v8419_v34 = vmul.f32 %v9563_v26, %v9562_v19  ;;  %v9565_v38 = vld [vmem:[#allocation101_spill] sm:$0xff]  ;;  %v3507_v19 = vmul.f32 1.442695, %v3494_v41  ;;  %v2475_v41 = vmul.f32 1.442695, %v2461_v39 }
 0x57f   : > { %1930 = vst.msk [vmem:[#allocation3 + $0x11] sm:$0x1] %vm1756_vm12, %v1928_v62  ;;  %v2092_v44 = vadd.f32 %v2091_v46, %v2090_v60  ;;  %v2162_v55 = vpop.permute.xlu1 %2161  ;;  %v8415_v3 = vadd.f32 %v2370_v18, %v2362_v57  ;;  %v8425_v10 = vmul.f32 %v9566_v35, %v9565_v38  ;;  %v3163_v62 = vmul.f32 1.442695, %v3150_v63  ;;  %v8443_v63 = vpop.eup %5322 }
 0x580   : > { %9564 = vst [vmem:[#allocation37_spill] sm:$0xff] %v8419_v34  ;;  %v8428_v36 = vpop.permute.xlu0 %2401  ;;  %v3335_v57 = vmul.f32 1.442695, %v3322_v17  ;;  %v2806_v46 = vmul.f32 %v8332_v24, %v6837_v6  ;;  %v2187_v8 = vmul.f32 %v8181_v21, %v2162_v55  ;;  %v2978_v38 = vmul.f32 %v9550_v0, %v6837_v6  ;;  %v9571_v34 = vld [vmem:[#allocation109_spill] sm:$0xff] }
 0x581   : > { %9567 = vst [vmem:[#allocation33_spill] sm:$0xff] %v8425_v10  ;;  %v2094_v18 = vadd.f32 %v2093_v48, %v2092_v44  ;;  %v8431_v60 = vmul.f32 %v5321_v15, %v8415_v3  ;;  %v3152_v48 = vmul.f32 %v9556_v7, %v6837_v6  ;;  %v9568_v44 = vld [vmem:[#allocation110_spill] sm:$0xff]  ;;  %v9569_v15 = vld [vmem:[#allocation115_spill] sm:$0xff]  ;;  %v8460_v28 = vmul.f32 %v9559_v50, %v9571_v34 }
 0x582   : > { %v8450_v55 = vmul.f32 %v9554_v53, %v9568_v44  ;;  %v8454_v29 = vmul.f32 %v9566_v35, %v9569_v15  ;;  %v8456_v45 = vmul.f32 1.442695, %v2806_v46  ;;  %v2203_v5 = vadd.f32 %v2195_v51, %v2187_v8  ;;  %v8465_v35 = vpop.eup %5324 }
 0x583   : > { %v2095_v47 = vrot.slane %v2094_v18, 4  ;;  %v2170_v10 = vpop.permute.xlu1 %2169  ;;  %9572 = vst [vmem:[#allocation38_spill] sm:$0xff] %v8460_v28  ;;  %v2993_v23 = vmul.f32 1.442695, %v2978_v38  ;;  %5336 = vpow2.f32 %v3163_v62  ;;  %v3167_v53 = vmul.f32 1.442695, %v3152_v48  ;;  %v5327_v38 = vpop.eup %5326 }
 0x584   : > { %v8445_v17 = vpop.permute.xlu0 %2409  ;;  %9570 = vst [vmem:[#allocation90_spill] sm:$0xff] %v8454_v29  ;;  %v2189_v54 = vmul.f32 %v8181_v21, %v2170_v10  ;;  %v8463_v44 = vmul.f32 1.442695, %v3324_v2  ;;  %v2197_v50 = vmul.f32 %v5319_v4, %v8390_v9  ;;  %v9573_v21 = vld [vmem:[#allocation55_spill] sm:$0xff]  ;;  %5338 = vpow2.f32 %v3335_v57  ;;  %v5329_v15 = vpop.eup %5328 }
 0x585   : > { %v2096_v22 = vadd.f32 %v2095_v47, %v2094_v18  ;;  %v2244_v18 = vmul.f32 %v8343_v43, %v8366_v32  ;;  %v3666_v34 = vmul.f32 %v9573_v21, %v9505_v52  ;;  %v9574_v62 = vld [vmem:[#allocation75_spill] sm:$0xff]  ;;  %v9575_v43 = vld [vmem:[#allocation50_spill] sm:$0xff]  ;;  %5340 = vpow2.f32 %v3507_v19 }
 0x586   : > { %v3838_v8 = vmul.f32 %v9574_v62, %v9505_v52  ;;  %v2205_v2 = vadd.f32 %v2197_v50, %v2189_v54  ;;  %v8478_v32 = vrot.slane %v9575_v43, %v9485_v31  ;;  %v8482_v9 = vrot.slane %v9575_v43, %v9488_v30  ;;  %v5331_v30 = vpop.eup %5330 }
 0x587   : > { %v2097_v27 = vrot.slane %v2096_v22, 2  ;;  %v2226_v39 = vpop.permute.xlu1 %2225  ;;  %v2631_v57 = vmul.f32 %v8322_v37, %v6841_v12  ;;  %v2261_v54 = vsel %vm1396_vm9, %v2244_v18, 0.0  ;;  %v2246_v31 = vmul.f32 %v8357_v56, %v8383_v49  ;;  %v8496_v19 = vpop.eup %5332 }
 0x588   : > { %v2243_v46 = vmul.f32 %v2226_v39, %v2203_v5  ;;  %v2510_v47 = vpop.permute.xlu0 %2509  ;;  %5342 = vpow2.f32 %v2475_v41  ;;  %v3679_v43 = vmul.f32 1.442695, %v3666_v34  ;;  %v3851_v18 = vmul.f32 1.442695, %v3838_v8 }
 0x589   : > { %v2098_v20 = vadd.f32 %v2097_v27, %v2096_v22  ;;  %v2532_v10 = vmul.f32 %v8253_v33, %v2510_v47  ;;  %v2633_v56 = vmul.f32 %v8322_v37, %v6850_v59  ;;  %v2265_v34 = vsel %vm1396_vm9, %v2246_v31, 0.0 }
 0x58a   : > { %v2260_v48 = vsel %vm1396_vm9, %v2243_v46, 0.0  ;;  %5344 = vpow2.f32 %v8456_v45  ;;  %v2369_v45 = vmul.f32 %v8465_v35, %v2205_v2  ;;  %v3493_v35 = vmul.f32 %v9561_v58, %v6841_v12 }
 0x58b   : > { %v2099_v4 = vrot.slane %v2098_v20, 1  ;;  %v2234_v22 = vpop.permute.xlu1 %2233  ;;  %v8485_v51 = vadd.f32 %v8405_v40, %v2532_v10  ;;  %v2262_v47 = vadd.f32 %v2261_v54, %v2260_v48  ;;  %v4182_v48 = vmul.f32 %v8482_v9, %v9505_v52 }
 0x58c   : > { %v2245_v27 = vmul.f32 %v2234_v22, %v2205_v2  ;;  %v2518_v39 = vpop.permute.xlu0 %2517  ;;  %v2367_v22 = vmul.f32 %v8443_v63, %v2203_v5  ;;  %v2643_v54 = vmul.f32 1.442695, %v2631_v57  ;;  %5346 = vpow2.f32 %v2993_v23 }
 0x58d   : > { %v2100_v46 = vadd.f32 %v2099_v4, %v2098_v20  ;;  %v2534_v50 = vmul.f32 %v8253_v33, %v2518_v39  ;;  %v8494_v40 = vmul.f32 %v5327_v38, %v8485_v51  ;;  %v4010_v38 = vmul.f32 %v8478_v32, %v9505_v52  ;;  %v8509_v4 = vpop.eup %5334 }
 0x58e   : > { %v2263_v10 = vsel %vm1396_vm9, %v2245_v27, 0.0  ;;  %v8516_v27 = vpop.eup %5336  ;;  %5348 = vpow2.f32 %v3167_v53  ;;  %v4195_v53 = vmul.f32 1.442695, %v4182_v48  ;;  %v2805_v2 = vmul.f32 %v8332_v24, %v6850_v59 }
 0x58f   : > { %2102 = vst.msk [vmem:[#allocation3 + $0x12] sm:$0x1] %vm1756_vm12, %v2100_v46  ;;  %v2264_v49 = vadd.f32 %v2263_v10, %v2262_v47  ;;  %v2334_v41 = vpop.permute.xlu1 %2333  ;;  %v8503_v20 = vadd.f32 %v8431_v60, %v2534_v50  ;;  %v9576_v60 = vld [vmem:[#allocation59_spill] sm:$0xff]  ;;  %v2647_v47 = vmul.f32 1.442695, %v2633_v56  ;;  %v2803_v50 = vmul.f32 %v8332_v24, %v6841_v12  ;;  %v8528_v63 = vpop.eup %5338 }
 0x590   : > { %v2359_v8 = vmul.f32 %v8234_v42, %v2334_v41  ;;  %v8513_v37 = vpop.permute.xlu0 %2573  ;;  %v8520_v39 = vmul.f32 %v8160_v11, %v9576_v60  ;;  %v4023_v10 = vmul.f32 1.442695, %v4010_v38  ;;  %v3149_v56 = vmul.f32 %v9556_v7, %v6841_v12 }
 0x591   : > { %v2266_v46 = vadd.f32 %v2265_v34, %v2264_v49  ;;  %v8523_v52 = vmul.f32 %v5329_v15, %v8503_v20  ;;  %v2975_v49 = vmul.f32 %v9550_v0, %v6841_v12  ;;  %v8540_v34 = vpop.eup %5340  ;;  %5350 = vpow2.f32 %v8463_v44 }
 0x592   : > { %9577 = vst [vmem:[#allocation28_spill] sm:$0xff] %v8520_v39  ;;  %v2375_v31 = vadd.f32 %v2367_v22, %v2359_v8  ;;  %v3321_v38 = vmul.f32 %v9557_v1, %v6841_v12  ;;  %v5343_v22 = vpop.eup %5342  ;;  %5352 = vpow2.f32 %v3679_v43  ;;  %v3161_v29 = vmul.f32 1.442695, %v3149_v56 }
 0x593   : > { %v2267_v5 = vrot.slane %v2266_v46, 4  ;;  %v2342_v57 = vpop.permute.xlu1 %2341  ;;  %v2987_v44 = vmul.f32 1.442695, %v2975_v49  ;;  %5354 = vpow2.f32 %v3851_v18  ;;  %v8558_v43 = vmul.f32 1.442695, %v2805_v2 }
 0x594   : > { %v2361_v15 = vmul.f32 %v8234_v42, %v2342_v57  ;;  %v8533_v41 = vpop.permute.xlu0 %2581  ;;  %v8536_v23 = vmul.f32 %v5331_v30, %v2375_v31  ;;  %v2416_v42 = vmul.f32 %v8428_v36, %v8393_v16  ;;  %5356 = vpow2.f32 %v2643_v54 }
 0x595   : > { %v2268_v8 = vadd.f32 %v2267_v5, %v2266_v46  ;;  %v2815_v46 = vmul.f32 1.442695, %v2803_v50  ;;  %v3333_v16 = vmul.f32 1.442695, %v3321_v38  ;;  %v5345_v50 = vpop.eup %5344  ;;  %v2977_v56 = vmul.f32 %v9550_v0, %v6850_v59 }
 0x596   : > { %v2377_v60 = vadd.f32 %v2369_v45, %v2361_v15  ;;  %v2433_v15 = vsel %vm1396_vm9, %v2416_v42, 0.0  ;;  %v8556_v45 = vmul.f32 1.442695, %v3493_v35  ;;  %v8565_v54 = vpop.eup %5346  ;;  %v3151_v35 = vmul.f32 %v9556_v7, %v6850_v59 }
 0x597   : > { %v2269_v30 = vrot.slane %v2268_v8, 2  ;;  %v2398_v57 = vpop.permute.xlu1 %2397  ;;  %v3323_v2 = vmul.f32 %v9557_v1, %v6850_v59  ;;  %5358 = vpow2.f32 %v2647_v47  ;;  %v3495_v7 = vmul.f32 %v9561_v58, %v6850_v59 }
 0x598   : > { %v2415_v48 = vmul.f32 %v2398_v57, %v2375_v31  ;;  %v2682_v5 = vpop.permute.xlu0 %2681  ;;  %v8551_v39 = vmul.f32 %v5343_v22, %v2377_v60  ;;  %5360 = vpow2.f32 %v4023_v10  ;;  %v2991_v47 = vmul.f32 1.442695, %v2977_v56 }
 0x599   : > { %v2270_v28 = vadd.f32 %v2269_v30, %v2268_v8  ;;  %v2704_v36 = vmul.f32 %v8312_v25, %v2682_v5  ;;  %v2418_v8 = vmul.f32 %v8445_v17, %v8415_v3  ;;  %v8573_v30 = vpop.eup %5348  ;;  %5362 = vpow2.f32 %v4195_v53 }
 0x59a   : > { %v2432_v24 = vsel %vm1396_vm9, %v2415_v48, 0.0  ;;  %v9578_v48 = vld [vmem:[#allocation116_spill] sm:$0xff]  ;;  %v3165_v10 = vmul.f32 1.442695, %v3151_v35  ;;  %v3665_v53 = vmul.f32 %v9573_v21, %v6841_v12  ;;  %5364 = vpow2.f32 %v2815_v46 }
 0x59b   : > { %v2271_v31 = vrot.slane %v2270_v28, 1  ;;  %v2434_v49 = vadd.f32 %v2433_v15, %v2432_v24  ;;  %v2406_v22 = vpop.permute.xlu1 %2405  ;;  %v8561_v18 = vadd.f32 %v8494_v40, %v2704_v36  ;;  %v8582_v3 = vmul.f32 %v8108_v61, %v9578_v48  ;;  %v8587_v1 = vpop.eup %5350 }
 0x59c   : > { %v2417_v38 = vmul.f32 %v2406_v22, %v2377_v60  ;;  %v2690_v42 = vpop.permute.xlu0 %2689  ;;  %v2437_v61 = vsel %vm1396_vm9, %v2418_v8, 0.0  ;;  %v8597_v15 = vmul.f32 1.442695, %v3323_v2  ;;  %v8599_v24 = vpop.eup %5352  ;;  %v3509_v8 = vmul.f32 1.442695, %v3495_v7 }
 0x59d   : > { %v2272_v40 = vadd.f32 %v2271_v31, %v2270_v28  ;;  %v2706_v57 = vmul.f32 %v8312_v25, %v2690_v42  ;;  %v8578_v0 = vmul.f32 %v8496_v19, %v8561_v18  ;;  %v8608_v22 = vpop.eup %5354  ;;  %5366 = vpow2.f32 %v2987_v44 }
 0x59e   : > { %v2435_v17 = vsel %vm1396_vm9, %v2417_v38, 0.0  ;;  %v9579_v38 = vld [vmem:[#allocation106_spill] sm:$0xff]  ;;  %v5357_v35 = vpop.eup %5356  ;;  %5368 = vpow2.f32 %v3161_v29  ;;  %v3677_v7 = vmul.f32 1.442695, %v3665_v53 }
 0x59f   : > { %2274 = vst.msk [vmem:[#allocation3 + $0x13] sm:$0x1] %vm1756_vm12, %v2272_v40  ;;  %v2436_v28 = vadd.f32 %v2435_v17, %v2434_v49  ;;  %v2506_v60 = vpop.permute.xlu1 %2505  ;;  %v8591_v19 = vadd.f32 %v8523_v52, %v2706_v57  ;;  %v3496_v52 = vmul.f32 %v9561_v58, %v6837_v6  ;;  %v8613_v42 = vmul.f32 %v9563_v26, %v9579_v38  ;;  %v9580_v57 = vld [vmem:[#allocation53_spill] sm:$0xff] }
 0x5a0   : > { %v2531_v5 = vmul.f32 %v8253_v33, %v2506_v60  ;;  %v8595_v36 = vpop.permute.xlu0 %2745  ;;  %v3667_v58 = vmul.f32 %v9573_v21, %v6850_v59  ;;  %v3668_v40 = vmul.f32 %v9573_v21, %v6837_v6  ;;  %v8621_v48 = vmul.f32 %v8111_v13, %v9580_v57 }
 0x5a1   : > { %v2438_v31 = vadd.f32 %v2437_v61, %v2436_v28  ;;  %v8602_v49 = vmul.f32 %v5345_v50, %v8591_v19  ;;  %5370 = vpow2.f32 %v3333_v16  ;;  %v3511_v44 = vmul.f32 1.442695, %v3496_v52  ;;  %v5359_v60 = vpop.eup %5358 }
 0x5a2   : > { %v2547_v56 = vadd.f32 %v8536_v23, %v2531_v5  ;;  %v2588_v28 = vmul.f32 %v8513_v37, %v8485_v51  ;;  %v3837_v13 = vmul.f32 %v9574_v62, %v6841_v12  ;;  %5372 = vpow2.f32 %v8556_v45 }
 0x5a3   : > { %v2439_v2 = vrot.slane %v2438_v31, 4  ;;  %v2514_v50 = vpop.permute.xlu1 %2513  ;;  %v3681_v29 = vmul.f32 1.442695, %v3667_v58  ;;  %v3683_v16 = vmul.f32 1.442695, %v3668_v40  ;;  %5374 = vpow2.f32 %v8558_v43 }
 0x5a4   : > { %v2533_v23 = vmul.f32 %v8253_v33, %v2514_v50  ;;  %v8624_v46 = vpop.permute.xlu0 %2753  ;;  %v8626_v26 = vmul.f32 %v5357_v35, %v2547_v56  ;;  %v3839_v33 = vmul.f32 %v9574_v62, %v6850_v59  ;;  %v3840_v37 = vmul.f32 %v9574_v62, %v6837_v6 }
 0x5a5   : > { %v2440_v17 = vadd.f32 %v2439_v2, %v2438_v31  ;;  %v8636_v31 = vpop.eup %5360  ;;  %5376 = vpow2.f32 %v2991_v47  ;;  %v4009_v45 = vmul.f32 %v8478_v32, %v6841_v12  ;;  %v2605_v2 = vsel %vm1396_vm9, %v2588_v28, 0.0 }
 0x5a6   : > { %v2549_v21 = vadd.f32 %v8551_v39, %v2533_v23  ;;  %v8643_v39 = vpop.eup %5362  ;;  %v3849_v50 = vmul.f32 1.442695, %v3837_v13  ;;  %v3853_v58 = vmul.f32 1.442695, %v3839_v33  ;;  %v4011_v23 = vmul.f32 %v8478_v32, %v6850_v59 }
 0x5a7   : > { %v2441_v61 = vrot.slane %v2440_v17, 2  ;;  %v2570_v5 = vpop.permute.xlu1 %2569  ;;  %v2590_v47 = vmul.f32 %v8533_v41, %v8503_v20  ;;  %5378 = vpow2.f32 %v3165_v10  ;;  %v4012_v28 = vmul.f32 %v8478_v32, %v6837_v6  ;;  %v9581_v32 = vld [vmem:[#allocation45_spill] sm:$0xff] }
 0x5a8   : > { %v2587_v52 = vmul.f32 %v2570_v5, %v2547_v56  ;;  %v2854_v53 = vpop.permute.xlu0 %2853  ;;  %v8638_v51 = vmul.f32 %v5359_v60, %v2549_v21  ;;  %5380 = vpow2.f32 %v8597_v15  ;;  %v3855_v5 = vmul.f32 1.442695, %v3840_v37 }
 0x5a9   : > { %v2442_v38 = vadd.f32 %v2441_v61, %v2440_v17  ;;  %v2876_v35 = vmul.f32 %v8336_v14, %v2854_v53  ;;  %v5365_v17 = vpop.eup %5364  ;;  %5382 = vpow2.f32 %v3509_v8  ;;  %v4021_v41 = vmul.f32 1.442695, %v4009_v45 }
 0x5aa   : > { %v2604_v56 = vsel %vm1396_vm9, %v2587_v52, 0.0  ;;  %v8661_v13 = vpop.eup %5366  ;;  %v4181_v10 = vmul.f32 %v8482_v9, %v6841_v12  ;;  %5384 = vpow2.f32 %v3511_v44  ;;  %v4025_v15 = vmul.f32 1.442695, %v4011_v23 }
 0x5ab   : > { %v2443_v40 = vrot.slane %v2442_v38, 1  ;;  %v2606_v43 = vadd.f32 %v2605_v2, %v2604_v56  ;;  %v8651_v57 = vadd.f32 %v8578_v0, %v2876_v35  ;;  %v2578_v62 = vpop.permute.xlu1 %2577  ;;  %v8666_v52 = vpop.eup %5368  ;;  %v2609_v37 = vsel %vm1396_vm9, %v2590_v47, 0.0 }
 0x5ac   : > { %v2589_v60 = vmul.f32 %v2578_v62, %v2549_v21  ;;  %v8657_v61 = vpop.permute.xlu0 %4279  ;;  %v8671_v21 = vpop.eup %5370  ;;  %5386 = vpow2.f32 %v3677_v7  ;;  %v4027_v45 = vmul.f32 1.442695, %v4012_v28  ;;  %v4193_v62 = vmul.f32 1.442695, %v4181_v10  ;;  %v9582_v7 = vld [vmem:[#allocation36_spill] sm:$0xff] }
 0x5ad   : > { %v2444_v33 = vadd.f32 %v2443_v40, %v2442_v38  ;;  %v3058_v0 = vmul.f32 %v8509_v4, %v8651_v57  ;;  %v8679_v2 = vpop.eup %5372  ;;  %5388 = vpow2.f32 %v3681_v29  ;;  %v4183_v23 = vmul.f32 %v8482_v9, %v6850_v59 }
 0x5ae   : > { %v2607_v20 = vsel %vm1396_vm9, %v2589_v60, 0.0  ;;  %5390 = vpow2.f32 %v3683_v16 }
 0x5af   : > { %2446 = vst.msk [vmem:[#allocation3 + $0x14] sm:$0x1] %vm1756_vm12, %v2444_v33  ;;  %v8675_v53 = vadd.f32 %v3058_v0, %v9581_v32  ;;  %v2608_v4 = vadd.f32 %v2607_v20, %v2606_v43  ;;  %v2678_v38 = vpop.permute.xlu1 %2677  ;;  %v5375_v43 = vpop.eup %5374  ;;  %5392 = vpow2.f32 %v3849_v50  ;;  %v4197_v50 = vmul.f32 1.442695, %v4183_v23 }
 0x5b0   : > { %v2703_v35 = vmul.f32 %v8312_v25, %v2678_v38  ;;  %v2862_v8 = vpop.permute.xlu0 %2861  ;;  %v8687_v47 = vpop.eup %5376  ;;  %5394 = vpow2.f32 %v3853_v58 }
 0x5b1   : > { %v3230_v12 = vmul.f32 %v8516_v27, %v8675_v53  ;;  %v2610_v56 = vadd.f32 %v2609_v37, %v2608_v4  ;;  %v2878_v40 = vmul.f32 %v8336_v14, %v2862_v8  ;;  %5396 = vpow2.f32 %v3855_v5  ;;  %v8701_v10 = vpop.eup %5378  ;;  %v9584_v5 = vld [vmem:[#allocation48_spill] sm:$0xff] }
 0x5b2   : > { %v2719_v44 = vadd.f32 %v8626_v26, %v2703_v35  ;;  %v4184_v26 = vmul.f32 %v8482_v9, %v6837_v6  ;;  %5398 = vpow2.f32 %v4021_v41  ;;  %v8706_v58 = vpop.eup %5380  ;;  %v8714_v4 = vmul.f32 %v8160_v11, %v9584_v5 }
 0x5b3   : > { %v3238_v60 = vadd.f32 %v3230_v12, %v9582_v7  ;;  %v2611_v28 = vrot.slane %v2610_v56, 4  ;;  %v8691_v33 = vadd.f32 %v8602_v49, %v2878_v40  ;;  %v2686_v27 = vpop.permute.xlu1 %2685  ;;  %v2760_v49 = vmul.f32 %v8595_v36, %v8561_v18 }
 0x5b4   : > { %v2705_v29 = vmul.f32 %v8312_v25, %v2686_v27  ;;  %v8694_v0 = vmul.f32 %v5365_v17, %v2719_v44  ;;  %v9583_v17 = vld [vmem:[#allocation37_spill] sm:$0xff]  ;;  %5400 = vpow2.f32 %v4025_v15  ;;  %v4199_v37 = vmul.f32 1.442695, %v4184_v26  ;;  %v8723_v8 = vpop.permute.xlu0 %4295 }
 0x5b5   : > { %v3402_v59 = vmul.f32 %v8528_v63, %v3238_v60  ;;  %v2612_v16 = vadd.f32 %v2611_v28, %v2610_v56  ;;  %v3060_v20 = vmul.f32 %v8565_v54, %v8691_v33  ;;  %v8710_v54 = vpop.eup %5382  ;;  %5402 = vpow2.f32 %v4027_v45  ;;  %v9585_v56 = vld [vmem:[#allocation108_spill] sm:$0xff]  ;;  %v9588_v28 = vld [vmem:[#allocation38_spill] sm:$0xff] }
 0x5b6   : > { %v2721_v25 = vadd.f32 %v8638_v51, %v2705_v29  ;;  %v5385_v51 = vpop.eup %5384  ;;  %5404 = vpow2.f32 %v4193_v62  ;;  %v2762_v45 = vmul.f32 %v8624_v46, %v8591_v19  ;;  %v4306_v40 = vmul.f32 %v8657_v61, %v9585_v56  ;;  %v9594_v56 = vld [vmem:[#allocation63_spill] sm:$0xff] }
 0x5b7   : > { %v3410_v6 = vadd.f32 %v3402_v59, %v9583_v17  ;;  %v2613_v9 = vrot.slane %v2612_v16, 2  ;;  %v3068_v63 = vadd.f32 %v3060_v20, %v8450_v55  ;;  %v2742_v32 = vpop.permute.xlu1 %2741  ;;  %v8719_v35 = vpop.eup %5386  ;;  %v2777_v55 = vsel %vm1396_vm9, %v2760_v49, 0.0  ;;  %v9590_v49 = vld [vmem:[#allocation56_spill] sm:$0xff]  ;;  %v9591_v17 = vld [vmem:[#allocation73_spill] sm:$0xff] }
 0x5b8   : > { %v2759_v18 = vmul.f32 %v2742_v32, %v2719_v44  ;;  %v8716_v36 = vmul.f32 %v5375_v43, %v2721_v25  ;;  %5406 = vpow2.f32 %v4197_v50  ;;  %v8726_v12 = vpop.eup %5388  ;;  %v9586_v43 = vld [vmem:[#allocation87_spill] sm:$0xff] }
 0x5b9   : > { %v3574_v41 = vmul.f32 %v8540_v34, %v3410_v6  ;;  %v2614_v38 = vadd.f32 %v2613_v9, %v2612_v16  ;;  %v3232_v15 = vmul.f32 %v8573_v30, %v3068_v63  ;;  %v5391_v23 = vpop.eup %5390  ;;  %v9587_v30 = vld [vmem:[#allocation72_spill] sm:$0xff]  ;;  %v9589_v16 = vld [vmem:[#allocation98_spill] sm:$0xff]  ;;  %5408 = vpow2.f32 %v4199_v37 }
 0x5ba   : > { %v2776_v11 = vsel %vm1396_vm9, %v2759_v18, 0.0  ;;  %v3106_v7 = vmul.f32 %v9587_v30, %v8675_v53  ;;  %v8736_v59 = vpop.eup %5392  ;;  %v3278_v20 = vmul.f32 %v9589_v16, %v3238_v60  ;;  %v3450_v50 = vmul.f32 %v9590_v49, %v3410_v6 }
 0x5bb   : > { %v2615_v34 = vrot.slane %v2614_v38, 1  ;;  %v3582_v44 = vadd.f32 %v3574_v41, %v9586_v43  ;;  %v2750_v62 = vpop.permute.xlu1 %2749  ;;  %v3240_v27 = vadd.f32 %v3232_v15, %v9588_v28  ;;  %v2778_v29 = vadd.f32 %v2777_v55, %v2776_v11  ;;  %v8740_v61 = vpop.eup %5394 }
 0x5bc   : > { %v2761_v26 = vmul.f32 %v2750_v62, %v2721_v25  ;;  %v3108_v9 = vmul.f32 %v9591_v17, %v3068_v63  ;;  %v8746_v5 = vpop.eup %5396  ;;  %v2781_v25 = vsel %vm1396_vm9, %v2762_v45, 0.0  ;;  %v8751_v60 = vsel %vm1396_vm9, %v4306_v40, 0.0  ;;  %v8758_v55 = vpop.permute.xlu0 %3955 }
 0x5bd   : > { %v2616_v19 = vadd.f32 %v2615_v34, %v2614_v38  ;;  %v3746_v46 = vmul.f32 %v8599_v24, %v3582_v44  ;;  %v3404_v53 = vmul.f32 %v8587_v1, %v3240_v27  ;;  %v9592_v24 = vld [vmem:[#allocation68_spill] sm:$0xff]  ;;  %v8754_v6 = vpop.eup %5398  ;;  %v3123_v63 = vsel %vm1396_vm9, %v3106_v7, 0.0  ;;  %v9593_v1 = vld [vmem:[#allocation113_spill] sm:$0xff] }
 0x5be   : > { %v2779_v32 = vsel %vm1396_vm9, %v2761_v26, 0.0  ;;  %v3622_v37 = vmul.f32 %v9593_v1, %v3582_v44  ;;  %v8762_v45 = vpop.eup %5400  ;;  %v8765_v34 = vsel %vm1396_vm9, %v3278_v20, 0.0  ;;  %v3280_v40 = vmul.f32 %v9594_v56, %v3240_v27  ;;  %v9595_v26 = vld [vmem:[#allocation78_spill] sm:$0xff]  ;;  %v9596_v27 = vld [vmem:[#allocation76_spill] sm:$0xff]  ;;  %v9600_v1 = vld [vmem:[#allocation85_spill] sm:$0xff] }
 0x5bf   : > { %2618 = vst.msk [vmem:[#allocation3 + $0x15] sm:$0x1] %vm1756_vm12, %v2616_v19  ;;  %v3754_v18 = vadd.f32 %v3746_v46, %v9592_v24  ;;  %v2780_v41 = vadd.f32 %v2779_v32, %v2778_v29  ;;  %v2850_v38 = vpop.permute.xlu1 %2849  ;;  %v3412_v11 = vadd.f32 %v3404_v53, %v8613_v42  ;;  %v8769_v30 = vpop.eup %5402  ;;  %v8772_v44 = vsel %vm1396_vm9, %v3450_v50, 0.0  ;;  %v9597_v46 = vld [vmem:[#allocation105_spill] sm:$0xff] }
 0x5c0   : > { %v2875_v15 = vmul.f32 %v8336_v14, %v2850_v38  ;;  %v8775_v7 = vsel %vm1396_vm9, %v3108_v9, 0.0  ;;  %v8780_v29 = vpop.eup %5404  ;;  %v8795_v32 = vsel %vm1396_vm9, %v3280_v40, 0.0  ;;  %v8799_v38 = vpop.permute.xlu0 %4127 }
 0x5c1   : > { %v3918_v43 = vmul.f32 %v8608_v22, %v3754_v18  ;;  %v2782_v62 = vadd.f32 %v2781_v25, %v2780_v41  ;;  %v3576_v28 = vmul.f32 %v5385_v51, %v3412_v11  ;;  %v3794_v16 = vmul.f32 %v9595_v26, %v3754_v18  ;;  %v9599_v18 = vld [vmem:[#allocation89_spill] sm:$0xff] }
 0x5c2   : > { %v8778_v42 = vadd.f32 %v8694_v0, %v2875_v15  ;;  %v3452_v49 = vmul.f32 %v9597_v46, %v3412_v11  ;;  %v8785_v17 = vpop.eup %5406  ;;  %v9598_v0 = vld [vmem:[#allocation77_spill] sm:$0xff]  ;;  %v8792_v51 = vsel %vm1396_vm9, %v3622_v37, 0.0 }
 0x5c3   : > { %v3926_v20 = vadd.f32 %v3918_v43, %v9596_v27  ;;  %v2783_v22 = vrot.slane %v2782_v62, 4  ;;  %v2858_v19 = vpop.permute.xlu1 %2857  ;;  %v3584_v53 = vadd.f32 %v3576_v28, %v9598_v0  ;;  %v8806_v37 = vpop.eup %5408  ;;  %v9602_v43 = vld [vmem:[#allocation91_spill] sm:$0xff] }
 0x5c4   : > { %v3057_v50 = vmul.f32 %v8661_v13, %v8778_v42  ;;  %v2877_v9 = vmul.f32 %v8336_v14, %v2858_v19  ;;  %v9601_v14 = vld [vmem:[#allocation82_spill] sm:$0xff]  ;;  %v9603_v27 = vld [vmem:[#allocation79_spill] sm:$0xff] }
 0x5c5   : > { %v4090_v25 = vmul.f32 %v8636_v31, %v3926_v20  ;;  %v2784_v24 = vadd.f32 %v2783_v22, %v2782_v62  ;;  %v3966_v41 = vmul.f32 %v9599_v18, %v3926_v20  ;;  %v3624_v11 = vmul.f32 %v9601_v14, %v3584_v53  ;;  %v9607_v18 = vld [vmem:[#allocation64_spill] sm:$0xff] }
 0x5c6   : > { %v3065_v15 = vadd.f32 %v3057_v50, %v9600_v1  ;;  %v8803_v13 = vadd.f32 %v8716_v36, %v2877_v9  ;;  %v3748_v56 = vmul.f32 %v5391_v23, %v3584_v53  ;;  %v8810_v31 = vsel %vm1396_vm9, %v3452_v49, 0.0  ;;  %v9604_v50 = vld [vmem:[#allocation74_spill] sm:$0xff]  ;;  %v9605_v9 = vld [vmem:[#allocation49_spill] sm:$0xff] }
 0x5c7   : > { %v4098_v40 = vadd.f32 %v4090_v25, %v9602_v43  ;;  %v2785_v28 = vrot.slane %v2784_v24, 2  ;;  %v8813_v62 = vsel %vm1396_vm9, %v3794_v16, 0.0  ;;  %v4276_v26 = vpop.permute.xlu1 %4275  ;;  %v8820_v23 = vsel %vm1396_vm9, %v3966_v41, 0.0  ;;  %v9608_v1 = vld [vmem:[#allocation34_spill] sm:$0xff] }
 0x5c8   : > { %v3105_v20 = vmul.f32 %v9603_v27, %v3065_v15  ;;  %v3229_v36 = vmul.f32 %v8666_v52, %v3065_v15  ;;  %v3059_v22 = vmul.f32 %v8687_v47, %v8803_v13  ;;  %v8824_v49 = vsel %vm1396_vm9, %v3624_v11, 0.0  ;;  %v9606_v52 = vld [vmem:[#allocation66_spill] sm:$0xff] }
 0x5c9   : > { %v4262_v19 = vmul.f32 %v8643_v39, %v4098_v40  ;;  %v2786_v46 = vadd.f32 %v2785_v28, %v2784_v24  ;;  %v3756_v16 = vadd.f32 %v3748_v56, %v9604_v50  ;;  %v8828_v0 = vmul.f32 %v9605_v9, %v4098_v40  ;;  %v9609_v39 = vld [vmem:[#allocation70_spill] sm:$0xff]  ;;  %v8839_v40 = vpop.permute.xlu0 %4299 }
 0x5ca   : > { %v3122_v53 = vsel %vm1396_vm9, %v3105_v20, 0.0  ;;  %v3237_v25 = vadd.f32 %v3229_v36, %v9606_v52  ;;  %v3067_v47 = vadd.f32 %v3059_v22, %v9607_v18  ;;  %v9610_v11 = vld [vmem:[#allocation94_spill] sm:$0xff]  ;;  %v9613_v52 = vld [vmem:[#allocation92_spill] sm:$0xff] }
 0x5cb   : > { %v4270_v41 = vadd.f32 %v4262_v19, %v9608_v1  ;;  %v2787_v15 = vrot.slane %v2786_v46, 1  ;;  %v3124_v14 = vadd.f32 %v3123_v63, %v3122_v53  ;;  %v3796_v24 = vmul.f32 %v9609_v39, %v3756_v16  ;;  %v8835_v43 = vpop.permute.xlu1 %4291  ;;  %v9611_v27 = vld [vmem:[#allocation114_spill] sm:$0xff]  ;;  %v9612_v63 = vld [vmem:[#allocation65_spill] sm:$0xff] }
 0x5cc   : > { %v3277_v28 = vmul.f32 %v9610_v11, %v3237_v25  ;;  %v3401_v56 = vmul.f32 %v8671_v21, %v3237_v25  ;;  %v3107_v20 = vmul.f32 %v9611_v27, %v3067_v47  ;;  %v3231_v36 = vmul.f32 %v8701_v10, %v3067_v47  ;;  %v9614_v21 = vld [vmem:[#allocation107_spill] sm:$0xff] }
 0x5cd   : > { %v4310_v22 = vmul.f32 %v8723_v8, %v4270_v41  ;;  %v2788_v50 = vadd.f32 %v2787_v15, %v2786_v46  ;;  %v3920_v19 = vmul.f32 %v8746_v5, %v3756_v16  ;;  %v4305_v9 = vmul.f32 %v4276_v26, %v9612_v63  ;;  %v9615_v46 = vld [vmem:[#allocation104_spill] sm:$0xff]  ;;  %v9616_v26 = vld [vmem:[#allocation47_spill] sm:$0xff]  ;;  %v3960_v63 = vpop.permute.xlu0 %3959 }
 0x5ce   : > { %v3294_v53 = vsel %vm1396_vm9, %v3277_v28, 0.0  ;;  %v3409_v18 = vadd.f32 %v3401_v56, %v9613_v52  ;;  %v3125_v1 = vsel %vm1396_vm9, %v3107_v20, 0.0  ;;  %v3239_v25 = vadd.f32 %v3231_v36, %v9614_v21  ;;  %v9617_v15 = vld [vmem:[#allocation80_spill] sm:$0xff]  ;;  %v9618_v20 = vld [vmem:[#allocation30_spill] sm:$0xff] }
 0x5cf   : > { %2790 = vst.msk [vmem:[#allocation3 + $0x16] sm:$0x1] %vm1756_vm12, %v2788_v50  ;;  %v3296_v39 = vadd.f32 %v8765_v34, %v3294_v53  ;;  %v3126_v10 = vadd.f32 %v3125_v1, %v3124_v14  ;;  %v8853_v8 = vsel %vm1396_vm9, %v3796_v24, 0.0  ;;  %v3928_v5 = vadd.f32 %v3920_v19, %v9615_v46  ;;  %v8856_v16 = vpop.permute.xlu1 %3939  ;;  %v9621_v1 = vld [vmem:[#allocation84_spill] sm:$0xff] }
 0x5d0   : > { %v3449_v47 = vmul.f32 %v9616_v26, %v3409_v18  ;;  %v3573_v41 = vmul.f32 %v8679_v2, %v3409_v18  ;;  %v3279_v11 = vmul.f32 %v9617_v15, %v3239_v25  ;;  %v3403_v28 = vmul.f32 %v8706_v58, %v3239_v25  ;;  %v9619_v2 = vld [vmem:[#allocation93_spill] sm:$0xff] }
 0x5d1   : > { %v8863_v56 = vsel %vm1396_vm9, %v4310_v22, 0.0  ;;  %v3128_v34 = vadd.f32 %v8775_v7, %v3126_v10  ;;  %v4313_v14 = vsel %vm1396_vm9, %v4305_v9, 0.0  ;;  %v4092_v24 = vmul.f32 %v8769_v30, %v3928_v5  ;;  %v9620_v7 = vld [vmem:[#allocation51_spill] sm:$0xff] }
 0x5d2   : > { %v3466_v27 = vsel %vm1396_vm9, %v3449_v47, 0.0  ;;  %v3581_v36 = vadd.f32 %v3573_v41, %v9618_v20  ;;  %v3297_v50 = vsel %vm1396_vm9, %v3279_v11, 0.0  ;;  %v3411_v19 = vadd.f32 %v3403_v28, %v9619_v2  ;;  %v9624_v11 = vld [vmem:[#allocation33_spill] sm:$0xff]  ;;  %v9626_v20 = vld [vmem:[#allocation46_spill] sm:$0xff] }
 0x5d3   : > { %v3468_v58 = vadd.f32 %v8772_v44, %v3466_v27  ;;  %v3129_v53 = vrot.slane %v3128_v34, 4  ;;  %v3298_v22 = vadd.f32 %v3297_v50, %v3296_v39  ;;  %v3968_v52 = vmul.f32 %v3960_v63, %v3928_v5  ;;  %v8873_v18 = vpop.permute.xlu1 %4111  ;;  %v9622_v44 = vld [vmem:[#allocation32_spill] sm:$0xff]  ;;  %v9623_v5 = vld [vmem:[#allocation31_spill] sm:$0xff] }
 0x5d4   : > { %v3621_v9 = vmul.f32 %v9620_v7, %v3581_v36  ;;  %v3451_v30 = vmul.f32 %v9621_v1, %v3411_v19  ;;  %v3575_v21 = vmul.f32 %v8710_v54, %v3411_v19  ;;  %v3745_v25 = vmul.f32 %v8719_v35, %v3581_v36 }
 0x5d5   : > { %v3130_v10 = vadd.f32 %v3129_v53, %v3128_v34  ;;  %v3300_v46 = vadd.f32 %v8795_v32, %v3298_v22  ;;  %v8881_v26 = vadd.f32 %v8751_v60, %v4313_v14  ;;  %v8884_v47 = vadd.f32 %v4092_v24, %v9622_v44  ;;  %v9625_v60 = vld [vmem:[#allocation111_spill] sm:$0xff]  ;;  %v9627_v22 = vld [vmem:[#allocation90_spill] sm:$0xff] }
 0x5d6   : > { %v3469_v39 = vsel %vm1396_vm9, %v3451_v30, 0.0  ;;  %v3583_v41 = vadd.f32 %v3575_v21, %v9623_v5  ;;  %v3638_v15 = vsel %vm1396_vm9, %v3621_v9, 0.0  ;;  %v3753_v28 = vadd.f32 %v3745_v25, %v9624_v11  ;;  %v4132_v25 = vpop.permute.xlu0 %4131  ;;  %v9629_v44 = vld [vmem:[#allocation54_spill] sm:$0xff] }
 0x5d7   : > { %v3131_v54 = vrot.slane %v3130_v10, 2  ;;  %v3301_v27 = vrot.slane %v3300_v46, 4  ;;  %v3470_v35 = vadd.f32 %v3469_v39, %v3468_v58  ;;  %v3640_v34 = vadd.f32 %v8792_v51, %v3638_v15  ;;  %v8891_v32 = vpop.permute.xlu1 %4283 }
 0x5d8   : > { %v3623_v14 = vmul.f32 %v9625_v60, %v3583_v41  ;;  %v3747_v24 = vmul.f32 %v8726_v12, %v3583_v41  ;;  %v3793_v36 = vmul.f32 %v9626_v20, %v3753_v28  ;;  %v3917_v50 = vmul.f32 %v8736_v59, %v3753_v28  ;;  %v9630_v28 = vld [vmem:[#allocation86_spill] sm:$0xff] }
 0x5d9   : > { %v3132_v2 = vadd.f32 %v3131_v54, %v3130_v10  ;;  %v3302_v19 = vadd.f32 %v3301_v27, %v3300_v46  ;;  %v3472_v63 = vadd.f32 %v8810_v31, %v3470_v35  ;;  %v3987_v53 = vsel %vm1396_vm9, %v3968_v52, 0.0  ;;  %v9628_v10 = vld [vmem:[#allocation117_spill] sm:$0xff] }
 0x5da   : > { %v3641_v58 = vsel %vm1396_vm9, %v3623_v14, 0.0  ;;  %v3755_v51 = vadd.f32 %v3747_v24, %v9627_v22  ;;  %v3810_v7 = vsel %vm1396_vm9, %v3793_v36, 0.0  ;;  %v3925_v9 = vadd.f32 %v3917_v50, %v8582_v3 }
 0x5db   : > { %v3133_v1 = vrot.slane %v3132_v2, 1  ;;  %v3303_v12 = vrot.slane %v3302_v19, 2  ;;  %v3473_v30 = vrot.slane %v3472_v63, 4  ;;  %v3642_v21 = vadd.f32 %v3641_v58, %v3640_v34  ;;  %v8903_v59 = vpop.permute.xlu1 %3943 }
 0x5dc   : > { %v3795_v46 = vmul.f32 %v9628_v10, %v3755_v51  ;;  %v3812_v31 = vadd.f32 %v8813_v62, %v3810_v7  ;;  %v3919_v52 = vmul.f32 %v8740_v61, %v3755_v51  ;;  %v3965_v39 = vmul.f32 %v9629_v44, %v3925_v9  ;;  %v9631_v51 = vld [vmem:[#allocation43_spill] sm:$0xff] }
 0x5dd   : > { %v3134_v5 = vadd.f32 %v3133_v1, %v3132_v2  ;;  %v3304_v41 = vadd.f32 %v3303_v12, %v3302_v19  ;;  %v3474_v15 = vadd.f32 %v3473_v30, %v3472_v63  ;;  %v3644_v3 = vadd.f32 %v8824_v49, %v3642_v21  ;;  %v2918_v63 = vpop.permute.xlu0 %2917 }
 0x5de   : > { %v3813_v11 = vsel %vm1396_vm9, %v3795_v46, 0.0  ;;  %v3927_v54 = vadd.f32 %v3919_v52, %v9630_v28  ;;  %v3982_v27 = vsel %vm1396_vm9, %v3965_v39, 0.0  ;;  %v4089_v35 = vmul.f32 %v8754_v6, %v3925_v9 }
 0x5df   : > { %3136 = vst.msk [vmem:[#allocation3 + $0x18] sm:$0x1] %vm1756_vm12, %v3134_v5  ;;  %v3305_v62 = vrot.slane %v3304_v41, 1  ;;  %v3475_v34 = vrot.slane %v3474_v15, 2  ;;  %v3645_v61 = vrot.slane %v3644_v3, 4  ;;  %v3814_v60 = vadd.f32 %v3813_v11, %v3812_v31  ;;  %v8915_v14 = vpop.permute.xlu1 %4115 }
 0x5e0   : > { %v3967_v24 = vmul.f32 %v8758_v55, %v3927_v54  ;;  %v3984_v49 = vadd.f32 %v8820_v23, %v3982_v27  ;;  %v4091_v20 = vmul.f32 %v8762_v45, %v3927_v54  ;;  %v4097_v36 = vadd.f32 %v4089_v35, %v8621_v48  ;;  %v9632_v55 = vld [vmem:[#allocation61_spill] sm:$0xff] }
 0x5e1   : > { %v3306_v50 = vadd.f32 %v3305_v62, %v3304_v41  ;;  %v3476_v2 = vadd.f32 %v3475_v34, %v3474_v15  ;;  %v3646_v19 = vadd.f32 %v3645_v61, %v3644_v3  ;;  %v3816_v6 = vadd.f32 %v8853_v8, %v3814_v60  ;;  %v9633_v3 = vld [vmem:[#allocation81_spill] sm:$0xff] }
 0x5e2   : > { %v3985_v58 = vsel %vm1396_vm9, %v3967_v24, 0.0  ;;  %v4155_v22 = vsel %vm1396_vm9, %v8828_v0, 0.0  ;;  %v4099_v7 = vadd.f32 %v4091_v20, %v9631_v51  ;;  %v4137_v9 = vmul.f32 %v9632_v55, %v4097_v36  ;;  %v9634_v24 = vld [vmem:[#allocation100_spill] sm:$0xff] }
 0x5e3   : > { %3308 = vst.msk [vmem:[#allocation3 + $0x19] sm:$0x1] %vm1756_vm12, %v3306_v50  ;;  %v3477_v45 = vrot.slane %v3476_v2, 1  ;;  %v3647_v23 = vrot.slane %v3646_v19, 2  ;;  %v3817_v48 = vrot.slane %v3816_v6, 4  ;;  %v3986_v1 = vadd.f32 %v3985_v58, %v3984_v49  ;;  %v8928_v12 = vpop.permute.xlu1 %2913  ;;  %v9635_v50 = vld [vmem:[#allocation57_spill] sm:$0xff] }
 0x5e4   : > { %v4139_v8 = vmul.f32 %v8799_v38, %v4099_v7  ;;  %v4140_v30 = vmul.f32 %v4132_v25, %v8884_v47  ;;  %v4154_v21 = vsel %vm1396_vm9, %v4137_v9, 0.0  ;;  %v4261_v0 = vmul.f32 %v8780_v29, %v4097_v36  ;;  %v2926_v29 = vpop.permute.xlu0 %2925  ;;  %v9636_v58 = vld [vmem:[#allocation88_spill] sm:$0xff] }
 0x5e5   : > { %v3478_v10 = vadd.f32 %v3477_v45, %v3476_v2  ;;  %v3648_v46 = vadd.f32 %v3647_v23, %v3646_v19  ;;  %v3818_v31 = vadd.f32 %v3817_v48, %v3816_v6  ;;  %v3988_v52 = vadd.f32 %v3987_v53, %v3986_v1  ;;  %v9637_v23 = vld [vmem:[#allocation97_spill] sm:$0xff] }
 0x5e6   : > { %v4156_v44 = vadd.f32 %v4155_v22, %v4154_v21  ;;  %v4157_v39 = vsel %vm1396_vm9, %v4139_v8, 0.0  ;;  %v4269_v5 = vadd.f32 %v4261_v0, %v8714_v4  ;;  %v2932_v41 = vmul.f32 %v2918_v63, %v8651_v57  ;;  %v9639_v8 = vld [vmem:[#allocation28_spill] sm:$0xff]  ;;  %v9641_v21 = vld [vmem:[#allocation99_spill] sm:$0xff] }
 0x5e7   : > { %3480 = vst.msk [vmem:[#allocation3 + $0x1a] sm:$0x1] %vm1756_vm12, %v3478_v10  ;;  %v3649_v38 = vrot.slane %v3648_v46, 1  ;;  %v3819_v15 = vrot.slane %v3818_v31, 2  ;;  %v3989_v25 = vrot.slane %v3988_v52, 4  ;;  %v3963_v11 = vmul.f32 %v8856_v16, %v9633_v3  ;;  %v2922_v28 = vpop.permute.xlu1 %2921 }
 0x5e8   : > { %v4158_v54 = vadd.f32 %v4157_v39, %v4156_v44  ;;  %v4159_v53 = vsel %vm1396_vm9, %v4140_v30, 0.0  ;;  %v4309_v27 = vmul.f32 %v8835_v43, %v4269_v5  ;;  %v2949_v35 = vsel %vm1396_vm9, %v2932_v41, 0.0  ;;  %v4304_v45 = vpop.permute.xlu0 %4303 }
 0x5e9   : > { %v3650_v4 = vadd.f32 %v3649_v38, %v3648_v46  ;;  %v3820_v62 = vadd.f32 %v3819_v15, %v3818_v31  ;;  %v3990_v57 = vadd.f32 %v3989_v25, %v3988_v52  ;;  %v3972_v34 = vsel %vm1396_vm9, %v3963_v11, 0.0 }
 0x5ea   : > { %v4160_v61 = vadd.f32 %v4159_v53, %v4158_v54  ;;  %v4326_v60 = vsel %vm1396_vm9, %v4309_v27, 0.0  ;;  %v3973_v49 = vadd.f32 %v3972_v34, %v9634_v24  ;;  %v2934_v16 = vmul.f32 %v2926_v29, %v8691_v33  ;;  %v9642_v27 = vld [vmem:[#allocation119_spill] sm:$0xff] }
 0x5eb   : > { %3652 = vst.msk [vmem:[#allocation3 + $0x1b] sm:$0x1] %vm1756_vm12, %v3650_v4  ;;  %v3821_v20 = vrot.slane %v3820_v62, 1  ;;  %v3991_v36 = vrot.slane %v3990_v57, 2  ;;  %v4328_v43 = vadd.f32 %v8863_v56, %v4326_v60  ;;  %v4135_v2 = vmul.f32 %v8873_v18, %v9635_v50  ;;  %v4288_v51 = vpop.permute.xlu1 %4287  ;;  %v9638_v18 = vld [vmem:[#allocation83_spill] sm:$0xff] }
 0x5ec   : > { %v4161_v19 = vrot.slane %v4160_v61, 4  ;;  %v4264_v6 = vmul.f32 %v8806_v37, %v8884_v47  ;;  %v4263_v63 = vmul.f32 %v8785_v17, %v4099_v7  ;;  %v4307_v22 = vmul.f32 %v8891_v32, %v9636_v58  ;;  %v9640_v37 = vld [vmem:[#allocation35_spill] sm:$0xff] }
 0x5ed   : > { %v3822_v33 = vadd.f32 %v3821_v20, %v3820_v62  ;;  %v3992_v55 = vadd.f32 %v3991_v36, %v3990_v57  ;;  %v4144_v9 = vsel %vm1396_vm9, %v4135_v2, 0.0  ;;  %v3964_v56 = vmul.f32 %v8903_v59, %v9637_v23  ;;  %v9643_v57 = vld [vmem:[#allocation58_spill] sm:$0xff] }
 0x5ee   : > { %v4162_v48 = vadd.f32 %v4161_v19, %v4160_v61  ;;  %v4145_v1 = vadd.f32 %v4144_v9, %v9638_v18  ;;  %v4272_v30 = vadd.f32 %v4264_v6, %v9639_v8  ;;  %v4271_v47 = vadd.f32 %v4263_v63, %v9640_v37 }
 0x5ef   : > { %3824 = vst.msk [vmem:[#allocation3 + $0x1c] sm:$0x1] %vm1756_vm12, %v3822_v33  ;;  %v3993_v17 = vrot.slane %v3992_v55, 1  ;;  %v4316_v32 = vsel %vm1396_vm9, %v4307_v22, 0.0  ;;  %v3974_v7 = vsel %vm1396_vm9, %v3964_v56, 0.0  ;;  %v4136_v0 = vmul.f32 %v8915_v14, %v9641_v21  ;;  %v4385_v14 = vpop.permute.xlu1 %4384  ;;  %v9644_v21 = vld [vmem:[#allocation41_spill] sm:$0xff] }
 0x5f0   : > { %v4163_v10 = vrot.slane %v4162_v48, 2  ;;  %v4311_v59 = vmul.f32 %v8839_v40, %v4271_v47  ;;  %v4312_v46 = vmul.f32 %v4304_v45, %v4272_v30  ;;  %v4317_v31 = vadd.f32 %v4316_v32, %v8881_v26  ;;  %v4387_v32 = vpop.permute.xlu0 %4386 }
 0x5f1   : > { %v3994_v52 = vadd.f32 %v3993_v17, %v3992_v55  ;;  %v3975_v44 = vadd.f32 %v3974_v7, %v3973_v49  ;;  %v4146_v39 = vsel %vm1396_vm9, %v4136_v0, 0.0  ;;  %v2931_v5 = vmul.f32 %v8928_v12, %v8778_v42  ;;  %v5412_v7 = vld [vmem:[%s6036_s12] ss:$0 sm:$0xff] }
 0x5f2   : > { %v4164_v41 = vadd.f32 %v4163_v10, %v4162_v48  ;;  %v4329_v38 = vsel %vm1396_vm9, %v4311_v59, 0.0  ;;  %v4331_v15 = vsel %vm1396_vm9, %v4312_v46, 0.0  ;;  %v4147_v25 = vadd.f32 %v4146_v39, %v4145_v1  ;;  %v9645_v59 = vld [vmem:[#allocation39_spill] sm:$0xff]  ;;  %v9646_v39 = vld [vmem:[#allocation40_spill] sm:$0xff] }
 0x5f3   : > { %3996 = vst.msk [vmem:[#allocation3 + $0x1d] sm:$0x1] %vm1756_vm12, %v3994_v52  ;;  %v4330_v40 = vadd.f32 %v4329_v38, %v4328_v43  ;;  %v3976_v3 = vrot.slane %v3975_v44, 4  ;;  %v2948_v26 = vsel %vm1396_vm9, %v2931_v5, 0.0  ;;  %v2933_v11 = vmul.f32 %v2922_v28, %v8803_v13 }
 0x5f4   : > { %v4165_v29 = vrot.slane %v4164_v41, 1  ;;  %v4148_v54 = vrot.slane %v4147_v25, 4  ;;  %v2950_v53 = vadd.f32 %v2949_v35, %v2948_v26  ;;  %v4308_v42 = vmul.f32 %v4288_v51, %v9642_v27  ;;  %v4391_v52 = vpop.permute.xlu0 %4390  ;;  %v4404_v26 = vld [vmem:[%s5992_s22] sm:$0xff] (!%p4869_p7) }
 0x5f5   : > { %v4332_v12 = vadd.f32 %v4331_v15, %v4330_v40  ;;  %v3977_v4 = vadd.f32 %v3976_v3, %v3975_v44  ;;  %v2951_v62 = vsel %vm1396_vm9, %v2933_v11, 0.0  ;;  %v4396_v34 = vmul.f32 %v4385_v14, %v9643_v57  ;;  %v4389_v40 = vpop.permute.xlu1 %4388  ;;  %v4405_v11 = vld [vmem:[%s5992_s22 + $0x8] sm:$0xff] (!%p4869_p7) }
 0x5f6   : > { %v4166_v61 = vadd.f32 %v4165_v29, %v4164_v41  ;;  %v4149_v60 = vadd.f32 %v4148_v54, %v4147_v25  ;;  %v2952_v24 = vadd.f32 %v2951_v62, %v2950_v53  ;;  %v4318_v49 = vsel %vm1396_vm9, %v4308_v42, 0.0  ;;  %v4406_v29 = vld [vmem:[%s5992_s22 + $0x10] sm:$0xff] (!%p4869_p7)  ;;  %v4407_v53 = vld [vmem:[%s5992_s22 + $0x18] sm:$0xff] (!%p4869_p7)  ;;  %v4408_v42 = vld [vmem:[%s5992_s22 + $0x20] sm:$0xff] (!%p4869_p7) }
 0x5f7   : > { %v2953_v20 = vsel %vm1396_vm9, %v2934_v16, 0.0  ;;  %v4333_v36 = vrot.slane %v4332_v12, 4  ;;  %v3978_v13 = vrot.slane %v3977_v4, 2  ;;  %v4319_v28 = vadd.f32 %v4318_v49, %v4317_v31  ;;  %4954 = vmatprep.mubr.msk.f32.mxu0 (!%p4869_p7), %vm1396_vm9, %v4396_v34  ;;  %v9647_v34 = vld [vmem:[#allocation23_spill] sm:$0xff] (!%p4869_p7) }
 0x5f8   : > { %4168 = vst.msk [vmem:[#allocation3 + $0x1e] sm:$0x1] %vm1756_vm12, %v4166_v61  ;;  %v4150_v35 = vrot.slane %v4149_v60, 2  ;;  %v2954_v43 = vadd.f32 %v2953_v20, %v2952_v24  ;;  %v4355_v0 = vmul.f32 %v5412_v7, %v9644_v21  ;;  %v4353_v46 = vmul.f32 %v5412_v7, %v9645_v59 }
 0x5f9   : > { %v4334_v50 = vadd.f32 %v4333_v36, %v4332_v12  ;;  %v3979_v2 = vadd.f32 %v3978_v13, %v3977_v4  ;;  %v4320_v19 = vrot.slane %v4319_v28, 4  ;;  %v4354_v5 = vmul.f32 %v5412_v7, %v9646_v39  ;;  %v4409_v12 = vld [vmem:[%s5992_s22 + $0x28] sm:$0xff] (!%p4869_p7) }
 0x5fa   : > { %v4151_v6 = vadd.f32 %v4150_v35, %v4149_v60  ;;  %v2955_v63 = vrot.slane %v2954_v43, 4  ;;  %v4987_v54 = vpack.c.bf16 (!%p4869_p7), %v4405_v11, %v4404_v26  ;;  %v4991_v27 = vpack.c.bf16 (!%p4869_p7), %v4407_v53, %v4406_v29  ;;  %v9648_v60 = vld [vmem:[#allocation25_spill] sm:$0xff] (!%p4869_p7)  ;;  %v9649_v36 = vld [vmem:[#allocation22_spill] sm:$0xff] (!%p4869_p7) }
 0x5fb   : > { %v4335_v58 = vrot.slane %v4334_v50, 2  ;;  %v3980_v22 = vrot.slane %v3979_v2, 1  ;;  %v4321_v51 = vadd.f32 %v4320_v19, %v4319_v28  ;;  %v4995_v4 = vpack.c.bf16 (!%p4869_p7), %v4409_v12, %v4408_v42  ;;  %v9650_v28 = vld [vmem:[#allocation24_spill] sm:$0xff] (!%p4869_p7) }
 0x5fc   : > { %v4152_v33 = vrot.slane %v4151_v6, 1  ;;  %v2956_v55 = vadd.f32 %v2955_v63, %v2954_v43  ;;  %4988 = vmatprep.subr.bf16.mxu0 (!%p4869_p7), %v4987_v54  ;;  %5014 = vmatprep.subr.bf16.mxu1 (!%p4869_p7), %v4987_v54 }
 0x5fd   : > { %v4336_v9 = vadd.f32 %v4335_v58, %v4334_v50  ;;  %v3981_v45 = vadd.f32 %v3980_v22, %v3979_v2  ;;  %v4322_v16 = vrot.slane %v4321_v51, 2  ;;  %4990 = vmatpush3.bf16.msra.mxu0 (!%p4869_p7), %v4987_v54  ;;  %5017 = vmatpush3.bf16.msra.mxu1 (!%p4869_p7), %v4987_v54 }
 0x5fe   : > { %v4153_v23 = vadd.f32 %v4152_v33, %v4151_v6  ;;  %v2957_v56 = vrot.slane %v2956_v55, 2  ;;  %4992 = vmatprep.subr.bf16.mxu0 (!%p4869_p7), %v4991_v27  ;;  %5015 = vmatprep.subr.bf16.mxu1 (!%p4869_p7), %v4991_v27 }
 0x5ff   : > { %v4337_v48 = vrot.slane %v4336_v9, 1  ;;  %3995 = vst.msk [vmem:[#allocation3 + $0xd] sm:$0x1] %vm1756_vm12, %v3981_v45  ;;  %v4323_v18 = vadd.f32 %v4322_v16, %v4321_v51 }
 0x600   : > { %4167 = vst.msk [vmem:[#allocation3 + $0xe] sm:$0x1] %vm1756_vm12, %v4153_v23  ;;  %v2958_v1 = vadd.f32 %v2957_v56, %v2956_v55 }
 0x601   : > { %v4338_v8 = vadd.f32 %v4337_v48, %v4336_v9  ;;  %v4324_v30 = vrot.slane %v4323_v18, 1  ;;  %4994 = vmatpush3.bf16.msra.mxu0 (!%p4869_p7), %v4991_v27  ;;  %5018 = vmatpush3.bf16.msra.mxu1 (!%p4869_p7), %v4991_v27 }
 0x602   : > { %v2959_v37 = vrot.slane %v2958_v1, 1  ;;  %4996 = vmatprep.subr.bf16.mxu0 (!%p4869_p7), %v4995_v4  ;;  %5016 = vmatprep.subr.bf16.mxu1 (!%p4869_p7), %v4995_v4 }
 0x603   : > { %4340 = vst.msk [vmem:[#allocation3 + $0x1f] sm:$0x1] %vm1756_vm12, %v4338_v8  ;;  %v4325_v47 = vadd.f32 %v4324_v30, %v4323_v18 }
 0x604   : > { %v2960_v17 = vadd.f32 %v2959_v37, %v2958_v1 }
 0x605   : > { %4339 = vst.msk [vmem:[#allocation3 + $0xf] sm:$0x1] %vm1756_vm12, %v4325_v47  ;;  %4998 = vmatpush3.bf16.msra.mxu0 (!%p4869_p7), %v4995_v4  ;;  %5019 = vmatpush3.bf16.msra.mxu1 (!%p4869_p7), %v4995_v4 }
 0x606   : > { %2962 = vst.msk [vmem:[#allocation3 + $0x17] sm:$0x1] %vm1756_vm12, %v2960_v17 }
 0x60a   : > { %v4344_v10 = vld [vmem:[#allocation3 + $0x18] sm:$0xff]  ;;  %4403 = sbr.rel (%p4869_p7) target bundleno = 1771 (0x6eb), region = 104 }
 0x60b   : > { %v4359_v31 = vadd.f32 %v4355_v0, %v4344_v10 }
 0x60c   : > { %v4342_v44 = vld [vmem:[#allocation3 + $0x8] sm:$0xff] }
 0x60d   : > { %v8992_v41 = vmul.f32 %v4391_v52, %v4359_v31  ;;  %v4357_v38 = vadd.f32 %v4353_v46, %v4342_v44  ;;  %v4343_v15 = vld [vmem:[#allocation3 + $0x10] sm:$0xff] }
 0x60e   : > { %v4358_v25 = vadd.f32 %v4354_v5, %v4343_v15 }
 0x60f   : > { %v8994_v14 = vmul.f32 %v4387_v32, %v4357_v38 }
 0x610   : > { %v4398_v3 = vmul.f32 %v4389_v40, %v4358_v25 }
 0x611   : > { %4955 = vmatmul.mubr.msk.f32.vlgmr.msra.gmra.mrb[0].mxu0 %vm1396_vm9, %v8994_v14 }
 0x612   : > { %4957 = vmatprep.mubr.msk.f32.mxu1 %vm1396_vm9, %v4398_v3 }
 0x613   : > { %4958 = vmatmul.mubr.msk.f32.vlgmr.msra.gmra.mrb[0].mxu1 %vm1396_vm9, %v8992_v41 }
 0x6e4   : > { %v4956_v62 = vpop.f32.mrb[0].mxu0 }
 0x6e5   : > { %v4508_v61 = vadd.f32 %v4956_v62, %v9647_v34  ;;  %v4488_v49 = vpop.f32.mrb[1].mxu0 }
 0x6e6   : > { %v4959_v57 = vpop.f32.mrb[0].mxu1  ;;  %v4507_v13 = vadd.f32 %v4488_v49, %v9649_v36 }
 0x6e7   : > { %v4510_v24 = vadd.f32 %v4959_v57, %v9648_v60  ;;  %v4498_v20 = vpop.f32.mrb[1].mxu1  ;;  %4512 = vst.msk [vmem:[#allocation2 + $0x8] sm:$0xff] %vm714_vm1, %v4508_v61 }
 0x6e8   : > { %v4509_v35 = vadd.f32 %v4498_v20, %v9650_v28  ;;  %4511 = vst.msk [vmem:[#allocation2] sm:$0xff] %vm714_vm1, %v4507_v13 }
 0x6e9   : > { %4514 = vst.msk [vmem:[#allocation2 + $0x18] sm:$0xff] %vm714_vm1, %v4510_v24 }
 0x6ea   : > { %4513 = vst.msk [vmem:[#allocation2 + $0x10] sm:$0xff] %vm714_vm1, %v4509_v35 }
 0x6eb PF: > { %p4874_p5 = scmp.ne.s32.totalorder %s5750_s17, 1 }
 0x6ec   : > { %v4520_v43 = vmul.f32 (!%p4874_p5), %v8992_v41, %v8992_v41  ;;  %v4519_v2 = vmul.f32 (!%p4874_p5), %v8994_v14, %v8994_v14  ;;  %vm4526_vm15 = vcmask (!%p4874_p5), 392199   ;;  %v4556_v63 = vld [vmem:[#allocation12] sm:$0xff] (!%p4874_p5)  ;;  %v4557_v58 = vld [vmem:[#allocation12 + $0x8] sm:$0xff] (!%p4874_p5)  ;;  %v5652_v51 = vmov (!%p4874_p5), 0.0|0.0   ;;  %v4558_v33 = vld [vmem:[#allocation12 + $0x10] sm:$0xff] (!%p4874_p5)  ;;  %s9651_s13 = sld [smem:[#allocation123_spill]] (!%p4874_p5) }
 0x6ed   : > { %4518 = sbr.rel (%p4874_p5) target bundleno = 2160 (0x870), region = 108  ;;  %v5000_v22 = vpack.c.bf16 (!%p4874_p5), %v4557_v58, %v4556_v63  ;;  %4999 = vmatprep.subr.bf16.mxu0 (!%p4874_p5), %v5652_v51  ;;  %v4559_v55 = vld [vmem:[#allocation12 + $0x18] sm:$0xff] (!%p4874_p5)  ;;  %v4560_v45 = vld [vmem:[#allocation12 + $0x20] sm:$0xff] (!%p4874_p5)  ;;  %v4561_v16 = vld [vmem:[#allocation12 + $0x28] sm:$0xff] (!%p4874_p5)  ;;  %vm5653_vm0 = vmmov (!%p4874_p5), 0   ;;  %v5654_v56 = vmov (!%p4874_p5), 0.0  }
 0x6ee   : > { %v4523_v50 = vrot.slane (!%p4874_p5), %v4520_v43, 7  ;;  %v4527_v6 = vsel (!%p4874_p5), %vm4526_vm15, %v4519_v2, 0.0  ;;  %v5003_v9 = vpack.c.bf16 (!%p4874_p5), %v4559_v55, %v4558_v33  ;;  %v5006_v23 = vpack.c.bf16 (!%p4874_p5), %v4561_v16, %v4560_v45  ;;  %4972 = vmatprep.mubr.msk.f32.mxu0 (!%p4874_p5), %vm5653_vm0, %v5654_v56  ;;  %s9652_s4 = sld [smem:[#allocation125_spill]] (!%p4874_p5) }
 0x6ef   : > { %5001 = vmatpush3.bf16.msra.mxu0 (!%p4874_p5), %v5000_v22  ;;  %vm4573_vm1 = vcmask (!%p4874_p5), 1041409   ;;  %vm4647_vm2 = vcmask (!%p4874_p5), 25600  }
 0x6f0   : > { %v4530_v19 = vsel (!%p4874_p5), %vm1756_vm12, %v4523_v50, 0.0  ;;  %5002 = vmatprep.subr.bf16.mxu0 (!%p4874_p5), %v5652_v51 }
 0x6f1   : > { %4531 = vadd.xlane.f32.xlu0 (!%p4874_p5), %v4530_v19 }
 0x6f2   : > { %v4875_v32 = vld [vmem:[%s9651_s13] ss:$0 sm:$0xff] (!%p4874_p5) }
 0x6f3   : > { %5004 = vmatpush3.bf16.msra.mxu0 (!%p4874_p5), %v5003_v9 }
 0x6f4   : > { %5005 = vmatprep.subr.bf16.mxu0 %v5652_v51  ;;  %v4876_v44 = vld [vmem:[%s9652_s4] ss:$0 sm:$0xff] }
 0x6f5   : > { %4528 = vadd.xlane.f32.xlu0 %v4527_v6 }
 0x6f7   : > { %5007 = vmatpush3.bf16.msra.mxu0 %v5006_v23 }
 0x77e   : > { %v4532_v48 = vpop.xlane.xlu0 %4531 }
 0x77f   : > { %v4535_v18 = vmul.f32 0.020833334, %v4532_v48 }
 0x781   : > { %v4537_v1 = vadd.f32 1e-05, %v4535_v18 }
 0x782   : > { %v4529_v8 = vpop.xlane.xlu0 %4528 }
 0x783   : > { %5413 = vrsqrt.f32 %v4537_v1  ;;  %v4534_v30 = vmul.f32 0.020833334, %v4529_v8 }
 0x785   : > { %v4536_v37 = vadd.f32 1e-05, %v4534_v30 }
 0x787   : > { %5415 = vrsqrt.f32 %v4536_v37 }
 0x78d   : > { %v5414_v47 = vpop.eup %5413 }
 0x78e   : > { %v4542_v17 = vrot.slane %v5414_v47, 1 }
 0x790   : > { %v4546_v7 = vmul.f32 %v4542_v17, %v8992_v41 }
 0x791   : > { %v5416_v21 = vpop.eup %5415 }
 0x792   : > { %v4545_v0 = vmul.f32 %v5416_v21, %v8994_v14  ;;  %v4555_v10 = vmul.f32 %v4875_v32, %v4546_v7 }
 0x794   : > { %v4554_v59 = vmul.f32 %v4875_v32, %v4545_v0  ;;  %v4572_v31 = vrot.slane %v4555_v10, 6 }
 0x796   : > { %v4571_v46 = vrot.slane %v4554_v59, 7 }
 0x798   : > { %v4574_v52 = vsel %vm4573_vm1, %v4572_v31, %v4571_v46 }
 0x799   : > { %4973 = vmatmul.mubr.msk.f32.vlgmr.msra.gmra.mrb[0].mxu0 %vm1396_vm9, %v4574_v52 }
 0x86c   : > { %v4643_v39 = vpop.f32.mrb[0].mxu0 }
 0x86d   : > { %v4644_v5 = vadd.f32 %v4876_v44, %v4643_v39  ;;  %v4974_v38 = vpop.f32.mrb[1].mxu0 }
 0x86f   : > { %4648 = vst.msk [vmem:[#allocation13] sm:$0x3] %vm4647_vm2, %v4644_v5 }
 0x870 PF: > { %p5061_p9 = scmp.eq.s32.totalorder %s5750_s17, 1  ;;  %s5655_s28 = smov [#allocation13]  }
 0x871   : > { %s4656_s12 = sshll.u32 %s5655_s28, 4  ;;  %s4657_s12 = int_to_ptr.vmem [resolvable:$true] %s4656_s12 }
 0x872   : > { %s5565_s14 = scalar_lea.vmem %s4657_s12, 32  ;;  %p5572_p2 = scmp.lt.s32.totalorder %s4657_s12, %s4657_s12 }
 0x873   : > { %p5566_p8 = scmp.ne.s32.totalorder %s4657_s12, %s5565_s14  ;;  %p5573_p13 = scmp.lt.s32.totalorder %s5565_s14, %s5565_s14 }
 0x875   : > { %p5567_p6 = pnand %p5566_p8, %p5061_p9  ;;  %p5574_p11 = por %p5573_p13, %p5572_p2 }
 0x877   : > { %p5568_p12 = pneg %p5567_p6 }
 0x879   : > { %p5575_p0 = pnand %p5574_p11, %p5568_p12 }
 0x87b   : > { %5578 = shalt.err (!%p5575_p0)
}
 0x87c   : > { %s9653_s20 = sld [smem:[#allocation126_spill]] }
 0x882   : > { %s5579_s25 = scalar_lea.hbm %s9653_s20, 32 }
 0x883   : > { %p5580_p10 = scmp.ne.s32.totalorder %s9653_s20, %s5579_s25  ;;  %p5585_p4 = scmp.lt.u32.totalorder %s5579_s25, %s9653_s20 }
 0x885   : > { %p5581_p3 = pnand %p5580_p10, %p5061_p9 }
 0x887   : > { %p5582_p1 = pneg %p5581_p3 }
 0x889   : > { %p5587_p7 = pnand %p5585_p4, %p5582_p1 }
 0x88b   : > { %5590 = shalt.err (!%p5587_p7)
}
 0x88c   : > { %5038 = dma.vmem_to_hbm [thread:$0]  (%p5061_p9), %s4657_s12, 32, %s9653_s20, [#allocation6]  }
 0x88d   : > { %5624 = dma.done.wait (%p5061_p9), [#allocation6], 32  }
 0x88e   : > { %5626 = vsyncadd (%p5061_p9), [#allocation6], 4294967264 }
 0x88f PF: > { %s9654_s16 = sld [smem:[#allocation20_spill]]  ;;  %s9655_s15 = sld [smem:[#allocation19_spill]] }
 0x890   : > { %s9656_s5 = sld [smem:[#allocation21_spill]]  ;;  %s9657_s29 = smov %s5633_s30 }
 0x895   : > { %p31_p5 = scmp.ge.s32.totalorder %s9654_s16, 4   ;;  %s9658_s30 = smov %s9655_s15 }
 0x896   : > { %s9659_s15 = smov %s9656_s5 }
 0x897   :  { %33 = sbr.rel (!%p31_p5) target bundleno = 16 (0x10), region = 184 }
 0x89e   :  { %4669 = vsyncpa [#allocation5], 1 }
 0x89f   :  { %4671 = vsyncpa [#allocation5 + $0x1], 1 }
 0x8a0   :  { %4672 = vsyncpa [#allocation8], 1 }
 0x8a1   :  { %4674 = vsyncpa [#allocation8 + $0x1], 1 }
 0x8a2   :  { %4675 = vsyncpa [#allocation11], 1 }
 0x8a3   :  { %4677 = vsyncpa [#allocation11 + $0x1], 1 }
 0x8a4   :  { %4678 = vsyncpa [#allocation6], 1 }
 0x8a5   :  { %4680 = vsyncpa [#allocation6 + $0x1], 1 }

</bundles_post_ra>
